<compile_context>
chip_gen: v5e
topology: v5e:2x2
jax: 0.10.0
libtpu: 0.0.40
codegen_flags: <defaults>
</compile_context>

<pallas_src>
import math

import jax
import jax.numpy as jnp
from jax.experimental import pallas as pl
from jax.experimental.pallas import tpu as pltpu

_LOG_SQRT_2PI = 0.5 * math.log(2.0 * math.pi)


def _relu(x):
    return jnp.maximum(x, 0.0)


def actor_kernel(
    state_ref, obs_ref, eps_ref,
    # state MLP: Linear(4,128), Linear(128,256), Linear(256,256)
    w1, b1, w2, b2, w3, b3,
    # obs1_layer: Conv1d(4,64,k=1) + BN(64) folded
    wc1, bc1,
    # t_net1: Conv1d(64,64)+BN, Conv1d(64,256)+BN (folded)
    wt1, bt1, wt2, bt2,
    # t_net2 bias + per-output-channel dequant scale (weight arrives via manual DMA)
    bt3, wt3_scale,
    # obs2_layer: Conv1d(64,128)+BN (folded) weight/bias + folded bias of Conv1d(128,512)
    wo1, bo1, bo2,
    # obs3_layer biases (weights arrive via manual DMA)
    bf1, bf2,
    # last_layer bias (split weights arrive via manual DMA)
    bl,
    # fused mu||std head
    whead, bhead,
    # HBM-resident late-use weights (memory_space=pl.ANY, manual DMA)
    wt3_hbm, wo2_hbm, wf1_hbm, wf2_hbm, wlx_hbm, wlo_hbm,
    # fused output: [tanh(u) || logprob]  (B, 2*n_action)
    out_ref,
    # scratch: VMEM staging buffers + DMA semaphores
    wt3_vmem, wo2_vmem, wf1_vmem, wf2_vmem, wlx_vmem, wlo_vmem, dma_sems,
):
    f32 = jnp.float32
    bf16 = jnp.bfloat16

    # Kick off ALL late-use weight transfers immediately (in order of first use) so
    # they overlap the state MLP / obs1 / t_net1 compute; each is waited on only
    # right before its matmul.
    cp_wt3 = pltpu.make_async_copy(wt3_hbm, wt3_vmem, dma_sems.at[0])
    cp_wo2 = pltpu.make_async_copy(wo2_hbm, wo2_vmem, dma_sems.at[1])
    cp_wf1 = pltpu.make_async_copy(wf1_hbm, wf1_vmem, dma_sems.at[2])
    cp_wf2 = pltpu.make_async_copy(wf2_hbm, wf2_vmem, dma_sems.at[3])
    cp_wlx = pltpu.make_async_copy(wlx_hbm, wlx_vmem, dma_sems.at[4])
    cp_wlo = pltpu.make_async_copy(wlo_hbm, wlo_vmem, dma_sems.at[5])
    cp_wt3.start()
    cp_wo2.start()
    cp_wf1.start()
    cp_wf2.start()
    cp_wlx.start()
    cp_wlo.start()

    state = state_ref[...]          # (B, 4)  f32
    obs = obs_ref[...]              # (B, N, 4)  channels-last, f32

    def dense(x, w_ref, b_ref):
        # bf16 MXU matmul, f32 accumulate, f32 bias add.
        return jnp.dot(x.astype(bf16), w_ref[...],
                       preferred_element_type=f32) + b_ref[...]

    def conv1x1(x_bnc, w_ref, b_ref):
        # Conv1d(kernel_size=1) in channels-last layout == per-point matmul.
        # BatchNorm (eval mode) is already folded into w_ref / b_ref.
        B, N, C = x_bnc.shape
        y = jnp.dot(x_bnc.reshape(B * N, C).astype(bf16), w_ref[...],
                    preferred_element_type=f32)
        return _relu(y.reshape(B, N, -1) + b_ref[...])

    # ----- state MLP: 4 -> 128 -> 256 -> 256, ReLU between -----
    x = _relu(dense(state, w1, b1))
    x = _relu(dense(x, w2, b2))
    x = _relu(dense(x, w3, b3))                                            # (B, 256)

    # ----- obs1_layer -----
    obs64 = conv1x1(obs, wc1, bc1)                                         # (B, N, 64)

    # ----- t_net1 -----
    t = conv1x1(obs64, wt1, bt1)                                           # (B, N, 64)
    t = conv1x1(t, wt2, bt2)                                               # (B, N, 256)

    # torch.max(_t, 2, keepdim=True)[0] -> max over points
    tmax = jnp.max(t, axis=1)                                              # (B, 256)

    # ----- t_net2: Flatten, Linear(256, 64*64), ReLU, view(-1, 64, 64) -----
    cp_wt3.wait()
    # int8 weight -> bf16 is exact (|q| <= 127); per-channel scale applied in epilogue.
    wt3_bf = wt3_vmem[...].astype(f32).astype(bf16)                        # (256, 4096)
    tfeat = jnp.dot(tmax.astype(bf16), wt3_bf, preferred_element_type=f32)
    tfeat = _relu(tfeat * wt3_scale[...] + bt3[...])                       # (B, 4096)
    # bf16 BEFORE the lane-crossing reshape: halves the bytes of the real relayout.
    tmat = tfeat.astype(bf16).reshape(tfeat.shape[0], 64, 64)              # (B, 64, 64)

    # torch.bmm(_t, obs): res[b,i,n] = sum_k tmat[b,i,k] * obs[b,k,n]
    # channels-last:      res[b,n,i] = sum_k obs64[b,n,k] * tmat[b,i,k]
    ob = jnp.einsum('bnk,bik->bni', obs64.astype(bf16), tmat,
                    preferred_element_type=f32)                            # (B, N, 64)

    # ----- obs2_layer -----
    ob = conv1x1(ob, wo1, bo1)                                             # (B, N, 128)
    cp_wo2.wait()
    ob = conv1x1(ob, wo2_vmem, bo2)                                        # (B, N, 512)

    omax = jnp.max(ob, axis=1)                                             # (B, 512)

    # ----- obs3_layer -----
    cp_wf1.wait()
    o = _relu(dense(omax, wf1_vmem, bf1))
    cp_wf2.wait()
    o = _relu(dense(o, wf2_vmem, bf2))                                     # (B, 256)

    # ----- last_layer on concat([x, obs]) -- concat avoided via split weights -----
    cp_wlx.wait()
    cp_wlo.wait()
    z = _relu(jnp.dot(x.astype(bf16), wlx_vmem[...], preferred_element_type=f32)
              + jnp.dot(o.astype(bf16), wlo_vmem[...], preferred_element_type=f32)
              + bl[...])                                                   # (B, 256)

    # ----- fused mu / std heads -----
    head = dense(z, whead, bhead)                                          # (B, 2*na)
    na = eps_ref.shape[-1]
    mu = head[:, :na]
    pre_std = head[:, na:]
    # Softplus (beta=1, threshold=20), overflow/underflow-safe:
    #   softplus(x) = max(x, 0) + log(1 + exp(-|x|));   x > 20  ->  x
    sp = jnp.maximum(pre_std, 0.0) + jnp.log(1.0 + jnp.exp(-jnp.abs(pre_std)))
    std = jnp.where(pre_std > 20.0, pre_std, sp)

    # ----- Normal(mu, std).rsample + log_prob, tanh squash -----
    eps = eps_ref[...]                                                     # (B, na) ~ N(0,1)
    u = mu + std * eps
    tanh_u = jnp.tanh(u)
    # (u - mu)/std == eps, so log_prob simplifies (no divide, no 0/0 hazard).
    # Floor std before the log so extreme pre_std can't produce -inf.
    logprob = (-0.5 * eps * eps - jnp.log(jnp.maximum(std, 1e-30)) - _LOG_SQRT_2PI
               - jnp.log(1.0 - jnp.square(tanh_u) + 1e-7))

    # Single lane-dense(ish) output slab: [action || logprob], one store / one DMA.
    out_ref[...] = jnp.concatenate([tanh_u, logprob], axis=-1)


def init_params(key, n_state=4, n_obs=4, n_action=2):
    """Deterministic synthetic parameters, pre-packed for the kernel.

    Returns (vmem_params, hbm_params):
      * vmem_params: small weights/biases fetched via auto BlockSpec (weights bf16,
        biases/scales f32, biases shaped (1, out)).  BatchNorm1d (eval mode) is folded
        into the preceding conv weight/bias.
      * hbm_params: large late-use weights left in HBM and DMA'd manually inside the
        kernel: t_net2 weight (int8 + per-channel scale), obs2.conv2, obs3 linears,
        split last-layer weights.
    """
    keys = iter(jax.random.split(key, 64))
    bf16 = jnp.bfloat16

    def linear(fan_in, fan_out):
        kw, kb = jax.random.split(next(keys))
        lim = 1.0 / math.sqrt(fan_in)
        w = jax.random.uniform(kw, (fan_in, fan_out), jnp.float32, -lim, lim)
        b = jax.random.uniform(kb, (1, fan_out), jnp.float32, -lim, lim)
        return w, b

    def bn(c):
        kg, kb, km, kv = jax.random.split(next(keys), 4)
        gamma = jax.random.uniform(kg, (1, c), jnp.float32, 0.5, 1.5)
        beta = jax.random.uniform(kb, (1, c), jnp.float32, -0.1, 0.1)
        mean = jax.random.uniform(km, (1, c), jnp.float32, -0.1, 0.1)
        var = jax.random.uniform(kv, (1, c), jnp.float32, 0.5, 1.5)
        scale = gamma / jnp.sqrt(var + 1e-5)
        shift = beta - scale * mean
        return scale, shift

    def conv_bn(fan_in, fan_out):
        # y = relu((x@W + b)*scale + shift) == relu(x @ (W*scale) + (b*scale + shift))
        w, b = linear(fan_in, fan_out)
        scale, shift = bn(fan_out)
        return (w * scale).astype(bf16), (b * scale + shift)

    # TODO(synk): BatchNorm1d is reproduced in eval mode only (running stats folded
    # into scale/shift); train-mode batch statistics are not computed in the kernel.
    w1, b1 = linear(n_state, 128)
    w2, b2 = linear(128, 256)
    w3, b3 = linear(256, 256)
    wc1, bc1 = conv_bn(n_obs, 64)
    wt1, bt1 = conv_bn(64, 64)
    wt2, bt2 = conv_bn(64, 256)
    wt3, bt3 = linear(256, 64 * 64)
    wo1, bo1 = conv_bn(64, 128)
    wo2, bo2 = conv_bn(128, 512)
    wf1, bf1 = linear(512, 256)
    wf2, bf2 = linear(256, 256)
    wl, bl = linear(512, 256)
    wmu, bmu = linear(256, n_action)
    wsd, bsd = linear(256, n_action)

    # Weight-only int8 quantization of the dominant t_net2 weight (per output channel).
    amax = jnp.maximum(jnp.max(jnp.abs(wt3), axis=0, keepdims=True), 1e-8)   # (1, 4096)
    wt3_scale = (amax / 127.0).astype(jnp.float32)
    wt3_q = jnp.clip(jnp.round(wt3 / wt3_scale), -127.0, 127.0).astype(jnp.int8)

    # Split last_layer weight (avoids in-kernel lane concat); fuse mu/std heads.
    wl_x, wl_o = wl[:256, :], wl[256:, :]
    whead = jnp.concatenate([wmu, wsd], axis=1)
    bhead = jnp.concatenate([bmu, bsd], axis=1)

    vmem_params = [
        w1.astype(bf16), b1, w2.astype(bf16), b2, w3.astype(bf16), b3,
        wc1, bc1,
        wt1, bt1, wt2, bt2,
        bt3, wt3_scale,
        wo1, bo1, bo2,
        bf1, bf2,
        bl,
        whead.astype(bf16), bhead,
    ]
    hbm_params = [
        wt3_q,                   # (256, 4096) int8
        wo2,                     # (128, 512)  bf16
        wf1.astype(bf16),        # (512, 256)
        wf2.astype(bf16),        # (256, 256)
        wl_x.astype(bf16),       # (256, 256)
        wl_o.astype(bf16),       # (256, 256)
    ]
    return vmem_params, hbm_params


def actor_forward(params, state, obs_ncl, eps):
    """state: (B, n_state); obs_ncl: (B, n_obs, N) in PyTorch NCL layout; eps: (B, n_action)."""
    vmem_params, hbm_params = params
    obs_nlc = jnp.transpose(obs_ncl, (0, 2, 1))   # -> channels-last (B, N, C)
    B = state.shape[0]
    N = obs_nlc.shape[1]
    n_state = state.shape[1]
    n_obs = obs_nlc.shape[2]
    n_action = eps.shape[-1]

    inputs = [state, obs_nlc, eps] + list(vmem_params) + list(hbm_params)
    n_auto = 3 + len(vmem_params)

    def full_spec(a):
        nd = a.ndim
        return pl.BlockSpec(a.shape, lambda i, nd=nd: (0,) * nd)

    in_specs = [full_spec(a) for a in inputs[:n_auto]]
    # Late-use big weights stay in HBM; DMA'd manually inside the kernel.
    in_specs += [pl.BlockSpec(memory_space=pl.ANY)] * len(hbm_params)

    # Fused output: [action || logprob], sliced in the wrapper.
    out_shape = jax.ShapeDtypeStruct((B, 2 * n_action), jnp.float32)
    out_specs = pl.BlockSpec((B, 2 * n_action), lambda i: (0, 0))

    # Advisory cost hint so XLA schedules neighbouring ops (e.g. the obs transpose)
    # around this weight-DMA-bound call instead of treating it as opaque.
    per_sample = (n_state * 128 + 128 * 256 + 256 * 256      # state MLP
                  + 256 * 4096                               # t_net2
                  + 512 * 256 + 256 * 256                    # obs3_layer
                  + 512 * 256                                # last_layer
                  + 256 * 2 * n_action)                      # fused heads
    per_point = (n_obs * 64 + 64 * 64 + 64 * 256             # obs1 + t_net1
                 + 64 * 64                                   # bmm
                 + 64 * 128 + 128 * 512)                     # obs2_layer
    flops = 2 * B * per_sample + 2 * B * N * per_point
    bytes_accessed = (sum(int(a.size) * a.dtype.itemsize for a in inputs)
                      + 2 * B * n_action * 4)
    cost = pl.CostEstimate(flops=flops,
                           transcendentals=8 * B * n_action,
                           bytes_accessed=bytes_accessed)

    # TODO(synk): at real batch sizes, add a leading "parallel" grid axis over B so the
    # second TensorCore on v7x is used; at B=2 it would be a no-op, so it is omitted.
    fn = pl.pallas_call(
        actor_kernel,
        grid=(1,),
        in_specs=in_specs,
        out_specs=out_specs,
        out_shape=out_shape,
        scratch_shapes=[
            pltpu.VMEM((256, 64 * 64), jnp.int8),       # t_net2 weight (int8) staging
            pltpu.VMEM((128, 512), jnp.bfloat16),       # obs2 conv2 weight
            pltpu.VMEM((512, 256), jnp.bfloat16),       # obs3 linear1 weight
            pltpu.VMEM((256, 256), jnp.bfloat16),       # obs3 linear2 weight
            pltpu.VMEM((256, 256), jnp.bfloat16),       # last_layer (state half)
            pltpu.VMEM((256, 256), jnp.bfloat16),       # last_layer (obs half)
            pltpu.SemaphoreType.DMA((6,)),              # one sem slot per manual DMA
        ],
        compiler_params=pltpu.CompilerParams(
            dimension_semantics=("arbitrary",),
            vmem_limit_bytes=16 * 1024 * 1024),
        cost_estimate=cost,
    )
    fused = fn(*inputs)
    action = fused[:, :n_action]
    logprob = fused[:, n_action:]
    return action, logprob


if __name__ == "__main__":
    B, N = 2, 16
    n_state, n_obs, n_action = 4, 4, 2

    root = jax.random.PRNGKey(0)
    kp, ks, ko, ke = jax.random.split(root, 4)

    params = init_params(kp, n_state, n_obs, n_action)
    state = jax.random.normal(ks, (B, n_state), jnp.float32)
    obs = jax.random.normal(ko, (B, n_obs, N), jnp.float32)      # PyTorch NCL layout
    eps = jax.random.normal(ke, (B, n_action), jnp.float32)      # reparameterization noise

    action, logprob = actor_forward(params, state, obs, eps)
    jax.block_until_ready((action, logprob))

    assert action.shape == (B, n_action) and logprob.shape == (B, n_action)
    assert bool(jnp.all(jnp.isfinite(action))) and bool(jnp.all(jnp.isfinite(logprob)))
    assert bool(jnp.all(jnp.abs(action) <= 1.0))
    print("KERNEL_OK")
</pallas_src>

<mosaic_0001>
module attributes {stable_mosaic.version = 11 : i64} {
  func.func @actor_kernel(%arg0: i32, %arg1: memref<2x4xf32, #tpu.memory_space<vmem>>, %arg2: memref<2x16x4xf32, #tpu.memory_space<vmem>>, %arg3: memref<2x2xf32, #tpu.memory_space<vmem>>, %arg4: memref<4x128xbf16, #tpu.memory_space<vmem>>, %arg5: memref<1x128xf32, #tpu.memory_space<vmem>>, %arg6: memref<128x256xbf16, #tpu.memory_space<vmem>>, %arg7: memref<1x256xf32, #tpu.memory_space<vmem>>, %arg8: memref<256x256xbf16, #tpu.memory_space<vmem>>, %arg9: memref<1x256xf32, #tpu.memory_space<vmem>>, %arg10: memref<4x64xbf16, #tpu.memory_space<vmem>>, %arg11: memref<1x64xf32, #tpu.memory_space<vmem>>, %arg12: memref<64x64xbf16, #tpu.memory_space<vmem>>, %arg13: memref<1x64xf32, #tpu.memory_space<vmem>>, %arg14: memref<64x256xbf16, #tpu.memory_space<vmem>>, %arg15: memref<1x256xf32, #tpu.memory_space<vmem>>, %arg16: memref<1x4096xf32, #tpu.memory_space<vmem>>, %arg17: memref<1x4096xf32, #tpu.memory_space<vmem>>, %arg18: memref<64x128xbf16, #tpu.memory_space<vmem>>, %arg19: memref<1x128xf32, #tpu.memory_space<vmem>>, %arg20: memref<1x512xf32, #tpu.memory_space<vmem>>, %arg21: memref<1x256xf32, #tpu.memory_space<vmem>>, %arg22: memref<1x256xf32, #tpu.memory_space<vmem>>, %arg23: memref<1x256xf32, #tpu.memory_space<vmem>>, %arg24: memref<256x4xbf16, #tpu.memory_space<vmem>>, %arg25: memref<1x4xf32, #tpu.memory_space<vmem>>, %arg26: memref<256x4096xi8, #tpu.memory_space<any>>, %arg27: memref<128x512xbf16, #tpu.memory_space<any>>, %arg28: memref<512x256xbf16, #tpu.memory_space<any>>, %arg29: memref<256x256xbf16, #tpu.memory_space<any>>, %arg30: memref<256x256xbf16, #tpu.memory_space<any>>, %arg31: memref<256x256xbf16, #tpu.memory_space<any>>, %arg32: memref<2x4xf32, #tpu.memory_space<vmem>>, %arg33: memref<256x4096xi8, #tpu.memory_space<vmem>>, %arg34: memref<128x512xbf16, #tpu.memory_space<vmem>>, %arg35: memref<512x256xbf16, #tpu.memory_space<vmem>>, %arg36: memref<256x256xbf16, #tpu.memory_space<vmem>>, %arg37: memref<256x256xbf16, #tpu.memory_space<vmem>>, %arg38: memref<256x256xbf16, #tpu.memory_space<vmem>>, %arg39: memref<6x!tpu.dma_semaphore, #tpu.memory_space<semaphore_mem>>) attributes {dimension_semantics = [#tpu.dimension_semantics<arbitrary>], iteration_bounds = array<i64: 1>, scalar_prefetch = 0 : i64, scratch_operands = 7 : i64, tpu.core_type = #tpu.core_type<tc>, window_params = [{pipeline_mode = #tpu.pipeline_mode<synchronous>, transform_indices = @transform_0, window_bounds = array<i64: 2, 4>}, {pipeline_mode = #tpu.pipeline_mode<synchronous>, transform_indices = @transform_1, window_bounds = array<i64: 2, 16, 4>}, {pipeline_mode = #tpu.pipeline_mode<synchronous>, transform_indices = @transform_2, window_bounds = array<i64: 2, 2>}, {pipeline_mode = #tpu.pipeline_mode<synchronous>, transform_indices = @transform_3, window_bounds = array<i64: 4, 128>}, {pipeline_mode = #tpu.pipeline_mode<synchronous>, transform_indices = @transform_4, window_bounds = array<i64: 1, 128>}, {pipeline_mode = #tpu.pipeline_mode<synchronous>, transform_indices = @transform_5, window_bounds = array<i64: 128, 256>}, {pipeline_mode = #tpu.pipeline_mode<synchronous>, transform_indices = @transform_6, window_bounds = array<i64: 1, 256>}, {pipeline_mode = #tpu.pipeline_mode<synchronous>, transform_indices = @transform_7, window_bounds = array<i64: 256, 256>}, {pipeline_mode = #tpu.pipeline_mode<synchronous>, transform_indices = @transform_8, window_bounds = array<i64: 1, 256>}, {pipeline_mode = #tpu.pipeline_mode<synchronous>, transform_indices = @transform_9, window_bounds = array<i64: 4, 64>}, {pipeline_mode = #tpu.pipeline_mode<synchronous>, transform_indices = @transform_10, window_bounds = array<i64: 1, 64>}, {pipeline_mode = #tpu.pipeline_mode<synchronous>, transform_indices = @transform_11, window_bounds = array<i64: 64, 64>}, {pipeline_mode = #tpu.pipeline_mode<synchronous>, transform_indices = @transform_12, window_bounds = array<i64: 1, 64>}, {pipeline_mode = #tpu.pipeline_mode<synchronous>, transform_indices = @transform_13, window_bounds = array<i64: 64, 256>}, {pipeline_mode = #tpu.pipeline_mode<synchronous>, transform_indices = @transform_14, window_bounds = array<i64: 1, 256>}, {pipeline_mode = #tpu.pipeline_mode<synchronous>, transform_indices = @transform_15, window_bounds = array<i64: 1, 4096>}, {pipeline_mode = #tpu.pipeline_mode<synchronous>, transform_indices = @transform_16, window_bounds = array<i64: 1, 4096>}, {pipeline_mode = #tpu.pipeline_mode<synchronous>, transform_indices = @transform_17, window_bounds = array<i64: 64, 128>}, {pipeline_mode = #tpu.pipeline_mode<synchronous>, transform_indices = @transform_18, window_bounds = array<i64: 1, 128>}, {pipeline_mode = #tpu.pipeline_mode<synchronous>, transform_indices = @transform_19, window_bounds = array<i64: 1, 512>}, {pipeline_mode = #tpu.pipeline_mode<synchronous>, transform_indices = @transform_20, window_bounds = array<i64: 1, 256>}, {pipeline_mode = #tpu.pipeline_mode<synchronous>, transform_indices = @transform_21, window_bounds = array<i64: 1, 256>}, {pipeline_mode = #tpu.pipeline_mode<synchronous>, transform_indices = @transform_22, window_bounds = array<i64: 1, 256>}, {pipeline_mode = #tpu.pipeline_mode<synchronous>, transform_indices = @transform_23, window_bounds = array<i64: 256, 4>}, {pipeline_mode = #tpu.pipeline_mode<synchronous>, transform_indices = @transform_24, window_bounds = array<i64: 1, 4>}, {}, {}, {}, {}, {}, {}, {pipeline_mode = #tpu.pipeline_mode<synchronous>, transform_indices = @transform_31, window_bounds = array<i64: 2, 4>}]} {
    %c0_i32 = arith.constant 0 : i32
    %0 = tpu.memref_slice %arg39[%c0_i32] : memref<6x!tpu.dma_semaphore, #tpu.memory_space<semaphore_mem>> -> memref<1x!tpu.dma_semaphore, #tpu.memory_space<semaphore_mem>>
    %1 = tpu.memref_squeeze %0 : memref<1x!tpu.dma_semaphore, #tpu.memory_space<semaphore_mem>> -> memref<!tpu.dma_semaphore, #tpu.memory_space<semaphore_mem>>
    tpu.enqueue_dma source(%arg26 : memref<256x4096xi8, #tpu.memory_space<any>>) target(%arg33 : memref<256x4096xi8, #tpu.memory_space<vmem>>) target_semaphore(%1 : memref<!tpu.dma_semaphore, #tpu.memory_space<semaphore_mem>>)
    %c1_i32 = arith.constant 1 : i32
    %2 = tpu.memref_slice %arg39[%c1_i32] : memref<6x!tpu.dma_semaphore, #tpu.memory_space<semaphore_mem>> -> memref<1x!tpu.dma_semaphore, #tpu.memory_space<semaphore_mem>>
    %3 = tpu.memref_squeeze %2 : memref<1x!tpu.dma_semaphore, #tpu.memory_space<semaphore_mem>> -> memref<!tpu.dma_semaphore, #tpu.memory_space<semaphore_mem>>
    tpu.enqueue_dma source(%arg27 : memref<128x512xbf16, #tpu.memory_space<any>>) target(%arg34 : memref<128x512xbf16, #tpu.memory_space<vmem>>) target_semaphore(%3 : memref<!tpu.dma_semaphore, #tpu.memory_space<semaphore_mem>>)
    %c2_i32 = arith.constant 2 : i32
    %4 = tpu.memref_slice %arg39[%c2_i32] : memref<6x!tpu.dma_semaphore, #tpu.memory_space<semaphore_mem>> -> memref<1x!tpu.dma_semaphore, #tpu.memory_space<semaphore_mem>>
    %5 = tpu.memref_squeeze %4 : memref<1x!tpu.dma_semaphore, #tpu.memory_space<semaphore_mem>> -> memref<!tpu.dma_semaphore, #tpu.memory_space<semaphore_mem>>
    tpu.enqueue_dma source(%arg28 : memref<512x256xbf16, #tpu.memory_space<any>>) target(%arg35 : memref<512x256xbf16, #tpu.memory_space<vmem>>) target_semaphore(%5 : memref<!tpu.dma_semaphore, #tpu.memory_space<semaphore_mem>>)
    %c3_i32 = arith.constant 3 : i32
    %6 = tpu.memref_slice %arg39[%c3_i32] : memref<6x!tpu.dma_semaphore, #tpu.memory_space<semaphore_mem>> -> memref<1x!tpu.dma_semaphore, #tpu.memory_space<semaphore_mem>>
    %7 = tpu.memref_squeeze %6 : memref<1x!tpu.dma_semaphore, #tpu.memory_space<semaphore_mem>> -> memref<!tpu.dma_semaphore, #tpu.memory_space<semaphore_mem>>
    tpu.enqueue_dma source(%arg29 : memref<256x256xbf16, #tpu.memory_space<any>>) target(%arg36 : memref<256x256xbf16, #tpu.memory_space<vmem>>) target_semaphore(%7 : memref<!tpu.dma_semaphore, #tpu.memory_space<semaphore_mem>>)
    %c4_i32 = arith.constant 4 : i32
    %8 = tpu.memref_slice %arg39[%c4_i32] : memref<6x!tpu.dma_semaphore, #tpu.memory_space<semaphore_mem>> -> memref<1x!tpu.dma_semaphore, #tpu.memory_space<semaphore_mem>>
    %9 = tpu.memref_squeeze %8 : memref<1x!tpu.dma_semaphore, #tpu.memory_space<semaphore_mem>> -> memref<!tpu.dma_semaphore, #tpu.memory_space<semaphore_mem>>
    tpu.enqueue_dma source(%arg30 : memref<256x256xbf16, #tpu.memory_space<any>>) target(%arg37 : memref<256x256xbf16, #tpu.memory_space<vmem>>) target_semaphore(%9 : memref<!tpu.dma_semaphore, #tpu.memory_space<semaphore_mem>>)
    %c5_i32 = arith.constant 5 : i32
    %10 = tpu.memref_slice %arg39[%c5_i32] : memref<6x!tpu.dma_semaphore, #tpu.memory_space<semaphore_mem>> -> memref<1x!tpu.dma_semaphore, #tpu.memory_space<semaphore_mem>>
    %11 = tpu.memref_squeeze %10 : memref<1x!tpu.dma_semaphore, #tpu.memory_space<semaphore_mem>> -> memref<!tpu.dma_semaphore, #tpu.memory_space<semaphore_mem>>
    tpu.enqueue_dma source(%arg31 : memref<256x256xbf16, #tpu.memory_space<any>>) target(%arg38 : memref<256x256xbf16, #tpu.memory_space<vmem>>) target_semaphore(%11 : memref<!tpu.dma_semaphore, #tpu.memory_space<semaphore_mem>>)
    %c0 = arith.constant 0 : index
    %c0_0 = arith.constant 0 : index
    %12 = vector.load %arg1[%c0, %c0_0] : memref<2x4xf32, #tpu.memory_space<vmem>>, vector<2x4xf32>
    %c0_1 = arith.constant 0 : index
    %c0_2 = arith.constant 0 : index
    %c0_3 = arith.constant 0 : index
    %13 = vector.load %arg2[%c0_1, %c0_2, %c0_3] : memref<2x16x4xf32, #tpu.memory_space<vmem>>, vector<2x16x4xf32>
    %14 = arith.truncf %12 : vector<2x4xf32> to vector<2x4xbf16>
    %c0_4 = arith.constant 0 : index
    %c0_5 = arith.constant 0 : index
    %15 = vector.load %arg4[%c0_4, %c0_5] : memref<4x128xbf16, #tpu.memory_space<vmem>>, vector<4x128xbf16>
    %cst = arith.constant dense<0.000000e+00> : vector<2x128xf32>
    %16 = tpu.matmul %14, %15, %cst {dimension_numbers = #tpu.dot_dimension_numbers<[1], [0], [0], [1], [0, 0, 1, 1], [], []>} : vector<2x4xbf16>, vector<4x128xbf16>, vector<2x128xf32> -> vector<2x128xf32>
    %c0_6 = arith.constant 0 : index
    %c0_7 = arith.constant 0 : index
    %17 = vector.load %arg5[%c0_6, %c0_7] : memref<1x128xf32, #tpu.memory_space<vmem>>, vector<1x128xf32>
    %18 = vector.broadcast %17 : vector<1x128xf32> to vector<2x128xf32>
    %19 = arith.addf %16, %18 : vector<2x128xf32>
    %cst_8 = arith.constant 0.000000e+00 : f32
    %20 = vector.broadcast %cst_8 : f32 to vector<2x128xf32>
    %21 = arith.maximumf %19, %20 : vector<2x128xf32>
    %22 = arith.truncf %21 : vector<2x128xf32> to vector<2x128xbf16>
    %c0_9 = arith.constant 0 : index
    %c0_10 = arith.constant 0 : index
    %23 = vector.load %arg6[%c0_9, %c0_10] : memref<128x256xbf16, #tpu.memory_space<vmem>>, vector<128x256xbf16>
    %cst_11 = arith.constant dense<0.000000e+00> : vector<2x256xf32>
    %24 = tpu.matmul %22, %23, %cst_11 {dimension_numbers = #tpu.dot_dimension_numbers<[1], [0], [0], [1], [0, 0, 1, 1], [], []>} : vector<2x128xbf16>, vector<128x256xbf16>, vector<2x256xf32> -> vector<2x256xf32>
    %c0_12 = arith.constant 0 : index
    %c0_13 = arith.constant 0 : index
    %25 = vector.load %arg7[%c0_12, %c0_13] : memref<1x256xf32, #tpu.memory_space<vmem>>, vector<1x256xf32>
    %26 = vector.broadcast %25 : vector<1x256xf32> to vector<2x256xf32>
    %27 = arith.addf %24, %26 : vector<2x256xf32>
    %cst_14 = arith.constant 0.000000e+00 : f32
    %28 = vector.broadcast %cst_14 : f32 to vector<2x256xf32>
    %29 = arith.maximumf %27, %28 : vector<2x256xf32>
    %30 = arith.truncf %29 : vector<2x256xf32> to vector<2x256xbf16>
    %c0_15 = arith.constant 0 : index
    %c0_16 = arith.constant 0 : index
    %31 = vector.load %arg8[%c0_15, %c0_16] : memref<256x256xbf16, #tpu.memory_space<vmem>>, vector<256x256xbf16>
    %cst_17 = arith.constant dense<0.000000e+00> : vector<2x256xf32>
    %32 = tpu.matmul %30, %31, %cst_17 {dimension_numbers = #tpu.dot_dimension_numbers<[1], [0], [0], [1], [0, 0, 1, 1], [], []>} : vector<2x256xbf16>, vector<256x256xbf16>, vector<2x256xf32> -> vector<2x256xf32>
    %c0_18 = arith.constant 0 : index
    %c0_19 = arith.constant 0 : index
    %33 = vector.load %arg9[%c0_18, %c0_19] : memref<1x256xf32, #tpu.memory_space<vmem>>, vector<1x256xf32>
    %34 = vector.broadcast %33 : vector<1x256xf32> to vector<2x256xf32>
    %35 = arith.addf %32, %34 : vector<2x256xf32>
    %cst_20 = arith.constant 0.000000e+00 : f32
    %36 = vector.broadcast %cst_20 : f32 to vector<2x256xf32>
    %37 = arith.maximumf %35, %36 : vector<2x256xf32>
    %38 = vector.shape_cast %13 : vector<2x16x4xf32> to vector<32x4xf32>
    %39 = arith.truncf %38 : vector<32x4xf32> to vector<32x4xbf16>
    %c0_21 = arith.constant 0 : index
    %c0_22 = arith.constant 0 : index
    %40 = vector.load %arg10[%c0_21, %c0_22] : memref<4x64xbf16, #tpu.memory_space<vmem>>, vector<4x64xbf16>
    %cst_23 = arith.constant dense<0.000000e+00> : vector<32x64xf32>
    %41 = tpu.matmul %39, %40, %cst_23 {dimension_numbers = #tpu.dot_dimension_numbers<[1], [0], [0], [1], [0, 0, 1, 1], [], []>} : vector<32x4xbf16>, vector<4x64xbf16>, vector<32x64xf32> -> vector<32x64xf32>
    %42 = vector.shape_cast %41 : vector<32x64xf32> to vector<2x16x64xf32>
    %c0_24 = arith.constant 0 : index
    %c0_25 = arith.constant 0 : index
    %43 = vector.load %arg11[%c0_24, %c0_25] : memref<1x64xf32, #tpu.memory_space<vmem>>, vector<1x64xf32>
    %44 = vector.shape_cast %43 : vector<1x64xf32> to vector<1x1x64xf32>
    %45 = vector.broadcast %44 : vector<1x1x64xf32> to vector<2x16x64xf32>
    %46 = arith.addf %42, %45 : vector<2x16x64xf32>
    %cst_26 = arith.constant 0.000000e+00 : f32
    %47 = vector.broadcast %cst_26 : f32 to vector<2x16x64xf32>
    %48 = arith.maximumf %46, %47 : vector<2x16x64xf32>
    %49 = vector.shape_cast %48 : vector<2x16x64xf32> to vector<32x64xf32>
    %50 = arith.truncf %49 : vector<32x64xf32> to vector<32x64xbf16>
    %c0_27 = arith.constant 0 : index
    %c0_28 = arith.constant 0 : index
    %51 = vector.load %arg12[%c0_27, %c0_28] : memref<64x64xbf16, #tpu.memory_space<vmem>>, vector<64x64xbf16>
    %cst_29 = arith.constant dense<0.000000e+00> : vector<32x64xf32>
    %52 = tpu.matmul %50, %51, %cst_29 {dimension_numbers = #tpu.dot_dimension_numbers<[1], [0], [0], [1], [0, 0, 1, 1], [], []>} : vector<32x64xbf16>, vector<64x64xbf16>, vector<32x64xf32> -> vector<32x64xf32>
    %53 = vector.shape_cast %52 : vector<32x64xf32> to vector<2x16x64xf32>
    %c0_30 = arith.constant 0 : index
    %c0_31 = arith.constant 0 : index
    %54 = vector.load %arg13[%c0_30, %c0_31] : memref<1x64xf32, #tpu.memory_space<vmem>>, vector<1x64xf32>
    %55 = vector.shape_cast %54 : vector<1x64xf32> to vector<1x1x64xf32>
    %56 = vector.broadcast %55 : vector<1x1x64xf32> to vector<2x16x64xf32>
    %57 = arith.addf %53, %56 : vector<2x16x64xf32>
    %cst_32 = arith.constant 0.000000e+00 : f32
    %58 = vector.broadcast %cst_32 : f32 to vector<2x16x64xf32>
    %59 = arith.maximumf %57, %58 : vector<2x16x64xf32>
    %60 = vector.shape_cast %59 : vector<2x16x64xf32> to vector<32x64xf32>
    %61 = arith.truncf %60 : vector<32x64xf32> to vector<32x64xbf16>
    %c0_33 = arith.constant 0 : index
    %c0_34 = arith.constant 0 : index
    %62 = vector.load %arg14[%c0_33, %c0_34] : memref<64x256xbf16, #tpu.memory_space<vmem>>, vector<64x256xbf16>
    %cst_35 = arith.constant dense<0.000000e+00> : vector<32x256xf32>
    %63 = tpu.matmul %61, %62, %cst_35 {dimension_numbers = #tpu.dot_dimension_numbers<[1], [0], [0], [1], [0, 0, 1, 1], [], []>} : vector<32x64xbf16>, vector<64x256xbf16>, vector<32x256xf32> -> vector<32x256xf32>
    %64 = vector.shape_cast %63 : vector<32x256xf32> to vector<2x16x256xf32>
    %c0_36 = arith.constant 0 : index
    %c0_37 = arith.constant 0 : index
    %65 = vector.load %arg15[%c0_36, %c0_37] : memref<1x256xf32, #tpu.memory_space<vmem>>, vector<1x256xf32>
    %66 = vector.shape_cast %65 : vector<1x256xf32> to vector<1x1x256xf32>
    %67 = vector.broadcast %66 : vector<1x1x256xf32> to vector<2x16x256xf32>
    %68 = arith.addf %64, %67 : vector<2x16x256xf32>
    %cst_38 = arith.constant 0.000000e+00 : f32
    %69 = vector.broadcast %cst_38 : f32 to vector<2x16x256xf32>
    %70 = arith.maximumf %68, %69 : vector<2x16x256xf32>
    %cst_39 = arith.constant dense<0xFF800000> : vector<2x256xf32>
    %71 = vector.multi_reduction <maximumf>, %70, %cst_39 [1] : vector<2x16x256xf32> to vector<2x256xf32>
    %c0_i32_40 = arith.constant 0 : i32
    %72 = tpu.memref_slice %arg39[%c0_i32_40] : memref<6x!tpu.dma_semaphore, #tpu.memory_space<semaphore_mem>> -> memref<1x!tpu.dma_semaphore, #tpu.memory_space<semaphore_mem>>
    %73 = tpu.memref_squeeze %72 : memref<1x!tpu.dma_semaphore, #tpu.memory_space<semaphore_mem>> -> memref<!tpu.dma_semaphore, #tpu.memory_space<semaphore_mem>>
    tpu.wait_dma2 semaphore(%73 : memref<!tpu.dma_semaphore, #tpu.memory_space<semaphore_mem>>) src(%arg26 : memref<256x4096xi8, #tpu.memory_space<any>>) dst(%arg33 : memref<256x4096xi8, #tpu.memory_space<vmem>>)
    %c0_41 = arith.constant 0 : index
    %c0_42 = arith.constant 0 : index
    %74 = vector.load %arg33[%c0_41, %c0_42] : memref<256x4096xi8, #tpu.memory_space<vmem>>, vector<256x4096xi8>
    %75 = arith.sitofp %74 : vector<256x4096xi8> to vector<256x4096xf32>
    %76 = arith.truncf %75 : vector<256x4096xf32> to vector<256x4096xbf16>
    %77 = arith.truncf %71 : vector<2x256xf32> to vector<2x256xbf16>
    %cst_43 = arith.constant dense<0.000000e+00> : vector<2x4096xf32>
    %78 = tpu.matmul %77, %76, %cst_43 {dimension_numbers = #tpu.dot_dimension_numbers<[1], [0], [0], [1], [0, 0, 1, 1], [], []>} : vector<2x256xbf16>, vector<256x4096xbf16>, vector<2x4096xf32> -> vector<2x4096xf32>
    %c0_44 = arith.constant 0 : index
    %c0_45 = arith.constant 0 : index
    %79 = vector.load %arg17[%c0_44, %c0_45] : memref<1x4096xf32, #tpu.memory_space<vmem>>, vector<1x4096xf32>
    %80 = vector.broadcast %79 : vector<1x4096xf32> to vector<2x4096xf32>
    %81 = arith.mulf %78, %80 : vector<2x4096xf32>
    %c0_46 = arith.constant 0 : index
    %c0_47 = arith.constant 0 : index
    %82 = vector.load %arg16[%c0_46, %c0_47] : memref<1x4096xf32, #tpu.memory_space<vmem>>, vector<1x4096xf32>
    %83 = vector.broadcast %82 : vector<1x4096xf32> to vector<2x4096xf32>
    %84 = arith.addf %81, %83 : vector<2x4096xf32>
    %cst_48 = arith.constant 0.000000e+00 : f32
    %85 = vector.broadcast %cst_48 : f32 to vector<2x4096xf32>
    %86 = arith.maximumf %84, %85 : vector<2x4096xf32>
    %87 = arith.truncf %86 : vector<2x4096xf32> to vector<2x4096xbf16>
    %88 = vector.shape_cast %87 : vector<2x4096xbf16> to vector<2x64x64xbf16>
    %89 = arith.truncf %48 : vector<2x16x64xf32> to vector<2x16x64xbf16>
    "tpu.trace_start"() <{level = 10 : i32, message = "bnk,bik->bni"}> : () -> ()
    %cst_49 = arith.constant dense<0.000000e+00> : vector<2x16x64xf32>
    %90 = tpu.matmul %89, %88, %cst_49 {dimension_numbers = #tpu.dot_dimension_numbers<[2], [2], [1], [1], [0, 0, 0, 1, 1, 1], [0], [0]>} : vector<2x16x64xbf16>, vector<2x64x64xbf16>, vector<2x16x64xf32> -> vector<2x16x64xf32>
    "tpu.trace_stop"() : () -> ()
    %91 = vector.shape_cast %90 : vector<2x16x64xf32> to vector<32x64xf32>
    %92 = arith.truncf %91 : vector<32x64xf32> to vector<32x64xbf16>
    %c0_50 = arith.constant 0 : index
    %c0_51 = arith.constant 0 : index
    %93 = vector.load %arg18[%c0_50, %c0_51] : memref<64x128xbf16, #tpu.memory_space<vmem>>, vector<64x128xbf16>
    %cst_52 = arith.constant dense<0.000000e+00> : vector<32x128xf32>
    %94 = tpu.matmul %92, %93, %cst_52 {dimension_numbers = #tpu.dot_dimension_numbers<[1], [0], [0], [1], [0, 0, 1, 1], [], []>} : vector<32x64xbf16>, vector<64x128xbf16>, vector<32x128xf32> -> vector<32x128xf32>
    %95 = vector.shape_cast %94 : vector<32x128xf32> to vector<2x16x128xf32>
    %c0_53 = arith.constant 0 : index
    %c0_54 = arith.constant 0 : index
    %96 = vector.load %arg19[%c0_53, %c0_54] : memref<1x128xf32, #tpu.memory_space<vmem>>, vector<1x128xf32>
    %97 = vector.shape_cast %96 : vector<1x128xf32> to vector<1x1x128xf32>
    %98 = vector.broadcast %97 : vector<1x1x128xf32> to vector<2x16x128xf32>
    %99 = arith.addf %95, %98 : vector<2x16x128xf32>
    %cst_55 = arith.constant 0.000000e+00 : f32
    %100 = vector.broadcast %cst_55 : f32 to vector<2x16x128xf32>
    %101 = arith.maximumf %99, %100 : vector<2x16x128xf32>
    %c1_i32_56 = arith.constant 1 : i32
    %102 = tpu.memref_slice %arg39[%c1_i32_56] : memref<6x!tpu.dma_semaphore, #tpu.memory_space<semaphore_mem>> -> memref<1x!tpu.dma_semaphore, #tpu.memory_space<semaphore_mem>>
    %103 = tpu.memref_squeeze %102 : memref<1x!tpu.dma_semaphore, #tpu.memory_space<semaphore_mem>> -> memref<!tpu.dma_semaphore, #tpu.memory_space<semaphore_mem>>
    tpu.wait_dma2 semaphore(%103 : memref<!tpu.dma_semaphore, #tpu.memory_space<semaphore_mem>>) src(%arg27 : memref<128x512xbf16, #tpu.memory_space<any>>) dst(%arg34 : memref<128x512xbf16, #tpu.memory_space<vmem>>)
    %104 = vector.shape_cast %101 : vector<2x16x128xf32> to vector<32x128xf32>
    %105 = arith.truncf %104 : vector<32x128xf32> to vector<32x128xbf16>
    %c0_57 = arith.constant 0 : index
    %c0_58 = arith.constant 0 : index
    %106 = vector.load %arg34[%c0_57, %c0_58] : memref<128x512xbf16, #tpu.memory_space<vmem>>, vector<128x512xbf16>
    %cst_59 = arith.constant dense<0.000000e+00> : vector<32x512xf32>
    %107 = tpu.matmul %105, %106, %cst_59 {dimension_numbers = #tpu.dot_dimension_numbers<[1], [0], [0], [1], [0, 0, 1, 1], [], []>} : vector<32x128xbf16>, vector<128x512xbf16>, vector<32x512xf32> -> vector<32x512xf32>
    %108 = vector.shape_cast %107 : vector<32x512xf32> to vector<2x16x512xf32>
    %c0_60 = arith.constant 0 : index
    %c0_61 = arith.constant 0 : index
    %109 = vector.load %arg20[%c0_60, %c0_61] : memref<1x512xf32, #tpu.memory_space<vmem>>, vector<1x512xf32>
    %110 = vector.shape_cast %109 : vector<1x512xf32> to vector<1x1x512xf32>
    %111 = vector.broadcast %110 : vector<1x1x512xf32> to vector<2x16x512xf32>
    %112 = arith.addf %108, %111 : vector<2x16x512xf32>
    %cst_62 = arith.constant 0.000000e+00 : f32
    %113 = vector.broadcast %cst_62 : f32 to vector<2x16x512xf32>
    %114 = arith.maximumf %112, %113 : vector<2x16x512xf32>
    %cst_63 = arith.constant dense<0xFF800000> : vector<2x512xf32>
    %115 = vector.multi_reduction <maximumf>, %114, %cst_63 [1] : vector<2x16x512xf32> to vector<2x512xf32>
    %c2_i32_64 = arith.constant 2 : i32
    %116 = tpu.memref_slice %arg39[%c2_i32_64] : memref<6x!tpu.dma_semaphore, #tpu.memory_space<semaphore_mem>> -> memref<1x!tpu.dma_semaphore, #tpu.memory_space<semaphore_mem>>
    %117 = tpu.memref_squeeze %116 : memref<1x!tpu.dma_semaphore, #tpu.memory_space<semaphore_mem>> -> memref<!tpu.dma_semaphore, #tpu.memory_space<semaphore_mem>>
    tpu.wait_dma2 semaphore(%117 : memref<!tpu.dma_semaphore, #tpu.memory_space<semaphore_mem>>) src(%arg28 : memref<512x256xbf16, #tpu.memory_space<any>>) dst(%arg35 : memref<512x256xbf16, #tpu.memory_space<vmem>>)
    %118 = arith.truncf %115 : vector<2x512xf32> to vector<2x512xbf16>
    %c0_65 = arith.constant 0 : index
    %c0_66 = arith.constant 0 : index
    %119 = vector.load %arg35[%c0_65, %c0_66] : memref<512x256xbf16, #tpu.memory_space<vmem>>, vector<512x256xbf16>
    %cst_67 = arith.constant dense<0.000000e+00> : vector<2x256xf32>
    %120 = tpu.matmul %118, %119, %cst_67 {dimension_numbers = #tpu.dot_dimension_numbers<[1], [0], [0], [1], [0, 0, 1, 1], [], []>} : vector<2x512xbf16>, vector<512x256xbf16>, vector<2x256xf32> -> vector<2x256xf32>
    %c0_68 = arith.constant 0 : index
    %c0_69 = arith.constant 0 : index
    %121 = vector.load %arg21[%c0_68, %c0_69] : memref<1x256xf32, #tpu.memory_space<vmem>>, vector<1x256xf32>
    %122 = vector.broadcast %121 : vector<1x256xf32> to vector<2x256xf32>
    %123 = arith.addf %120, %122 : vector<2x256xf32>
    %cst_70 = arith.constant 0.000000e+00 : f32
    %124 = vector.broadcast %cst_70 : f32 to vector<2x256xf32>
    %125 = arith.maximumf %123, %124 : vector<2x256xf32>
    %c3_i32_71 = arith.constant 3 : i32
    %126 = tpu.memref_slice %arg39[%c3_i32_71] : memref<6x!tpu.dma_semaphore, #tpu.memory_space<semaphore_mem>> -> memref<1x!tpu.dma_semaphore, #tpu.memory_space<semaphore_mem>>
    %127 = tpu.memref_squeeze %126 : memref<1x!tpu.dma_semaphore, #tpu.memory_space<semaphore_mem>> -> memref<!tpu.dma_semaphore, #tpu.memory_space<semaphore_mem>>
    tpu.wait_dma2 semaphore(%127 : memref<!tpu.dma_semaphore, #tpu.memory_space<semaphore_mem>>) src(%arg29 : memref<256x256xbf16, #tpu.memory_space<any>>) dst(%arg36 : memref<256x256xbf16, #tpu.memory_space<vmem>>)
    %128 = arith.truncf %125 : vector<2x256xf32> to vector<2x256xbf16>
    %c0_72 = arith.constant 0 : index
    %c0_73 = arith.constant 0 : index
    %129 = vector.load %arg36[%c0_72, %c0_73] : memref<256x256xbf16, #tpu.memory_space<vmem>>, vector<256x256xbf16>
    %cst_74 = arith.constant dense<0.000000e+00> : vector<2x256xf32>
    %130 = tpu.matmul %128, %129, %cst_74 {dimension_numbers = #tpu.dot_dimension_numbers<[1], [0], [0], [1], [0, 0, 1, 1], [], []>} : vector<2x256xbf16>, vector<256x256xbf16>, vector<2x256xf32> -> vector<2x256xf32>
    %c0_75 = arith.constant 0 : index
    %c0_76 = arith.constant 0 : index
    %131 = vector.load %arg22[%c0_75, %c0_76] : memref<1x256xf32, #tpu.memory_space<vmem>>, vector<1x256xf32>
    %132 = vector.broadcast %131 : vector<1x256xf32> to vector<2x256xf32>
    %133 = arith.addf %130, %132 : vector<2x256xf32>
    %cst_77 = arith.constant 0.000000e+00 : f32
    %134 = vector.broadcast %cst_77 : f32 to vector<2x256xf32>
    %135 = arith.maximumf %133, %134 : vector<2x256xf32>
    %c4_i32_78 = arith.constant 4 : i32
    %136 = tpu.memref_slice %arg39[%c4_i32_78] : memref<6x!tpu.dma_semaphore, #tpu.memory_space<semaphore_mem>> -> memref<1x!tpu.dma_semaphore, #tpu.memory_space<semaphore_mem>>
    %137 = tpu.memref_squeeze %136 : memref<1x!tpu.dma_semaphore, #tpu.memory_space<semaphore_mem>> -> memref<!tpu.dma_semaphore, #tpu.memory_space<semaphore_mem>>
    tpu.wait_dma2 semaphore(%137 : memref<!tpu.dma_semaphore, #tpu.memory_space<semaphore_mem>>) src(%arg30 : memref<256x256xbf16, #tpu.memory_space<any>>) dst(%arg37 : memref<256x256xbf16, #tpu.memory_space<vmem>>)
    %c5_i32_79 = arith.constant 5 : i32
    %138 = tpu.memref_slice %arg39[%c5_i32_79] : memref<6x!tpu.dma_semaphore, #tpu.memory_space<semaphore_mem>> -> memref<1x!tpu.dma_semaphore, #tpu.memory_space<semaphore_mem>>
    %139 = tpu.memref_squeeze %138 : memref<1x!tpu.dma_semaphore, #tpu.memory_space<semaphore_mem>> -> memref<!tpu.dma_semaphore, #tpu.memory_space<semaphore_mem>>
    tpu.wait_dma2 semaphore(%139 : memref<!tpu.dma_semaphore, #tpu.memory_space<semaphore_mem>>) src(%arg31 : memref<256x256xbf16, #tpu.memory_space<any>>) dst(%arg38 : memref<256x256xbf16, #tpu.memory_space<vmem>>)
    %140 = arith.truncf %37 : vector<2x256xf32> to vector<2x256xbf16>
    %c0_80 = arith.constant 0 : index
    %c0_81 = arith.constant 0 : index
    %141 = vector.load %arg37[%c0_80, %c0_81] : memref<256x256xbf16, #tpu.memory_space<vmem>>, vector<256x256xbf16>
    %cst_82 = arith.constant dense<0.000000e+00> : vector<2x256xf32>
    %142 = tpu.matmul %140, %141, %cst_82 {dimension_numbers = #tpu.dot_dimension_numbers<[1], [0], [0], [1], [0, 0, 1, 1], [], []>} : vector<2x256xbf16>, vector<256x256xbf16>, vector<2x256xf32> -> vector<2x256xf32>
    %143 = arith.truncf %135 : vector<2x256xf32> to vector<2x256xbf16>
    %c0_83 = arith.constant 0 : index
    %c0_84 = arith.constant 0 : index
    %144 = vector.load %arg38[%c0_83, %c0_84] : memref<256x256xbf16, #tpu.memory_space<vmem>>, vector<256x256xbf16>
    %cst_85 = arith.constant dense<0.000000e+00> : vector<2x256xf32>
    %145 = tpu.matmul %143, %144, %cst_85 {dimension_numbers = #tpu.dot_dimension_numbers<[1], [0], [0], [1], [0, 0, 1, 1], [], []>} : vector<2x256xbf16>, vector<256x256xbf16>, vector<2x256xf32> -> vector<2x256xf32>
    %146 = arith.addf %142, %145 : vector<2x256xf32>
    %c0_86 = arith.constant 0 : index
    %c0_87 = arith.constant 0 : index
    %147 = vector.load %arg23[%c0_86, %c0_87] : memref<1x256xf32, #tpu.memory_space<vmem>>, vector<1x256xf32>
    %148 = vector.broadcast %147 : vector<1x256xf32> to vector<2x256xf32>
    %149 = arith.addf %146, %148 : vector<2x256xf32>
    %cst_88 = arith.constant 0.000000e+00 : f32
    %150 = vector.broadcast %cst_88 : f32 to vector<2x256xf32>
    %151 = arith.maximumf %149, %150 : vector<2x256xf32>
    %152 = arith.truncf %151 : vector<2x256xf32> to vector<2x256xbf16>
    %c0_89 = arith.constant 0 : index
    %c0_90 = arith.constant 0 : index
    %153 = vector.load %arg24[%c0_89, %c0_90] : memref<256x4xbf16, #tpu.memory_space<vmem>>, vector<256x4xbf16>
    %cst_91 = arith.constant dense<0.000000e+00> : vector<2x4xf32>
    %154 = tpu.matmul %152, %153, %cst_91 {dimension_numbers = #tpu.dot_dimension_numbers<[1], [0], [0], [1], [0, 0, 1, 1], [], []>} : vector<2x256xbf16>, vector<256x4xbf16>, vector<2x4xf32> -> vector<2x4xf32>
    %c0_92 = arith.constant 0 : index
    %c0_93 = arith.constant 0 : index
    %155 = vector.load %arg25[%c0_92, %c0_93] : memref<1x4xf32, #tpu.memory_space<vmem>>, vector<1x4xf32>
    %156 = vector.broadcast %155 : vector<1x4xf32> to vector<2x4xf32>
    %157 = arith.addf %154, %156 : vector<2x4xf32>
    %158 = vector.extract_strided_slice %157 {offsets = [0, 0], sizes = [2, 2], strides = [1, 1]} : vector<2x4xf32> to vector<2x2xf32>
    %159 = vector.extract_strided_slice %157 {offsets = [0, 2], sizes = [2, 2], strides = [1, 1]} : vector<2x4xf32> to vector<2x2xf32>
    %cst_94 = arith.constant 0.000000e+00 : f32
    %160 = vector.broadcast %cst_94 : f32 to vector<2x2xf32>
    %161 = arith.maximumf %159, %160 : vector<2x2xf32>
    %162 = math.absf %159 : vector<2x2xf32>
    %cst_95 = arith.constant 0.000000e+00 : f32
    %163 = vector.broadcast %cst_95 : f32 to vector<2x2xf32>
    %164 = arith.subf %163, %162 : vector<2x2xf32>
    %165 = math.exp %164 : vector<2x2xf32>
    %cst_96 = arith.constant 1.000000e+00 : f32
    %166 = vector.broadcast %cst_96 : f32 to vector<2x2xf32>
    %167 = arith.addf %166, %165 : vector<2x2xf32>
    %168 = math.log %167 : vector<2x2xf32>
    %169 = arith.addf %161, %168 : vector<2x2xf32>
    %cst_97 = arith.constant 2.000000e+01 : f32
    %170 = vector.broadcast %cst_97 : f32 to vector<2x2xf32>
    %171 = arith.cmpf ogt, %159, %170 : vector<2x2xf32>
    %172 = arith.select %171, %159, %169 : vector<2x2xi1>, vector<2x2xf32>
    %c0_98 = arith.constant 0 : index
    %c0_99 = arith.constant 0 : index
    %173 = vector.load %arg3[%c0_98, %c0_99] : memref<2x2xf32, #tpu.memory_space<vmem>>, vector<2x2xf32>
    %174 = arith.mulf %172, %173 : vector<2x2xf32>
    %175 = arith.addf %158, %174 : vector<2x2xf32>
    %176 = math.tanh %175 : vector<2x2xf32>
    %cst_100 = arith.constant -5.000000e-01 : f32
    %177 = vector.broadcast %cst_100 : f32 to vector<2x2xf32>
    %178 = arith.mulf %177, %173 : vector<2x2xf32>
    %179 = arith.mulf %178, %173 : vector<2x2xf32>
    %cst_101 = arith.constant 1.000000e-30 : f32
    %180 = vector.broadcast %cst_101 : f32 to vector<2x2xf32>
    %181 = arith.maximumf %172, %180 : vector<2x2xf32>
    %182 = math.log %181 : vector<2x2xf32>
    %183 = arith.subf %179, %182 : vector<2x2xf32>
    %cst_102 = arith.constant 0.918938517 : f32
    %184 = vector.broadcast %cst_102 : f32 to vector<2x2xf32>
    %185 = arith.subf %183, %184 : vector<2x2xf32>
    %186 = arith.mulf %176, %176 : vector<2x2xf32>
    %cst_103 = arith.constant 1.000000e+00 : f32
    %187 = vector.broadcast %cst_103 : f32 to vector<2x2xf32>
    %188 = arith.subf %187, %186 : vector<2x2xf32>
    %cst_104 = arith.constant 1.000000e-07 : f32
    %189 = vector.broadcast %cst_104 : f32 to vector<2x2xf32>
    %190 = arith.addf %188, %189 : vector<2x2xf32>
    %191 = math.log %190 : vector<2x2xf32>
    %192 = arith.subf %185, %191 : vector<2x2xf32>
    %193 = tpu.concatenate %176, %192 in 1 : vector<2x2xf32>, vector<2x2xf32> -> vector<2x4xf32>
    %c0_105 = arith.constant 0 : index
    %c0_106 = arith.constant 0 : index
    %194 = vector.load %arg32[%c0_105, %c0_106] : memref<2x4xf32, #tpu.memory_space<vmem>>, vector<2x4xf32>
    tpu.vector_store %arg32[%c0_105, %c0_106], %193 {strides = array<i32>} : memref<2x4xf32, #tpu.memory_space<vmem>>, vector<2x4xf32>,
    return
  }
  func.func @transform_0(%arg0: i32) -> (i32, i32) {
    %c0_i32 = arith.constant 0 : i32
    %c0_i32_0 = arith.constant 0 : i32
    %c0_i32_1 = arith.constant 0 : i32
    return %c0_i32, %c0_i32_0 : i32, i32
  }
  func.func @transform_1(%arg0: i32) -> (i32, i32, i32) {
    %c0_i32 = arith.constant 0 : i32
    %c0_i32_0 = arith.constant 0 : i32
    %c0_i32_1 = arith.constant 0 : i32
    %c0_i32_2 = arith.constant 0 : i32
    return %c0_i32, %c0_i32_0, %c0_i32_1 : i32, i32, i32
  }
  func.func @transform_2(%arg0: i32) -> (i32, i32) {
    %c0_i32 = arith.constant 0 : i32
    %c0_i32_0 = arith.constant 0 : i32
    %c0_i32_1 = arith.constant 0 : i32
    return %c0_i32, %c0_i32_0 : i32, i32
  }
  func.func @transform_3(%arg0: i32) -> (i32, i32) {
    %c0_i32 = arith.constant 0 : i32
    %c0_i32_0 = arith.constant 0 : i32
    %c0_i32_1 = arith.constant 0 : i32
    return %c0_i32, %c0_i32_0 : i32, i32
  }
  func.func @transform_4(%arg0: i32) -> (i32, i32) {
    %c0_i32 = arith.constant 0 : i32
    %c0_i32_0 = arith.constant 0 : i32
    %c0_i32_1 = arith.constant 0 : i32
    return %c0_i32, %c0_i32_0 : i32, i32
  }
  func.func @transform_5(%arg0: i32) -> (i32, i32) {
    %c0_i32 = arith.constant 0 : i32
    %c0_i32_0 = arith.constant 0 : i32
    %c0_i32_1 = arith.constant 0 : i32
    return %c0_i32, %c0_i32_0 : i32, i32
  }
  func.func @transform_6(%arg0: i32) -> (i32, i32) {
    %c0_i32 = arith.constant 0 : i32
    %c0_i32_0 = arith.constant 0 : i32
    %c0_i32_1 = arith.constant 0 : i32
    return %c0_i32, %c0_i32_0 : i32, i32
  }
  func.func @transform_7(%arg0: i32) -> (i32, i32) {
    %c0_i32 = arith.constant 0 : i32
    %c0_i32_0 = arith.constant 0 : i32
    %c0_i32_1 = arith.constant 0 : i32
    return %c0_i32, %c0_i32_0 : i32, i32
  }
  func.func @transform_8(%arg0: i32) -> (i32, i32) {
    %c0_i32 = arith.constant 0 : i32
    %c0_i32_0 = arith.constant 0 : i32
    %c0_i32_1 = arith.constant 0 : i32
    return %c0_i32, %c0_i32_0 : i32, i32
  }
  func.func @transform_9(%arg0: i32) -> (i32, i32) {
    %c0_i32 = arith.constant 0 : i32
    %c0_i32_0 = arith.constant 0 : i32
    %c0_i32_1 = arith.constant 0 : i32
    return %c0_i32, %c0_i32_0 : i32, i32
  }
  func.func @transform_10(%arg0: i32) -> (i32, i32) {
    %c0_i32 = arith.constant 0 : i32
    %c0_i32_0 = arith.constant 0 : i32
    %c0_i32_1 = arith.constant 0 : i32
    return %c0_i32, %c0_i32_0 : i32, i32
  }
  func.func @transform_11(%arg0: i32) -> (i32, i32) {
    %c0_i32 = arith.constant 0 : i32
    %c0_i32_0 = arith.constant 0 : i32
    %c0_i32_1 = arith.constant 0 : i32
    return %c0_i32, %c0_i32_0 : i32, i32
  }
  func.func @transform_12(%arg0: i32) -> (i32, i32) {
    %c0_i32 = arith.constant 0 : i32
    %c0_i32_0 = arith.constant 0 : i32
    %c0_i32_1 = arith.constant 0 : i32
    return %c0_i32, %c0_i32_0 : i32, i32
  }
  func.func @transform_13(%arg0: i32) -> (i32, i32) {
    %c0_i32 = arith.constant 0 : i32
    %c0_i32_0 = arith.constant 0 : i32
    %c0_i32_1 = arith.constant 0 : i32
    return %c0_i32, %c0_i32_0 : i32, i32
  }
  func.func @transform_14(%arg0: i32) -> (i32, i32) {
    %c0_i32 = arith.constant 0 : i32
    %c0_i32_0 = arith.constant 0 : i32
    %c0_i32_1 = arith.constant 0 : i32
    return %c0_i32, %c0_i32_0 : i32, i32
  }
  func.func @transform_15(%arg0: i32) -> (i32, i32) {
    %c0_i32 = arith.constant 0 : i32
    %c0_i32_0 = arith.constant 0 : i32
    %c0_i32_1 = arith.constant 0 : i32
    return %c0_i32, %c0_i32_0 : i32, i32
  }
  func.func @transform_16(%arg0: i32) -> (i32, i32) {
    %c0_i32 = arith.constant 0 : i32
    %c0_i32_0 = arith.constant 0 : i32
    %c0_i32_1 = arith.constant 0 : i32
    return %c0_i32, %c0_i32_0 : i32, i32
  }
  func.func @transform_17(%arg0: i32) -> (i32, i32) {
    %c0_i32 = arith.constant 0 : i32
    %c0_i32_0 = arith.constant 0 : i32
    %c0_i32_1 = arith.constant 0 : i32
    return %c0_i32, %c0_i32_0 : i32, i32
  }
  func.func @transform_18(%arg0: i32) -> (i32, i32) {
    %c0_i32 = arith.constant 0 : i32
    %c0_i32_0 = arith.constant 0 : i32
    %c0_i32_1 = arith.constant 0 : i32
    return %c0_i32, %c0_i32_0 : i32, i32
  }
  func.func @transform_19(%arg0: i32) -> (i32, i32) {
    %c0_i32 = arith.constant 0 : i32
    %c0_i32_0 = arith.constant 0 : i32
    %c0_i32_1 = arith.constant 0 : i32
    return %c0_i32, %c0_i32_0 : i32, i32
  }
  func.func @transform_20(%arg0: i32) -> (i32, i32) {
    %c0_i32 = arith.constant 0 : i32
    %c0_i32_0 = arith.constant 0 : i32
    %c0_i32_1 = arith.constant 0 : i32
    return %c0_i32, %c0_i32_0 : i32, i32
  }
  func.func @transform_21(%arg0: i32) -> (i32, i32) {
    %c0_i32 = arith.constant 0 : i32
    %c0_i32_0 = arith.constant 0 : i32
    %c0_i32_1 = arith.constant 0 : i32
    return %c0_i32, %c0_i32_0 : i32, i32
  }
  func.func @transform_22(%arg0: i32) -> (i32, i32) {
    %c0_i32 = arith.constant 0 : i32
    %c0_i32_0 = arith.constant 0 : i32
    %c0_i32_1 = arith.constant 0 : i32
    return %c0_i32, %c0_i32_0 : i32, i32
  }
  func.func @transform_23(%arg0: i32) -> (i32, i32) {
    %c0_i32 = arith.constant 0 : i32
    %c0_i32_0 = arith.constant 0 : i32
    %c0_i32_1 = arith.constant 0 : i32
    return %c0_i32, %c0_i32_0 : i32, i32
  }
  func.func @transform_24(%arg0: i32) -> (i32, i32) {
    %c0_i32 = arith.constant 0 : i32
    %c0_i32_0 = arith.constant 0 : i32
    %c0_i32_1 = arith.constant 0 : i32
    return %c0_i32, %c0_i32_0 : i32, i32
  }
  func.func @transform_31(%arg0: i32) -> (i32, i32) {
    %c0_i32 = arith.constant 0 : i32
    %c0_i32_0 = arith.constant 0 : i32
    %c0_i32_1 = arith.constant 0 : i32
    return %c0_i32, %c0_i32_0 : i32, i32
  }
}

</mosaic_0001>

<bundles_post_ra>
// kernel: tpu_custom_call.1
= control target key start
LH: loop header
LB: loop body
LE: loop exit
PB: predicated region body
PF: predicated region fallthrough
CT: control target
= control target key end

     0   :  { %s9420_s6 = smov 1   ;;  %s9421_s10 = smov 2   ;;  %s10778_s0 = inlined_call_operand.smem [shape: u32[32], index: -1, kind: input, shape index: {}] }
   0x1   :  { %s9483_s5 = sld [smem:[%s10778_s0]]   ;;  %s9422_s14 = smov 3  }
   0x2   :  { %s9488_s9 = sld [smem:[%s10778_s0 + %s9420_s6]]   ;;  %s9423_s18 = smov 4  }
   0x3   :  { %s9493_s13 = sld [smem:[%s10778_s0 + %s9421_s10]]   ;;  %s9424_s22 = smov 5  }
   0x4   :  { %s9498_s17 = sld [smem:[%s10778_s0 + %s9422_s14]]   ;;  %s9425_s26 = smov 6  }
   0x5   :  { %s9503_s21 = sld [smem:[%s10778_s0 + %s9423_s18]]   ;;  %s9426_s30 = smov 7  }
   0x6   :  { %s9508_s25 = sld [smem:[%s10778_s0 + %s9424_s22]]   ;;  %s9427_s4 = smov 8  }
   0x7   :  { %s9513_s29 = sld [smem:[%s10778_s0 + %s9425_s26]]   ;;  %s9428_s10 = smov 9  }
   0x8   :  { %s9518_s3 = sld [smem:[%s10778_s0 + %s9426_s30]]   ;;  %s9429_s15 = smov 10  }
   0x9   :  { %10785 = sst [smem:[#allocation51_spill]] %s9493_s13  ;;  %s9430_s20 = smov 11  }
   0xa   :  { %s9523_s8 = sld [smem:[%s10778_s0 + %s9427_s4]]   ;;  %s9431_s26 = smov 12  }
   0xb   :  { %s9528_s14 = sld [smem:[%s10778_s0 + %s9428_s10]]   ;;  %s9432_s1 = smov 13  }
   0xc   :  { %s9533_s19 = sld [smem:[%s10778_s0 + %s9429_s15]]   ;;  %s9433_s7 = smov 14  }
   0xd   :  { %s9538_s24 = sld [smem:[%s10778_s0 + %s9430_s20]]   ;;  %s9434_s15 = smov 15  }
   0xe   :  { %s9543_s30 = sld [smem:[%s10778_s0 + %s9431_s26]]   ;;  %s9435_s22 = smov 16  }
   0xf   :  { %s9548_s6 = sld [smem:[%s10778_s0 + %s9432_s1]]   ;;  %s9436_s28 = smov 17  }
  0x10   :  { %10786 = sst [smem:[#allocation52_spill]] %s9523_s8 }
  0x11   :  { %s9553_s12 = sld [smem:[%s10778_s0 + %s9433_s7]]   ;;  %s9437_s7 = smov 18  }
  0x12   :  { %s9558_s20 = sld [smem:[%s10778_s0 + %s9434_s15]]   ;;  %s9438_s15 = smov 19  }
  0x13   :  { %10787 = sst [smem:[#allocation53_spill]] %s9538_s24 }
  0x14   :  { %s9563_s27 = sld [smem:[%s10778_s0 + %s9435_s22]]   ;;  %s9439_s22 = smov 20  }
  0x15   :  { %s9568_s4 = sld [smem:[%s10778_s0 + %s9436_s28]]   ;;  %s9440_s28 = smov 21  }
  0x16   :  { %s9573_s13 = sld [smem:[%s10778_s0 + %s9437_s7]]   ;;  %s9441_s7 = smov 22  }
  0x17   :  { %10788 = sst [smem:[#allocation54_spill]] %s9553_s12 }
  0x18   :  { %s9578_s12 = sld [smem:[%s10778_s0 + %s9438_s15]]   ;;  %s9442_s15 = smov 23  }
  0x19   :  { %s9583_s8 = sld [smem:[%s10778_s0 + %s9439_s22]]   ;;  %s9443_s22 = smov 24  }
  0x1a   :  { %s9588_s24 = sld [smem:[%s10778_s0 + %s9440_s28]]   ;;  %s9444_s28 = smov 25  }
  0x1c   :  { %10789 = sst [smem:[#allocation55_spill]] %s9573_s13 }
  0x1d   :  { %s9593_s13 = sld [smem:[%s10778_s0 + %s9441_s7]]   ;;  %s9445_s7 = smov 26  }
  0x1e   :  { %10790 = sst [smem:[#allocation56_spill]] %s9578_s12 }
  0x1f   :  { %10791 = sst [smem:[#allocation57_spill]] %s9583_s8 }
  0x20   :  { %10792 = sst [smem:[#allocation58_spill]] %s9588_s24 }
  0x21   :  { %s9598_s12 = sld [smem:[%s10778_s0 + %s9442_s15]]   ;;  %s9446_s15 = smov 27  }
  0x22   :  { %s9603_s8 = sld [smem:[%s10778_s0 + %s9443_s22]]   ;;  %s9447_s22 = smov 28  }
  0x23   :  { %10793 = sst [smem:[#allocation59_spill]] %s9593_s13 }
  0x24   :  { %s9608_s24 = sld [smem:[%s10778_s0 + %s9444_s28]]   ;;  %s9448_s28 = smov 29  }
  0x25   :  { %s9613_s13 = sld [smem:[%s10778_s0 + %s9445_s7]]   ;;  %s9449_s7 = smov 30  }
  0x27   :  { %10794 = sst [smem:[#allocation60_spill]] %s9598_s12 }
  0x28   :  { %10795 = sst [smem:[#allocation61_spill]] %s9603_s8 }
  0x29   :  { %s9618_s12 = sld [smem:[%s10778_s0 + %s9446_s15]]   ;;  %s9450_s15 = smov 31  }
  0x2a   :  { %10796 = sst [smem:[#allocation62_spill]] %s9608_s24 }
  0x2b   :  { %10797 = sst [smem:[#allocation63_spill]] %s9613_s13 }
  0x2c   :  { %s9623_s8 = sld [smem:[%s10778_s0 + %s9447_s22]]  }
  0x2d   :  { %s9628_s24 = sld [smem:[%s10778_s0 + %s9448_s28]]  }
  0x2e   :  { %s9633_s13 = sld [smem:[%s10778_s0 + %s9449_s7]]  }
  0x2f   :  { %10798 = sst [smem:[#allocation64_spill]] %s9618_s12 }
  0x30   :  { %s9638_s12 = sld [smem:[%s10778_s0 + %s9450_s15]]  }
  0x31   :  { %68 = vsyncpa [#allocation10], 0 }
  0x32   :  { %69 = vsyncpa [#allocation13], 0 }
  0x33   :  { %70 = vsyncpa [#allocation16], 0 }
  0x34   :  { %71 = vsyncpa [#allocation19], 0 }
  0x35   :  { %72 = vsyncpa [#allocation22], 0  ;;  %s101_s22 = sshll.u32 %s9518_s3, 4  ;;  %s102_s22 = int_to_ptr.hbm [resolvable:$true] %s101_s22 }
  0x36   :  { %73 = vsyncpa [#allocation11], 0  ;;  %s9451_s23 = smov [#allocation12]   ;;  %s128_s28 = sshll.u32 %s9533_s19, 4  ;;  %s129_s28 = int_to_ptr.hbm [resolvable:$true] %s128_s28 }
  0x37   :  { %s103_s26 = sshll.u32 %s9451_s23, 4  ;;  %s9012_s1 = sshra.s32 %s102_s22, 4  ;;  %s104_s26 = int_to_ptr.vmem [resolvable:$true] %s103_s26  ;;  %s9013_s1 = int_to_ptr.hbm [resolvable:$true] %s9012_s1 }
  0x38   :  { %s9014_s0 = scalar_lea.hbm %s9013_s1, 256  ;;  %s9016_s2 = scalar_lea.hbm %s9518_s3, 256 }
  0x39   :  { %p9015_p0 = scmp.ne.s32.totalorder %s9013_s1, %s9014_s0  ;;  %p9017_p1 = scmp.lt.s32.totalorder %s9013_s1, %s9518_s3 }
  0x3a   :  { %p9018_p2 = scmp.lt.s32.totalorder %s9016_s2, %s9014_s0 }
  0x3c   :  { %p9019_p3 = por %p9018_p2, %p9017_p1 }
  0x3e   :  { %p9020_p4 = pnand %p9019_p3, %p9015_p0 }
  0x40   :  { %9023 = shalt.err (!%p9020_p4)
}
  0x41   :  { %s9452_s7 = smov 128   ;;  %s9453_s10 = smov 8  }
  0x42   :  { %109 = dma.hbm_to_vmem [thread:$0]  %s102_s22, 4096, %s104_s26, [#allocation13], %s9452_s7, %s9452_s7, %s9453_s10  }
  0x43   :  { %s9454_s11 = smov [#allocation15]   ;;  %s151_s16 = sshll.u32 %s9548_s6, 4  ;;  %s9648_s16 = int_to_ptr.hbm [resolvable:$true] %s151_s16 }
  0x44   :  { %s130_s15 = sshll.u32 %s9454_s11, 4  ;;  %s9036_s3 = sshra.s32 %s129_s28, 4  ;;  %s131_s15 = int_to_ptr.vmem [resolvable:$true] %s130_s15  ;;  %s9037_s3 = int_to_ptr.hbm [resolvable:$true] %s9036_s3 }
  0x45   :  { %s9038_s18 = scalar_lea.hbm %s9037_s3, 1  ;;  %s9040_s23 = scalar_lea.hbm %s9533_s19, 1 }
  0x46   :  { %p9039_p5 = scmp.ne.s32.totalorder %s9037_s3, %s9038_s18  ;;  %p9041_p6 = scmp.lt.s32.totalorder %s9037_s3, %s9533_s19 }
  0x47   :  { %p9042_p7 = scmp.lt.s32.totalorder %s9040_s23, %s9038_s18 }
  0x49   :  { %p9043_p8 = por %p9042_p7, %p9041_p6 }
  0x4b   :  { %p9044_p9 = pnand %p9043_p8, %p9039_p5 }
  0x4d   :  { %9047 = shalt.err (!%p9044_p9)
}
  0x4e   :  { %133 = dma.hbm_to_vmem [thread:$0]  %s129_s28, 16, %s131_s15, [#allocation16]  }
  0x4f   :  { %s178_s22 = sshll.u32 %s9563_s27, 4  ;;  %s9455_s26 = smov [#allocation18]   ;;  %s179_s22 = int_to_ptr.hbm [resolvable:$true] %s178_s22 }
  0x50   :  { %s153_s1 = sshll.u32 %s9455_s26, 4  ;;  %s9060_s0 = sshra.s32 %s9648_s16, 4  ;;  %s154_s1 = int_to_ptr.vmem [resolvable:$true] %s153_s1  ;;  %s9061_s0 = int_to_ptr.hbm [resolvable:$true] %s9060_s0 }
  0x51   :  { %s9062_s2 = scalar_lea.hbm %s9061_s0, 64  ;;  %s9064_s11 = scalar_lea.hbm %s9548_s6, 64 }
  0x52   :  { %p9063_p10 = scmp.ne.s32.totalorder %s9061_s0, %s9062_s2  ;;  %p9065_p11 = scmp.lt.s32.totalorder %s9061_s0, %s9548_s6 }
  0x53   :  { %p9066_p12 = scmp.lt.s32.totalorder %s9064_s11, %s9062_s2 }
  0x55   :  { %p9067_p13 = por %p9066_p12, %p9065_p11 }
  0x57   :  { %p9068_p0 = pnand %p9067_p13, %p9063_p10 }
  0x59   :  { %9071 = shalt.err (!%p9068_p0)
}
  0x5a   :  { %159 = dma.hbm_to_vmem [thread:$0]  %s9648_s16, 1024, %s154_s1, [#allocation19], %s9452_s7, %s9452_s7, %s9453_s10  }
  0x5b   :  { %s9456_s19 = smov [#allocation21]   ;;  %s87_s15 = sshll.u32 %s9503_s21, 4  ;;  %s88_s15 = int_to_ptr.hbm [resolvable:$true] %s87_s15 }
  0x5c   :  { %s180_s28 = sshll.u32 %s9456_s19, 4  ;;  %s9084_s3 = sshra.s32 %s179_s22, 4  ;;  %s181_s28 = int_to_ptr.vmem [resolvable:$true] %s180_s28  ;;  %s9085_s3 = int_to_ptr.hbm [resolvable:$true] %s9084_s3 }
  0x5d   :  { %s9086_s6 = scalar_lea.hbm %s9085_s3, 32  ;;  %s9088_s18 = scalar_lea.hbm %s9563_s27, 32 }
  0x5e   :  { %p9087_p1 = scmp.ne.s32.totalorder %s9085_s3, %s9086_s6  ;;  %p9089_p2 = scmp.lt.s32.totalorder %s9085_s3, %s9563_s27 }
  0x5f   :  { %p9090_p3 = scmp.lt.s32.totalorder %s9088_s18, %s9086_s6 }
  0x61   :  { %p9091_p4 = por %p9090_p3, %p9089_p2 }
  0x63   :  { %p9092_p5 = pnand %p9091_p4, %p9087_p1 }
  0x65   :  { %9095 = shalt.err (!%p9092_p5)
}
  0x66   :  { %183 = dma.hbm_to_vmem [thread:$0]  %s179_s22, 512, %s181_s28, [#allocation22]  }
  0x67   :  { %s117_s7 = sshll.u32 %s9528_s14, 4  ;;  %s9457_s10 = smov [#allocation9]   ;;  %s118_s7 = int_to_ptr.hbm [resolvable:$true] %s117_s7 }
  0x68   :  { %s89_s16 = sshll.u32 %s9457_s10, 4  ;;  %s9108_s23 = sshra.s32 %s88_s15, 4  ;;  %s90_s16 = int_to_ptr.vmem [resolvable:$true] %s89_s16  ;;  %s9109_s23 = int_to_ptr.hbm [resolvable:$true] %s9108_s23 }
  0x69   :  { %s9110_s26 = scalar_lea.hbm %s9109_s23, 1  ;;  %s9112_s1 = scalar_lea.hbm %s9503_s21, 1 }
  0x6a   :  { %p9111_p6 = scmp.ne.s32.totalorder %s9109_s23, %s9110_s26  ;;  %p9113_p7 = scmp.lt.s32.totalorder %s9109_s23, %s9503_s21 }
  0x6b   :  { %p9114_p8 = scmp.lt.s32.totalorder %s9112_s1, %s9110_s26 }
  0x6d   :  { %p9115_p9 = por %p9114_p8, %p9113_p7 }
  0x6f   :  { %p9116_p10 = pnand %p9115_p9, %p9111_p6 }
  0x71   :  { %9119 = shalt.err (!%p9116_p10)
}
  0x72   :  { %92 = dma.hbm_to_vmem [thread:$0]  %s88_s15, 16, %s90_s16, [#allocation10]  }
  0x73   :  { %s9458_s27 = smov [#allocation14]   ;;  %s141_s0 = sshll.u32 %s9543_s30, 4  ;;  %s142_s0 = int_to_ptr.hbm [resolvable:$true] %s141_s0 }
  0x74   :  { %s119_s22 = sshll.u32 %s9458_s27, 4  ;;  %s9132_s2 = sshra.s32 %s118_s7, 4  ;;  %s120_s22 = int_to_ptr.vmem [resolvable:$true] %s119_s22  ;;  %s9133_s2 = int_to_ptr.hbm [resolvable:$true] %s9132_s2 }
  0x75   :  { %s9134_s11 = scalar_lea.hbm %s9133_s2, 2  ;;  %s9136_s19 = scalar_lea.hbm %s9528_s14, 2 }
  0x76   :  { %p9135_p11 = scmp.ne.s32.totalorder %s9133_s2, %s9134_s11  ;;  %p9137_p12 = scmp.lt.s32.totalorder %s9133_s2, %s9528_s14 }
  0x77   :  { %p9138_p13 = scmp.lt.s32.totalorder %s9136_s19, %s9134_s11 }
  0x79   :  { %p9139_p0 = por %p9138_p13, %p9137_p12 }
  0x7b   :  { %p9140_p1 = pnand %p9139_p0, %p9135_p11 }
  0x7d   :  { %9143 = shalt.err (!%p9140_p1)
}
  0x7e   :  { %122 = dma.hbm_to_vmem [thread:$0]  %s118_s7, 32, %s120_s22, [#allocation13]  }
  0x7f   :  { %s167_s21 = sshll.u32 %s9558_s20, 4  ;;  %s9459_s28 = smov [#allocation17]   ;;  %s168_s21 = int_to_ptr.hbm [resolvable:$true] %s167_s21 }
  0x80   :  { %s143_s15 = sshll.u32 %s9459_s28, 4  ;;  %s9156_s3 = sshra.s32 %s142_s0, 4  ;;  %s144_s15 = int_to_ptr.vmem [resolvable:$true] %s143_s15  ;;  %s9157_s3 = int_to_ptr.hbm [resolvable:$true] %s9156_s3 }
  0x81   :  { %s9158_s6 = scalar_lea.hbm %s9157_s3, 1  ;;  %s9160_s18 = scalar_lea.hbm %s9543_s30, 1 }
  0x82   :  { %p9159_p2 = scmp.ne.s32.totalorder %s9157_s3, %s9158_s6  ;;  %p9161_p3 = scmp.lt.s32.totalorder %s9157_s3, %s9543_s30 }
  0x83   :  { %p9162_p4 = scmp.lt.s32.totalorder %s9160_s18, %s9158_s6 }
  0x85   :  { %p9163_p5 = por %p9162_p4, %p9161_p3 }
  0x87   :  { %p9164_p6 = pnand %p9163_p5, %p9159_p2 }
  0x89   :  { %9167 = shalt.err (!%p9164_p6)
}
  0x8a   :  { %146 = dma.hbm_to_vmem [thread:$0]  %s142_s0, 16, %s144_s15, [#allocation16]  }
  0x8b   :  { %s9460_s14 = smov [#allocation20]   ;;  %s188_s10 = sshll.u32 %s9568_s4, 4  ;;  %s9673_s10 = int_to_ptr.hbm [resolvable:$true] %s188_s10 }
  0x8c   :  { %s169_s7 = sshll.u32 %s9460_s14, 4  ;;  %s9180_s16 = sshra.s32 %s168_s21, 4  ;;  %s170_s7 = int_to_ptr.vmem [resolvable:$true] %s169_s7  ;;  %s9181_s16 = int_to_ptr.hbm [resolvable:$true] %s9180_s16 }
  0x8d   :  { %s9182_s23 = scalar_lea.hbm %s9181_s16, 32  ;;  %s9184_s26 = scalar_lea.hbm %s9558_s20, 32 }
  0x8e   :  { %p9183_p7 = scmp.ne.s32.totalorder %s9181_s16, %s9182_s23  ;;  %p9185_p8 = scmp.lt.s32.totalorder %s9181_s16, %s9558_s20 }
  0x8f   :  { %p9186_p9 = scmp.lt.s32.totalorder %s9184_s26, %s9182_s23 }
  0x91   :  { %p9187_p10 = por %p9186_p9, %p9185_p8 }
  0x93   :  { %p9188_p11 = pnand %p9187_p10, %p9183_p7 }
  0x95   :  { %9191 = shalt.err (!%p9188_p11)
}
  0x96   :  { %172 = dma.hbm_to_vmem [thread:$0]  %s168_s21, 512, %s170_s7, [#allocation19]  }
  0x97   :  { %s9461_s30 = smov [#allocation23]   ;;  %s9204_s27 = sshra.s32 %s9673_s10, 4  ;;  %s9205_s27 = int_to_ptr.hbm [resolvable:$true] %s9204_s27 }
  0x98   :  { %s190_s1 = sshll.u32 %s9461_s30, 4  ;;  %s9206_s22 = scalar_lea.hbm %s9205_s27, 32  ;;  %s191_s1 = int_to_ptr.vmem [resolvable:$true] %s190_s1 }
  0x99   :  { %p9207_p12 = scmp.ne.s32.totalorder %s9205_s27, %s9206_s22  ;;  %s9208_s0 = scalar_lea.hbm %s9568_s4, 32 }
  0x9a   :  { %p9209_p13 = scmp.lt.s32.totalorder %s9205_s27, %s9568_s4  ;;  %p9210_p0 = scmp.lt.s32.totalorder %s9208_s0, %s9206_s22 }
  0x9c   :  { %p9211_p1 = por %p9210_p0, %p9209_p13 }
  0x9e   :  { %p9212_p2 = pnand %p9211_p1, %p9207_p12 }
  0xa0   :  { %9215 = shalt.err (!%p9212_p2)
}
  0xa1   :  { %s9462_s20 = smov 64   ;;  %s9463_s2 = smov 4  }
  0xa2   :  { %196 = dma.hbm_to_vmem [thread:$0]  %s9673_s10, 512, %s191_s1, [#allocation22], %s9462_s20, %s9462_s20, %s9463_s2  }
  0xa3   :  { %9396 = dma.done.wait [#allocation10], 16  }
  0xa4   :  { %9397 = vsyncadd [#allocation10], 4294967280 }
  0xa5   :  { %9398 = dma.done.wait [#allocation13], 4128  }
  0xa6   :  { %9399 = vsyncadd [#allocation13], 4294963168 }
  0xa7   :  { %9400 = dma.done.wait [#allocation16], 32  }
  0xa8   :  { %9401 = vsyncadd [#allocation16], 4294967264 }
  0xa9   :  { %9402 = dma.done.wait [#allocation19], 1536  }
  0xaa   :  { %9403 = vsyncadd [#allocation19], 4294965760 }
  0xab   :  { %9404 = dma.done.wait [#allocation22], 1024  }
  0xac   :  { %9405 = vsyncadd [#allocation22], 4294966272  ;;  %vm346_vm0 = vcmask 1041408   ;;  %v337_v0 = vld [vmem:[%s9498_s17] sm:$0x3]  ;;  %vm342_vm1 = vcmask 31744  }
  0xad   :  { %v331_v1 = vld [vmem:[%s9483_s5] sm:$0x3]  ;;  %v7599_v2 = vld [vmem:[%s9508_s25 + $0x70] sm:$0xf]  ;;  %v348_v3 = vsel %vm346_vm0, %v337_v0, 0  ;;  %s10799_s5 = sld [smem:[#allocation53_spill]] }
  0xae   :  { %v336_v4 = vpack.c.bf16 %v331_v1, %v331_v1  ;;  %v8679_v5 = vld [vmem:[%s9508_s25 + $0x74] sm:$0xf0]  ;;  %v8678_v6 = vld [vmem:[%s9508_s25 + $0x74] sm:$0xf]  ;;  %357 = vmatpush.bf16.msra.mxu0 %v348_v3  ;;  %v7601_v8 = vld [vmem:[%s9508_s25 + $0x78] sm:$0xf0] }
  0xaf   :  { %v7600_v7 = vor.u32 %v8679_v5, %v7599_v2  ;;  %v7591_v9 = vld [vmem:[%s9508_s25 + $0x60] sm:$0xf]  ;;  %v8677_v10 = vld [vmem:[%s9508_s25 + $0x64] sm:$0xf0]  ;;  %v7604_v11 = vor.u32 %v8678_v6, %v7601_v8  ;;  %v8676_v12 = vld [vmem:[%s9508_s25 + $0x64] sm:$0xf] }
  0xb0   :  { %v7593_v13 = vld [vmem:[%s9508_s25 + $0x68] sm:$0xf0]  ;;  %v7592_v14 = vor.u32 %v8677_v10, %v7591_v9  ;;  %v7583_v16 = vld [vmem:[%s9508_s25 + $0x50] sm:$0xf]  ;;  %v8675_v17 = vld [vmem:[%s9508_s25 + $0x54] sm:$0xf0] }
  0xb1   :  { %467 = vmatpush.bf16.msra.mxu1 %v7600_v7  ;;  %7540 = vmatmul.msk.bf16.vlgmr.msra.gmra.mxu0 %vm342_vm1, %v336_v4  ;;  %v7596_v15 = vor.u32 %v8676_v12, %v7593_v13  ;;  %v8674_v18 = vld [vmem:[%s9508_s25 + $0x54] sm:$0xf]  ;;  %v7585_v19 = vld [vmem:[%s9508_s25 + $0x58] sm:$0xf0]  ;;  %v7584_v20 = vor.u32 %v8675_v17, %v7583_v16  ;;  %v7575_v21 = vld [vmem:[%s9508_s25 + $0x40] sm:$0xf] }
  0xb2   :  { %480 = vmatpush.bf16.msra.mxu2 %v7604_v11  ;;  %v7588_v22 = vor.u32 %v8674_v18, %v7585_v19  ;;  %v8673_v23 = vld [vmem:[%s9508_s25 + $0x44] sm:$0xf0]  ;;  %v8672_v24 = vld [vmem:[%s9508_s25 + $0x44] sm:$0xf]  ;;  %v7577_v25 = vld [vmem:[%s9508_s25 + $0x48] sm:$0xf0] }
  0xb3   :  { %v7576_v26 = vor.u32 %v8673_v23, %v7575_v21  ;;  %v7580_v27 = vor.u32 %v8672_v24, %v7577_v25  ;;  %v7567_v28 = vld [vmem:[%s9508_s25 + $0x30] sm:$0xf]  ;;  %v8671_v29 = vld [vmem:[%s9508_s25 + $0x34] sm:$0xf0]  ;;  %v8670_v30 = vld [vmem:[%s9508_s25 + $0x34] sm:$0xf] }
  0xb4   :  { %v7569_v31 = vld [vmem:[%s9508_s25 + $0x38] sm:$0xf0]  ;;  %v7568_v32 = vor.u32 %v8671_v29, %v7567_v28  ;;  %v7559_v34 = vld [vmem:[%s9508_s25 + $0x20] sm:$0xf]  ;;  %v8669_v35 = vld [vmem:[%s9508_s25 + $0x24] sm:$0xf0] }
  0xb5   :  { %468 = vmatpush.bf16.msra.mxu1 %v7592_v14  ;;  %v7572_v33 = vor.u32 %v8670_v30, %v7569_v31  ;;  %v8668_v36 = vld [vmem:[%s9508_s25 + $0x24] sm:$0xf]  ;;  %v7561_v37 = vld [vmem:[%s9508_s25 + $0x28] sm:$0xf0]  ;;  %v7560_v38 = vor.u32 %v8669_v35, %v7559_v34  ;;  %v7551_v40 = vld [vmem:[%s9508_s25 + $0x10] sm:$0xf] }
  0xb6   :  { %481 = vmatpush.bf16.msra.mxu2 %v7596_v15  ;;  %v7564_v39 = vor.u32 %v8668_v36, %v7561_v37  ;;  %v8667_v41 = vld [vmem:[%s9508_s25 + $0x14] sm:$0xf0]  ;;  %v8666_v42 = vld [vmem:[%s9508_s25 + $0x14] sm:$0xf]  ;;  %v7553_v44 = vld [vmem:[%s9508_s25 + $0x18] sm:$0xf0] }
  0xb7   :  { %v7552_v43 = vor.u32 %v8667_v41, %v7551_v40  ;;  %v7556_v45 = vor.u32 %v8666_v42, %v7553_v44  ;;  %v7543_v46 = vld [vmem:[%s9508_s25] sm:$0xf]  ;;  %v8665_v47 = vld [vmem:[%s9508_s25 + $0x4] sm:$0xf0]  ;;  %v8664_v48 = vld [vmem:[%s9508_s25 + $0x4] sm:$0xf] }
  0xb8   :  { %v7544_v49 = vor.u32 %v8665_v47, %v7543_v46  ;;  %v7545_v50 = vld [vmem:[%s9508_s25 + $0x8] sm:$0xf0]  ;;  %v7663_v52 = vld [vmem:[#allocation12 + $0x70] sm:$0xf]  ;;  %v8695_v53 = vld [vmem:[#allocation12 + $0x74] sm:$0xf0] }
  0xb9   :  { %469 = vmatpush.bf16.msra.mxu1 %v7584_v20  ;;  %v7548_v51 = vor.u32 %v8664_v48, %v7545_v50  ;;  %v8694_v54 = vld [vmem:[#allocation12 + $0x74] sm:$0xf]  ;;  %v7664_v55 = vor.u32 %v8695_v53, %v7663_v52  ;;  %v7665_v56 = vld [vmem:[#allocation12 + $0x78] sm:$0xf0]  ;;  %v7655_v57 = vld [vmem:[#allocation12 + $0x60] sm:$0xf] }
  0xba   :  { %482 = vmatpush.bf16.msra.mxu2 %v7588_v22  ;;  %v8693_v58 = vld [vmem:[#allocation12 + $0x64] sm:$0xf0]  ;;  %v7668_v59 = vor.u32 %v8694_v54, %v7665_v56  ;;  %v8692_v60 = vld [vmem:[#allocation12 + $0x64] sm:$0xf]  ;;  %v7657_v61 = vld [vmem:[#allocation12 + $0x68] sm:$0xf0] }
  0xbb   :  { %v7727_v62 = vld [vmem:[#allocation12 + $0xf0] sm:$0xf]  ;;  %695 = vmatpush.bf16.msra.mxu3 %v7664_v55  ;;  %v7656_v63 = vor.u32 %v8693_v58, %v7655_v57  ;;  %v8711_v0 = vld [vmem:[#allocation12 + $0xf4] sm:$0xf0]  ;;  %v8710_v1 = vld [vmem:[#allocation12 + $0xf4] sm:$0xf]  ;;  %v7660_v3 = vor.u32 %v8692_v60, %v7657_v61 }
  0xbc   :  { %v7729_v2 = vld [vmem:[#allocation12 + $0xf8] sm:$0xf0]  ;;  %v7728_v4 = vor.u32 %v8711_v0, %v7727_v62  ;;  %v7647_v6 = vld [vmem:[#allocation12 + $0x50] sm:$0xf]  ;;  %v8691_v7 = vld [vmem:[#allocation12 + $0x54] sm:$0xf0] }
  0xbd   :  { %470 = vmatpush.bf16.msra.mxu1 %v7576_v26  ;;  %v7732_v5 = vor.u32 %v8710_v1, %v7729_v2  ;;  %v8690_v8 = vld [vmem:[#allocation12 + $0x54] sm:$0xf]  ;;  %v7649_v9 = vld [vmem:[#allocation12 + $0x58] sm:$0xf0]  ;;  %v7719_v10 = vld [vmem:[#allocation12 + $0xe0] sm:$0xf]  ;;  %v7648_v15 = vor.u32 %v8691_v7, %v7647_v6 }
  0xbe   :  { %483 = vmatpush.bf16.msra.mxu2 %v7580_v27  ;;  %v8709_v11 = vld [vmem:[#allocation12 + $0xe4] sm:$0xf0]  ;;  %708 = vmatpush.bf16.msrb.mxu0 %v7728_v4  ;;  %v8708_v13 = vld [vmem:[#allocation12 + $0xe4] sm:$0xf]  ;;  %v7721_v14 = vld [vmem:[#allocation12 + $0xe8] sm:$0xf0]  ;;  %v7652_v19 = vor.u32 %v8690_v8, %v7649_v9 }
  0xbf   :  { %v7720_v12 = vor.u32 %v8709_v11, %v7719_v10  ;;  %696 = vmatpush.bf16.msra.mxu3 %v7656_v63  ;;  %v7724_v16 = vor.u32 %v8708_v13, %v7721_v14  ;;  %v7639_v17 = vld [vmem:[#allocation12 + $0x40] sm:$0xf]  ;;  %v8689_v18 = vld [vmem:[#allocation12 + $0x44] sm:$0xf0]  ;;  %v7711_v20 = vld [vmem:[#allocation12 + $0xd0] sm:$0xf] }
  0xc0   :  { %v8707_v21 = vld [vmem:[#allocation12 + $0xd4] sm:$0xf0]  ;;  %v8706_v22 = vld [vmem:[#allocation12 + $0xd4] sm:$0xf]  ;;  %v8688_v23 = vld [vmem:[#allocation12 + $0x44] sm:$0xf]  ;;  %v7640_v29 = vor.u32 %v8689_v18, %v7639_v17 }
  0xc1   :  { %471 = vmatpush.bf16.msra.mxu1 %v7568_v32  ;;  %v7641_v24 = vld [vmem:[#allocation12 + $0x48] sm:$0xf0]  ;;  %v7713_v25 = vld [vmem:[#allocation12 + $0xd8] sm:$0xf0]  ;;  %v7712_v26 = vor.u32 %v8707_v21, %v7711_v20  ;;  %v7703_v28 = vld [vmem:[#allocation12 + $0xc0] sm:$0xf] }
  0xc2   :  { %484 = vmatpush.bf16.msra.mxu2 %v7572_v33  ;;  %709 = vmatpush.bf16.msrb.mxu0 %v7720_v12  ;;  %v7716_v27 = vor.u32 %v8706_v22, %v7713_v25  ;;  %v8705_v30 = vld [vmem:[#allocation12 + $0xc4] sm:$0xf0]  ;;  %v8704_v31 = vld [vmem:[#allocation12 + $0xc4] sm:$0xf]  ;;  %v7705_v32 = vld [vmem:[#allocation12 + $0xc8] sm:$0xf0]  ;;  %v7644_v33 = vor.u32 %v8688_v23, %v7641_v24 }
  0xc3   :  { %697 = vmatpush.bf16.msra.mxu3 %v7648_v15  ;;  %v7631_v34 = vld [vmem:[#allocation12 + $0x30] sm:$0xf]  ;;  %v8687_v35 = vld [vmem:[#allocation12 + $0x34] sm:$0xf0]  ;;  %v8686_v36 = vld [vmem:[#allocation12 + $0x34] sm:$0xf] }
  0xc4   :  { %v7633_v37 = vld [vmem:[#allocation12 + $0x38] sm:$0xf0]  ;;  %v7695_v40 = vld [vmem:[#allocation12 + $0xb0] sm:$0xf]  ;;  %v7632_v41 = vor.u32 %v8687_v35, %v7631_v34  ;;  %v8703_v42 = vld [vmem:[#allocation12 + $0xb4] sm:$0xf0] }
  0xc5   :  { %472 = vmatpush.bf16.msra.mxu1 %v7560_v38  ;;  %v7704_v38 = vor.u32 %v8705_v30, %v7703_v28  ;;  %v7697_v44 = vld [vmem:[#allocation12 + $0xb8] sm:$0xf0]  ;;  %v7623_v46 = vld [vmem:[#allocation12 + $0x20] sm:$0xf]  ;;  %v8685_v47 = vld [vmem:[#allocation12 + $0x24] sm:$0xf0]  ;;  %v7696_v50 = vor.u32 %v8703_v42, %v7695_v40 }
  0xc6   :  { %485 = vmatpush.bf16.msra.mxu2 %v7564_v39  ;;  %710 = vmatpush.bf16.msrb.mxu0 %v7712_v26  ;;  %v7708_v39 = vor.u32 %v8704_v31, %v7705_v32  ;;  %v8684_v48 = vld [vmem:[#allocation12 + $0x24] sm:$0xf]  ;;  %v7624_v52 = vor.u32 %v8685_v47, %v7623_v46  ;;  %v8991_v54 = vld [vmem:[#allocation9] ss:$0 sm:$0xff]  ;;  %v7615_v60 = vld [vmem:[#allocation12 + $0x10] sm:$0xf] }
  0xc7   :  { %698 = vmatpush.bf16.msra.mxu3 %v7640_v29  ;;  %v8683_v61 = vld [vmem:[#allocation12 + $0x14] sm:$0xf0]  ;;  %v8682_v62 = vld [vmem:[#allocation12 + $0x14] sm:$0xf]  ;;  %v7617_v0 = vld [vmem:[#allocation12 + $0x18] sm:$0xf0] }
  0xc8   :  { %v7616_v63 = vor.u32 %v8683_v61, %v7615_v60  ;;  %v7620_v1 = vor.u32 %v8682_v62, %v7617_v0  ;;  %v7687_v2 = vld [vmem:[#allocation12 + $0xa0] sm:$0xf]  ;;  %v8700_v4 = vld [vmem:[#allocation12 + $0xa4] sm:$0xf]  ;;  %v7689_v6 = vld [vmem:[#allocation12 + $0xa8] sm:$0xf0] }
  0xc9   :  { %473 = vmatpush.bf16.msra.mxu1 %v7552_v43  ;;  %v8702_v43 = vld [vmem:[#allocation12 + $0xb4] sm:$0xf]  ;;  %v7692_v7 = vor.u32 %v8700_v4, %v7689_v6  ;;  %v7607_v8 = vld [vmem:[#allocation12] sm:$0xf]  ;;  %v8681_v9 = vld [vmem:[#allocation12 + $0x4] sm:$0xf0] }
  0xca   :  { %486 = vmatpush.bf16.msra.mxu2 %v7556_v45  ;;  %v7636_v45 = vor.u32 %v8686_v36, %v7633_v37  ;;  %711 = vmatpush.bf16.msrb.mxu0 %v7704_v38  ;;  %v8680_v10 = vld [vmem:[#allocation12 + $0x4] sm:$0xf]  ;;  %v7608_v11 = vor.u32 %v8681_v9, %v7607_v8  ;;  %v7609_v12 = vld [vmem:[#allocation12 + $0x8] sm:$0xf0]  ;;  %v7679_v14 = vld [vmem:[#allocation12 + $0x90] sm:$0xf] }
  0xcb   :  { %699 = vmatpush.bf16.msra.mxu3 %v7632_v41  ;;  %v7612_v13 = vor.u32 %v8680_v10, %v7609_v12  ;;  %v8699_v15 = vld [vmem:[#allocation12 + $0x94] sm:$0xf0]  ;;  %v8698_v17 = vld [vmem:[#allocation12 + $0x94] sm:$0xf]  ;;  %v7681_v18 = vld [vmem:[#allocation12 + $0x98] sm:$0xf0] }
  0xcc   :  { %v7671_v20 = vld [vmem:[#allocation12 + $0x80] sm:$0xf]  ;;  %v8697_v21 = vld [vmem:[#allocation12 + $0x84] sm:$0xf0]  ;;  %v8696_v22 = vld [vmem:[#allocation12 + $0x84] sm:$0xf] }
  0xcd   :  { %474 = vmatpush.bf16.msra.mxu1 %v7544_v49  ;;  %v7625_v49 = vld [vmem:[#allocation12 + $0x28] sm:$0xf0]  ;;  %v7672_v23 = vor.u32 %v8697_v21, %v7671_v20  ;;  %v751_v26 = vld [vmem:[#allocation14] sm:$0x3]  ;;  %v381_v28 = vld [vmem:[%s9513_s29] sm:$0x3] }
  0xce   :  { %487 = vmatpush.bf16.msra.mxu2 %v7548_v51  ;;  %v7700_v51 = vor.u32 %v8702_v43, %v7697_v44  ;;  %v7628_v53 = vor.u32 %v8684_v48, %v7625_v49  ;;  %712 = vmatpush.bf16.msrb.mxu0 %v7696_v50  ;;  %v7673_v24 = vld [vmem:[#allocation12 + $0x88] sm:$0xf0]  ;;  %v383_v29 = vperm.slane %v381_v28, 0  ;;  %v332_v41 = vld [vmem:[%s9488_s9] sm:$0xff]  ;;  %s10800_s17 = sld [smem:[#allocation52_spill]]  ;;  %v8715_v47 = vld [vmem:[%s10799_s5 + $0x18] sm:$0xff] }
  0xcf   :  { %700 = vmatpush.bf16.msra.mxu3 %v7624_v52  ;;  %v7676_v25 = vor.u32 %v8696_v22, %v7673_v24  ;;  %v333_v42 = vld [vmem:[%s9488_s9 + $0x8] sm:$0xff]  ;;  %v334_v44 = vld [vmem:[%s9488_s9 + $0x10] sm:$0xff]  ;;  %v8722_v4 = vld [vmem:[#allocation18 + $0x34] sm:$0xf]  ;;  %vm826_vm2 = vcmask 523264   ;;  %s9464_s29 = smov [#allocation2]  }
  0xd0   :  { %v749_v43 = vpack.c.bf16 %v333_v42, %v332_v41  ;;  %v8714_v48 = vld [vmem:[%s10799_s5 + $0x10] sm:$0xff]  ;;  %v8713_v49 = vld [vmem:[%s10799_s5 + $0x8] sm:$0xff]  ;;  %v8992_v8 = vld [vmem:[#allocation15] ss:$0 sm:$0xff]  ;;  %s257_s4 = sshll.u32 %s9464_s29, 4  ;;  %s258_s4 = int_to_ptr.vmem [resolvable:$true] %s257_s4 }
  0xd1   :  { %721 = vmatpush.bf16.msrb.mxu1 %v7668_v59  ;;  %v7779_v22 = vld [vmem:[#allocation18 + $0x30] sm:$0xf]  ;;  %v8717_v41 = vld [vmem:[#allocation18 + $0x4] sm:$0xf0] }
  0xd2   :  { %734 = vmatpush.bf16.msrb.mxu2 %v7732_v5 }
  0xd3   :  { %701 = vmatpush.bf16.msra.mxu3 %v7616_v63 }
  0xd4   :  { %v529_v52 = vld [vmem:[%s10800_s17] sm:$0x3] }
  0xd5   :  { %722 = vmatpush.bf16.msrb.mxu1 %v7660_v3  ;;  %v8701_v3 = vld [vmem:[#allocation12 + $0xa4] sm:$0xf0] }
  0xd6   :  { %735 = vmatpush.bf16.msrb.mxu2 %v7724_v16  ;;  %v7688_v5 = vor.u32 %v8701_v3, %v7687_v2  ;;  %v7680_v16 = vor.u32 %v8699_v15, %v7679_v14 }
  0xd7   :  { %702 = vmatpush.bf16.msra.mxu3 %v7608_v11 }
  0xd8   :  { %713 = vmatpush.bf16.msrb.mxu0 %v7688_v5  ;;  %v7781_v5 = vld [vmem:[#allocation18 + $0x38] sm:$0xf0] }
  0xd9   :  { %723 = vmatpush.bf16.msrb.mxu1 %v7652_v19  ;;  %v7684_v19 = vor.u32 %v8698_v17, %v7681_v18 }
  0xda   :  { %736 = vmatpush.bf16.msrb.mxu2 %v7716_v27  ;;  %v759_v27 = vsel %vm346_vm0, %v751_v26, 0  ;;  %v7773_v26 = vld [vmem:[#allocation18 + $0x28] sm:$0xf0] }
  0xdb   :  { %768 = vmatpush.bf16.msrb.mxu3 %v759_v27  ;;  %v7771_v27 = vld [vmem:[#allocation18 + $0x20] sm:$0xf] }
  0xdc   :  { %714 = vmatpush.bf16.msrb.mxu0 %v7680_v16 }
  0xdd   :  { %724 = vmatpush.bf16.msrb.mxu1 %v7644_v33  ;;  %v384_v33 = vperm.slane %v381_v28, 1 }
  0xde   :  { %737 = vmatpush.bf16.msrb.mxu2 %v7708_v39 }
  0xe0   :  { %715 = vmatpush.bf16.msrb.mxu0 %v7672_v23  ;;  %v8723_v23 = vld [vmem:[#allocation18 + $0x34] sm:$0xf0] }
  0xe1   :  { %725 = vmatpush.bf16.msrb.mxu1 %v7636_v45  ;;  %v335_v45 = vld [vmem:[%s9488_s9 + $0x18] sm:$0xff]  ;;  %v7780_v24 = vor.u32 %v8723_v23, %v7779_v22  ;;  %s10802_s9 = sld [smem:[#allocation62_spill]] }
  0xe2   :  { %738 = vmatpush.bf16.msrb.mxu2 %v7700_v51  ;;  %v750_v46 = vpack.c.bf16 %v335_v45, %v334_v44  ;;  %v8712_v51 = vld [vmem:[%s10799_s5] sm:$0xff] }
  0xe3   :  { %v8993_v44 = vld [vmem:[#allocation17] ss:$0 sm:$0xff] }
  0xe4   :  { %837 = vmatpush.bf16.msra.mxu0 %v8715_v47 }
  0xe5   :  { %726 = vmatpush.bf16.msrb.mxu1 %v7628_v53  ;;  %v531_v53 = vperm.slane %v529_v52, 0 }
  0xe6   :  { %739 = vmatpush.bf16.msrb.mxu2 %v7692_v7  ;;  %v7784_v7 = vor.u32 %v8722_v4, %v7781_v5 }
  0xe7   :  { %s255_s25 = sshll.u32 %s10802_s9, 4  ;;  %s9232_s21 = scalar_lea.hbm %s10802_s9, 2048  ;;  %s256_s25 = int_to_ptr.hbm [resolvable:$true] %s255_s25 }
  0xe8   :  { %838 = vmatpush.bf16.msra.mxu0 %v8714_v48  ;;  %s9228_s11 = sshra.s32 %s256_s25, 4  ;;  %s9229_s11 = int_to_ptr.hbm [resolvable:$true] %s9228_s11 }
  0xe9   :  { %727 = vmatpush.bf16.msrb.mxu1 %v7620_v1  ;;  %s9230_s19 = scalar_lea.hbm %s9229_s11, 2048  ;;  %p9233_p4 = scmp.lt.s32.totalorder %s9229_s11, %s10802_s9 }
  0xea   :  { %740 = vmatpush.bf16.msrb.mxu2 %v7684_v19  ;;  %p9231_p3 = scmp.ne.s32.totalorder %s9229_s11, %s9230_s19  ;;  %p9234_p5 = scmp.lt.s32.totalorder %s9232_s21, %s9230_s19 }
  0xec   :  { %839 = vmatpush.bf16.msra.mxu0 %v8713_v49  ;;  %p9235_p6 = por %p9234_p5, %p9233_p4 }
  0xed   :  { %728 = vmatpush.bf16.msrb.mxu1 %v7612_v13 }
  0xee   :  { %741 = vmatpush.bf16.msrb.mxu2 %v7676_v25  ;;  %v8720_v25 = vld [vmem:[#allocation18 + $0x24] sm:$0xf]  ;;  %p9236_p7 = pnand %p9235_p6, %p9231_p3 }
  0xef   :  { %v7776_v28 = vor.u32 %v8720_v25, %v7773_v26 }
  0xf0   :  { %840 = vmatpush.bf16.msra.mxu0 %v8712_v51 }
 0x12e   :  { %v359_v55 = vpop.f32.mrf.mxu0 }
 0x12f   :  { %v360_v56 = vadd.f32 %v8991_v54, %v359_v55 }
 0x131   :  { %v363_v57 = vmax.f32 %v360_v56, 0.0  ;;  %v532_v56 = vperm.slane %v529_v52, 1 }
 0x133   :  { %v364_v58 = vpack.c.bf16 %v363_v57, %v363_v57 }
 0x135   :  { %475 = vmatmul.bf16.vlgmr.msra.gmra.mxu1 %v364_v58  ;;  %488 = vmatmul.bf16.vlgmr.msra.gmra.mxu2 %v364_v58 }
 0x136   :  { %v361_v59 = vpop.f32.mrf.mxu0  ;;  %943 = vmatpush.bf16.msra.mxu2 %v7784_v7  ;;  %924 = vmatpush.bf16.msra.mxu1 %v7780_v24 }
 0x13a   :  { %944 = vmatpush.bf16.msra.mxu2 %v7776_v28 }
 0x1b2   :  { %v476_v30 = vpop.f32.mrf.mxu1 }
 0x1b3   :  { %v477_v31 = vadd.f32 %v476_v30, %v383_v29  ;;  %v8721_v29 = vld [vmem:[#allocation18 + $0x24] sm:$0xf0] }
 0x1b4   :  { %v7772_v30 = vor.u32 %v8721_v29, %v7771_v27 }
 0x1b5   :  { %v493_v32 = vmax.f32 %v477_v31, 0.0  ;;  %v8718_v31 = vld [vmem:[#allocation18 + $0x14] sm:$0xf] }
 0x1b6   :  { %925 = vmatpush.bf16.msra.mxu1 %v7772_v30 }
 0x1b7   :  { %v495_v34 = vpack.c.bf16 %v493_v32, %v493_v32  ;;  %v7765_v32 = vld [vmem:[#allocation18 + $0x18] sm:$0xf0] }
 0x1b8   :  { %v489_v35 = vpop.f32.mrf.mxu2 }
 0x1b9   :  { %v490_v36 = vadd.f32 %v489_v35, %v384_v33  ;;  %703 = vmatmul.bf16.vlgmr.msra.gmra.mxu3 %v495_v34  ;;  %729 = vmatmul.bf16.vlgmr.msrb.gmra.mxu1 %v495_v34  ;;  %v7768_v33 = vor.u32 %v8718_v31, %v7765_v32  ;;  %v7763_v34 = vld [vmem:[#allocation18 + $0x10] sm:$0xf]  ;;  %v8719_v35 = vld [vmem:[#allocation18 + $0x14] sm:$0xf0] }
 0x1ba   :  { %v478_v37 = vpop.f32.mrf.mxu1 }
 0x1bb   :  { %v494_v38 = vmax.f32 %v490_v36, 0.0  ;;  %v7764_v36 = vor.u32 %v8719_v35, %v7763_v34  ;;  %945 = vmatpush.bf16.msra.mxu2 %v7768_v33  ;;  %v8716_v37 = vld [vmem:[#allocation18 + $0x4] sm:$0xf] }
 0x1bd   :  { %v496_v39 = vpack.c.bf16 %v494_v38, %v494_v38  ;;  %926 = vmatpush.bf16.msra.mxu1 %v7764_v36  ;;  %v7757_v38 = vld [vmem:[#allocation18 + $0x8] sm:$0xf0] }
 0x1bf   :  { %716 = vmatmul.bf16.vlgmr.msrb.gmra.mxu0 %v496_v39  ;;  %742 = vmatmul.bf16.vlgmr.msrb.gmra.mxu2 %v496_v39  ;;  %v7755_v39 = vld [vmem:[#allocation18] sm:$0xf] }
 0x1c0   :  { %v491_v40 = vpop.f32.mrf.mxu2  ;;  %v7756_v42 = vor.u32 %v8717_v41, %v7755_v39 }
 0x1c1   :  { %v7760_v40 = vor.u32 %v8716_v37, %v7757_v38 }
 0x1c2   :  { %927 = vmatpush.bf16.msra.mxu1 %v7756_v42 }
 0x1c3   :  { %946 = vmatpush.bf16.msra.mxu2 %v7760_v40 }
 0x1c9   :  { %7733 = vmatmul.msk.bf16.vlgmr.msrb.gmra.mxu3 %vm342_vm1, %v749_v43 }
 0x1d9   :  { %7734 = vmatmul.msk.bf16.gmra.mxu3 %vm342_vm1, %v750_v46 }
 0x236   :  { %v730_v50 = vpop.f32.mrf.mxu1 }
 0x237   :  { %v731_v60 = vadd.f32 %v730_v50, %v532_v56 }
 0x23c   :  { %v704_v54 = vpop.f32.mrf.mxu3  ;;  %v717_v55 = vpop.f32.mrf.mxu0 }
 0x23d   :  { %v705_v57 = vadd.f32 %v704_v54, %v531_v53 }
 0x23e   :  { %v732_v58 = vpop.f32.mrf.mxu1 }
 0x23f   :  { %v9732_v59 = vadd.f32 %v717_v55, %v705_v57 }
 0x242   :  { %v743_v62 = vpop.f32.mrf.mxu2 }
 0x243   :  { %v9735_v63 = vadd.f32 %v743_v62, %v731_v60 }
 0x244   :  { %v706_v0 = vpop.f32.mrf.mxu3  ;;  %v719_v1 = vpop.f32.mrf.mxu0 }
 0x245   :  { %10801 = vst [vmem:[#allocation65_spill] sm:$0xff] %v9735_v63 }
 0x24a   :  { %v745_v3 = vpop.f32.mrf.mxu2 }
 0x24c   :  { %v770_v6 = vpop.f32.mrf.mxu3 }
 0x24d   :  { %v784_v9 = vadd.f32 %v8992_v8, %v770_v6 }
 0x24f   :  { %v9738_v12 = vmax.f32 %v784_v9, 0.0 }
 0x254   :  { %v772_v10 = vpop.f32.mrf.mxu3 }
 0x255   :  { %v785_v11 = vadd.f32 %v8992_v8, %v772_v10 }
 0x257   :  { %v9740_v13 = vmax.f32 %v785_v11, 0.0 }
 0x259   :  { %v792_v14 = vpack.c.bf16 %v9740_v13, %v9738_v12 }
 0x25b   :  { %7751 = vmatmul.msk.bf16.vlgmr.msra.gmra.mxu0 %vm826_vm2, %v792_v14 }
 0x25c   :  { %v775_v15 = vpop.f32.mrf.mxu3 }
 0x25d   :  { %v786_v16 = vadd.f32 %v8992_v8, %v775_v15 }
 0x25f   :  { %v9745_v19 = vmax.f32 %v786_v16, 0.0 }
 0x264   :  { %v777_v17 = vpop.f32.mrf.mxu3 }
 0x265   :  { %v787_v18 = vadd.f32 %v8992_v8, %v777_v17 }
 0x267   :  { %v9747_v20 = vmax.f32 %v787_v18, 0.0 }
 0x269   :  { %v793_v21 = vpack.c.bf16 %v9747_v20, %v9745_v19 }
 0x26b   :  { %7752 = vmatmul.msk.bf16.gmra.mxu0 %vm826_vm2, %v793_v21 }
 0x2d8   :  { %v842_v43 = vpop.f32.mrf.mxu0 }
 0x2d9   :  { %v856_v45 = vadd.f32 %v8993_v44, %v842_v43 }
 0x2db   :  { %v860_v48 = vmax.f32 %v856_v45, 0.0 }
 0x2e0   :  { %v844_v46 = vpop.f32.mrf.mxu0 }
 0x2e1   :  { %v857_v47 = vadd.f32 %v8993_v44, %v844_v46 }
 0x2e3   :  { %v861_v49 = vmax.f32 %v857_v47, 0.0 }
 0x2e5   :  { %v864_v50 = vpack.c.bf16 %v861_v49, %v860_v48 }
 0x2e7   :  { %7785 = vmatmul.msk.bf16.vlgmr.msra.gmra.mxu1 %vm826_vm2, %v864_v50  ;;  %7787 = vmatmul.msk.bf16.vlgmr.msra.gmra.mxu2 %vm826_vm2, %v864_v50 }
 0x2e8   :  { %v847_v51 = vpop.f32.mrf.mxu0 }
 0x2e9   :  { %v858_v52 = vadd.f32 %v8993_v44, %v847_v51 }
 0x2eb   :  { %v862_v55 = vmax.f32 %v858_v52, 0.0 }
 0x2f0   :  { %v849_v53 = vpop.f32.mrf.mxu0 }
 0x2f1   :  { %v859_v54 = vadd.f32 %v8993_v44, %v849_v53 }
 0x2f3   :  { %v863_v56 = vmax.f32 %v859_v54, 0.0 }
 0x2f5   :  { %v865_v57 = vpack.c.bf16 %v863_v56, %v862_v55 }
 0x2f7   :  { %7786 = vmatmul.msk.bf16.gmra.mxu1 %vm826_vm2, %v865_v57  ;;  %7788 = vmatmul.msk.bf16.gmra.mxu2 %vm826_vm2, %v865_v57 }
 0x2f8   :  { %9239 = shalt.err (!%p9236_p7)  }
 0x2f9   :  { %260 = dma.hbm_to_vmem [thread:$0]  %s256_s25, 32768, %s258_s4, [#allocation8] }
 0x2fa   :  { %s10803_s28 = sld [smem:[#allocation63_spill]]  ;;  %s9465_s6 = smov [#allocation3]  }
 0x2fb   :  { %s10804_s15 = sld [smem:[#allocation64_spill]]  ;;  %s271_s18 = sshll.u32 %s9465_s6, 4  ;;  %s272_s18 = int_to_ptr.vmem [resolvable:$true] %s271_s18 }
 0x300   :  { %s269_s3 = sshll.u32 %s10803_s28, 4  ;;  %s9256_s16 = scalar_lea.hbm %s10803_s28, 256  ;;  %s270_s3 = int_to_ptr.hbm [resolvable:$true] %s269_s3 }
 0x301   :  { %s283_s14 = sshll.u32 %s10804_s15, 4  ;;  %s9252_s7 = sshra.s32 %s270_s3, 4  ;;  %s9253_s7 = int_to_ptr.hbm [resolvable:$true] %s9252_s7  ;;  %s284_s14 = int_to_ptr.hbm [resolvable:$true] %s283_s14 }
 0x302   :  { %s9254_s10 = scalar_lea.hbm %s9253_s7, 256  ;;  %p9257_p9 = scmp.lt.s32.totalorder %s9253_s7, %s10803_s28 }
 0x303   :  { %p9255_p8 = scmp.ne.s32.totalorder %s9253_s7, %s9254_s10  ;;  %p9258_p10 = scmp.lt.s32.totalorder %s9256_s16, %s9254_s10 }
 0x305   :  { %p9259_p11 = por %p9258_p10, %p9257_p9 }
 0x307   :  { %p9260_p12 = pnand %p9259_p11, %p9255_p8 }
 0x309   :  { %9263 = shalt.err (!%p9260_p12)  }
 0x30a   :  { %274 = dma.hbm_to_vmem [thread:$0]  %s270_s3, 4096, %s272_s18, [#allocation8 + $0x1] }
 0x30b   :  { %s9466_s23 = smov [#allocation4]   ;;  %s297_s30 = sshll.u32 %s9623_s8, 4  ;;  %s298_s30 = int_to_ptr.hbm [resolvable:$true] %s297_s30 }
 0x30c   :  { %s285_s26 = sshll.u32 %s9466_s23, 4  ;;  %s9276_s1 = sshra.s32 %s284_s14, 4  ;;  %s286_s26 = int_to_ptr.vmem [resolvable:$true] %s285_s26  ;;  %s9277_s1 = int_to_ptr.hbm [resolvable:$true] %s9276_s1 }
 0x30d   :  { %s9278_s27 = scalar_lea.hbm %s9277_s1, 512  ;;  %s9280_s22 = scalar_lea.hbm %s10804_s15, 512 }
 0x30e   :  { %p9279_p13 = scmp.ne.s32.totalorder %s9277_s1, %s9278_s27  ;;  %p9281_p0 = scmp.lt.s32.totalorder %s9277_s1, %s10804_s15 }
 0x30f   :  { %p9282_p1 = scmp.lt.s32.totalorder %s9280_s22, %s9278_s27 }
 0x311   :  { %p9283_p2 = por %p9282_p1, %p9281_p0 }
 0x313   :  { %p9284_p3 = pnand %p9283_p2, %p9279_p13 }
 0x315   :  { %9287 = shalt.err (!%p9284_p3)  }
 0x316   :  { %288 = dma.hbm_to_vmem [thread:$0]  %s284_s14, 8192, %s286_s26, [#allocation8 + $0x2] }
 0x317   :  { %s311_s0 = sshll.u32 %s9628_s24, 4  ;;  %s9467_s2 = smov [#allocation5]   ;;  %s312_s0 = int_to_ptr.hbm [resolvable:$true] %s311_s0 }
 0x318   :  { %s299_s5 = sshll.u32 %s9467_s2, 4  ;;  %s9300_s17 = sshra.s32 %s298_s30, 4  ;;  %s300_s5 = int_to_ptr.vmem [resolvable:$true] %s299_s5  ;;  %s9301_s17 = int_to_ptr.hbm [resolvable:$true] %s9300_s17 }
 0x319   :  { %s9302_s9 = scalar_lea.hbm %s9301_s17, 256  ;;  %s9304_s25 = scalar_lea.hbm %s9623_s8, 256 }
 0x31a   :  { %p9303_p4 = scmp.ne.s32.totalorder %s9301_s17, %s9302_s9  ;;  %p9305_p5 = scmp.lt.s32.totalorder %s9301_s17, %s9623_s8 }
 0x31b   :  { %p9306_p6 = scmp.lt.s32.totalorder %s9304_s25, %s9302_s9 }
 0x31d   :  { %p9307_p7 = por %p9306_p6, %p9305_p5 }
 0x31f   :  { %p9308_p8 = pnand %p9307_p7, %p9303_p4 }
 0x321   :  { %9311 = shalt.err (!%p9308_p8)  }
 0x322   :  { %302 = dma.hbm_to_vmem [thread:$0]  %s298_s30, 4096, %s300_s5, [#allocation8 + $0x3] }
 0x323   :  { %s9468_s29 = smov [#allocation6]   ;;  %s325_s11 = sshll.u32 %s9633_s13, 4  ;;  %s326_s11 = int_to_ptr.hbm [resolvable:$true] %s325_s11 }
 0x324   :  { %s313_s4 = sshll.u32 %s9468_s29, 4  ;;  %s9324_s19 = sshra.s32 %s312_s0, 4  ;;  %s314_s4 = int_to_ptr.vmem [resolvable:$true] %s313_s4  ;;  %s9325_s19 = int_to_ptr.hbm [resolvable:$true] %s9324_s19 }
 0x325   :  { %s9326_s21 = scalar_lea.hbm %s9325_s19, 256  ;;  %s9328_s28 = scalar_lea.hbm %s9628_s24, 256 }
 0x326   :  { %p9327_p9 = scmp.ne.s32.totalorder %s9325_s19, %s9326_s21  ;;  %p9329_p10 = scmp.lt.s32.totalorder %s9325_s19, %s9628_s24 }
 0x327   :  { %p9330_p11 = scmp.lt.s32.totalorder %s9328_s28, %s9326_s21 }
 0x329   :  { %p9331_p12 = por %p9330_p11, %p9329_p10 }
 0x32b   :  { %p9332_p13 = pnand %p9331_p12, %p9327_p9 }
 0x32d   :  { %9335 = shalt.err (!%p9332_p13)  }
 0x32e   :  { %316 = dma.hbm_to_vmem [thread:$0]  %s312_s0, 4096, %s314_s4, [#allocation8 + $0x4] }
 0x32f   :  { %s9469_s8 = smov [#allocation7]   ;;  %s9348_s3 = sshra.s32 %s326_s11, 4  ;;  %s9349_s3 = int_to_ptr.hbm [resolvable:$true] %s9348_s3 }
 0x330   :  { %s327_s15 = sshll.u32 %s9469_s8, 4  ;;  %s9350_s6 = scalar_lea.hbm %s9349_s3, 256  ;;  %s328_s15 = int_to_ptr.vmem [resolvable:$true] %s327_s15 }
 0x331   :  { %p9351_p0 = scmp.ne.s32.totalorder %s9349_s3, %s9350_s6  ;;  %s9352_s18 = scalar_lea.hbm %s9633_s13, 256 }
 0x332   :  { %p9353_p1 = scmp.lt.s32.totalorder %s9349_s3, %s9633_s13  ;;  %p9354_p2 = scmp.lt.s32.totalorder %s9352_s18, %s9350_s6 }
 0x334   :  { %p9355_p3 = por %p9354_p2, %p9353_p1 }
 0x336   :  { %p9356_p4 = pnand %p9355_p3, %p9351_p0 }
 0x338   :  { %9359 = shalt.err (!%p9356_p4)  }
 0x339   :  { %330 = dma.hbm_to_vmem [thread:$0]  %s326_s11, 4096, %s328_s15, [#allocation8 + $0x5] }
 0x33a   :  { %s10805_s24 = sld [smem:[#allocation54_spill]] }
 0x340   :  { %v958_v60 = vld [vmem:[%s10805_s24] sm:$0x3] }
 0x341   :  { %v960_v62 = vperm.slane %v958_v60, 0  ;;  %v961_v4 = vperm.slane %v958_v60, 1 }
 0x364   :  { %v929_v58 = vpop.f32.mrf.mxu1 }
 0x365   :  { %v964_v1 = vadd.f32 %v960_v62, %v929_v58 }
 0x367   :  { %v972_v6 = vmax.f32 %v964_v1, 0.0 }
 0x36a   :  { %v948_v0 = vpop.f32.mrf.mxu2 }
 0x36b   :  { %v965_v8 = vadd.f32 %v961_v4, %v948_v0 }
 0x36c   :  { %v931_v3 = vpop.f32.mrf.mxu1 }
 0x36d   :  { %v966_v5 = vadd.f32 %v960_v62, %v931_v3  ;;  %v973_v16 = vmax.f32 %v965_v8, 0.0 }
 0x36f   :  { %v974_v7 = vmax.f32 %v966_v5, 0.0 }
 0x371   :  { %v980_v9 = vmax.f32 %v972_v6, %v974_v7 }
 0x372   :  { %v950_v10 = vpop.f32.mrf.mxu2 }
 0x373   :  { %v981_v11 = vrot.slane %v980_v9, 4  ;;  %v967_v14 = vadd.f32 %v961_v4, %v950_v10 }
 0x374   :  { %v934_v15 = vpop.f32.mrf.mxu1 }
 0x375   :  { %v982_v17 = vmax.f32 %v980_v9, %v981_v11  ;;  %v975_v18 = vmax.f32 %v967_v14, 0.0  ;;  %v968_v28 = vadd.f32 %v960_v62, %v934_v15 }
 0x377   :  { %v983_v21 = vrot.slane %v982_v17, 2  ;;  %v987_v22 = vmax.f32 %v973_v16, %v975_v18  ;;  %v976_v34 = vmax.f32 %v968_v28, 0.0 }
 0x379   :  { %v984_v23 = vmax.f32 %v982_v17, %v983_v21  ;;  %v988_v24 = vrot.slane %v987_v22, 4 }
 0x37a   :  { %v953_v25 = vpop.f32.mrf.mxu2 }
 0x37b   :  { %v985_v26 = vrot.slane %v984_v23, 1  ;;  %v989_v27 = vmax.f32 %v987_v22, %v988_v24  ;;  %v969_v37 = vadd.f32 %v961_v4, %v953_v25 }
 0x37c   :  { %v936_v29 = vpop.f32.mrf.mxu1 }
 0x37d   :  { %v9775_v30 = vmax.f32 %v984_v23, %v985_v26  ;;  %v990_v31 = vrot.slane %v989_v27, 2  ;;  %v970_v32 = vadd.f32 %v960_v62, %v936_v29  ;;  %v977_v43 = vmax.f32 %v969_v37, 0.0 }
 0x37f   :  { %v991_v33 = vmax.f32 %v989_v27, %v990_v31  ;;  %v978_v35 = vmax.f32 %v970_v32, 0.0 }
 0x381   :  { %v992_v36 = vrot.slane %v991_v33, 1  ;;  %v994_v38 = vmax.f32 %v976_v34, %v978_v35 }
 0x382   :  { %v955_v39 = vpop.f32.mrf.mxu2 }
 0x383   :  { %v9777_v40 = vmax.f32 %v991_v33, %v992_v36  ;;  %v995_v41 = vrot.slane %v994_v38, 4  ;;  %v971_v42 = vadd.f32 %v961_v4, %v955_v39 }
 0x385   :  { %v996_v44 = vmax.f32 %v994_v38, %v995_v41  ;;  %v979_v45 = vmax.f32 %v971_v42, 0.0 }
 0x387   :  { %v997_v46 = vrot.slane %v996_v44, 2  ;;  %v1001_v47 = vmax.f32 %v977_v43, %v979_v45 }
 0x389   :  { %v998_v48 = vmax.f32 %v996_v44, %v997_v46  ;;  %v1002_v49 = vrot.slane %v1001_v47, 4 }
 0x38b   :  { %v999_v50 = vrot.slane %v998_v48, 1  ;;  %v1003_v51 = vmax.f32 %v1001_v47, %v1002_v49 }
 0x38d   :  { %v9779_v52 = vmax.f32 %v998_v48, %v999_v50  ;;  %v1004_v53 = vrot.slane %v1003_v51, 2 }
 0x38f   :  { %v1005_v54 = vmax.f32 %v1003_v51, %v1004_v53 }
 0x391   :  { %v1006_v55 = vrot.slane %v1005_v54, 1 }
 0x393   :  { %v9781_v56 = vmax.f32 %v1005_v54, %v1006_v55 }
 0x394   :  { %9406 = dma.done.wait [#allocation8], 32768 }
 0x395   :  { %9407 = vsyncadd [#allocation8], 4294934528  ;;  %v1108_v57 = vld [vmem:[#allocation2 + $0x300] sm:$0xff]  ;;  %v1109_v60 = vld [vmem:[#allocation2 + $0x308] sm:$0xff]  ;;  %vm3840_vm3 = vcmask 1041409   ;;  %vm5064_vm4 = vcmask 1047556  }
 0x396   :  { %v1236_v58 = vld [vmem:[#allocation2 + $0x700] sm:$0xff]  ;;  %v1716_v62 = vunpack.c.2.s8 %v1108_v57  ;;  %v1748_v0 = vunpack.c.3.s8 %v1108_v57  ;;  %v1237_v4 = vld [vmem:[#allocation2 + $0x708] sm:$0xff]  ;;  %v1717_v5 = vunpack.c.2.s8 %v1109_v60  ;;  %v1749_v6 = vunpack.c.3.s8 %v1109_v60  ;;  %s10817_s13 = sld [smem:[#allocation55_spill]] }
 0x397   :  { %v2228_v1 = vunpack.c.2.s8 %v1236_v58  ;;  %v2260_v3 = vunpack.c.3.s8 %v1236_v58  ;;  %v2229_v7 = vunpack.c.2.s8 %v1237_v4  ;;  %v2261_v8 = vunpack.c.3.s8 %v1237_v4  ;;  %v1076_v29 = vld [vmem:[#allocation2 + $0x200] sm:$0xff]  ;;  %v1077_v45 = vld [vmem:[#allocation2 + $0x208] sm:$0xff] }
 0x398   :  { %v2740_v9 = vcvt.s32.f32 %v1716_v62  ;;  %v2772_v10 = vcvt.s32.f32 %v1748_v0  ;;  %v2741_v15 = vcvt.s32.f32 %v1717_v5  ;;  %v2773_v16 = vcvt.s32.f32 %v1749_v6  ;;  %v1204_v39 = vld [vmem:[#allocation2 + $0x600] sm:$0xff]  ;;  %v1205_v50 = vld [vmem:[#allocation2 + $0x608] sm:$0xff] }
 0x399   :  { %v3252_v11 = vcvt.s32.f32 %v2228_v1  ;;  %v3284_v14 = vcvt.s32.f32 %v2260_v3  ;;  %v3253_v17 = vcvt.s32.f32 %v2229_v7  ;;  %v3285_v18 = vcvt.s32.f32 %v2261_v8 }
 0x39a   :  { %v3540_v21 = vpack.c.bf16 %v2772_v10, %v2740_v9  ;;  %v1652_v23 = vunpack.c.0.s8 %v1108_v57  ;;  %v1684_v24 = vunpack.c.1.s8 %v1108_v57  ;;  %v3541_v25 = vpack.c.bf16 %v2773_v16, %v2741_v15 }
 0x39b   :  { %v3796_v22 = vpack.c.bf16 %v3284_v14, %v3252_v11  ;;  %v3797_v26 = vpack.c.bf16 %v3285_v18, %v3253_v17  ;;  %v2164_v27 = vunpack.c.0.s8 %v1236_v58  ;;  %v2196_v28 = vunpack.c.1.s8 %v1236_v58 }
 0x39c   :  { %3847 = vmatpush.bf16.msra.mxu3 %v3540_v21  ;;  %v2676_v31 = vcvt.s32.f32 %v1652_v23  ;;  %v2708_v32 = vcvt.s32.f32 %v1684_v24  ;;  %v1653_v33 = vunpack.c.0.s8 %v1109_v60  ;;  %v1685_v34 = vunpack.c.1.s8 %v1109_v60  ;;  %3873 = vmatpush.bf16.msrb.mxu1 %v3541_v25  ;;  %v1044_v21 = vld [vmem:[#allocation2 + $0x100] sm:$0xff] }
 0x39d   :  { %3860 = vmatpush.bf16.msrb.mxu0 %v3796_v22  ;;  %3886 = vmatpush.bf16.msrb.mxu2 %v3797_v26  ;;  %v3188_v35 = vcvt.s32.f32 %v2164_v27  ;;  %v3220_v36 = vcvt.s32.f32 %v2196_v28  ;;  %v2165_v37 = vunpack.c.0.s8 %v1237_v4  ;;  %v2197_v38 = vunpack.c.1.s8 %v1237_v4 }
 0x39e   :  { %v3508_v41 = vpack.c.bf16 %v2708_v32, %v2676_v31  ;;  %v2677_v42 = vcvt.s32.f32 %v1653_v33  ;;  %v2709_v43 = vcvt.s32.f32 %v1685_v34  ;;  %v1588_v44 = vunpack.c.2.s8 %v1076_v29  ;;  %v1172_v32 = vld [vmem:[#allocation2 + $0x500] sm:$0xff] }
 0x39f   :  { %v3764_v46 = vpack.c.bf16 %v3220_v36, %v3188_v35  ;;  %v3189_v47 = vcvt.s32.f32 %v2165_v37  ;;  %v3221_v48 = vcvt.s32.f32 %v2197_v38  ;;  %v1620_v49 = vunpack.c.3.s8 %v1076_v29  ;;  %v1045_v36 = vld [vmem:[#allocation2 + $0x108] sm:$0xff] }
 0x3a0   :  { %3848 = vmatpush.bf16.msra.mxu3 %v3508_v41  ;;  %v3509_v51 = vpack.c.bf16 %v2709_v43, %v2677_v42  ;;  %v2612_v53 = vcvt.s32.f32 %v1588_v44  ;;  %v2100_v54 = vunpack.c.2.s8 %v1204_v39  ;;  %v2132_v55 = vunpack.c.3.s8 %v1204_v39  ;;  %v1173_v42 = vld [vmem:[#allocation2 + $0x508] sm:$0xff] }
 0x3a1   :  { %3861 = vmatpush.bf16.msrb.mxu0 %v3764_v46  ;;  %v3765_v57 = vpack.c.bf16 %v3221_v48, %v3189_v47  ;;  %v2644_v58 = vcvt.s32.f32 %v1620_v49  ;;  %v1589_v60 = vunpack.c.2.s8 %v1077_v45  ;;  %v1621_v62 = vunpack.c.3.s8 %v1077_v45 }
 0x3a2   :  { %3874 = vmatpush.bf16.msrb.mxu1 %v3509_v51  ;;  %v3124_v0 = vcvt.s32.f32 %v2100_v54  ;;  %v3156_v1 = vcvt.s32.f32 %v2132_v55  ;;  %v2101_v3 = vunpack.c.2.s8 %v1205_v50  ;;  %v2133_v4 = vunpack.c.3.s8 %v1205_v50 }
 0x3a3   :  { %3887 = vmatpush.bf16.msrb.mxu2 %v3765_v57  ;;  %v3476_v5 = vpack.c.bf16 %v2644_v58, %v2612_v53  ;;  %v2613_v6 = vcvt.s32.f32 %v1589_v60  ;;  %v2645_v7 = vcvt.s32.f32 %v1621_v62  ;;  %v1524_v8 = vunpack.c.0.s8 %v1076_v29 }
 0x3a4   :  { %v3732_v9 = vpack.c.bf16 %v3156_v1, %v3124_v0  ;;  %v3125_v10 = vcvt.s32.f32 %v2101_v3  ;;  %v3157_v11 = vcvt.s32.f32 %v2133_v4  ;;  %v1556_v14 = vunpack.c.1.s8 %v1076_v29 }
 0x3a5   :  { %3849 = vmatpush.bf16.msra.mxu3 %v3476_v5  ;;  %v3477_v15 = vpack.c.bf16 %v2645_v7, %v2613_v6  ;;  %v2548_v16 = vcvt.s32.f32 %v1524_v8  ;;  %v2036_v17 = vunpack.c.0.s8 %v1204_v39  ;;  %v2068_v18 = vunpack.c.1.s8 %v1204_v39 }
 0x3a6   :  { %3862 = vmatpush.bf16.msrb.mxu0 %v3732_v9  ;;  %v3733_v22 = vpack.c.bf16 %v3157_v11, %v3125_v10  ;;  %v2580_v23 = vcvt.s32.f32 %v1556_v14  ;;  %v1525_v24 = vunpack.c.0.s8 %v1077_v45  ;;  %v1557_v25 = vunpack.c.1.s8 %v1077_v45  ;;  %v1012_v9 = vld [vmem:[#allocation2] sm:$0xff] }
 0x3a7   :  { %3875 = vmatpush.bf16.msrb.mxu1 %v3477_v15  ;;  %v3060_v26 = vcvt.s32.f32 %v2036_v17  ;;  %v3092_v27 = vcvt.s32.f32 %v2068_v18  ;;  %v2037_v28 = vunpack.c.0.s8 %v1205_v50  ;;  %v2069_v31 = vunpack.c.1.s8 %v1205_v50 }
 0x3a8   :  { %3888 = vmatpush.bf16.msrb.mxu2 %v3733_v22  ;;  %v3444_v33 = vpack.c.bf16 %v2580_v23, %v2548_v16  ;;  %v2549_v29 = vcvt.s32.f32 %v1525_v24  ;;  %v2581_v34 = vcvt.s32.f32 %v1557_v25  ;;  %v1460_v35 = vunpack.c.2.s8 %v1044_v21  ;;  %v1140_v23 = vld [vmem:[#allocation2 + $0x400] sm:$0xff] }
 0x3a9   :  { %v3700_v37 = vpack.c.bf16 %v3092_v27, %v3060_v26  ;;  %v3061_v38 = vcvt.s32.f32 %v2037_v28  ;;  %v3093_v39 = vcvt.s32.f32 %v2069_v31  ;;  %v1492_v41 = vunpack.c.3.s8 %v1044_v21  ;;  %v1013_v27 = vld [vmem:[#allocation2 + $0x8] sm:$0xff] }
 0x3aa   :  { %3850 = vmatpush.bf16.msra.mxu3 %v3444_v33  ;;  %v3445_v43 = vpack.c.bf16 %v2581_v34, %v2549_v29  ;;  %v2484_v44 = vcvt.s32.f32 %v1460_v35  ;;  %v1972_v45 = vunpack.c.2.s8 %v1172_v32  ;;  %v2004_v46 = vunpack.c.3.s8 %v1172_v32  ;;  %v1141_v29 = vld [vmem:[#allocation2 + $0x408] sm:$0xff] }
 0x3ab   :  { %3863 = vmatpush.bf16.msrb.mxu0 %v3700_v37  ;;  %v3701_v47 = vpack.c.bf16 %v3093_v39, %v3061_v38  ;;  %v2516_v48 = vcvt.s32.f32 %v1492_v41  ;;  %v1461_v49 = vunpack.c.2.s8 %v1045_v36  ;;  %v1493_v50 = vunpack.c.3.s8 %v1045_v36 }
 0x3ac   :  { %3876 = vmatpush.bf16.msrb.mxu1 %v3445_v43  ;;  %v2996_v51 = vcvt.s32.f32 %v1972_v45  ;;  %v3028_v53 = vcvt.s32.f32 %v2004_v46  ;;  %v1973_v54 = vunpack.c.2.s8 %v1173_v42  ;;  %v2005_v55 = vunpack.c.3.s8 %v1173_v42 }
 0x3ad   :  { %3889 = vmatpush.bf16.msrb.mxu2 %v3701_v47  ;;  %v3412_v57 = vpack.c.bf16 %v2516_v48, %v2484_v44  ;;  %v2485_v58 = vcvt.s32.f32 %v1461_v49  ;;  %v2517_v60 = vcvt.s32.f32 %v1493_v50  ;;  %v1396_v62 = vunpack.c.0.s8 %v1044_v21 }
 0x3ae   :  { %v3668_v0 = vpack.c.bf16 %v3028_v53, %v2996_v51  ;;  %v2997_v1 = vcvt.s32.f32 %v1973_v54  ;;  %v3029_v3 = vcvt.s32.f32 %v2005_v55  ;;  %v1428_v4 = vunpack.c.1.s8 %v1044_v21 }
 0x3af   :  { %3851 = vmatpush.bf16.msra.mxu3 %v3412_v57  ;;  %v3413_v5 = vpack.c.bf16 %v2517_v60, %v2485_v58  ;;  %v2420_v6 = vcvt.s32.f32 %v1396_v62  ;;  %v1908_v7 = vunpack.c.0.s8 %v1172_v32  ;;  %v1940_v8 = vunpack.c.1.s8 %v1172_v32 }
 0x3b0   :  { %3864 = vmatpush.bf16.msrb.mxu0 %v3668_v0  ;;  %v3669_v10 = vpack.c.bf16 %v3029_v3, %v2997_v1  ;;  %v2452_v11 = vcvt.s32.f32 %v1428_v4  ;;  %v1397_v14 = vunpack.c.0.s8 %v1045_v36  ;;  %v1429_v15 = vunpack.c.1.s8 %v1045_v36  ;;  %v1110_v0 = vld [vmem:[#allocation2 + $0x310] sm:$0xff] }
 0x3b1   :  { %3877 = vmatpush.bf16.msrb.mxu1 %v3413_v5  ;;  %v2932_v16 = vcvt.s32.f32 %v1908_v7  ;;  %v2964_v17 = vcvt.s32.f32 %v1940_v8  ;;  %v1909_v18 = vunpack.c.0.s8 %v1173_v42  ;;  %v1941_v22 = vunpack.c.1.s8 %v1173_v42 }
 0x3b2   :  { %3890 = vmatpush.bf16.msrb.mxu2 %v3669_v10  ;;  %v3380_v24 = vpack.c.bf16 %v2452_v11, %v2420_v6  ;;  %v2421_v21 = vcvt.s32.f32 %v1397_v14  ;;  %v2453_v25 = vcvt.s32.f32 %v1429_v15  ;;  %v1332_v26 = vunpack.c.2.s8 %v1012_v9  ;;  %v1238_v11 = vld [vmem:[#allocation2 + $0x710] sm:$0xff] }
 0x3b3   :  { %v3636_v28 = vpack.c.bf16 %v2964_v17, %v2932_v16  ;;  %v2933_v31 = vcvt.s32.f32 %v1909_v18  ;;  %v2965_v32 = vcvt.s32.f32 %v1941_v22  ;;  %v1364_v33 = vunpack.c.3.s8 %v1012_v9  ;;  %v1111_v17 = vld [vmem:[#allocation2 + $0x318] sm:$0xff] }
 0x3b4   :  { %3852 = vmatpush.bf16.msra.mxu3 %v3380_v24  ;;  %v3381_v34 = vpack.c.bf16 %v2453_v25, %v2421_v21  ;;  %v2356_v35 = vcvt.s32.f32 %v1332_v26  ;;  %v1844_v36 = vunpack.c.2.s8 %v1140_v23  ;;  %v1876_v37 = vunpack.c.3.s8 %v1140_v23  ;;  %v1239_v21 = vld [vmem:[#allocation2 + $0x718] sm:$0xff] }
 0x3b5   :  { %3865 = vmatpush.bf16.msrb.mxu0 %v3636_v28  ;;  %v3637_v38 = vpack.c.bf16 %v2965_v32, %v2933_v31  ;;  %v2388_v39 = vcvt.s32.f32 %v1364_v33  ;;  %v1333_v41 = vunpack.c.2.s8 %v1013_v27  ;;  %v1365_v42 = vunpack.c.3.s8 %v1013_v27 }
 0x3b6   :  { %3878 = vmatpush.bf16.msrb.mxu1 %v3381_v34  ;;  %v2868_v43 = vcvt.s32.f32 %v1844_v36  ;;  %v2900_v44 = vcvt.s32.f32 %v1876_v37  ;;  %v1845_v45 = vunpack.c.2.s8 %v1141_v29  ;;  %v1877_v46 = vunpack.c.3.s8 %v1141_v29 }
 0x3b7   :  { %3891 = vmatpush.bf16.msrb.mxu2 %v3637_v38  ;;  %v3348_v47 = vpack.c.bf16 %v2388_v39, %v2356_v35  ;;  %v2357_v48 = vcvt.s32.f32 %v1333_v41  ;;  %v2389_v49 = vcvt.s32.f32 %v1365_v42  ;;  %v1268_v50 = vunpack.c.0.s8 %v1012_v9 }
 0x3b8   :  { %v3604_v51 = vpack.c.bf16 %v2900_v44, %v2868_v43  ;;  %v2869_v53 = vcvt.s32.f32 %v1845_v45  ;;  %v2901_v54 = vcvt.s32.f32 %v1877_v46  ;;  %v1300_v55 = vunpack.c.1.s8 %v1012_v9 }
 0x3b9   :  { %3853 = vmatpush.bf16.msra.mxu3 %v3348_v47  ;;  %v3349_v57 = vpack.c.bf16 %v2389_v49, %v2357_v48  ;;  %v2292_v58 = vcvt.s32.f32 %v1268_v50  ;;  %v1780_v60 = vunpack.c.0.s8 %v1140_v23  ;;  %v1812_v62 = vunpack.c.1.s8 %v1140_v23 }
 0x3ba   :  { %3866 = vmatpush.bf16.msrb.mxu0 %v3604_v51  ;;  %v3605_v1 = vpack.c.bf16 %v2901_v54, %v2869_v53  ;;  %v2324_v3 = vcvt.s32.f32 %v1300_v55  ;;  %v1269_v4 = vunpack.c.0.s8 %v1013_v27  ;;  %v1301_v5 = vunpack.c.1.s8 %v1013_v27  ;;  %v1078_v51 = vld [vmem:[#allocation2 + $0x210] sm:$0xff] }
 0x3bb   :  { %3879 = vmatpush.bf16.msrb.mxu1 %v3349_v57  ;;  %v2804_v6 = vcvt.s32.f32 %v1780_v60  ;;  %v2836_v7 = vcvt.s32.f32 %v1812_v62  ;;  %v1781_v8 = vunpack.c.0.s8 %v1141_v29  ;;  %v1813_v10 = vunpack.c.1.s8 %v1141_v29 }
 0x3bc   :  { %3892 = vmatpush.bf16.msrb.mxu2 %v3605_v1  ;;  %v3316_v14 = vpack.c.bf16 %v2324_v3, %v2292_v58  ;;  %v2293_v9 = vcvt.s32.f32 %v1269_v4  ;;  %v2325_v15 = vcvt.s32.f32 %v1301_v5  ;;  %v1718_v16 = vunpack.c.2.s8 %v1110_v0  ;;  %v1206_v3 = vld [vmem:[#allocation2 + $0x610] sm:$0xff] }
 0x3bd   :  { %v3572_v18 = vpack.c.bf16 %v2836_v7, %v2804_v6  ;;  %v2805_v22 = vcvt.s32.f32 %v1781_v8  ;;  %v2837_v23 = vcvt.s32.f32 %v1813_v10  ;;  %v1750_v24 = vunpack.c.3.s8 %v1110_v0  ;;  %v1079_v7 = vld [vmem:[#allocation2 + $0x218] sm:$0xff] }
 0x3be   :  { %3854 = vmatpush.bf16.msra.mxu3 %v3316_v14  ;;  %v3317_v25 = vpack.c.bf16 %v2325_v15, %v2293_v9  ;;  %v2742_v26 = vcvt.s32.f32 %v1718_v16  ;;  %v2230_v27 = vunpack.c.2.s8 %v1238_v11  ;;  %v2262_v28 = vunpack.c.3.s8 %v1238_v11  ;;  %v1207_v9 = vld [vmem:[#allocation2 + $0x618] sm:$0xff] }
 0x3bf   :  { %3867 = vmatpush.bf16.msrb.mxu0 %v3572_v18  ;;  %v3573_v31 = vpack.c.bf16 %v2837_v23, %v2805_v22  ;;  %v2774_v32 = vcvt.s32.f32 %v1750_v24  ;;  %v1719_v33 = vunpack.c.2.s8 %v1111_v17  ;;  %v1751_v29 = vunpack.c.3.s8 %v1111_v17 }
 0x3c0   :  { %3880 = vmatpush.bf16.msrb.mxu1 %v3317_v25  ;;  %v3254_v34 = vcvt.s32.f32 %v2230_v27  ;;  %v3286_v35 = vcvt.s32.f32 %v2262_v28  ;;  %v2231_v36 = vunpack.c.2.s8 %v1239_v21  ;;  %v2263_v37 = vunpack.c.3.s8 %v1239_v21 }
 0x3c1   :  { %3893 = vmatpush.bf16.msrb.mxu2 %v3573_v31  ;;  %v3542_v38 = vpack.c.bf16 %v2774_v32, %v2742_v26  ;;  %v2743_v39 = vcvt.s32.f32 %v1719_v33  ;;  %v2775_v41 = vcvt.s32.f32 %v1751_v29  ;;  %v1654_v42 = vunpack.c.0.s8 %v1110_v0 }
 0x3c2   :  { %v3798_v43 = vpack.c.bf16 %v3286_v35, %v3254_v34  ;;  %v3255_v44 = vcvt.s32.f32 %v2231_v36  ;;  %v3287_v45 = vcvt.s32.f32 %v2263_v37  ;;  %v1686_v46 = vunpack.c.1.s8 %v1110_v0 }
 0x3c3   :  { %3899 = vmatpush.bf16.msrb.mxu3 %v3542_v38  ;;  %v3543_v47 = vpack.c.bf16 %v2775_v41, %v2743_v39  ;;  %v2678_v48 = vcvt.s32.f32 %v1654_v42  ;;  %v2166_v49 = vunpack.c.0.s8 %v1238_v11  ;;  %v2198_v50 = vunpack.c.1.s8 %v1238_v11 }
 0x3c4   :  { %3912 = vmatpush.bf16.msra.mxu0 %v3798_v43  ;;  %v3799_v53 = vpack.c.bf16 %v3287_v45, %v3255_v44  ;;  %v2710_v54 = vcvt.s32.f32 %v1686_v46  ;;  %v1655_v55 = vunpack.c.0.s8 %v1111_v17  ;;  %v1687_v57 = vunpack.c.1.s8 %v1111_v17 }
 0x3c5   :  { %3925 = vmatpush.bf16.msra.mxu1 %v3543_v47  ;;  %v3190_v58 = vcvt.s32.f32 %v2166_v49  ;;  %v3222_v60 = vcvt.s32.f32 %v2198_v50  ;;  %v2167_v62 = vunpack.c.0.s8 %v1239_v21  ;;  %v2199_v1 = vunpack.c.1.s8 %v1239_v21 }
 0x3c6   :  { %3938 = vmatpush.bf16.msra.mxu2 %v3799_v53  ;;  %v3510_v4 = vpack.c.bf16 %v2710_v54, %v2678_v48  ;;  %v2679_v0 = vcvt.s32.f32 %v1655_v55  ;;  %v2711_v5 = vcvt.s32.f32 %v1687_v57  ;;  %v1590_v6 = vunpack.c.2.s8 %v1078_v51  ;;  %v1046_v57 = vld [vmem:[#allocation2 + $0x110] sm:$0xff] }
 0x3c7   :  { %v3766_v8 = vpack.c.bf16 %v3222_v60, %v3190_v58  ;;  %v3191_v10 = vcvt.s32.f32 %v2167_v62  ;;  %v3223_v11 = vcvt.s32.f32 %v2199_v1  ;;  %v1622_v14 = vunpack.c.3.s8 %v1078_v51 }
 0x3c8   :  { %3900 = vmatpush.bf16.msrb.mxu3 %v3510_v4  ;;  %v3511_v15 = vpack.c.bf16 %v2711_v5, %v2679_v0  ;;  %v2614_v16 = vcvt.s32.f32 %v1590_v6  ;;  %v2102_v17 = vunpack.c.2.s8 %v1206_v3  ;;  %v2134_v18 = vunpack.c.3.s8 %v1206_v3  ;;  %v1047_v6 = vld [vmem:[#allocation2 + $0x118] sm:$0xff] }
 0x3c9   :  { %3913 = vmatpush.bf16.msra.mxu0 %v3766_v8  ;;  %v3767_v22 = vpack.c.bf16 %v3223_v11, %v3191_v10  ;;  %v2646_v23 = vcvt.s32.f32 %v1622_v14  ;;  %v1591_v24 = vunpack.c.2.s8 %v1079_v7  ;;  %v1623_v21 = vunpack.c.3.s8 %v1079_v7 }
 0x3ca   :  { %3926 = vmatpush.bf16.msra.mxu1 %v3511_v15  ;;  %v3126_v25 = vcvt.s32.f32 %v2102_v17  ;;  %v3158_v26 = vcvt.s32.f32 %v2134_v18  ;;  %v2103_v27 = vunpack.c.2.s8 %v1207_v9  ;;  %v2135_v28 = vunpack.c.3.s8 %v1207_v9  ;;  %v1175_v15 = vld [vmem:[#allocation2 + $0x518] sm:$0xff] }
 0x3cb   :  { %3939 = vmatpush.bf16.msra.mxu2 %v3767_v22  ;;  %v3478_v31 = vpack.c.bf16 %v2646_v23, %v2614_v16  ;;  %v2615_v32 = vcvt.s32.f32 %v1591_v24  ;;  %v2647_v33 = vcvt.s32.f32 %v1623_v21  ;;  %v1526_v29 = vunpack.c.0.s8 %v1078_v51 }
 0x3cc   :  { %v3734_v34 = vpack.c.bf16 %v3158_v26, %v3126_v25  ;;  %v3127_v35 = vcvt.s32.f32 %v2103_v27  ;;  %v3159_v36 = vcvt.s32.f32 %v2135_v28  ;;  %v1558_v37 = vunpack.c.1.s8 %v1078_v51 }
 0x3cd   :  { %3901 = vmatpush.bf16.msrb.mxu3 %v3478_v31  ;;  %v3479_v38 = vpack.c.bf16 %v2647_v33, %v2615_v32  ;;  %v2550_v39 = vcvt.s32.f32 %v1526_v29  ;;  %v2038_v41 = vunpack.c.0.s8 %v1206_v3  ;;  %v2070_v42 = vunpack.c.1.s8 %v1206_v3  ;;  %v1174_v3 = vld [vmem:[#allocation2 + $0x510] sm:$0xff] }
 0x3ce   :  { %3914 = vmatpush.bf16.msra.mxu0 %v3734_v34  ;;  %v3735_v43 = vpack.c.bf16 %v3159_v36, %v3127_v35  ;;  %v2582_v44 = vcvt.s32.f32 %v1558_v37  ;;  %v1527_v45 = vunpack.c.0.s8 %v1079_v7  ;;  %v1559_v46 = vunpack.c.1.s8 %v1079_v7 }
 0x3cf   :  { %3927 = vmatpush.bf16.msra.mxu1 %v3479_v38  ;;  %v3062_v47 = vcvt.s32.f32 %v2038_v41  ;;  %v3094_v48 = vcvt.s32.f32 %v2070_v42  ;;  %v2039_v49 = vunpack.c.0.s8 %v1207_v9  ;;  %v2071_v50 = vunpack.c.1.s8 %v1207_v9 }
 0x3d0   :  { %3940 = vmatpush.bf16.msra.mxu2 %v3735_v43  ;;  %v3446_v53 = vpack.c.bf16 %v2582_v44, %v2550_v39  ;;  %v2551_v54 = vcvt.s32.f32 %v1527_v45  ;;  %v2583_v55 = vcvt.s32.f32 %v1559_v46  ;;  %v3828_v51 = vpack.c.bf16 %v9775_v30, %v9775_v30  ;;  %v1014_v46 = vld [vmem:[#allocation2 + $0x10] sm:$0xff] }
 0x3d1   :  { %v3702_v58 = vpack.c.bf16 %v3094_v48, %v3062_v47  ;;  %v3063_v60 = vcvt.s32.f32 %v2039_v49  ;;  %v3095_v62 = vcvt.s32.f32 %v2071_v50  ;;  %v3830_v1 = vpack.c.bf16 %v9779_v52, %v9779_v52  ;;  %v1142_v47 = vld [vmem:[#allocation2 + $0x410] sm:$0xff] }
 0x3d2   :  { %3902 = vmatpush.bf16.msrb.mxu3 %v3446_v53  ;;  %v3447_v4 = vpack.c.bf16 %v2583_v55, %v2551_v54  ;;  %v3836_v0 = vunpack.c.l.b16 %v3828_v51  ;;  %v3829_v5 = vpack.c.bf16 %v9777_v40, %v9777_v40  ;;  %v3831_v30 = vpack.c.bf16 %v9781_v56, %v9781_v56 }
 0x3d3   :  { %3915 = vmatpush.bf16.msra.mxu0 %v3702_v58  ;;  %v3703_v7 = vpack.c.bf16 %v3095_v62, %v3063_v60  ;;  %v3838_v8 = vunpack.c.l.b16 %v3830_v1  ;;  %v1462_v10 = vunpack.c.2.s8 %v1046_v57  ;;  %v1494_v14 = vunpack.c.3.s8 %v1046_v57  ;;  %v1015_v58 = vld [vmem:[#allocation2 + $0x18] sm:$0xff] }
 0x3d4   :  { %3928 = vmatpush.bf16.msra.mxu1 %v3447_v4  ;;  %v3837_v11 = vunpack.c.l.b16 %v3829_v5  ;;  %v1974_v52 = vunpack.c.2.s8 %v1174_v3  ;;  %v2006_v9 = vunpack.c.3.s8 %v1174_v3  ;;  %v3839_v17 = vunpack.c.l.b16 %v3831_v30  ;;  %v1143_v4 = vld [vmem:[#allocation2 + $0x418] sm:$0xff] }
 0x3d5   :  { %3941 = vmatpush.bf16.msra.mxu2 %v3703_v7  ;;  %v3841_v16 = vsel %vm3840_vm3, %v3838_v8, %v3836_v0  ;;  %v2486_v18 = vcvt.s32.f32 %v1462_v10  ;;  %v1463_v40 = vunpack.c.2.s8 %v1047_v6  ;;  %v2518_v23 = vcvt.s32.f32 %v1494_v14 }
 0x3d6   :  { %v9792_v22 = vpack.c.b16 %v3841_v16, %v3841_v16  ;;  %v2998_v24 = vcvt.s32.f32 %v1974_v52  ;;  %v3030_v21 = vcvt.s32.f32 %v2006_v9  ;;  %v3842_v56 = vsel %vm3840_vm3, %v3839_v17, %v3837_v11 }
 0x3d7   :  { %v1495_v25 = vunpack.c.3.s8 %v1047_v6  ;;  %v2487_v26 = vcvt.s32.f32 %v1463_v40  ;;  %v1975_v27 = vunpack.c.2.s8 %v1175_v15  ;;  %v9796_v28 = vpack.c.b16 %v3842_v56, %v3842_v56 }
 0x3d8   :  { %3855 = vmatmul.bf16.vlgmr.msra.gmra.mxu3 %v9792_v22  ;;  %v3414_v31 = vpack.c.bf16 %v2518_v23, %v2486_v18  ;;  %v3670_v32 = vpack.c.bf16 %v3030_v21, %v2998_v24  ;;  %v2007_v33 = vunpack.c.3.s8 %v1175_v15  ;;  %3881 = vmatmul.bf16.vlgmr.msrb.gmra.mxu1 %v9792_v22  ;;  %v1398_v35 = vunpack.c.0.s8 %v1046_v57 }
 0x3d9   :  { %v2519_v29 = vcvt.s32.f32 %v1495_v25  ;;  %v2999_v34 = vcvt.s32.f32 %v1975_v27  ;;  %v1430_v36 = vunpack.c.1.s8 %v1046_v57  ;;  %3894 = vmatmul.bf16.vlgmr.msrb.gmra.mxu2 %v9796_v28  ;;  %v1910_v38 = vunpack.c.0.s8 %v1174_v3  ;;  %3868 = vmatmul.bf16.vlgmr.msrb.gmra.mxu0 %v9796_v28 }
 0x3da   :  { %3903 = vmatpush.bf16.msrb.mxu3 %v3414_v31  ;;  %v3031_v37 = vcvt.s32.f32 %v2007_v33  ;;  %v1942_v39 = vunpack.c.1.s8 %v1174_v3  ;;  %v1399_v41 = vunpack.c.0.s8 %v1047_v6  ;;  %3916 = vmatpush.bf16.msra.mxu0 %v3670_v32  ;;  %v2422_v43 = vcvt.s32.f32 %v1398_v35  ;;  %v1112_v35 = vld [vmem:[#allocation2 + $0x320] sm:$0xff] }
 0x3db   :  { %v3415_v42 = vpack.c.bf16 %v2519_v29, %v2487_v26  ;;  %v2454_v44 = vcvt.s32.f32 %v1430_v36  ;;  %v1431_v45 = vunpack.c.1.s8 %v1047_v6  ;;  %v2934_v49 = vcvt.s32.f32 %v1910_v38 }
 0x3dc   :  { %v3671_v48 = vpack.c.bf16 %v3031_v37, %v2999_v34  ;;  %v2966_v50 = vcvt.s32.f32 %v1942_v39  ;;  %v2423_v53 = vcvt.s32.f32 %v1399_v41  ;;  %v1911_v51 = vunpack.c.0.s8 %v1175_v15  ;;  %v1240_v41 = vld [vmem:[#allocation2 + $0x720] sm:$0xff] }
 0x3dd   :  { %3929 = vmatpush.bf16.msra.mxu1 %v3415_v42  ;;  %v3382_v54 = vpack.c.bf16 %v2454_v44, %v2422_v43  ;;  %v2455_v55 = vcvt.s32.f32 %v1431_v45  ;;  %v1943_v57 = vunpack.c.1.s8 %v1175_v15  ;;  %v1334_v62 = vunpack.c.2.s8 %v1014_v46 }
 0x3de   :  { %3942 = vmatpush.bf16.msra.mxu2 %v3671_v48  ;;  %v3638_v60 = vpack.c.bf16 %v2966_v50, %v2934_v49  ;;  %v1366_v1 = vunpack.c.3.s8 %v1014_v46  ;;  %v1846_v3 = vunpack.c.2.s8 %v1142_v47  ;;  %v2935_v5 = vcvt.s32.f32 %v1911_v51 }
 0x3df   :  { %3904 = vmatpush.bf16.msrb.mxu3 %v3382_v54  ;;  %v3383_v0 = vpack.c.bf16 %v2455_v55, %v2423_v53  ;;  %v2967_v6 = vcvt.s32.f32 %v1943_v57  ;;  %v1878_v7 = vunpack.c.3.s8 %v1142_v47  ;;  %v2358_v8 = vcvt.s32.f32 %v1334_v62  ;;  %v1241_v53 = vld [vmem:[#allocation2 + $0x728] sm:$0xff] }
 0x3e0   :  { %3917 = vmatpush.bf16.msra.mxu0 %v3638_v60  ;;  %v2390_v30 = vcvt.s32.f32 %v1366_v1  ;;  %v2870_v10 = vcvt.s32.f32 %v1846_v3  ;;  %v1335_v11 = vunpack.c.2.s8 %v1015_v58  ;;  %v1367_v9 = vunpack.c.3.s8 %v1015_v58 }
 0x3e1   :  { %3930 = vmatpush.bf16.msra.mxu1 %v3383_v0  ;;  %v3639_v14 = vpack.c.bf16 %v2967_v6, %v2935_v5  ;;  %v2902_v52 = vcvt.s32.f32 %v1878_v7  ;;  %v1847_v15 = vunpack.c.2.s8 %v1143_v4  ;;  %v1879_v18 = vunpack.c.3.s8 %v1143_v4 }
 0x3e2   :  { %v3350_v16 = vpack.c.bf16 %v2390_v30, %v2358_v8  ;;  %v2359_v17 = vcvt.s32.f32 %v1335_v11  ;;  %v1270_v40 = vunpack.c.0.s8 %v1014_v46  ;;  %v2391_v24 = vcvt.s32.f32 %v1367_v9 }
 0x3e3   :  { %3943 = vmatpush.bf16.msra.mxu2 %v3639_v14  ;;  %v3606_v23 = vpack.c.bf16 %v2902_v52, %v2870_v10  ;;  %v2871_v21 = vcvt.s32.f32 %v1847_v15  ;;  %v1302_v56 = vunpack.c.1.s8 %v1014_v46  ;;  %v2903_v25 = vcvt.s32.f32 %v1879_v18  ;;  %v1113_v46 = vld [vmem:[#allocation2 + $0x328] sm:$0xff] }
 0x3e4   :  { %3905 = vmatpush.bf16.msrb.mxu3 %v3350_v16  ;;  %v2294_v26 = vcvt.s32.f32 %v1270_v40  ;;  %v1782_v27 = vunpack.c.0.s8 %v1142_v47  ;;  %v1814_v31 = vunpack.c.1.s8 %v1142_v47  ;;  %v3351_v32 = vpack.c.bf16 %v2391_v24, %v2359_v17 }
 0x3e5   :  { %3918 = vmatpush.bf16.msra.mxu0 %v3606_v23  ;;  %v2326_v33 = vcvt.s32.f32 %v1302_v56  ;;  %v1271_v29 = vunpack.c.0.s8 %v1015_v58  ;;  %v1303_v34 = vunpack.c.1.s8 %v1015_v58  ;;  %v3607_v36 = vpack.c.bf16 %v2903_v25, %v2871_v21  ;;  %v1080_v21 = vld [vmem:[#allocation2 + $0x220] sm:$0xff] }
 0x3e6   :  { %v2806_v37 = vcvt.s32.f32 %v1782_v27  ;;  %v2838_v38 = vcvt.s32.f32 %v1814_v31  ;;  %v1783_v39 = vunpack.c.0.s8 %v1143_v4  ;;  %3931 = vmatpush.bf16.msra.mxu1 %v3351_v32  ;;  %v1815_v45 = vunpack.c.1.s8 %v1143_v4  ;;  %v1208_v31 = vld [vmem:[#allocation2 + $0x620] sm:$0xff] }
 0x3e7   :  { %v3318_v42 = vpack.c.bf16 %v2326_v33, %v2294_v26  ;;  %v2295_v43 = vcvt.s32.f32 %v1271_v29  ;;  %v2327_v44 = vcvt.s32.f32 %v1303_v34  ;;  %3944 = vmatpush.bf16.msra.mxu2 %v3607_v36  ;;  %v1720_v49 = vunpack.c.2.s8 %v1112_v35 }
 0x3e8   :  { %v3574_v48 = vpack.c.bf16 %v2838_v38, %v2806_v37  ;;  %v2807_v47 = vcvt.s32.f32 %v1783_v39  ;;  %v1752_v50 = vunpack.c.3.s8 %v1112_v35  ;;  %v2839_v55 = vcvt.s32.f32 %v1815_v45 }
 0x3e9   :  { %3906 = vmatpush.bf16.msrb.mxu3 %v3318_v42  ;;  %v3319_v54 = vpack.c.bf16 %v2327_v44, %v2295_v43  ;;  %v2232_v51 = vunpack.c.2.s8 %v1240_v41  ;;  %v2264_v57 = vunpack.c.3.s8 %v1240_v41  ;;  %v2744_v58 = vcvt.s32.f32 %v1720_v49 }
 0x3ea   :  { %3919 = vmatpush.bf16.msra.mxu0 %v3574_v48  ;;  %v2776_v60 = vcvt.s32.f32 %v1752_v50  ;;  %v1721_v62 = vunpack.c.2.s8 %v1113_v46  ;;  %v1753_v1 = vunpack.c.3.s8 %v1113_v46  ;;  %v3575_v3 = vpack.c.bf16 %v2839_v55, %v2807_v47 }
 0x3eb   :  { %3932 = vmatpush.bf16.msra.mxu1 %v3319_v54  ;;  %v3256_v4 = vcvt.s32.f32 %v2232_v51  ;;  %v3288_v0 = vcvt.s32.f32 %v2264_v57  ;;  %v2233_v5 = vunpack.c.2.s8 %v1241_v53  ;;  %v2265_v30 = vunpack.c.3.s8 %v1241_v53 }
 0x3ec   :  { %v3544_v6 = vpack.c.bf16 %v2776_v60, %v2744_v58  ;;  %v2745_v7 = vcvt.s32.f32 %v1721_v62  ;;  %v2777_v8 = vcvt.s32.f32 %v1753_v1  ;;  %3907 = vmatmul.bf16.vlgmr.msrb.gmra.mxu3 %v9792_v22  ;;  %3945 = vmatpush.bf16.msra.mxu2 %v3575_v3  ;;  %v1656_v14 = vunpack.c.0.s8 %v1112_v35 }
 0x3ed   :  { %v3800_v10 = vpack.c.bf16 %v3288_v0, %v3256_v4  ;;  %v3257_v11 = vcvt.s32.f32 %v2233_v5  ;;  %v1688_v52 = vunpack.c.1.s8 %v1112_v35  ;;  %3920 = vmatmul.bf16.vlgmr.msra.gmra.mxu0 %v9796_v28  ;;  %v3289_v15 = vcvt.s32.f32 %v2265_v30  ;;  %v1081_v35 = vld [vmem:[#allocation2 + $0x228] sm:$0xff] }
 0x3ee   :  { %3951 = vmatpush.bf16.msra.mxu3 %v3544_v6  ;;  %v3545_v9 = vpack.c.bf16 %v2777_v8, %v2745_v7  ;;  %v2168_v16 = vunpack.c.0.s8 %v1240_v41  ;;  %v2200_v17 = vunpack.c.1.s8 %v1240_v41  ;;  %3933 = vmatmul.bf16.vlgmr.msra.gmra.mxu1 %v9792_v22  ;;  %v2680_v18 = vcvt.s32.f32 %v1656_v14  ;;  %v1209_v41 = vld [vmem:[#allocation2 + $0x628] sm:$0xff]  ;;  %v1048_v14 = vld [vmem:[#allocation2 + $0x120] sm:$0xff] }
 0x3ef   :  { %3964 = vmatpush.bf16.msrb.mxu0 %v3800_v10  ;;  %v2712_v40 = vcvt.s32.f32 %v1688_v52  ;;  %v1657_v23 = vunpack.c.0.s8 %v1113_v46  ;;  %v1689_v24 = vunpack.c.1.s8 %v1113_v46  ;;  %v3801_v56 = vpack.c.bf16 %v3289_v15, %v3257_v11  ;;  %3946 = vmatmul.bf16.vlgmr.msra.gmra.mxu2 %v9796_v28 }
 0x3f0   :  { %3977 = vmatpush.bf16.msrb.mxu1 %v3545_v9  ;;  %v3192_v25 = vcvt.s32.f32 %v2168_v16  ;;  %v3224_v26 = vcvt.s32.f32 %v2200_v17  ;;  %v2169_v27 = vunpack.c.0.s8 %v1241_v53  ;;  %v2201_v34 = vunpack.c.1.s8 %v1241_v53  ;;  %v1176_v17 = vld [vmem:[#allocation2 + $0x520] sm:$0xff] }
 0x3f1   :  { %v3512_v32 = vpack.c.bf16 %v2712_v40, %v2680_v18  ;;  %v2681_v33 = vcvt.s32.f32 %v1657_v23  ;;  %v2713_v29 = vcvt.s32.f32 %v1689_v24  ;;  %3990 = vmatpush.bf16.msrb.mxu2 %v3801_v56  ;;  %v1592_v38 = vunpack.c.2.s8 %v1080_v21 }
 0x3f2   :  { %v3768_v36 = vpack.c.bf16 %v3224_v26, %v3192_v25  ;;  %v3193_v37 = vcvt.s32.f32 %v2169_v27  ;;  %v1624_v39 = vunpack.c.3.s8 %v1080_v21  ;;  %v3225_v43 = vcvt.s32.f32 %v2201_v34 }
 0x3f3   :  { %3952 = vmatpush.bf16.msra.mxu3 %v3512_v32  ;;  %v3513_v42 = vpack.c.bf16 %v2713_v29, %v2681_v33  ;;  %v2104_v44 = vunpack.c.2.s8 %v1208_v31  ;;  %v2136_v45 = vunpack.c.3.s8 %v1208_v31  ;;  %v2616_v46 = vcvt.s32.f32 %v1592_v38 }
 0x3f4   :  { %3965 = vmatpush.bf16.msrb.mxu0 %v3768_v36  ;;  %v2648_v48 = vcvt.s32.f32 %v1624_v39  ;;  %v1593_v47 = vunpack.c.2.s8 %v1081_v35  ;;  %v1625_v49 = vunpack.c.3.s8 %v1081_v35  ;;  %v3769_v50 = vpack.c.bf16 %v3225_v43, %v3193_v37 }
 0x3f5   :  { %3978 = vmatpush.bf16.msrb.mxu1 %v3513_v42  ;;  %v3128_v53 = vcvt.s32.f32 %v2104_v44  ;;  %v3160_v54 = vcvt.s32.f32 %v2136_v45  ;;  %v2105_v55 = vunpack.c.2.s8 %v1209_v41  ;;  %v2137_v60 = vunpack.c.3.s8 %v1209_v41 }
 0x3f6   :  { %v3480_v51 = vpack.c.bf16 %v2648_v48, %v2616_v46  ;;  %v2617_v57 = vcvt.s32.f32 %v1593_v47  ;;  %v2649_v58 = vcvt.s32.f32 %v1625_v49  ;;  %3991 = vmatpush.bf16.msrb.mxu2 %v3769_v50  ;;  %v1528_v3 = vunpack.c.0.s8 %v1080_v21 }
 0x3f7   :  { %v3736_v62 = vpack.c.bf16 %v3160_v54, %v3128_v53  ;;  %v3129_v1 = vcvt.s32.f32 %v2105_v55  ;;  %v1560_v4 = vunpack.c.1.s8 %v1080_v21  ;;  %v3161_v5 = vcvt.s32.f32 %v2137_v60  ;;  %v1049_v21 = vld [vmem:[#allocation2 + $0x128] sm:$0xff] }
 0x3f8   :  { %3953 = vmatpush.bf16.msra.mxu3 %v3480_v51  ;;  %v3481_v0 = vpack.c.bf16 %v2649_v58, %v2617_v57  ;;  %v2040_v6 = vunpack.c.0.s8 %v1208_v31  ;;  %v2072_v7 = vunpack.c.1.s8 %v1208_v31  ;;  %v2552_v8 = vcvt.s32.f32 %v1528_v3  ;;  %v1177_v31 = vld [vmem:[#allocation2 + $0x528] sm:$0xff]  ;;  %v1016_v3 = vld [vmem:[#allocation2 + $0x20] sm:$0xff] }
 0x3f9   :  { %3966 = vmatpush.bf16.msrb.mxu0 %v3736_v62  ;;  %v2584_v30 = vcvt.s32.f32 %v1560_v4  ;;  %v1529_v10 = vunpack.c.0.s8 %v1081_v35  ;;  %v1561_v11 = vunpack.c.1.s8 %v1081_v35  ;;  %v3737_v52 = vpack.c.bf16 %v3161_v5, %v3129_v1 }
 0x3fa   :  { %3979 = vmatpush.bf16.msrb.mxu1 %v3481_v0  ;;  %v3064_v9 = vcvt.s32.f32 %v2040_v6  ;;  %v3096_v15 = vcvt.s32.f32 %v2072_v7  ;;  %v2041_v16 = vunpack.c.0.s8 %v1209_v41  ;;  %v2073_v24 = vunpack.c.1.s8 %v1209_v41  ;;  %v1144_v7 = vld [vmem:[#allocation2 + $0x420] sm:$0xff] }
 0x3fb   :  { %v3448_v18 = vpack.c.bf16 %v2584_v30, %v2552_v8  ;;  %v2553_v40 = vcvt.s32.f32 %v1529_v10  ;;  %v2585_v23 = vcvt.s32.f32 %v1561_v11  ;;  %3992 = vmatpush.bf16.msrb.mxu2 %v3737_v52  ;;  %v1464_v26 = vunpack.c.2.s8 %v1048_v14 }
 0x3fc   :  { %v3704_v56 = vpack.c.bf16 %v3096_v15, %v3064_v9  ;;  %v3065_v25 = vcvt.s32.f32 %v2041_v16  ;;  %v1496_v27 = vunpack.c.3.s8 %v1048_v14  ;;  %v3097_v33 = vcvt.s32.f32 %v2073_v24 }
 0x3fd   :  { %3954 = vmatpush.bf16.msra.mxu3 %v3448_v18  ;;  %v3449_v32 = vpack.c.bf16 %v2585_v23, %v2553_v40  ;;  %v1976_v29 = vunpack.c.2.s8 %v1176_v17  ;;  %v2008_v34 = vunpack.c.3.s8 %v1176_v17  ;;  %v2488_v35 = vcvt.s32.f32 %v1464_v26 }
 0x3fe   :  { %3967 = vmatpush.bf16.msrb.mxu0 %v3704_v56  ;;  %v2520_v36 = vcvt.s32.f32 %v1496_v27  ;;  %v1465_v37 = vunpack.c.2.s8 %v1049_v21  ;;  %v1497_v38 = vunpack.c.3.s8 %v1049_v21  ;;  %v3705_v39 = vpack.c.bf16 %v3097_v33, %v3065_v25 }
 0x3ff   :  { %3980 = vmatpush.bf16.msrb.mxu1 %v3449_v32  ;;  %v3000_v41 = vcvt.s32.f32 %v1976_v29  ;;  %v3032_v42 = vcvt.s32.f32 %v2008_v34  ;;  %v1977_v43 = vunpack.c.2.s8 %v1177_v31  ;;  %v2009_v48 = vunpack.c.3.s8 %v1177_v31 }
 0x400   :  { %v3416_v44 = vpack.c.bf16 %v2520_v36, %v2488_v35  ;;  %v2489_v45 = vcvt.s32.f32 %v1465_v37  ;;  %v2521_v46 = vcvt.s32.f32 %v1497_v38  ;;  %3993 = vmatpush.bf16.msrb.mxu2 %v3705_v39  ;;  %v1400_v50 = vunpack.c.0.s8 %v1048_v14 }
 0x401   :  { %v3672_v47 = vpack.c.bf16 %v3032_v42, %v3000_v41  ;;  %v3001_v49 = vcvt.s32.f32 %v1977_v43  ;;  %v1432_v53 = vunpack.c.1.s8 %v1048_v14  ;;  %v3033_v55 = vcvt.s32.f32 %v2009_v48  ;;  %v1017_v14 = vld [vmem:[#allocation2 + $0x28] sm:$0xff] }
 0x402   :  { %3955 = vmatpush.bf16.msra.mxu3 %v3416_v44  ;;  %v3417_v54 = vpack.c.bf16 %v2521_v46, %v2489_v45  ;;  %v1912_v51 = vunpack.c.0.s8 %v1176_v17  ;;  %v1944_v57 = vunpack.c.1.s8 %v1176_v17  ;;  %v2424_v58 = vcvt.s32.f32 %v1400_v50  ;;  %v1145_v17 = vld [vmem:[#allocation2 + $0x428] sm:$0xff]  ;;  %v1114_v50 = vld [vmem:[#allocation2 + $0x330] sm:$0xff] }
 0x403   :  { %3968 = vmatpush.bf16.msrb.mxu0 %v3672_v47  ;;  %v2456_v60 = vcvt.s32.f32 %v1432_v53  ;;  %v1401_v62 = vunpack.c.0.s8 %v1049_v21  ;;  %v1433_v1 = vunpack.c.1.s8 %v1049_v21  ;;  %v3673_v4 = vpack.c.bf16 %v3033_v55, %v3001_v49 }
 0x404   :  { %3981 = vmatpush.bf16.msrb.mxu1 %v3417_v54  ;;  %v2936_v0 = vcvt.s32.f32 %v1912_v51  ;;  %v2968_v5 = vcvt.s32.f32 %v1944_v57  ;;  %v1913_v6 = vunpack.c.0.s8 %v1177_v31  ;;  %v1945_v11 = vunpack.c.1.s8 %v1177_v31  ;;  %v1242_v57 = vld [vmem:[#allocation2 + $0x730] sm:$0xff] }
 0x405   :  { %v3384_v8 = vpack.c.bf16 %v2456_v60, %v2424_v58  ;;  %v2425_v30 = vcvt.s32.f32 %v1401_v62  ;;  %v2457_v10 = vcvt.s32.f32 %v1433_v1  ;;  %3994 = vmatpush.bf16.msrb.mxu2 %v3673_v4  ;;  %v1336_v15 = vunpack.c.2.s8 %v1016_v3 }
 0x406   :  { %v3640_v52 = vpack.c.bf16 %v2968_v5, %v2936_v0  ;;  %v2937_v9 = vcvt.s32.f32 %v1913_v6  ;;  %v1368_v16 = vunpack.c.3.s8 %v1016_v3  ;;  %v2969_v40 = vcvt.s32.f32 %v1945_v11 }
 0x407   :  { %3956 = vmatpush.bf16.msra.mxu3 %v3384_v8  ;;  %v3385_v18 = vpack.c.bf16 %v2457_v10, %v2425_v30  ;;  %v1848_v23 = vunpack.c.2.s8 %v1144_v7  ;;  %v1880_v24 = vunpack.c.3.s8 %v1144_v7  ;;  %v2360_v21 = vcvt.s32.f32 %v1336_v15 }
 0x408   :  { %3969 = vmatpush.bf16.msrb.mxu0 %v3640_v52  ;;  %v2392_v56 = vcvt.s32.f32 %v1368_v16  ;;  %v1337_v25 = vunpack.c.2.s8 %v1017_v14  ;;  %v1369_v26 = vunpack.c.3.s8 %v1017_v14  ;;  %v3641_v27 = vpack.c.bf16 %v2969_v40, %v2937_v9 }
 0x409   :  { %3982 = vmatpush.bf16.msrb.mxu1 %v3385_v18  ;;  %v2872_v31 = vcvt.s32.f32 %v1848_v23  ;;  %v2904_v32 = vcvt.s32.f32 %v1880_v24  ;;  %v1849_v33 = vunpack.c.2.s8 %v1145_v17  ;;  %v1881_v36 = vunpack.c.3.s8 %v1145_v17 }
 0x40a   :  { %v3352_v29 = vpack.c.bf16 %v2392_v56, %v2360_v21  ;;  %v2361_v34 = vcvt.s32.f32 %v1337_v25  ;;  %v2393_v35 = vcvt.s32.f32 %v1369_v26  ;;  %3995 = vmatpush.bf16.msrb.mxu2 %v3641_v27  ;;  %v1272_v39 = vunpack.c.0.s8 %v1016_v3 }
 0x40b   :  { %v3608_v37 = vpack.c.bf16 %v2904_v32, %v2872_v31  ;;  %v2873_v38 = vcvt.s32.f32 %v1849_v33  ;;  %v1304_v41 = vunpack.c.1.s8 %v1016_v3  ;;  %v2905_v43 = vcvt.s32.f32 %v1881_v36  ;;  %v1115_v3 = vld [vmem:[#allocation2 + $0x338] sm:$0xff] }
 0x40c   :  { %3957 = vmatpush.bf16.msra.mxu3 %v3352_v29  ;;  %v3353_v42 = vpack.c.bf16 %v2393_v35, %v2361_v34  ;;  %v1784_v44 = vunpack.c.0.s8 %v1144_v7  ;;  %v1816_v45 = vunpack.c.1.s8 %v1144_v7  ;;  %v2296_v46 = vcvt.s32.f32 %v1272_v39  ;;  %v1243_v7 = vld [vmem:[#allocation2 + $0x738] sm:$0xff]  ;;  %v1082_v39 = vld [vmem:[#allocation2 + $0x230] sm:$0xff] }
 0x40d   :  { %3970 = vmatpush.bf16.msrb.mxu0 %v3608_v37  ;;  %v2328_v48 = vcvt.s32.f32 %v1304_v41  ;;  %v1273_v47 = vunpack.c.0.s8 %v1017_v14  ;;  %v1305_v49 = vunpack.c.1.s8 %v1017_v14  ;;  %v3609_v53 = vpack.c.bf16 %v2905_v43, %v2873_v38 }
 0x40e   :  { %3983 = vmatpush.bf16.msrb.mxu1 %v3353_v42  ;;  %v2808_v54 = vcvt.s32.f32 %v1784_v44  ;;  %v2840_v55 = vcvt.s32.f32 %v1816_v45  ;;  %v1785_v51 = vunpack.c.0.s8 %v1145_v17  ;;  %v1817_v1 = vunpack.c.1.s8 %v1145_v17  ;;  %v1210_v45 = vld [vmem:[#allocation2 + $0x630] sm:$0xff] }
 0x40f   :  { %v3320_v58 = vpack.c.bf16 %v2328_v48, %v2296_v46  ;;  %v2297_v60 = vcvt.s32.f32 %v1273_v47  ;;  %v2329_v62 = vcvt.s32.f32 %v1305_v49  ;;  %3996 = vmatpush.bf16.msrb.mxu2 %v3609_v53  ;;  %v1722_v5 = vunpack.c.2.s8 %v1114_v50 }
 0x410   :  { %v3576_v4 = vpack.c.bf16 %v2840_v55, %v2808_v54  ;;  %v2809_v0 = vcvt.s32.f32 %v1785_v51  ;;  %v1754_v6 = vunpack.c.3.s8 %v1114_v50  ;;  %v2841_v30 = vcvt.s32.f32 %v1817_v1 }
 0x411   :  { %3958 = vmatpush.bf16.msra.mxu3 %v3320_v58  ;;  %v3321_v8 = vpack.c.bf16 %v2329_v62, %v2297_v60  ;;  %v2234_v10 = vunpack.c.2.s8 %v1242_v57  ;;  %v2266_v11 = vunpack.c.3.s8 %v1242_v57  ;;  %v2746_v14 = vcvt.s32.f32 %v1722_v5 }
 0x412   :  { %3971 = vmatpush.bf16.msrb.mxu0 %v3576_v4  ;;  %v2778_v52 = vcvt.s32.f32 %v1754_v6  ;;  %v1723_v9 = vunpack.c.2.s8 %v1115_v3  ;;  %v1755_v15 = vunpack.c.3.s8 %v1115_v3  ;;  %v3577_v16 = vpack.c.bf16 %v2841_v30, %v2809_v0 }
 0x413   :  { %3984 = vmatpush.bf16.msrb.mxu1 %v3321_v8  ;;  %v3258_v17 = vcvt.s32.f32 %v2234_v10  ;;  %v3290_v18 = vcvt.s32.f32 %v2266_v11  ;;  %v2235_v40 = vunpack.c.2.s8 %v1243_v7  ;;  %v2267_v56 = vunpack.c.3.s8 %v1243_v7 }
 0x414   :  { %v3546_v23 = vpack.c.bf16 %v2778_v52, %v2746_v14  ;;  %v2747_v24 = vcvt.s32.f32 %v1723_v9  ;;  %v2779_v21 = vcvt.s32.f32 %v1755_v15  ;;  %3959 = vmatmul.bf16.vlgmr.msra.gmra.mxu3 %v9792_v22  ;;  %3997 = vmatpush.bf16.msrb.mxu2 %v3577_v16  ;;  %v1658_v27 = vunpack.c.0.s8 %v1114_v50 }
 0x415   :  { %v3802_v25 = vpack.c.bf16 %v3290_v18, %v3258_v17  ;;  %v3259_v26 = vcvt.s32.f32 %v2235_v40  ;;  %v1690_v31 = vunpack.c.1.s8 %v1114_v50  ;;  %3972 = vmatmul.bf16.vlgmr.msrb.gmra.mxu0 %v9796_v28  ;;  %v3291_v33 = vcvt.s32.f32 %v2267_v56  ;;  %v1083_v50 = vld [vmem:[#allocation2 + $0x238] sm:$0xff] }
 0x416   :  { %4003 = vmatpush.bf16.msrb.mxu3 %v3546_v23  ;;  %v3547_v32 = vpack.c.bf16 %v2779_v21, %v2747_v24  ;;  %v2170_v29 = vunpack.c.0.s8 %v1242_v57  ;;  %v2202_v34 = vunpack.c.1.s8 %v1242_v57  ;;  %3985 = vmatmul.bf16.vlgmr.msrb.gmra.mxu1 %v9792_v22  ;;  %v2682_v35 = vcvt.s32.f32 %v1658_v27  ;;  %v1211_v57 = vld [vmem:[#allocation2 + $0x638] sm:$0xff]  ;;  %v1050_v27 = vld [vmem:[#allocation2 + $0x130] sm:$0xff] }
 0x417   :  { %4016 = vmatpush.bf16.msra.mxu0 %v3802_v25  ;;  %v2714_v36 = vcvt.s32.f32 %v1690_v31  ;;  %v1659_v37 = vunpack.c.0.s8 %v1115_v3  ;;  %v1691_v38 = vunpack.c.1.s8 %v1115_v3  ;;  %v3803_v41 = vpack.c.bf16 %v3291_v33, %v3259_v26  ;;  %3998 = vmatmul.bf16.vlgmr.msrb.gmra.mxu2 %v9796_v28 }
 0x418   :  { %4029 = vmatpush.bf16.msra.mxu1 %v3547_v32  ;;  %v3194_v42 = vcvt.s32.f32 %v2170_v29  ;;  %v3226_v43 = vcvt.s32.f32 %v2202_v34  ;;  %v2171_v44 = vunpack.c.0.s8 %v1243_v7  ;;  %v2203_v49 = vunpack.c.1.s8 %v1243_v7  ;;  %v1178_v34 = vld [vmem:[#allocation2 + $0x530] sm:$0xff] }
 0x419   :  { %v3514_v46 = vpack.c.bf16 %v2714_v36, %v2682_v35  ;;  %v2683_v48 = vcvt.s32.f32 %v1659_v37  ;;  %v2715_v47 = vcvt.s32.f32 %v1691_v38  ;;  %4042 = vmatpush.bf16.msra.mxu2 %v3803_v41  ;;  %v1594_v55 = vunpack.c.2.s8 %v1082_v39 }
 0x41a   :  { %v3770_v53 = vpack.c.bf16 %v3226_v43, %v3194_v42  ;;  %v3195_v54 = vcvt.s32.f32 %v2171_v44  ;;  %v1626_v51 = vunpack.c.3.s8 %v1082_v39  ;;  %v3227_v60 = vcvt.s32.f32 %v2203_v49 }
 0x41b   :  { %4004 = vmatpush.bf16.msrb.mxu3 %v3514_v46  ;;  %v3515_v58 = vpack.c.bf16 %v2715_v47, %v2683_v48  ;;  %v2106_v62 = vunpack.c.2.s8 %v1210_v45  ;;  %v2138_v1 = vunpack.c.3.s8 %v1210_v45  ;;  %v2618_v3 = vcvt.s32.f32 %v1594_v55 }
 0x41c   :  { %4017 = vmatpush.bf16.msra.mxu0 %v3770_v53  ;;  %v2650_v4 = vcvt.s32.f32 %v1626_v51  ;;  %v1595_v0 = vunpack.c.2.s8 %v1083_v50  ;;  %v1627_v5 = vunpack.c.3.s8 %v1083_v50  ;;  %v3771_v6 = vpack.c.bf16 %v3227_v60, %v3195_v54 }
 0x41d   :  { %4030 = vmatpush.bf16.msra.mxu1 %v3515_v58  ;;  %v3130_v7 = vcvt.s32.f32 %v2106_v62  ;;  %v3162_v8 = vcvt.s32.f32 %v2138_v1  ;;  %v2107_v30 = vunpack.c.2.s8 %v1211_v57  ;;  %v2139_v52 = vunpack.c.3.s8 %v1211_v57 }
 0x41e   :  { %v3482_v10 = vpack.c.bf16 %v2650_v4, %v2618_v3  ;;  %v2619_v11 = vcvt.s32.f32 %v1595_v0  ;;  %v2651_v14 = vcvt.s32.f32 %v1627_v5  ;;  %4043 = vmatpush.bf16.msra.mxu2 %v3771_v6  ;;  %v1530_v16 = vunpack.c.0.s8 %v1082_v39 }
 0x41f   :  { %v3738_v9 = vpack.c.bf16 %v3162_v8, %v3130_v7  ;;  %v3131_v15 = vcvt.s32.f32 %v2107_v30  ;;  %v1562_v17 = vunpack.c.1.s8 %v1082_v39  ;;  %v3163_v40 = vcvt.s32.f32 %v2139_v52  ;;  %v1051_v39 = vld [vmem:[#allocation2 + $0x138] sm:$0xff] }
 0x420   :  { %4005 = vmatpush.bf16.msrb.mxu3 %v3482_v10  ;;  %v3483_v18 = vpack.c.bf16 %v2651_v14, %v2619_v11  ;;  %v2042_v23 = vunpack.c.0.s8 %v1210_v45  ;;  %v2074_v24 = vunpack.c.1.s8 %v1210_v45  ;;  %v2554_v21 = vcvt.s32.f32 %v1530_v16  ;;  %v1179_v45 = vld [vmem:[#allocation2 + $0x538] sm:$0xff]  ;;  %v1018_v16 = vld [vmem:[#allocation2 + $0x30] sm:$0xff] }
 0x421   :  { %4018 = vmatpush.bf16.msra.mxu0 %v3738_v9  ;;  %v2586_v56 = vcvt.s32.f32 %v1562_v17  ;;  %v1531_v25 = vunpack.c.0.s8 %v1083_v50  ;;  %v1563_v26 = vunpack.c.1.s8 %v1083_v50  ;;  %v3739_v31 = vpack.c.bf16 %v3163_v40, %v3131_v15 }
 0x422   :  { %4031 = vmatpush.bf16.msra.mxu1 %v3483_v18  ;;  %v3066_v32 = vcvt.s32.f32 %v2042_v23  ;;  %v3098_v33 = vcvt.s32.f32 %v2074_v24  ;;  %v2043_v29 = vunpack.c.0.s8 %v1211_v57  ;;  %v2075_v38 = vunpack.c.1.s8 %v1211_v57  ;;  %v1146_v24 = vld [vmem:[#allocation2 + $0x430] sm:$0xff] }
 0x423   :  { %v3450_v35 = vpack.c.bf16 %v2586_v56, %v2554_v21  ;;  %v2555_v36 = vcvt.s32.f32 %v1531_v25  ;;  %v2587_v37 = vcvt.s32.f32 %v1563_v26  ;;  %4044 = vmatpush.bf16.msra.mxu2 %v3739_v31  ;;  %v1466_v43 = vunpack.c.2.s8 %v1050_v27 }
 0x424   :  { %v3706_v41 = vpack.c.bf16 %v3098_v33, %v3066_v32  ;;  %v3067_v42 = vcvt.s32.f32 %v2043_v29  ;;  %v1498_v44 = vunpack.c.3.s8 %v1050_v27  ;;  %v3099_v48 = vcvt.s32.f32 %v2075_v38 }
 0x425   :  { %4006 = vmatpush.bf16.msrb.mxu3 %v3450_v35  ;;  %v3451_v46 = vpack.c.bf16 %v2587_v37, %v2555_v36  ;;  %v1978_v47 = vunpack.c.2.s8 %v1178_v34  ;;  %v2010_v49 = vunpack.c.3.s8 %v1178_v34  ;;  %v2490_v50 = vcvt.s32.f32 %v1466_v43 }
 0x426   :  { %4019 = vmatpush.bf16.msra.mxu0 %v3706_v41  ;;  %v2522_v53 = vcvt.s32.f32 %v1498_v44  ;;  %v1467_v54 = vunpack.c.2.s8 %v1051_v39  ;;  %v1499_v55 = vunpack.c.3.s8 %v1051_v39  ;;  %v3707_v51 = vpack.c.bf16 %v3099_v48, %v3067_v42 }
 0x427   :  { %4032 = vmatpush.bf16.msra.mxu1 %v3451_v46  ;;  %v3002_v57 = vcvt.s32.f32 %v1978_v47  ;;  %v3034_v58 = vcvt.s32.f32 %v2010_v49  ;;  %v1979_v60 = vunpack.c.2.s8 %v1179_v45  ;;  %v2011_v4 = vunpack.c.3.s8 %v1179_v45 }
 0x428   :  { %v3418_v62 = vpack.c.bf16 %v2522_v53, %v2490_v50  ;;  %v2491_v1 = vcvt.s32.f32 %v1467_v54  ;;  %v2523_v3 = vcvt.s32.f32 %v1499_v55  ;;  %4045 = vmatpush.bf16.msra.mxu2 %v3707_v51  ;;  %v1402_v6 = vunpack.c.0.s8 %v1050_v27 }
 0x429   :  { %v3674_v0 = vpack.c.bf16 %v3034_v58, %v3002_v57  ;;  %v3003_v5 = vcvt.s32.f32 %v1979_v60  ;;  %v1434_v7 = vunpack.c.1.s8 %v1050_v27  ;;  %v3035_v30 = vcvt.s32.f32 %v2011_v4  ;;  %v1019_v27 = vld [vmem:[#allocation2 + $0x38] sm:$0xff] }
 0x42a   :  { %4007 = vmatpush.bf16.msrb.mxu3 %v3418_v62  ;;  %v3419_v8 = vpack.c.bf16 %v2523_v3, %v2491_v1  ;;  %v1914_v10 = vunpack.c.0.s8 %v1178_v34  ;;  %v1946_v11 = vunpack.c.1.s8 %v1178_v34  ;;  %v2426_v14 = vcvt.s32.f32 %v1402_v6  ;;  %v1147_v34 = vld [vmem:[#allocation2 + $0x438] sm:$0xff]  ;;  %v1116_v6 = vld [vmem:[#allocation2 + $0x340] sm:$0xff] }
 0x42b   :  { %4020 = vmatpush.bf16.msra.mxu0 %v3674_v0  ;;  %v2458_v52 = vcvt.s32.f32 %v1434_v7  ;;  %v1403_v9 = vunpack.c.0.s8 %v1051_v39  ;;  %v1435_v15 = vunpack.c.1.s8 %v1051_v39  ;;  %v3675_v17 = vpack.c.bf16 %v3035_v30, %v3003_v5 }
 0x42c   :  { %4033 = vmatpush.bf16.msra.mxu1 %v3419_v8  ;;  %v2938_v18 = vcvt.s32.f32 %v1914_v10  ;;  %v2970_v40 = vcvt.s32.f32 %v1946_v11  ;;  %v1915_v23 = vunpack.c.0.s8 %v1179_v45  ;;  %v1947_v26 = vunpack.c.1.s8 %v1179_v45  ;;  %v1244_v11 = vld [vmem:[#allocation2 + $0x740] sm:$0xff] }
 0x42d   :  { %v3386_v21 = vpack.c.bf16 %v2458_v52, %v2426_v14  ;;  %v2427_v56 = vcvt.s32.f32 %v1403_v9  ;;  %v2459_v25 = vcvt.s32.f32 %v1435_v15  ;;  %4046 = vmatpush.bf16.msra.mxu2 %v3675_v17  ;;  %v1338_v33 = vunpack.c.2.s8 %v1018_v16 }
 0x42e   :  { %v3642_v31 = vpack.c.bf16 %v2970_v40, %v2938_v18  ;;  %v2939_v32 = vcvt.s32.f32 %v1915_v23  ;;  %v1370_v29 = vunpack.c.3.s8 %v1018_v16  ;;  %v2971_v36 = vcvt.s32.f32 %v1947_v26 }
 0x42f   :  { %4008 = vmatpush.bf16.msrb.mxu3 %v3386_v21  ;;  %v3387_v35 = vpack.c.bf16 %v2459_v25, %v2427_v56  ;;  %v1850_v37 = vunpack.c.2.s8 %v1146_v24  ;;  %v1882_v38 = vunpack.c.3.s8 %v1146_v24  ;;  %v2362_v39 = vcvt.s32.f32 %v1338_v33 }
 0x430   :  { %4021 = vmatpush.bf16.msra.mxu0 %v3642_v31  ;;  %v2394_v41 = vcvt.s32.f32 %v1370_v29  ;;  %v1339_v42 = vunpack.c.2.s8 %v1019_v27  ;;  %v1371_v43 = vunpack.c.3.s8 %v1019_v27  ;;  %v3643_v44 = vpack.c.bf16 %v2971_v36, %v2939_v32 }
 0x431   :  { %4034 = vmatpush.bf16.msra.mxu1 %v3387_v35  ;;  %v2874_v45 = vcvt.s32.f32 %v1850_v37  ;;  %v2906_v46 = vcvt.s32.f32 %v1882_v38  ;;  %v1851_v48 = vunpack.c.2.s8 %v1147_v34  ;;  %v1883_v53 = vunpack.c.3.s8 %v1147_v34 }
 0x432   :  { %v3354_v47 = vpack.c.bf16 %v2394_v41, %v2362_v39  ;;  %v2363_v49 = vcvt.s32.f32 %v1339_v42  ;;  %v2395_v50 = vcvt.s32.f32 %v1371_v43  ;;  %4047 = vmatpush.bf16.msra.mxu2 %v3643_v44  ;;  %v1274_v51 = vunpack.c.0.s8 %v1018_v16 }
 0x433   :  { %v3610_v54 = vpack.c.bf16 %v2906_v46, %v2874_v45  ;;  %v2875_v55 = vcvt.s32.f32 %v1851_v48  ;;  %v1306_v57 = vunpack.c.1.s8 %v1018_v16  ;;  %v2907_v60 = vcvt.s32.f32 %v1883_v53  ;;  %v1117_v16 = vld [vmem:[#allocation2 + $0x348] sm:$0xff] }
 0x434   :  { %4009 = vmatpush.bf16.msrb.mxu3 %v3354_v47  ;;  %v3355_v58 = vpack.c.bf16 %v2395_v50, %v2363_v49  ;;  %v1786_v62 = vunpack.c.0.s8 %v1146_v24  ;;  %v1818_v1 = vunpack.c.1.s8 %v1146_v24  ;;  %v2298_v3 = vcvt.s32.f32 %v1274_v51  ;;  %v1245_v24 = vld [vmem:[#allocation2 + $0x748] sm:$0xff]  ;;  %v1084_v51 = vld [vmem:[#allocation2 + $0x240] sm:$0xff] }
 0x435   :  { %4022 = vmatpush.bf16.msra.mxu0 %v3610_v54  ;;  %v2330_v4 = vcvt.s32.f32 %v1306_v57  ;;  %v1275_v0 = vunpack.c.0.s8 %v1019_v27  ;;  %v1307_v5 = vunpack.c.1.s8 %v1019_v27  ;;  %v3611_v7 = vpack.c.bf16 %v2907_v60, %v2875_v55 }
 0x436   :  { %4035 = vmatpush.bf16.msra.mxu1 %v3355_v58  ;;  %v2810_v8 = vcvt.s32.f32 %v1786_v62  ;;  %v2842_v30 = vcvt.s32.f32 %v1818_v1  ;;  %v1787_v10 = vunpack.c.0.s8 %v1147_v34  ;;  %v1819_v15 = vunpack.c.1.s8 %v1147_v34  ;;  %v1212_v1 = vld [vmem:[#allocation2 + $0x640] sm:$0xff] }
 0x437   :  { %v3322_v14 = vpack.c.bf16 %v2330_v4, %v2298_v3  ;;  %v2299_v52 = vcvt.s32.f32 %v1275_v0  ;;  %v2331_v9 = vcvt.s32.f32 %v1307_v5  ;;  %4048 = vmatpush.bf16.msra.mxu2 %v3611_v7  ;;  %v1724_v40 = vunpack.c.2.s8 %v1116_v6 }
 0x438   :  { %v3578_v17 = vpack.c.bf16 %v2842_v30, %v2810_v8  ;;  %v2811_v18 = vcvt.s32.f32 %v1787_v10  ;;  %v1756_v23 = vunpack.c.3.s8 %v1116_v6  ;;  %v2843_v56 = vcvt.s32.f32 %v1819_v15 }
 0x439   :  { %4010 = vmatpush.bf16.msrb.mxu3 %v3322_v14  ;;  %v3323_v21 = vpack.c.bf16 %v2331_v9, %v2299_v52  ;;  %v2236_v25 = vunpack.c.2.s8 %v1244_v11  ;;  %v2268_v26 = vunpack.c.3.s8 %v1244_v11  ;;  %v2748_v27 = vcvt.s32.f32 %v1724_v40 }
 0x43a   :  { %4023 = vmatpush.bf16.msra.mxu0 %v3578_v17  ;;  %v2780_v31 = vcvt.s32.f32 %v1756_v23  ;;  %v1725_v32 = vunpack.c.2.s8 %v1117_v16  ;;  %v1757_v33 = vunpack.c.3.s8 %v1117_v16  ;;  %v3579_v29 = vpack.c.bf16 %v2843_v56, %v2811_v18 }
 0x43b   :  { %4036 = vmatpush.bf16.msra.mxu1 %v3323_v21  ;;  %v3260_v34 = vcvt.s32.f32 %v2236_v25  ;;  %v3292_v35 = vcvt.s32.f32 %v2268_v26  ;;  %v2237_v36 = vunpack.c.2.s8 %v1245_v24  ;;  %v2269_v41 = vunpack.c.3.s8 %v1245_v24 }
 0x43c   :  { %v3548_v37 = vpack.c.bf16 %v2780_v31, %v2748_v27  ;;  %v2749_v38 = vcvt.s32.f32 %v1725_v32  ;;  %v2781_v39 = vcvt.s32.f32 %v1757_v33  ;;  %4011 = vmatmul.bf16.vlgmr.msrb.gmra.mxu3 %v9792_v22  ;;  %4049 = vmatpush.bf16.msra.mxu2 %v3579_v29  ;;  %v1660_v44 = vunpack.c.0.s8 %v1116_v6 }
 0x43d   :  { %v3804_v42 = vpack.c.bf16 %v3292_v35, %v3260_v34  ;;  %v3261_v43 = vcvt.s32.f32 %v2237_v36  ;;  %v1692_v45 = vunpack.c.1.s8 %v1116_v6  ;;  %4024 = vmatmul.bf16.vlgmr.msra.gmra.mxu0 %v9796_v28  ;;  %v3293_v48 = vcvt.s32.f32 %v2269_v41  ;;  %v1085_v6 = vld [vmem:[#allocation2 + $0x248] sm:$0xff] }
 0x43e   :  { %4055 = vmatpush.bf16.msra.mxu3 %v3548_v37  ;;  %v3549_v46 = vpack.c.bf16 %v2781_v39, %v2749_v38  ;;  %v2172_v47 = vunpack.c.0.s8 %v1244_v11  ;;  %v2204_v49 = vunpack.c.1.s8 %v1244_v11  ;;  %4037 = vmatmul.bf16.vlgmr.msra.gmra.mxu1 %v9792_v22  ;;  %v2684_v50 = vcvt.s32.f32 %v1660_v44  ;;  %v1213_v11 = vld [vmem:[#allocation2 + $0x648] sm:$0xff]  ;;  %v1052_v44 = vld [vmem:[#allocation2 + $0x140] sm:$0xff] }
 0x43f   :  { %4068 = vmatpush.bf16.msrb.mxu0 %v3804_v42  ;;  %v2716_v53 = vcvt.s32.f32 %v1692_v45  ;;  %v1661_v54 = vunpack.c.0.s8 %v1117_v16  ;;  %v1693_v55 = vunpack.c.1.s8 %v1117_v16  ;;  %v3805_v57 = vpack.c.bf16 %v3293_v48, %v3261_v43  ;;  %4050 = vmatmul.bf16.vlgmr.msra.gmra.mxu2 %v9796_v28 }
 0x440   :  { %4081 = vmatpush.bf16.msrb.mxu1 %v3549_v46  ;;  %v3196_v58 = vcvt.s32.f32 %v2172_v47  ;;  %v3228_v60 = vcvt.s32.f32 %v2204_v49  ;;  %v2173_v62 = vunpack.c.0.s8 %v1245_v24  ;;  %v2205_v5 = vunpack.c.1.s8 %v1245_v24  ;;  %v1180_v49 = vld [vmem:[#allocation2 + $0x540] sm:$0xff] }
 0x441   :  { %v3516_v3 = vpack.c.bf16 %v2716_v53, %v2684_v50  ;;  %v2685_v4 = vcvt.s32.f32 %v1661_v54  ;;  %v2717_v0 = vcvt.s32.f32 %v1693_v55  ;;  %4094 = vmatpush.bf16.msrb.mxu2 %v3805_v57  ;;  %v1596_v30 = vunpack.c.2.s8 %v1084_v51 }
 0x442   :  { %v3772_v7 = vpack.c.bf16 %v3228_v60, %v3196_v58  ;;  %v3197_v8 = vcvt.s32.f32 %v2173_v62  ;;  %v1628_v10 = vunpack.c.3.s8 %v1084_v51  ;;  %v3229_v52 = vcvt.s32.f32 %v2205_v5 }
 0x443   :  { %4056 = vmatpush.bf16.msra.mxu3 %v3516_v3  ;;  %v3517_v14 = vpack.c.bf16 %v2717_v0, %v2685_v4  ;;  %v2108_v9 = vunpack.c.2.s8 %v1212_v1  ;;  %v2140_v15 = vunpack.c.3.s8 %v1212_v1  ;;  %v2620_v16 = vcvt.s32.f32 %v1596_v30 }
 0x444   :  { %4069 = vmatpush.bf16.msrb.mxu0 %v3772_v7  ;;  %v2652_v17 = vcvt.s32.f32 %v1628_v10  ;;  %v1597_v18 = vunpack.c.2.s8 %v1085_v6  ;;  %v1629_v40 = vunpack.c.3.s8 %v1085_v6  ;;  %v3773_v23 = vpack.c.bf16 %v3229_v52, %v3197_v8 }
 0x445   :  { %4082 = vmatpush.bf16.msrb.mxu1 %v3517_v14  ;;  %v3132_v24 = vcvt.s32.f32 %v2108_v9  ;;  %v3164_v21 = vcvt.s32.f32 %v2140_v15  ;;  %v2109_v56 = vunpack.c.2.s8 %v1213_v11  ;;  %v2141_v31 = vunpack.c.3.s8 %v1213_v11 }
 0x446   :  { %v3484_v25 = vpack.c.bf16 %v2652_v17, %v2620_v16  ;;  %v2621_v26 = vcvt.s32.f32 %v1597_v18  ;;  %v2653_v27 = vcvt.s32.f32 %v1629_v40  ;;  %4095 = vmatpush.bf16.msrb.mxu2 %v3773_v23  ;;  %v1532_v29 = vunpack.c.0.s8 %v1084_v51 }
 0x447   :  { %v3740_v32 = vpack.c.bf16 %v3164_v21, %v3132_v24  ;;  %v3133_v33 = vcvt.s32.f32 %v2109_v56  ;;  %v1564_v34 = vunpack.c.1.s8 %v1084_v51  ;;  %v3165_v36 = vcvt.s32.f32 %v2141_v31  ;;  %v1053_v51 = vld [vmem:[#allocation2 + $0x148] sm:$0xff] }
 0x448   :  { %4057 = vmatpush.bf16.msra.mxu3 %v3484_v25  ;;  %v3485_v35 = vpack.c.bf16 %v2653_v27, %v2621_v26  ;;  %v2044_v37 = vunpack.c.0.s8 %v1212_v1  ;;  %v2076_v38 = vunpack.c.1.s8 %v1212_v1  ;;  %v2556_v39 = vcvt.s32.f32 %v1532_v29  ;;  %v1181_v1 = vld [vmem:[#allocation2 + $0x548] sm:$0xff]  ;;  %v1020_v29 = vld [vmem:[#allocation2 + $0x40] sm:$0xff] }
 0x449   :  { %4070 = vmatpush.bf16.msrb.mxu0 %v3740_v32  ;;  %v2588_v41 = vcvt.s32.f32 %v1564_v34  ;;  %v1533_v42 = vunpack.c.0.s8 %v1085_v6  ;;  %v1565_v43 = vunpack.c.1.s8 %v1085_v6  ;;  %v3741_v45 = vpack.c.bf16 %v3165_v36, %v3133_v33 }
 0x44a   :  { %4083 = vmatpush.bf16.msrb.mxu1 %v3485_v35  ;;  %v3068_v46 = vcvt.s32.f32 %v2044_v37  ;;  %v3100_v48 = vcvt.s32.f32 %v2076_v38  ;;  %v2045_v47 = vunpack.c.0.s8 %v1213_v11  ;;  %v2077_v55 = vunpack.c.1.s8 %v1213_v11  ;;  %v1148_v38 = vld [vmem:[#allocation2 + $0x440] sm:$0xff] }
 0x44b   :  { %v3452_v50 = vpack.c.bf16 %v2588_v41, %v2556_v39  ;;  %v2557_v53 = vcvt.s32.f32 %v1533_v42  ;;  %v2589_v54 = vcvt.s32.f32 %v1565_v43  ;;  %4096 = vmatpush.bf16.msrb.mxu2 %v3741_v45  ;;  %v1468_v60 = vunpack.c.2.s8 %v1052_v44 }
 0x44c   :  { %v3708_v57 = vpack.c.bf16 %v3100_v48, %v3068_v46  ;;  %v3069_v58 = vcvt.s32.f32 %v2045_v47  ;;  %v1500_v62 = vunpack.c.3.s8 %v1052_v44  ;;  %v3101_v4 = vcvt.s32.f32 %v2077_v55 }
 0x44d   :  { %4058 = vmatpush.bf16.msra.mxu3 %v3452_v50  ;;  %v3453_v3 = vpack.c.bf16 %v2589_v54, %v2557_v53  ;;  %v1980_v0 = vunpack.c.2.s8 %v1180_v49  ;;  %v2012_v5 = vunpack.c.3.s8 %v1180_v49  ;;  %v2492_v6 = vcvt.s32.f32 %v1468_v60 }
 0x44e   :  { %4071 = vmatpush.bf16.msrb.mxu0 %v3708_v57  ;;  %v2524_v7 = vcvt.s32.f32 %v1500_v62  ;;  %v1469_v8 = vunpack.c.2.s8 %v1053_v51  ;;  %v1501_v30 = vunpack.c.3.s8 %v1053_v51  ;;  %v3709_v10 = vpack.c.bf16 %v3101_v4, %v3069_v58 }
 0x44f   :  { %4084 = vmatpush.bf16.msrb.mxu1 %v3453_v3  ;;  %v3004_v11 = vcvt.s32.f32 %v1980_v0  ;;  %v3036_v14 = vcvt.s32.f32 %v2012_v5  ;;  %v1981_v52 = vunpack.c.2.s8 %v1181_v1  ;;  %v2013_v17 = vunpack.c.3.s8 %v1181_v1 }
 0x450   :  { %v3420_v9 = vpack.c.bf16 %v2524_v7, %v2492_v6  ;;  %v2493_v15 = vcvt.s32.f32 %v1469_v8  ;;  %v2525_v16 = vcvt.s32.f32 %v1501_v30  ;;  %4097 = vmatpush.bf16.msrb.mxu2 %v3709_v10  ;;  %v1404_v23 = vunpack.c.0.s8 %v1052_v44 }
 0x451   :  { %v3676_v18 = vpack.c.bf16 %v3036_v14, %v3004_v11  ;;  %v3005_v40 = vcvt.s32.f32 %v1981_v52  ;;  %v1436_v24 = vunpack.c.1.s8 %v1052_v44  ;;  %v3037_v56 = vcvt.s32.f32 %v2013_v17  ;;  %v1021_v44 = vld [vmem:[#allocation2 + $0x48] sm:$0xff] }
 0x452   :  { %4059 = vmatpush.bf16.msra.mxu3 %v3420_v9  ;;  %v3421_v21 = vpack.c.bf16 %v2525_v16, %v2493_v15  ;;  %v1916_v25 = vunpack.c.0.s8 %v1180_v49  ;;  %v1948_v26 = vunpack.c.1.s8 %v1180_v49  ;;  %v2428_v27 = vcvt.s32.f32 %v1404_v23  ;;  %v1149_v49 = vld [vmem:[#allocation2 + $0x448] sm:$0xff]  ;;  %v1118_v23 = vld [vmem:[#allocation2 + $0x350] sm:$0xff] }
 0x453   :  { %4072 = vmatpush.bf16.msrb.mxu0 %v3676_v18  ;;  %v2460_v31 = vcvt.s32.f32 %v1436_v24  ;;  %v1405_v32 = vunpack.c.0.s8 %v1053_v51  ;;  %v1437_v33 = vunpack.c.1.s8 %v1053_v51  ;;  %v3677_v34 = vpack.c.bf16 %v3037_v56, %v3005_v40 }
 0x454   :  { %4085 = vmatpush.bf16.msrb.mxu1 %v3421_v21  ;;  %v2940_v35 = vcvt.s32.f32 %v1916_v25  ;;  %v2972_v36 = vcvt.s32.f32 %v1948_v26  ;;  %v1917_v37 = vunpack.c.0.s8 %v1181_v1  ;;  %v1949_v43 = vunpack.c.1.s8 %v1181_v1  ;;  %v1246_v26 = vld [vmem:[#allocation2 + $0x750] sm:$0xff] }
 0x455   :  { %v3388_v39 = vpack.c.bf16 %v2460_v31, %v2428_v27  ;;  %v2429_v41 = vcvt.s32.f32 %v1405_v32  ;;  %v2461_v42 = vcvt.s32.f32 %v1437_v33  ;;  %4098 = vmatpush.bf16.msrb.mxu2 %v3677_v34  ;;  %v1340_v48 = vunpack.c.2.s8 %v1020_v29 }
 0x456   :  { %v3644_v45 = vpack.c.bf16 %v2972_v36, %v2940_v35  ;;  %v2941_v46 = vcvt.s32.f32 %v1917_v37  ;;  %v1372_v47 = vunpack.c.3.s8 %v1020_v29  ;;  %v2973_v53 = vcvt.s32.f32 %v1949_v43 }
 0x457   :  { %4060 = vmatpush.bf16.msra.mxu3 %v3388_v39  ;;  %v3389_v50 = vpack.c.bf16 %v2461_v42, %v2429_v41  ;;  %v1852_v54 = vunpack.c.2.s8 %v1148_v38  ;;  %v1884_v55 = vunpack.c.3.s8 %v1148_v38  ;;  %v2364_v51 = vcvt.s32.f32 %v1340_v48 }
 0x458   :  { %4073 = vmatpush.bf16.msrb.mxu0 %v3644_v45  ;;  %v2396_v57 = vcvt.s32.f32 %v1372_v47  ;;  %v1341_v58 = vunpack.c.2.s8 %v1021_v44  ;;  %v1373_v60 = vunpack.c.3.s8 %v1021_v44  ;;  %v3645_v62 = vpack.c.bf16 %v2973_v53, %v2941_v46 }
 0x459   :  { %4086 = vmatpush.bf16.msrb.mxu1 %v3389_v50  ;;  %v2876_v1 = vcvt.s32.f32 %v1852_v54  ;;  %v2908_v3 = vcvt.s32.f32 %v1884_v55  ;;  %v1853_v4 = vunpack.c.2.s8 %v1149_v49  ;;  %v1885_v7 = vunpack.c.3.s8 %v1149_v49 }
 0x45a   :  { %v3356_v0 = vpack.c.bf16 %v2396_v57, %v2364_v51  ;;  %v2365_v5 = vcvt.s32.f32 %v1341_v58  ;;  %v2397_v6 = vcvt.s32.f32 %v1373_v60  ;;  %4099 = vmatpush.bf16.msrb.mxu2 %v3645_v62  ;;  %v1276_v10 = vunpack.c.0.s8 %v1020_v29 }
 0x45b   :  { %v3612_v8 = vpack.c.bf16 %v2908_v3, %v2876_v1  ;;  %v2877_v30 = vcvt.s32.f32 %v1853_v4  ;;  %v1308_v11 = vunpack.c.1.s8 %v1020_v29  ;;  %v2909_v52 = vcvt.s32.f32 %v1885_v7  ;;  %v1119_v29 = vld [vmem:[#allocation2 + $0x358] sm:$0xff] }
 0x45c   :  { %4061 = vmatpush.bf16.msra.mxu3 %v3356_v0  ;;  %v3357_v14 = vpack.c.bf16 %v2397_v6, %v2365_v5  ;;  %v1788_v9 = vunpack.c.0.s8 %v1148_v38  ;;  %v1820_v15 = vunpack.c.1.s8 %v1148_v38  ;;  %v2300_v16 = vcvt.s32.f32 %v1276_v10  ;;  %v1247_v38 = vld [vmem:[#allocation2 + $0x758] sm:$0xff]  ;;  %v1086_v10 = vld [vmem:[#allocation2 + $0x250] sm:$0xff] }
 0x45d   :  { %4074 = vmatpush.bf16.msrb.mxu0 %v3612_v8  ;;  %v2332_v17 = vcvt.s32.f32 %v1308_v11  ;;  %v1277_v18 = vunpack.c.0.s8 %v1021_v44  ;;  %v1309_v40 = vunpack.c.1.s8 %v1021_v44  ;;  %v3613_v24 = vpack.c.bf16 %v2909_v52, %v2877_v30 }
 0x45e   :  { %4087 = vmatpush.bf16.msrb.mxu1 %v3357_v14  ;;  %v2812_v21 = vcvt.s32.f32 %v1788_v9  ;;  %v2844_v56 = vcvt.s32.f32 %v1820_v15  ;;  %v1789_v25 = vunpack.c.0.s8 %v1149_v49  ;;  %v1821_v33 = vunpack.c.1.s8 %v1149_v49  ;;  %v1214_v15 = vld [vmem:[#allocation2 + $0x650] sm:$0xff] }
 0x45f   :  { %v3324_v27 = vpack.c.bf16 %v2332_v17, %v2300_v16  ;;  %v2301_v31 = vcvt.s32.f32 %v1277_v18  ;;  %v2333_v32 = vcvt.s32.f32 %v1309_v40  ;;  %4100 = vmatpush.bf16.msrb.mxu2 %v3613_v24  ;;  %v1726_v36 = vunpack.c.2.s8 %v1118_v23 }
 0x460   :  { %v3580_v34 = vpack.c.bf16 %v2844_v56, %v2812_v21  ;;  %v2813_v35 = vcvt.s32.f32 %v1789_v25  ;;  %v1758_v37 = vunpack.c.3.s8 %v1118_v23  ;;  %v2845_v41 = vcvt.s32.f32 %v1821_v33 }
 0x461   :  { %4062 = vmatpush.bf16.msra.mxu3 %v3324_v27  ;;  %v3325_v39 = vpack.c.bf16 %v2333_v32, %v2301_v31  ;;  %v2238_v42 = vunpack.c.2.s8 %v1246_v26  ;;  %v2270_v43 = vunpack.c.3.s8 %v1246_v26  ;;  %v2750_v44 = vcvt.s32.f32 %v1726_v36 }
 0x462   :  { %4075 = vmatpush.bf16.msrb.mxu0 %v3580_v34  ;;  %v2782_v45 = vcvt.s32.f32 %v1758_v37  ;;  %v1727_v46 = vunpack.c.2.s8 %v1119_v29  ;;  %v1759_v48 = vunpack.c.3.s8 %v1119_v29  ;;  %v3581_v47 = vpack.c.bf16 %v2845_v41, %v2813_v35 }
 0x463   :  { %4088 = vmatpush.bf16.msrb.mxu1 %v3325_v39  ;;  %v3262_v49 = vcvt.s32.f32 %v2238_v42  ;;  %v3294_v50 = vcvt.s32.f32 %v2270_v43  ;;  %v2239_v53 = vunpack.c.2.s8 %v1247_v38  ;;  %v2271_v57 = vunpack.c.3.s8 %v1247_v38 }
 0x464   :  { %v3550_v54 = vpack.c.bf16 %v2782_v45, %v2750_v44  ;;  %v2751_v55 = vcvt.s32.f32 %v1727_v46  ;;  %v2783_v51 = vcvt.s32.f32 %v1759_v48  ;;  %4063 = vmatmul.bf16.vlgmr.msra.gmra.mxu3 %v9792_v22  ;;  %4101 = vmatpush.bf16.msrb.mxu2 %v3581_v47  ;;  %v1662_v62 = vunpack.c.0.s8 %v1118_v23 }
 0x465   :  { %v3806_v58 = vpack.c.bf16 %v3294_v50, %v3262_v49  ;;  %v3263_v60 = vcvt.s32.f32 %v2239_v53  ;;  %v1694_v1 = vunpack.c.1.s8 %v1118_v23  ;;  %4076 = vmatmul.bf16.vlgmr.msrb.gmra.mxu0 %v9796_v28  ;;  %v3295_v4 = vcvt.s32.f32 %v2271_v57  ;;  %v1087_v23 = vld [vmem:[#allocation2 + $0x258] sm:$0xff] }
 0x466   :  { %4107 = vmatpush.bf16.msrb.mxu3 %v3550_v54  ;;  %v3551_v3 = vpack.c.bf16 %v2783_v51, %v2751_v55  ;;  %v2174_v0 = vunpack.c.0.s8 %v1246_v26  ;;  %v2206_v5 = vunpack.c.1.s8 %v1246_v26  ;;  %4089 = vmatmul.bf16.vlgmr.msrb.gmra.mxu1 %v9792_v22  ;;  %v2686_v6 = vcvt.s32.f32 %v1662_v62  ;;  %v1215_v26 = vld [vmem:[#allocation2 + $0x658] sm:$0xff]  ;;  %v1054_v62 = vld [vmem:[#allocation2 + $0x150] sm:$0xff] }
 0x467   :  { %4120 = vmatpush.bf16.msra.mxu0 %v3806_v58  ;;  %v2718_v7 = vcvt.s32.f32 %v1694_v1  ;;  %v1663_v8 = vunpack.c.0.s8 %v1119_v29  ;;  %v1695_v30 = vunpack.c.1.s8 %v1119_v29  ;;  %v3807_v11 = vpack.c.bf16 %v3295_v4, %v3263_v60  ;;  %4102 = vmatmul.bf16.vlgmr.msrb.gmra.mxu2 %v9796_v28 }
 0x468   :  { %4133 = vmatpush.bf16.msra.mxu1 %v3551_v3  ;;  %v3198_v14 = vcvt.s32.f32 %v2174_v0  ;;  %v3230_v52 = vcvt.s32.f32 %v2206_v5  ;;  %v2175_v9 = vunpack.c.0.s8 %v1247_v38  ;;  %v2207_v40 = vunpack.c.1.s8 %v1247_v38  ;;  %v1182_v5 = vld [vmem:[#allocation2 + $0x550] sm:$0xff] }
 0x469   :  { %v3518_v16 = vpack.c.bf16 %v2718_v7, %v2686_v6  ;;  %v2687_v17 = vcvt.s32.f32 %v1663_v8  ;;  %v2719_v18 = vcvt.s32.f32 %v1695_v30  ;;  %4146 = vmatpush.bf16.msra.mxu2 %v3807_v11  ;;  %v1598_v56 = vunpack.c.2.s8 %v1086_v10  ;;  %v9817_v6 = vpop.f32.mrf.mxu3  ;;  %v9819_v7 = vpop.f32.mrf.mxu0 }
 0x46a   :  { %v3774_v24 = vpack.c.bf16 %v3230_v52, %v3198_v14  ;;  %v3199_v21 = vcvt.s32.f32 %v2175_v9  ;;  %v1630_v25 = vunpack.c.3.s8 %v1086_v10  ;;  %v3231_v31 = vcvt.s32.f32 %v2207_v40  ;;  %v1055_v14 = vld [vmem:[#allocation2 + $0x158] sm:$0xff]  ;;  %v9821_v52 = vpop.f32.mrf.mxu1  ;;  %v9823_v9 = vpop.f32.mrf.mxu2 }
 0x46b   :  { %4108 = vmatpush.bf16.msrb.mxu3 %v3518_v16  ;;  %v3519_v27 = vpack.c.bf16 %v2719_v18, %v2687_v17  ;;  %v2110_v32 = vunpack.c.2.s8 %v1214_v15  ;;  %v2142_v33 = vunpack.c.3.s8 %v1214_v15  ;;  %v2622_v29 = vcvt.s32.f32 %v1598_v56  ;;  %v1183_v40 = vld [vmem:[#allocation2 + $0x558] sm:$0xff] }
 0x46c   :  { %4121 = vmatpush.bf16.msra.mxu0 %v3774_v24  ;;  %v2654_v34 = vcvt.s32.f32 %v1630_v25  ;;  %v1599_v35 = vunpack.c.2.s8 %v1087_v23  ;;  %v1631_v36 = vunpack.c.3.s8 %v1087_v23  ;;  %v3775_v37 = vpack.c.bf16 %v3231_v31, %v3199_v21 }
 0x46d   :  { %4134 = vmatpush.bf16.msra.mxu1 %v3519_v27  ;;  %v3134_v38 = vcvt.s32.f32 %v2110_v32  ;;  %v3166_v39 = vcvt.s32.f32 %v2142_v33  ;;  %v2111_v41 = vunpack.c.2.s8 %v1215_v26  ;;  %v2143_v45 = vunpack.c.3.s8 %v1215_v26 }
 0x46e   :  { %v3486_v42 = vpack.c.bf16 %v2654_v34, %v2622_v29  ;;  %v2623_v43 = vcvt.s32.f32 %v1599_v35  ;;  %v2655_v44 = vcvt.s32.f32 %v1631_v36  ;;  %4147 = vmatpush.bf16.msra.mxu2 %v3775_v37  ;;  %v1534_v47 = vunpack.c.0.s8 %v1086_v10 }
 0x46f   :  { %v3742_v46 = vpack.c.bf16 %v3166_v39, %v3134_v38  ;;  %v3135_v48 = vcvt.s32.f32 %v2111_v41  ;;  %v1566_v49 = vunpack.c.1.s8 %v1086_v10  ;;  %v3167_v53 = vcvt.s32.f32 %v2143_v45 }
 0x470   :  { %4109 = vmatpush.bf16.msrb.mxu3 %v3486_v42  ;;  %v3487_v50 = vpack.c.bf16 %v2655_v44, %v2623_v43  ;;  %v2046_v54 = vunpack.c.0.s8 %v1214_v15  ;;  %v2078_v55 = vunpack.c.1.s8 %v1214_v15  ;;  %v2558_v51 = vcvt.s32.f32 %v1534_v47 }
 0x471   :  { %4122 = vmatpush.bf16.msra.mxu0 %v3742_v46  ;;  %v2590_v57 = vcvt.s32.f32 %v1566_v49  ;;  %v1535_v58 = vunpack.c.0.s8 %v1087_v23  ;;  %v1567_v60 = vunpack.c.1.s8 %v1087_v23  ;;  %v3743_v1 = vpack.c.bf16 %v3167_v53, %v3135_v48  ;;  %v3858_v47 = vpop.f32.mrf.mxu3  ;;  %v3871_v49 = vpop.f32.mrf.mxu0 }
 0x472   :  { %4135 = vmatpush.bf16.msra.mxu1 %v3487_v50  ;;  %v3070_v3 = vcvt.s32.f32 %v2046_v54  ;;  %v3102_v4 = vcvt.s32.f32 %v2078_v55  ;;  %v2047_v0 = vunpack.c.0.s8 %v1215_v26  ;;  %v2079_v11 = vunpack.c.1.s8 %v1215_v26 }
 0x473   :  { %v3454_v8 = vpack.c.bf16 %v2590_v57, %v2558_v51  ;;  %v2559_v30 = vcvt.s32.f32 %v1535_v58  ;;  %v2591_v10 = vcvt.s32.f32 %v1567_v60  ;;  %4148 = vmatpush.bf16.msra.mxu2 %v3743_v1  ;;  %v1470_v17 = vunpack.c.2.s8 %v1054_v62  ;;  %v1022_v51 = vld [vmem:[#allocation2 + $0x50] sm:$0xff]  ;;  %v3884_v57 = vpop.f32.mrf.mxu1  ;;  %v3897_v58 = vpop.f32.mrf.mxu2 }
 0x474   :  { %v3710_v15 = vpack.c.bf16 %v3102_v4, %v3070_v3  ;;  %v3071_v16 = vcvt.s32.f32 %v2047_v0  ;;  %v1502_v18 = vunpack.c.3.s8 %v1054_v62  ;;  %v3103_v24 = vcvt.s32.f32 %v2079_v11  ;;  %v1150_v4 = vld [vmem:[#allocation2 + $0x450] sm:$0xff]  ;;  %v1248_v58 = vld [vmem:[#allocation2 + $0x760] sm:$0xff] }
 0x475   :  { %4110 = vmatpush.bf16.msrb.mxu3 %v3454_v8  ;;  %v3455_v23 = vpack.c.bf16 %v2591_v10, %v2559_v30  ;;  %v1982_v21 = vunpack.c.2.s8 %v1182_v5  ;;  %v2014_v56 = vunpack.c.3.s8 %v1182_v5  ;;  %v2494_v25 = vcvt.s32.f32 %v1470_v17  ;;  %v1023_v10 = vld [vmem:[#allocation2 + $0x58] sm:$0xff] }
 0x476   :  { %4123 = vmatpush.bf16.msra.mxu0 %v3710_v15  ;;  %v2526_v27 = vcvt.s32.f32 %v1502_v18  ;;  %v1471_v26 = vunpack.c.2.s8 %v1055_v14  ;;  %v1503_v31 = vunpack.c.3.s8 %v1055_v14  ;;  %v3711_v32 = vpack.c.bf16 %v3103_v24, %v3071_v16 }
 0x477   :  { %4136 = vmatpush.bf16.msra.mxu1 %v3455_v23  ;;  %v3006_v33 = vcvt.s32.f32 %v1982_v21  ;;  %v3038_v29 = vcvt.s32.f32 %v2014_v56  ;;  %v1983_v34 = vunpack.c.2.s8 %v1183_v40  ;;  %v2015_v38 = vunpack.c.3.s8 %v1183_v40 }
 0x478   :  { %v3422_v35 = vpack.c.bf16 %v2526_v27, %v2494_v25  ;;  %v2495_v36 = vcvt.s32.f32 %v1471_v26  ;;  %v2527_v37 = vcvt.s32.f32 %v1503_v31  ;;  %4149 = vmatpush.bf16.msra.mxu2 %v3711_v32  ;;  %v1406_v42 = vunpack.c.0.s8 %v1054_v62 }
 0x479   :  { %v3678_v39 = vpack.c.bf16 %v3038_v29, %v3006_v33  ;;  %v3007_v41 = vcvt.s32.f32 %v1983_v34  ;;  %v1438_v43 = vunpack.c.1.s8 %v1054_v62  ;;  %v3039_v45 = vcvt.s32.f32 %v2015_v38 }
 0x47a   :  { %4111 = vmatpush.bf16.msrb.mxu3 %v3422_v35  ;;  %v3423_v44 = vpack.c.bf16 %v2527_v37, %v2495_v36  ;;  %v1918_v46 = vunpack.c.0.s8 %v1182_v5  ;;  %v1950_v48 = vunpack.c.1.s8 %v1182_v5  ;;  %v2430_v50 = vcvt.s32.f32 %v1406_v42 }
 0x47b   :  { %4124 = vmatpush.bf16.msra.mxu0 %v3678_v39  ;;  %v2462_v53 = vcvt.s32.f32 %v1438_v43  ;;  %v1407_v54 = vunpack.c.0.s8 %v1055_v14  ;;  %v1439_v55 = vunpack.c.1.s8 %v1055_v14  ;;  %v3679_v60 = vpack.c.bf16 %v3039_v45, %v3007_v41  ;;  %v1151_v14 = vld [vmem:[#allocation2 + $0x458] sm:$0xff] }
 0x47c   :  { %4137 = vmatpush.bf16.msra.mxu1 %v3423_v44  ;;  %v2942_v1 = vcvt.s32.f32 %v1918_v46  ;;  %v2974_v3 = vcvt.s32.f32 %v1950_v48  ;;  %v1919_v62 = vunpack.c.0.s8 %v1183_v40  ;;  %v1951_v5 = vunpack.c.1.s8 %v1183_v40 }
 0x47d   :  { %v3390_v0 = vpack.c.bf16 %v2462_v53, %v2430_v50  ;;  %v2431_v8 = vcvt.s32.f32 %v1407_v54  ;;  %v2463_v30 = vcvt.s32.f32 %v1439_v55  ;;  %4150 = vmatpush.bf16.msra.mxu2 %v3679_v60  ;;  %v1342_v16 = vunpack.c.2.s8 %v1022_v51  ;;  %v9825_v50 = vld [vmem:[#allocation2 + $0x360] sm:$0xff] }
 0x47e   :  { %v3646_v11 = vpack.c.bf16 %v2974_v3, %v2942_v1  ;;  %v2943_v15 = vcvt.s32.f32 %v1919_v62  ;;  %v1374_v17 = vunpack.c.3.s8 %v1022_v51  ;;  %v2975_v23 = vcvt.s32.f32 %v1951_v5  ;;  %v9827_v62 = vld [vmem:[#allocation2 + $0x368] sm:$0xff] }
 0x47f   :  { %4112 = vmatpush.bf16.msrb.mxu3 %v3390_v0  ;;  %v3391_v18 = vpack.c.bf16 %v2463_v30, %v2431_v8  ;;  %v1854_v24 = vunpack.c.2.s8 %v1150_v4  ;;  %v1886_v21 = vunpack.c.3.s8 %v1150_v4  ;;  %v2366_v56 = vcvt.s32.f32 %v1342_v16  ;;  %v9831_v5 = vld [vmem:[#allocation2 + $0x768] sm:$0xff] }
 0x480   :  { %4125 = vmatpush.bf16.msra.mxu0 %v3646_v11  ;;  %v2398_v25 = vcvt.s32.f32 %v1374_v17  ;;  %v1343_v27 = vunpack.c.2.s8 %v1023_v10  ;;  %v1375_v26 = vunpack.c.3.s8 %v1023_v10  ;;  %v3647_v31 = vpack.c.bf16 %v2975_v23, %v2943_v15  ;;  %v9833_v17 = vpop.f32.mrf.mxu3 }
 0x481   :  { %4138 = vmatpush.bf16.msra.mxu1 %v3391_v18  ;;  %v2878_v40 = vcvt.s32.f32 %v1854_v24  ;;  %v2910_v32 = vcvt.s32.f32 %v1886_v21  ;;  %v1855_v33 = vunpack.c.2.s8 %v1151_v14  ;;  %v1887_v36 = vunpack.c.3.s8 %v1151_v14  ;;  %v9835_v18 = vpop.f32.mrf.mxu0 }
 0x482   :  { %v3358_v29 = vpack.c.bf16 %v2398_v25, %v2366_v56  ;;  %v2367_v34 = vcvt.s32.f32 %v1343_v27  ;;  %v2399_v35 = vcvt.s32.f32 %v1375_v26  ;;  %4151 = vmatpush.bf16.msra.mxu2 %v3647_v31  ;;  %v1278_v39 = vunpack.c.0.s8 %v1022_v51  ;;  %v9839_v56 = vpop.f32.mrf.mxu1  ;;  %v9841_v25 = vpop.f32.mrf.mxu2 }
 0x483   :  { %v3614_v37 = vpack.c.bf16 %v2910_v32, %v2878_v40  ;;  %v2879_v38 = vcvt.s32.f32 %v1855_v33  ;;  %v1310_v41 = vunpack.c.1.s8 %v1022_v51  ;;  %v2911_v43 = vcvt.s32.f32 %v1887_v36 }
 0x484   :  { %4113 = vmatpush.bf16.msrb.mxu3 %v3358_v29  ;;  %v3359_v42 = vpack.c.bf16 %v2399_v35, %v2367_v34  ;;  %v1790_v44 = vunpack.c.0.s8 %v1150_v4  ;;  %v1822_v45 = vunpack.c.1.s8 %v1150_v4  ;;  %v2302_v46 = vcvt.s32.f32 %v1278_v39 }
 0x485   :  { %4126 = vmatpush.bf16.msra.mxu0 %v3614_v37  ;;  %v2334_v48 = vcvt.s32.f32 %v1310_v41  ;;  %v1279_v47 = vunpack.c.0.s8 %v1023_v10  ;;  %v1311_v49 = vunpack.c.1.s8 %v1023_v10  ;;  %v3615_v53 = vpack.c.bf16 %v2911_v43, %v2879_v38 }
 0x486   :  { %4139 = vmatpush.bf16.msra.mxu1 %v3359_v42  ;;  %v2814_v54 = vcvt.s32.f32 %v1790_v44  ;;  %v2846_v55 = vcvt.s32.f32 %v1822_v45  ;;  %v1791_v57 = vunpack.c.0.s8 %v1151_v14  ;;  %v1823_v3 = vunpack.c.1.s8 %v1151_v14 }
 0x487   :  { %v3326_v60 = vpack.c.bf16 %v2334_v48, %v2302_v46  ;;  %v2303_v51 = vcvt.s32.f32 %v1279_v47  ;;  %v2335_v1 = vcvt.s32.f32 %v1311_v49  ;;  %4152 = vmatpush.bf16.msra.mxu2 %v3615_v53  ;;  %v1728_v8 = vunpack.c.2.s8 %v9825_v50 }
 0x488   :  { %v3582_v4 = vpack.c.bf16 %v2846_v55, %v2814_v54  ;;  %v2815_v0 = vcvt.s32.f32 %v1791_v57  ;;  %v1760_v30 = vunpack.c.3.s8 %v9825_v50  ;;  %v2847_v11 = vcvt.s32.f32 %v1823_v3  ;;  %v3910_v48 = vpop.f32.mrf.mxu3  ;;  %v1088_v54 = vld [vmem:[#allocation2 + $0x260] sm:$0xff] }
 0x489   :  { %4114 = vmatpush.bf16.msrb.mxu3 %v3326_v60  ;;  %v3327_v10 = vpack.c.bf16 %v2335_v1, %v2303_v51  ;;  %v2240_v15 = vunpack.c.2.s8 %v1248_v58  ;;  %v2272_v16 = vunpack.c.3.s8 %v1248_v58  ;;  %v2752_v14 = vcvt.s32.f32 %v1728_v8  ;;  %v3923_v47 = vpop.f32.mrf.mxu0 }
 0x48a   :  { %4127 = vmatpush.bf16.msra.mxu0 %v3582_v4  ;;  %v2784_v23 = vcvt.s32.f32 %v1760_v30  ;;  %v1729_v24 = vunpack.c.2.s8 %v9827_v62  ;;  %v1761_v21 = vunpack.c.3.s8 %v9827_v62  ;;  %v3583_v27 = vpack.c.bf16 %v2847_v11, %v2815_v0  ;;  %v3936_v55 = vpop.f32.mrf.mxu1  ;;  %v3949_v57 = vpop.f32.mrf.mxu2  ;;  %v1089_v0 = vld [vmem:[#allocation2 + $0x268] sm:$0xff]  ;;  %v1056_v47 = vld [vmem:[#allocation2 + $0x160] sm:$0xff] }
 0x48b   :  { %4140 = vmatpush.bf16.msra.mxu1 %v3327_v10  ;;  %v3264_v26 = vcvt.s32.f32 %v2240_v15  ;;  %v3296_v31 = vcvt.s32.f32 %v2272_v16  ;;  %v2241_v40 = vunpack.c.2.s8 %v9831_v5  ;;  %v2273_v34 = vunpack.c.3.s8 %v9831_v5  ;;  %v1217_v11 = vld [vmem:[#allocation2 + $0x668] sm:$0xff]  ;;  %v1184_v55 = vld [vmem:[#allocation2 + $0x560] sm:$0xff] }
 0x48c   :  { %v3552_v32 = vpack.c.bf16 %v2784_v23, %v2752_v14  ;;  %v2753_v33 = vcvt.s32.f32 %v1729_v24  ;;  %v2785_v29 = vcvt.s32.f32 %v1761_v21  ;;  %4115 = vmatmul.bf16.vlgmr.msrb.gmra.mxu3 %v9792_v22  ;;  %4153 = vmatpush.bf16.msra.mxu2 %v3583_v27  ;;  %v9848_v37 = vadd.f32 %v9819_v7, %v9817_v6 }
 0x48d   :  { %v3808_v35 = vpack.c.bf16 %v3296_v31, %v3264_v26  ;;  %v3265_v36 = vcvt.s32.f32 %v2241_v40  ;;  %4128 = vmatmul.bf16.vlgmr.msra.gmra.mxu0 %v9796_v28  ;;  %v3297_v39 = vcvt.s32.f32 %v2273_v34  ;;  %v9853_v41 = vadd.f32 %v9823_v9, %v9821_v52 }
 0x48e   :  { %4159 = vmatpush.bf16.msra.mxu3 %v3552_v32  ;;  %v3553_v38 = vpack.c.bf16 %v2785_v29, %v2753_v33  ;;  %4141 = vmatmul.bf16.vlgmr.msra.gmra.mxu1 %v9792_v22  ;;  %v1664_v42 = vunpack.c.0.s8 %v9825_v50  ;;  %v1696_v6 = vunpack.c.1.s8 %v9825_v50  ;;  %v2176_v7 = vunpack.c.0.s8 %v1248_v58  ;;  %v1216_v50 = vld [vmem:[#allocation2 + $0x660] sm:$0xff] }
 0x48f   :  { %4172 = vmatpush.bf16.msrb.mxu0 %v3808_v35  ;;  %v3809_v43 = vpack.c.bf16 %v3297_v39, %v3265_v36  ;;  %4154 = vmatmul.bf16.vlgmr.msra.gmra.mxu2 %v9796_v28  ;;  %v2208_v44 = vunpack.c.1.s8 %v1248_v58  ;;  %v1665_v46 = vunpack.c.0.s8 %v9827_v62  ;;  %v1697_v53 = vunpack.c.1.s8 %v9827_v62 }
 0x490   :  { %4185 = vmatpush.bf16.msrb.mxu1 %v3553_v38  ;;  %v2688_v45 = vcvt.s32.f32 %v1664_v42  ;;  %v2720_v52 = vcvt.s32.f32 %v1696_v6  ;;  %v3200_v9 = vcvt.s32.f32 %v2176_v7  ;;  %v2177_v51 = vunpack.c.0.s8 %v9831_v5 }
 0x491   :  { %4198 = vmatpush.bf16.msrb.mxu2 %v3809_v43  ;;  %v3232_v49 = vcvt.s32.f32 %v2208_v44  ;;  %v2689_v60 = vcvt.s32.f32 %v1665_v46  ;;  %v2721_v3 = vcvt.s32.f32 %v1697_v53  ;;  %v2209_v4 = vunpack.c.1.s8 %v9831_v5 }
 0x492   :  { %v3520_v1 = vpack.c.bf16 %v2720_v52, %v2688_v45  ;;  %v3201_v8 = vcvt.s32.f32 %v2177_v51  ;;  %v1600_v30 = vunpack.c.2.s8 %v1088_v54  ;;  %v1632_v10 = vunpack.c.3.s8 %v1088_v54 }
 0x493   :  { %v3776_v58 = vpack.c.bf16 %v3232_v49, %v3200_v9  ;;  %v3521_v62 = vpack.c.bf16 %v2721_v3, %v2689_v60  ;;  %v3233_v15 = vcvt.s32.f32 %v2209_v4  ;;  %v2112_v16 = vunpack.c.2.s8 %v1216_v50 }
 0x494   :  { %4160 = vmatpush.bf16.msra.mxu3 %v3520_v1  ;;  %v2144_v14 = vunpack.c.3.s8 %v1216_v50  ;;  %v2624_v23 = vcvt.s32.f32 %v1600_v30  ;;  %v2656_v24 = vcvt.s32.f32 %v1632_v10  ;;  %v1601_v21 = vunpack.c.2.s8 %v1089_v0  ;;  %v1057_v1 = vld [vmem:[#allocation2 + $0x168] sm:$0xff] }
 0x495   :  { %4173 = vmatpush.bf16.msrb.mxu0 %v3776_v58  ;;  %v1633_v27 = vunpack.c.3.s8 %v1089_v0  ;;  %4186 = vmatpush.bf16.msrb.mxu1 %v3521_v62  ;;  %v3777_v26 = vpack.c.bf16 %v3233_v15, %v3201_v8  ;;  %v3136_v31 = vcvt.s32.f32 %v2112_v16  ;;  %v2113_v5 = vunpack.c.2.s8 %v1217_v11  ;;  %v1185_v8 = vld [vmem:[#allocation2 + $0x568] sm:$0xff] }
 0x496   :  { %v3168_v40 = vcvt.s32.f32 %v2144_v14  ;;  %v3488_v32 = vpack.c.bf16 %v2656_v24, %v2624_v23  ;;  %v2625_v33 = vcvt.s32.f32 %v1601_v21  ;;  %v2145_v34 = vunpack.c.3.s8 %v1217_v11 }
 0x497   :  { %v2657_v29 = vcvt.s32.f32 %v1633_v27  ;;  %4199 = vmatpush.bf16.msrb.mxu2 %v3777_v26  ;;  %v3137_v36 = vcvt.s32.f32 %v2113_v5  ;;  %v1536_v38 = vunpack.c.0.s8 %v1088_v54  ;;  %v1568_v39 = vunpack.c.1.s8 %v1088_v54 }
 0x498   :  { %v3744_v35 = vpack.c.bf16 %v3168_v40, %v3136_v31  ;;  %4161 = vmatpush.bf16.msra.mxu3 %v3488_v32  ;;  %v3169_v43 = vcvt.s32.f32 %v2145_v34  ;;  %v2048_v6 = vunpack.c.0.s8 %v1216_v50  ;;  %v2080_v7 = vunpack.c.1.s8 %v1216_v50 }
 0x499   :  { %v3489_v42 = vpack.c.bf16 %v2657_v29, %v2625_v33  ;;  %v2560_v44 = vcvt.s32.f32 %v1536_v38  ;;  %v2592_v45 = vcvt.s32.f32 %v1568_v39  ;;  %v1537_v46 = vunpack.c.0.s8 %v1089_v0 }
 0x49a   :  { %4174 = vmatpush.bf16.msrb.mxu0 %v3744_v35  ;;  %v1569_v48 = vunpack.c.1.s8 %v1089_v0  ;;  %v3745_v52 = vpack.c.bf16 %v3169_v43, %v3137_v36  ;;  %v3072_v9 = vcvt.s32.f32 %v2048_v6  ;;  %v3104_v49 = vcvt.s32.f32 %v2080_v7 }
 0x49b   :  { %4187 = vmatpush.bf16.msrb.mxu1 %v3489_v42  ;;  %v2049_v53 = vunpack.c.0.s8 %v1217_v11  ;;  %v3456_v57 = vpack.c.bf16 %v2592_v45, %v2560_v44  ;;  %v2561_v60 = vcvt.s32.f32 %v1537_v46  ;;  %v2081_v51 = vunpack.c.1.s8 %v1217_v11 }
 0x49c   :  { %v2593_v54 = vcvt.s32.f32 %v1569_v48  ;;  %4200 = vmatpush.bf16.msrb.mxu2 %v3745_v52  ;;  %v3712_v58 = vpack.c.bf16 %v3104_v49, %v3072_v9  ;;  %v1472_v3 = vunpack.c.2.s8 %v1056_v47  ;;  %v1504_v4 = vunpack.c.3.s8 %v1056_v47  ;;  %v1024_v48 = vld [vmem:[#allocation2 + $0x60] sm:$0xff] }
 0x49d   :  { %v3073_v50 = vcvt.s32.f32 %v2049_v53  ;;  %4162 = vmatpush.bf16.msra.mxu3 %v3456_v57  ;;  %v3105_v30 = vcvt.s32.f32 %v2081_v51  ;;  %v1984_v10 = vunpack.c.2.s8 %v1184_v55  ;;  %v2016_v62 = vunpack.c.3.s8 %v1184_v55  ;;  %v1152_v49 = vld [vmem:[#allocation2 + $0x460] sm:$0xff] }
 0x49e   :  { %v3457_v0 = vpack.c.bf16 %v2593_v54, %v2561_v60  ;;  %4175 = vmatpush.bf16.msrb.mxu0 %v3712_v58  ;;  %v2496_v15 = vcvt.s32.f32 %v1472_v3  ;;  %v2528_v16 = vcvt.s32.f32 %v1504_v4  ;;  %v1473_v14 = vunpack.c.2.s8 %v1057_v1  ;;  %v1025_v60 = vld [vmem:[#allocation2 + $0x68] sm:$0xff] }
 0x49f   :  { %v1505_v23 = vunpack.c.3.s8 %v1057_v1  ;;  %v3713_v24 = vpack.c.bf16 %v3105_v30, %v3073_v50  ;;  %v3008_v11 = vcvt.s32.f32 %v1984_v10  ;;  %v3040_v21 = vcvt.s32.f32 %v2016_v62 }
 0x4a0   :  { %4188 = vmatpush.bf16.msrb.mxu1 %v3457_v0  ;;  %v1985_v27 = vunpack.c.2.s8 %v1185_v8  ;;  %v3424_v26 = vpack.c.bf16 %v2528_v16, %v2496_v15  ;;  %v2497_v31 = vcvt.s32.f32 %v1473_v14  ;;  %v2017_v5 = vunpack.c.3.s8 %v1185_v8 }
 0x4a1   :  { %v2529_v40 = vcvt.s32.f32 %v1505_v23  ;;  %4201 = vmatpush.bf16.msrb.mxu2 %v3713_v24  ;;  %v3680_v32 = vpack.c.bf16 %v3040_v21, %v3008_v11  ;;  %v9865_v29 = vadd.f32 %v9835_v18, %v9833_v17  ;;  %v9869_v36 = vadd.f32 %v9841_v25, %v9839_v56 }
 0x4a2   :  { %v3009_v33 = vcvt.s32.f32 %v1985_v27  ;;  %4163 = vmatpush.bf16.msra.mxu3 %v3424_v26  ;;  %v3041_v35 = vcvt.s32.f32 %v2017_v5  ;;  %v1408_v38 = vunpack.c.0.s8 %v1056_v47  ;;  %v1440_v42 = vunpack.c.1.s8 %v1056_v47 }
 0x4a3   :  { %v3425_v34 = vpack.c.bf16 %v2529_v40, %v2497_v31  ;;  %4176 = vmatpush.bf16.msrb.mxu0 %v3680_v32  ;;  %v1920_v43 = vunpack.c.0.s8 %v1184_v55  ;;  %v1952_v6 = vunpack.c.1.s8 %v1184_v55  ;;  %v1409_v44 = vunpack.c.0.s8 %v1057_v1  ;;  %v1153_v55 = vld [vmem:[#allocation2 + $0x468] sm:$0xff] }
 0x4a4   :  { %v3681_v39 = vpack.c.bf16 %v3041_v35, %v3009_v33  ;;  %v2432_v7 = vcvt.s32.f32 %v1408_v38  ;;  %v2464_v45 = vcvt.s32.f32 %v1440_v42  ;;  %v1441_v46 = vunpack.c.1.s8 %v1057_v1  ;;  %v1122_v42 = vld [vmem:[#allocation2 + $0x370] sm:$0xff] }
 0x4a5   :  { %4189 = vmatpush.bf16.msrb.mxu1 %v3425_v34  ;;  %v2944_v17 = vcvt.s32.f32 %v1920_v43  ;;  %v2976_v18 = vcvt.s32.f32 %v1952_v6  ;;  %v2433_v52 = vcvt.s32.f32 %v1409_v44  ;;  %v1921_v9 = vunpack.c.0.s8 %v1185_v8 }
 0x4a6   :  { %4202 = vmatpush.bf16.msrb.mxu2 %v3681_v39  ;;  %v3392_v56 = vpack.c.bf16 %v2464_v45, %v2432_v7  ;;  %v2465_v53 = vcvt.s32.f32 %v1441_v46  ;;  %v1953_v57 = vunpack.c.1.s8 %v1185_v8  ;;  %v1344_v47 = vunpack.c.2.s8 %v1024_v48  ;;  %v1250_v45 = vld [vmem:[#allocation2 + $0x770] sm:$0xff] }
 0x4a7   :  { %v3648_v25 = vpack.c.bf16 %v2976_v18, %v2944_v17  ;;  %v2945_v54 = vcvt.s32.f32 %v1921_v9  ;;  %v1376_v51 = vunpack.c.3.s8 %v1024_v48  ;;  %v1856_v3 = vunpack.c.2.s8 %v1152_v49 }
 0x4a8   :  { %4164 = vmatpush.bf16.msra.mxu3 %v3392_v56  ;;  %v3393_v58 = vpack.c.bf16 %v2465_v53, %v2433_v52  ;;  %v2977_v50 = vcvt.s32.f32 %v1953_v57  ;;  %v1888_v4 = vunpack.c.3.s8 %v1152_v49  ;;  %v2368_v1 = vcvt.s32.f32 %v1344_v47  ;;  %v1123_v52 = vld [vmem:[#allocation2 + $0x378] sm:$0xff] }
 0x4a9   :  { %4177 = vmatpush.bf16.msrb.mxu0 %v3648_v25  ;;  %v2400_v0 = vcvt.s32.f32 %v1376_v51  ;;  %v1345_v30 = vunpack.c.2.s8 %v1025_v60  ;;  %v1377_v10 = vunpack.c.3.s8 %v1025_v60  ;;  %v2880_v15 = vcvt.s32.f32 %v1856_v3  ;;  %v1251_v53 = vld [vmem:[#allocation2 + $0x778] sm:$0xff] }
 0x4aa   :  { %4190 = vmatpush.bf16.msrb.mxu1 %v3393_v58  ;;  %v3649_v62 = vpack.c.bf16 %v2977_v50, %v2945_v54  ;;  %v2912_v16 = vcvt.s32.f32 %v1888_v4  ;;  %v1857_v8 = vunpack.c.2.s8 %v1153_v55  ;;  %v1889_v11 = vunpack.c.3.s8 %v1153_v55 }
 0x4ab   :  { %v3360_v14 = vpack.c.bf16 %v2400_v0, %v2368_v1  ;;  %v2369_v23 = vcvt.s32.f32 %v1345_v30  ;;  %v2401_v24 = vcvt.s32.f32 %v1377_v10  ;;  %v1280_v26 = vunpack.c.0.s8 %v1024_v48 }
 0x4ac   :  { %4203 = vmatpush.bf16.msrb.mxu2 %v3649_v62  ;;  %v3616_v21 = vpack.c.bf16 %v2912_v16, %v2880_v15  ;;  %v2881_v27 = vcvt.s32.f32 %v1857_v8  ;;  %v1312_v31 = vunpack.c.1.s8 %v1024_v48  ;;  %v2913_v5 = vcvt.s32.f32 %v1889_v11 }
 0x4ad   :  { %4165 = vmatpush.bf16.msra.mxu3 %v3360_v14  ;;  %v3361_v40 = vpack.c.bf16 %v2401_v24, %v2369_v23  ;;  %v1792_v32 = vunpack.c.0.s8 %v1152_v49  ;;  %v1824_v33 = vunpack.c.1.s8 %v1152_v49  ;;  %v2304_v34 = vcvt.s32.f32 %v1280_v26 }
 0x4ae   :  { %4178 = vmatpush.bf16.msrb.mxu0 %v3616_v21  ;;  %v2336_v35 = vcvt.s32.f32 %v1312_v31  ;;  %v1281_v38 = vunpack.c.0.s8 %v1025_v60  ;;  %v1313_v39 = vunpack.c.1.s8 %v1025_v60  ;;  %v3617_v43 = vpack.c.bf16 %v2913_v5, %v2881_v27 }
 0x4af   :  { %4191 = vmatpush.bf16.msrb.mxu1 %v3361_v40  ;;  %v2816_v6 = vcvt.s32.f32 %v1792_v32  ;;  %v2848_v7 = vcvt.s32.f32 %v1824_v33  ;;  %v1793_v44 = vunpack.c.0.s8 %v1153_v55  ;;  %v1825_v48 = vunpack.c.1.s8 %v1153_v55  ;;  %v1090_v32 = vld [vmem:[#allocation2 + $0x270] sm:$0xff] }
 0x4b0   :  { %v3328_v17 = vpack.c.bf16 %v2336_v35, %v2304_v34  ;;  %v2305_v18 = vcvt.s32.f32 %v1281_v38  ;;  %v2337_v46 = vcvt.s32.f32 %v1313_v39  ;;  %4204 = vmatpush.bf16.msrb.mxu2 %v3617_v43  ;;  %v1730_v56 = vunpack.c.2.s8 %v1122_v42  ;;  %v1218_v39 = vld [vmem:[#allocation2 + $0x670] sm:$0xff] }
 0x4b1   :  { %v3584_v9 = vpack.c.bf16 %v2848_v7, %v2816_v6  ;;  %v2817_v49 = vcvt.s32.f32 %v1793_v44  ;;  %v1762_v25 = vunpack.c.3.s8 %v1122_v42  ;;  %v2849_v60 = vcvt.s32.f32 %v1825_v48  ;;  %v1091_v44 = vld [vmem:[#allocation2 + $0x278] sm:$0xff] }
 0x4b2   :  { %4166 = vmatpush.bf16.msra.mxu3 %v3328_v17  ;;  %v3329_v57 = vpack.c.bf16 %v2337_v46, %v2305_v18  ;;  %v2242_v54 = vunpack.c.2.s8 %v1250_v45  ;;  %v2274_v47 = vunpack.c.3.s8 %v1250_v45  ;;  %v2754_v51 = vcvt.s32.f32 %v1730_v56  ;;  %v1219_v48 = vld [vmem:[#allocation2 + $0x678] sm:$0xff] }
 0x4b3   :  { %4179 = vmatpush.bf16.msrb.mxu0 %v3584_v9  ;;  %v2786_v58 = vcvt.s32.f32 %v1762_v25  ;;  %v1731_v50 = vunpack.c.2.s8 %v1123_v52  ;;  %v1763_v3 = vunpack.c.3.s8 %v1123_v52  ;;  %v3585_v4 = vpack.c.bf16 %v2849_v60, %v2817_v49 }
 0x4b4   :  { %4192 = vmatpush.bf16.msrb.mxu1 %v3329_v57  ;;  %v3266_v55 = vcvt.s32.f32 %v2242_v54  ;;  %v3298_v1 = vcvt.s32.f32 %v2274_v47  ;;  %v2243_v0 = vunpack.c.2.s8 %v1251_v53  ;;  %v2275_v15 = vunpack.c.3.s8 %v1251_v53 }
 0x4b5   :  { %v3554_v30 = vpack.c.bf16 %v2786_v58, %v2754_v51  ;;  %v2755_v10 = vcvt.s32.f32 %v1731_v50  ;;  %v2787_v62 = vcvt.s32.f32 %v1763_v3  ;;  %4167 = vmatmul.bf16.vlgmr.msra.gmra.mxu3 %v9792_v22  ;;  %4205 = vmatpush.bf16.msrb.mxu2 %v3585_v4  ;;  %v1666_v14 = vunpack.c.0.s8 %v1122_v42 }
 0x4b6   :  { %v3810_v16 = vpack.c.bf16 %v3298_v1, %v3266_v55  ;;  %v3267_v8 = vcvt.s32.f32 %v2243_v0  ;;  %v1698_v23 = vunpack.c.1.s8 %v1122_v42  ;;  %4180 = vmatmul.bf16.vlgmr.msrb.gmra.mxu0 %v9796_v28  ;;  %v3299_v11 = vcvt.s32.f32 %v2275_v15 }
 0x4b7   :  { %4211 = vmatpush.bf16.msrb.mxu3 %v3554_v30  ;;  %v3555_v24 = vpack.c.bf16 %v2787_v62, %v2755_v10  ;;  %v2178_v21 = vunpack.c.0.s8 %v1250_v45  ;;  %v2210_v27 = vunpack.c.1.s8 %v1250_v45  ;;  %4193 = vmatmul.bf16.vlgmr.msrb.gmra.mxu1 %v9792_v22  ;;  %v2690_v26 = vcvt.s32.f32 %v1666_v14 }
 0x4b8   :  { %4224 = vmatpush.bf16.msra.mxu0 %v3810_v16  ;;  %v2722_v31 = vcvt.s32.f32 %v1698_v23  ;;  %v1667_v40 = vunpack.c.0.s8 %v1123_v52  ;;  %v1699_v5 = vunpack.c.1.s8 %v1123_v52  ;;  %v3811_v33 = vpack.c.bf16 %v3299_v11, %v3267_v8  ;;  %4206 = vmatmul.bf16.vlgmr.msrb.gmra.mxu2 %v9796_v28 }
 0x4b9   :  { %4237 = vmatpush.bf16.msra.mxu1 %v3555_v24  ;;  %v3202_v34 = vcvt.s32.f32 %v2178_v21  ;;  %v3234_v35 = vcvt.s32.f32 %v2210_v27  ;;  %v2179_v38 = vunpack.c.0.s8 %v1251_v53  ;;  %v2211_v7 = vunpack.c.1.s8 %v1251_v53  ;;  %v1058_v21 = vld [vmem:[#allocation2 + $0x170] sm:$0xff] }
 0x4ba   :  { %v3522_v42 = vpack.c.bf16 %v2722_v31, %v2690_v26  ;;  %v2691_v43 = vcvt.s32.f32 %v1667_v40  ;;  %v2723_v6 = vcvt.s32.f32 %v1699_v5  ;;  %4250 = vmatpush.bf16.msra.mxu2 %v3811_v33  ;;  %v1602_v18 = vunpack.c.2.s8 %v1090_v32  ;;  %v1186_v5 = vld [vmem:[#allocation2 + $0x570] sm:$0xff]  ;;  %v9875_v33 = vpop.f32.mrf.mxu3 }
 0x4bb   :  { %v3778_v45 = vpack.c.bf16 %v3234_v35, %v3202_v34  ;;  %v3203_v17 = vcvt.s32.f32 %v2179_v38  ;;  %v1634_v46 = vunpack.c.3.s8 %v1090_v32  ;;  %v3235_v9 = vcvt.s32.f32 %v2211_v7 }
 0x4bc   :  { %4212 = vmatpush.bf16.msrb.mxu3 %v3522_v42  ;;  %v3523_v52 = vpack.c.bf16 %v2723_v6, %v2691_v43  ;;  %v2114_v49 = vunpack.c.2.s8 %v1218_v39  ;;  %v2146_v56 = vunpack.c.3.s8 %v1218_v39  ;;  %v2626_v25 = vcvt.s32.f32 %v1602_v18  ;;  %v1059_v42 = vld [vmem:[#allocation2 + $0x178] sm:$0xff]  ;;  %v9879_v43 = vpop.f32.mrf.mxu1  ;;  %v9881_v6 = vpop.f32.mrf.mxu2 }
 0x4bd   :  { %4225 = vmatpush.bf16.msra.mxu0 %v3778_v45  ;;  %v2658_v57 = vcvt.s32.f32 %v1634_v46  ;;  %v1603_v60 = vunpack.c.2.s8 %v1091_v44  ;;  %v1635_v54 = vunpack.c.3.s8 %v1091_v44  ;;  %v3779_v47 = vpack.c.bf16 %v3235_v9, %v3203_v17  ;;  %v1187_v18 = vld [vmem:[#allocation2 + $0x578] sm:$0xff] }
 0x4be   :  { %4238 = vmatpush.bf16.msra.mxu1 %v3523_v52  ;;  %v3138_v53 = vcvt.s32.f32 %v2114_v49  ;;  %v3170_v51 = vcvt.s32.f32 %v2146_v56  ;;  %v2115_v58 = vunpack.c.2.s8 %v1219_v48  ;;  %v2147_v55 = vunpack.c.3.s8 %v1219_v48 }
 0x4bf   :  { %v3490_v50 = vpack.c.bf16 %v2658_v57, %v2626_v25  ;;  %v2627_v3 = vcvt.s32.f32 %v1603_v60  ;;  %v2659_v4 = vcvt.s32.f32 %v1635_v54  ;;  %4251 = vmatpush.bf16.msra.mxu2 %v3779_v47  ;;  %v1538_v30 = vunpack.c.0.s8 %v1090_v32 }
 0x4c0   :  { %v3746_v1 = vpack.c.bf16 %v3170_v51, %v3138_v53  ;;  %v3139_v0 = vcvt.s32.f32 %v2115_v58  ;;  %v1570_v10 = vunpack.c.1.s8 %v1090_v32  ;;  %v3171_v15 = vcvt.s32.f32 %v2147_v55  ;;  %v9877_v32 = vpop.f32.mrf.mxu0 }
 0x4c1   :  { %4213 = vmatpush.bf16.msrb.mxu3 %v3490_v50  ;;  %v3491_v62 = vpack.c.bf16 %v2659_v4, %v2627_v3  ;;  %v2050_v16 = vunpack.c.0.s8 %v1218_v39  ;;  %v2082_v8 = vunpack.c.1.s8 %v1218_v39  ;;  %v2562_v14 = vcvt.s32.f32 %v1538_v30 }
 0x4c2   :  { %4226 = vmatpush.bf16.msra.mxu0 %v3746_v1  ;;  %v2594_v23 = vcvt.s32.f32 %v1570_v10  ;;  %v1539_v24 = vunpack.c.0.s8 %v1091_v44  ;;  %v1571_v11 = vunpack.c.1.s8 %v1091_v44  ;;  %v3747_v27 = vpack.c.bf16 %v3171_v15, %v3139_v0 }
 0x4c3   :  { %4239 = vmatpush.bf16.msra.mxu1 %v3491_v62  ;;  %v3074_v26 = vcvt.s32.f32 %v2050_v16  ;;  %v3106_v31 = vcvt.s32.f32 %v2082_v8  ;;  %v2051_v40 = vunpack.c.0.s8 %v1219_v48  ;;  %v2083_v39 = vunpack.c.1.s8 %v1219_v48  ;;  %v3962_v16 = vpop.f32.mrf.mxu3 }
 0x4c4   :  { %v3458_v34 = vpack.c.bf16 %v2594_v23, %v2562_v14  ;;  %v2563_v35 = vcvt.s32.f32 %v1539_v24  ;;  %v2595_v38 = vcvt.s32.f32 %v1571_v11  ;;  %4252 = vmatpush.bf16.msra.mxu2 %v3747_v27  ;;  %v1474_v45 = vunpack.c.2.s8 %v1058_v21  ;;  %v1026_v27 = vld [vmem:[#allocation2 + $0x70] sm:$0xff] }
 0x4c5   :  { %v3714_v7 = vpack.c.bf16 %v3106_v31, %v3074_v26  ;;  %v3075_v44 = vcvt.s32.f32 %v2051_v40  ;;  %v1506_v17 = vunpack.c.3.s8 %v1058_v21  ;;  %v3107_v52 = vcvt.s32.f32 %v2083_v39  ;;  %v3988_v26 = vpop.f32.mrf.mxu1  ;;  %v4001_v31 = vpop.f32.mrf.mxu2 }
 0x4c6   :  { %4214 = vmatpush.bf16.msrb.mxu3 %v3458_v34  ;;  %v3459_v46 = vpack.c.bf16 %v2595_v38, %v2563_v35  ;;  %v1986_v9 = vunpack.c.2.s8 %v1186_v5  ;;  %v2018_v49 = vunpack.c.3.s8 %v1186_v5  ;;  %v2498_v56 = vcvt.s32.f32 %v1474_v45  ;;  %v1154_v38 = vld [vmem:[#allocation2 + $0x470] sm:$0xff]  ;;  %v1027_v45 = vld [vmem:[#allocation2 + $0x78] sm:$0xff]  ;;  %v9883_v26 = vld [vmem:[#allocation2 + $0x380] sm:$0xff] }
 0x4c7   :  { %4227 = vmatpush.bf16.msra.mxu0 %v3714_v7  ;;  %v2530_v25 = vcvt.s32.f32 %v1506_v17  ;;  %v1475_v48 = vunpack.c.2.s8 %v1059_v42  ;;  %v1507_v57 = vunpack.c.3.s8 %v1059_v42  ;;  %v3715_v60 = vpack.c.bf16 %v3107_v52, %v3075_v44 }
 0x4c8   :  { %4240 = vmatpush.bf16.msra.mxu1 %v3459_v46  ;;  %v3010_v54 = vcvt.s32.f32 %v1986_v9  ;;  %v3042_v47 = vcvt.s32.f32 %v2018_v49  ;;  %v1987_v53 = vunpack.c.2.s8 %v1187_v18  ;;  %v2019_v3 = vunpack.c.3.s8 %v1187_v18  ;;  %v3975_v8 = vpop.f32.mrf.mxu0 }
 0x4c9   :  { %v3426_v51 = vpack.c.bf16 %v2530_v25, %v2498_v56  ;;  %v2499_v58 = vcvt.s32.f32 %v1475_v48  ;;  %v2531_v50 = vcvt.s32.f32 %v1507_v57  ;;  %4253 = vmatpush.bf16.msra.mxu2 %v3715_v60  ;;  %v1410_v1 = vunpack.c.0.s8 %v1058_v21 }
 0x4ca   :  { %v3682_v4 = vpack.c.bf16 %v3042_v47, %v3010_v54  ;;  %v3011_v55 = vcvt.s32.f32 %v1987_v53  ;;  %v1442_v0 = vunpack.c.1.s8 %v1058_v21  ;;  %v3043_v10 = vcvt.s32.f32 %v2019_v3 }
 0x4cb   :  { %4215 = vmatpush.bf16.msrb.mxu3 %v3426_v51  ;;  %v3427_v30 = vpack.c.bf16 %v2531_v50, %v2499_v58  ;;  %v1922_v62 = vunpack.c.0.s8 %v1186_v5  ;;  %v1954_v15 = vunpack.c.1.s8 %v1186_v5  ;;  %v2434_v14 = vcvt.s32.f32 %v1410_v1 }
 0x4cc   :  { %4228 = vmatpush.bf16.msra.mxu0 %v3682_v4  ;;  %v2466_v23 = vcvt.s32.f32 %v1442_v0  ;;  %v1411_v24 = vunpack.c.0.s8 %v1059_v42  ;;  %v1443_v11 = vunpack.c.1.s8 %v1059_v42  ;;  %v3683_v40 = vpack.c.bf16 %v3043_v10, %v3011_v55  ;;  %v1155_v42 = vld [vmem:[#allocation2 + $0x478] sm:$0xff] }
 0x4cd   :  { %4241 = vmatpush.bf16.msra.mxu1 %v3427_v30  ;;  %v2946_v34 = vcvt.s32.f32 %v1922_v62  ;;  %v2978_v35 = vcvt.s32.f32 %v1954_v15  ;;  %v1923_v21 = vunpack.c.0.s8 %v1187_v18  ;;  %v1955_v5 = vunpack.c.1.s8 %v1187_v18 }
 0x4ce   :  { %v3394_v39 = vpack.c.bf16 %v2466_v23, %v2434_v14  ;;  %v2435_v7 = vcvt.s32.f32 %v1411_v24  ;;  %v2467_v44 = vcvt.s32.f32 %v1443_v11  ;;  %4254 = vmatpush.bf16.msra.mxu2 %v3683_v40  ;;  %v1346_v52 = vunpack.c.2.s8 %v1026_v27 }
 0x4cf   :  { %v3650_v17 = vpack.c.bf16 %v2978_v35, %v2946_v34  ;;  %v2947_v46 = vcvt.s32.f32 %v1923_v21  ;;  %v1378_v9 = vunpack.c.3.s8 %v1026_v27  ;;  %v2979_v56 = vcvt.s32.f32 %v1955_v5  ;;  %v1252_v21 = vld [vmem:[#allocation2 + $0x780] sm:$0xff]  ;;  %v9885_v5 = vld [vmem:[#allocation2 + $0x388] sm:$0xff] }
 0x4d0   :  { %4216 = vmatpush.bf16.msrb.mxu3 %v3394_v39  ;;  %v3395_v49 = vpack.c.bf16 %v2467_v44, %v2435_v7  ;;  %v1858_v25 = vunpack.c.2.s8 %v1154_v38  ;;  %v1890_v48 = vunpack.c.3.s8 %v1154_v38  ;;  %v2370_v57 = vcvt.s32.f32 %v1346_v52  ;;  %v9889_v52 = vld [vmem:[#allocation2 + $0x788] sm:$0xff] }
 0x4d1   :  { %4229 = vmatpush.bf16.msra.mxu0 %v3650_v17  ;;  %v2402_v60 = vcvt.s32.f32 %v1378_v9  ;;  %v1347_v54 = vunpack.c.2.s8 %v1027_v45  ;;  %v1379_v47 = vunpack.c.3.s8 %v1027_v45  ;;  %v3651_v53 = vpack.c.bf16 %v2979_v56, %v2947_v46 }
 0x4d2   :  { %4242 = vmatpush.bf16.msra.mxu1 %v3395_v49  ;;  %v2882_v18 = vcvt.s32.f32 %v1858_v25  ;;  %v2914_v51 = vcvt.s32.f32 %v1890_v48  ;;  %v1859_v58 = vunpack.c.2.s8 %v1155_v42  ;;  %v1891_v55 = vunpack.c.3.s8 %v1155_v42  ;;  %v9891_v48 = vpop.f32.mrf.mxu3 }
 0x4d3   :  { %v3362_v50 = vpack.c.bf16 %v2402_v60, %v2370_v57  ;;  %v2371_v3 = vcvt.s32.f32 %v1347_v54  ;;  %v2403_v4 = vcvt.s32.f32 %v1379_v47  ;;  %4255 = vmatpush.bf16.msra.mxu2 %v3651_v53  ;;  %v1282_v30 = vunpack.c.0.s8 %v1026_v27  ;;  %v9893_v57 = vpop.f32.mrf.mxu0  ;;  %v9897_v53 = vpop.f32.mrf.mxu1 }
 0x4d4   :  { %v3618_v1 = vpack.c.bf16 %v2914_v51, %v2882_v18  ;;  %v2883_v0 = vcvt.s32.f32 %v1859_v58  ;;  %v1314_v10 = vunpack.c.1.s8 %v1026_v27  ;;  %v2915_v15 = vcvt.s32.f32 %v1891_v55  ;;  %v9899_v18 = vpop.f32.mrf.mxu2 }
 0x4d5   :  { %4217 = vmatpush.bf16.msrb.mxu3 %v3362_v50  ;;  %v3363_v62 = vpack.c.bf16 %v2403_v4, %v2371_v3  ;;  %v1794_v16 = vunpack.c.0.s8 %v1154_v38  ;;  %v1826_v8 = vunpack.c.1.s8 %v1154_v38  ;;  %v2306_v14 = vcvt.s32.f32 %v1282_v30 }
 0x4d6   :  { %4230 = vmatpush.bf16.msra.mxu0 %v3618_v1  ;;  %v2338_v23 = vcvt.s32.f32 %v1314_v10  ;;  %v1283_v24 = vunpack.c.0.s8 %v1027_v45  ;;  %v1315_v11 = vunpack.c.1.s8 %v1027_v45  ;;  %v3619_v31 = vpack.c.bf16 %v2915_v15, %v2883_v0 }
 0x4d7   :  { %4243 = vmatpush.bf16.msra.mxu1 %v3363_v62  ;;  %v2818_v40 = vcvt.s32.f32 %v1794_v16  ;;  %v2850_v34 = vcvt.s32.f32 %v1826_v8  ;;  %v1795_v35 = vunpack.c.0.s8 %v1155_v42  ;;  %v1827_v44 = vunpack.c.1.s8 %v1155_v42 }
 0x4d8   :  { %v3330_v39 = vpack.c.bf16 %v2338_v23, %v2306_v14  ;;  %v2307_v27 = vcvt.s32.f32 %v1283_v24  ;;  %v2339_v7 = vcvt.s32.f32 %v1315_v11  ;;  %4256 = vmatpush.bf16.msra.mxu2 %v3619_v31  ;;  %v1732_v46 = vunpack.c.2.s8 %v9883_v26 }
 0x4d9   :  { %v3586_v38 = vpack.c.bf16 %v2850_v34, %v2818_v40  ;;  %v2819_v17 = vcvt.s32.f32 %v1795_v35  ;;  %v1764_v45 = vunpack.c.3.s8 %v9883_v26  ;;  %v2851_v49 = vcvt.s32.f32 %v1827_v44 }
 0x4da   :  { %4218 = vmatpush.bf16.msrb.mxu3 %v3330_v39  ;;  %v3331_v9 = vpack.c.bf16 %v2339_v7, %v2307_v27  ;;  %v2244_v56 = vunpack.c.2.s8 %v1252_v21  ;;  %v2276_v25 = vunpack.c.3.s8 %v1252_v21  ;;  %v2756_v42 = vcvt.s32.f32 %v1732_v46  ;;  %v4014_v40 = vpop.f32.mrf.mxu3  ;;  %v1092_v27 = vld [vmem:[#allocation2 + $0x280] sm:$0xff] }
 0x4db   :  { %4231 = vmatpush.bf16.msra.mxu0 %v3586_v38  ;;  %v2788_v60 = vcvt.s32.f32 %v1764_v45  ;;  %v1733_v54 = vunpack.c.2.s8 %v9885_v5  ;;  %v1765_v47 = vunpack.c.3.s8 %v9885_v5  ;;  %v3587_v51 = vpack.c.bf16 %v2851_v49, %v2819_v17  ;;  %v4027_v34 = vpop.f32.mrf.mxu0  ;;  %v4040_v7 = vpop.f32.mrf.mxu1  ;;  %v1093_v49 = vld [vmem:[#allocation2 + $0x288] sm:$0xff] }
 0x4dc   :  { %4244 = vmatpush.bf16.msra.mxu1 %v3331_v9  ;;  %v3268_v58 = vcvt.s32.f32 %v2244_v56  ;;  %v3300_v50 = vcvt.s32.f32 %v2276_v25  ;;  %v2245_v3 = vunpack.c.2.s8 %v9889_v52  ;;  %v2277_v0 = vunpack.c.3.s8 %v9889_v52  ;;  %v4053_v44 = vpop.f32.mrf.mxu2 }
 0x4dd   :  { %v3556_v4 = vpack.c.bf16 %v2788_v60, %v2756_v42  ;;  %v2757_v55 = vcvt.s32.f32 %v1733_v54  ;;  %v2789_v1 = vcvt.s32.f32 %v1765_v47  ;;  %4219 = vmatmul.bf16.vlgmr.msrb.gmra.mxu3 %v9792_v22  ;;  %4257 = vmatpush.bf16.msra.mxu2 %v3587_v51  ;;  %v9906_v62 = vadd.f32 %v9877_v32, %v9875_v33  ;;  %v1221_v60 = vld [vmem:[#allocation2 + $0x688] sm:$0xff] }
 0x4de   :  { %v3812_v30 = vpack.c.bf16 %v3300_v50, %v3268_v58  ;;  %v3269_v10 = vcvt.s32.f32 %v2245_v3  ;;  %4232 = vmatmul.bf16.vlgmr.msra.gmra.mxu0 %v9796_v28  ;;  %v3301_v16 = vcvt.s32.f32 %v2277_v0  ;;  %v9911_v8 = vadd.f32 %v9881_v6, %v9879_v43 }
 0x4df   :  { %4263 = vmatpush.bf16.msra.mxu3 %v3556_v4  ;;  %v3557_v15 = vpack.c.bf16 %v2789_v1, %v2757_v55  ;;  %4245 = vmatmul.bf16.vlgmr.msra.gmra.mxu1 %v9792_v22  ;;  %v1668_v14 = vunpack.c.0.s8 %v9883_v26  ;;  %v1700_v33 = vunpack.c.1.s8 %v9883_v26  ;;  %v2180_v32 = vunpack.c.0.s8 %v1252_v21  ;;  %v1220_v26 = vld [vmem:[#allocation2 + $0x680] sm:$0xff] }
 0x4e0   :  { %4276 = vmatpush.bf16.msrb.mxu0 %v3812_v30  ;;  %v3813_v23 = vpack.c.bf16 %v3301_v16, %v3269_v10  ;;  %4258 = vmatmul.bf16.vlgmr.msra.gmra.mxu2 %v9796_v28  ;;  %v2212_v24 = vunpack.c.1.s8 %v1252_v21  ;;  %v1669_v31 = vunpack.c.0.s8 %v9885_v5  ;;  %v1701_v39 = vunpack.c.1.s8 %v9885_v5 }
 0x4e1   :  { %4289 = vmatpush.bf16.msrb.mxu1 %v3557_v15  ;;  %v2692_v11 = vcvt.s32.f32 %v1668_v14  ;;  %v2724_v43 = vcvt.s32.f32 %v1700_v33  ;;  %v3204_v6 = vcvt.s32.f32 %v2180_v32  ;;  %v2181_v17 = vunpack.c.0.s8 %v9889_v52 }
 0x4e2   :  { %4302 = vmatpush.bf16.msrb.mxu2 %v3813_v23  ;;  %v3236_v35 = vcvt.s32.f32 %v2212_v24  ;;  %v2693_v38 = vcvt.s32.f32 %v1669_v31  ;;  %v2725_v45 = vcvt.s32.f32 %v1701_v39  ;;  %v2213_v9 = vunpack.c.1.s8 %v9889_v52  ;;  %v1060_v39 = vld [vmem:[#allocation2 + $0x180] sm:$0xff] }
 0x4e3   :  { %v3524_v46 = vpack.c.bf16 %v2724_v43, %v2692_v11  ;;  %v3205_v56 = vcvt.s32.f32 %v2181_v17  ;;  %v1604_v25 = vunpack.c.2.s8 %v1092_v27  ;;  %v1636_v42 = vunpack.c.3.s8 %v1092_v27 }
 0x4e4   :  { %v3780_v21 = vpack.c.bf16 %v3236_v35, %v3204_v6  ;;  %v3525_v5 = vpack.c.bf16 %v2725_v45, %v2693_v38  ;;  %v3237_v54 = vcvt.s32.f32 %v2213_v9  ;;  %v2116_v47 = vunpack.c.2.s8 %v1220_v26 }
 0x4e5   :  { %4264 = vmatpush.bf16.msra.mxu3 %v3524_v46  ;;  %v2148_v51 = vunpack.c.3.s8 %v1220_v26  ;;  %v2628_v58 = vcvt.s32.f32 %v1604_v25  ;;  %v2660_v50 = vcvt.s32.f32 %v1636_v42  ;;  %v1605_v3 = vunpack.c.2.s8 %v1093_v49  ;;  %v1188_v46 = vld [vmem:[#allocation2 + $0x580] sm:$0xff] }
 0x4e6   :  { %4277 = vmatpush.bf16.msrb.mxu0 %v3780_v21  ;;  %v1637_v4 = vunpack.c.3.s8 %v1093_v49  ;;  %4290 = vmatpush.bf16.msrb.mxu1 %v3525_v5  ;;  %v3781_v55 = vpack.c.bf16 %v3237_v54, %v3205_v56  ;;  %v3140_v1 = vcvt.s32.f32 %v2116_v47  ;;  %v2117_v52 = vunpack.c.2.s8 %v1221_v60  ;;  %v1061_v56 = vld [vmem:[#allocation2 + $0x188] sm:$0xff] }
 0x4e7   :  { %v3172_v0 = vcvt.s32.f32 %v2148_v51  ;;  %v3492_v30 = vpack.c.bf16 %v2660_v50, %v2628_v58  ;;  %v2629_v10 = vcvt.s32.f32 %v1605_v3  ;;  %v2149_v16 = vunpack.c.3.s8 %v1221_v60  ;;  %v1189_v54 = vld [vmem:[#allocation2 + $0x588] sm:$0xff] }
 0x4e8   :  { %v2661_v15 = vcvt.s32.f32 %v1637_v4  ;;  %4303 = vmatpush.bf16.msrb.mxu2 %v3781_v55  ;;  %v3141_v23 = vcvt.s32.f32 %v2117_v52  ;;  %v1540_v33 = vunpack.c.0.s8 %v1092_v27  ;;  %v1572_v32 = vunpack.c.1.s8 %v1092_v27 }
 0x4e9   :  { %v3748_v14 = vpack.c.bf16 %v3172_v0, %v3140_v1  ;;  %4265 = vmatpush.bf16.msra.mxu3 %v3492_v30  ;;  %v3173_v11 = vcvt.s32.f32 %v2149_v16  ;;  %v2052_v31 = vunpack.c.0.s8 %v1220_v26  ;;  %v2084_v40 = vunpack.c.1.s8 %v1220_v26 }
 0x4ea   :  { %v3493_v24 = vpack.c.bf16 %v2661_v15, %v2629_v10  ;;  %v2564_v34 = vcvt.s32.f32 %v1540_v33  ;;  %v2596_v43 = vcvt.s32.f32 %v1572_v32  ;;  %v1541_v6 = vunpack.c.0.s8 %v1093_v49 }
 0x4eb   :  { %4278 = vmatpush.bf16.msrb.mxu0 %v3748_v14  ;;  %v1573_v35 = vunpack.c.1.s8 %v1093_v49  ;;  %v3749_v7 = vpack.c.bf16 %v3173_v11, %v3141_v23  ;;  %v3076_v44 = vcvt.s32.f32 %v2052_v31  ;;  %v3108_v38 = vcvt.s32.f32 %v2084_v40 }
 0x4ec   :  { %4291 = vmatpush.bf16.msrb.mxu1 %v3493_v24  ;;  %v2053_v17 = vunpack.c.0.s8 %v1221_v60  ;;  %v3460_v21 = vpack.c.bf16 %v2596_v43, %v2564_v34  ;;  %v2565_v45 = vcvt.s32.f32 %v1541_v6  ;;  %v2085_v9 = vunpack.c.1.s8 %v1221_v60 }
 0x4ed   :  { %v2597_v27 = vcvt.s32.f32 %v1573_v35  ;;  %4304 = vmatpush.bf16.msrb.mxu2 %v3749_v7  ;;  %v3716_v25 = vpack.c.bf16 %v3108_v38, %v3076_v44  ;;  %v1476_v42 = vunpack.c.2.s8 %v1060_v39  ;;  %v1508_v5 = vunpack.c.3.s8 %v1060_v39 }
 0x4ee   :  { %v3077_v26 = vcvt.s32.f32 %v2053_v17  ;;  %4266 = vmatpush.bf16.msra.mxu3 %v3460_v21  ;;  %v3109_v47 = vcvt.s32.f32 %v2085_v9  ;;  %v1988_v51 = vunpack.c.2.s8 %v1188_v46  ;;  %v2020_v58 = vunpack.c.3.s8 %v1188_v46  ;;  %v1028_v17 = vld [vmem:[#allocation2 + $0x80] sm:$0xff] }
 0x4ef   :  { %v3461_v49 = vpack.c.bf16 %v2597_v27, %v2565_v45  ;;  %4279 = vmatpush.bf16.msrb.mxu0 %v3716_v25  ;;  %v2500_v50 = vcvt.s32.f32 %v1476_v42  ;;  %v2532_v3 = vcvt.s32.f32 %v1508_v5  ;;  %v1477_v4 = vunpack.c.2.s8 %v1061_v56  ;;  %v1156_v27 = vld [vmem:[#allocation2 + $0x480] sm:$0xff] }
 0x4f0   :  { %v1509_v55 = vunpack.c.3.s8 %v1061_v56  ;;  %v3717_v1 = vpack.c.bf16 %v3109_v47, %v3077_v26  ;;  %v3012_v60 = vcvt.s32.f32 %v1988_v51  ;;  %v3044_v0 = vcvt.s32.f32 %v2020_v58  ;;  %v1029_v26 = vld [vmem:[#allocation2 + $0x88] sm:$0xff] }
 0x4f1   :  { %4292 = vmatpush.bf16.msrb.mxu1 %v3461_v49  ;;  %v1989_v52 = vunpack.c.2.s8 %v1189_v54  ;;  %v3428_v30 = vpack.c.bf16 %v2532_v3, %v2500_v50  ;;  %v2501_v10 = vcvt.s32.f32 %v1477_v4  ;;  %v2021_v16 = vunpack.c.3.s8 %v1189_v54 }
 0x4f2   :  { %v2533_v15 = vcvt.s32.f32 %v1509_v55  ;;  %4305 = vmatpush.bf16.msrb.mxu2 %v3717_v1  ;;  %v3684_v14 = vpack.c.bf16 %v3044_v0, %v3012_v60  ;;  %v9923_v33 = vadd.f32 %v9893_v57, %v9891_v48  ;;  %v9927_v11 = vadd.f32 %v9899_v18, %v9897_v53 }
 0x4f3   :  { %v3013_v23 = vcvt.s32.f32 %v1989_v52  ;;  %4267 = vmatpush.bf16.msra.mxu3 %v3428_v30  ;;  %v3045_v24 = vcvt.s32.f32 %v2021_v16  ;;  %v1412_v31 = vunpack.c.0.s8 %v1060_v39  ;;  %v1444_v34 = vunpack.c.1.s8 %v1060_v39 }
 0x4f4   :  { %v3429_v32 = vpack.c.bf16 %v2533_v15, %v2501_v10  ;;  %4280 = vmatpush.bf16.msrb.mxu0 %v3684_v14  ;;  %v1924_v43 = vunpack.c.0.s8 %v1188_v46  ;;  %v1956_v6 = vunpack.c.1.s8 %v1188_v46  ;;  %v1413_v7 = vunpack.c.0.s8 %v1061_v56  ;;  %v1157_v46 = vld [vmem:[#allocation2 + $0x488] sm:$0xff] }
 0x4f5   :  { %v3685_v40 = vpack.c.bf16 %v3045_v24, %v3013_v23  ;;  %v2436_v35 = vcvt.s32.f32 %v1412_v31  ;;  %v2468_v44 = vcvt.s32.f32 %v1444_v34  ;;  %v1445_v38 = vunpack.c.1.s8 %v1061_v56 }
 0x4f6   :  { %4293 = vmatpush.bf16.msrb.mxu1 %v3429_v32  ;;  %v2948_v48 = vcvt.s32.f32 %v1924_v43  ;;  %v2980_v57 = vcvt.s32.f32 %v1956_v6  ;;  %v2437_v21 = vcvt.s32.f32 %v1413_v7  ;;  %v1925_v45 = vunpack.c.0.s8 %v1189_v54  ;;  %v1126_v7 = vld [vmem:[#allocation2 + $0x390] sm:$0xff] }
 0x4f7   :  { %4306 = vmatpush.bf16.msrb.mxu2 %v3685_v40  ;;  %v3396_v53 = vpack.c.bf16 %v2468_v44, %v2436_v35  ;;  %v2469_v9 = vcvt.s32.f32 %v1445_v38  ;;  %v1957_v25 = vunpack.c.1.s8 %v1189_v54  ;;  %v1348_v39 = vunpack.c.2.s8 %v1028_v17 }
 0x4f8   :  { %v3652_v18 = vpack.c.bf16 %v2980_v57, %v2948_v48  ;;  %v2949_v42 = vcvt.s32.f32 %v1925_v45  ;;  %v1380_v5 = vunpack.c.3.s8 %v1028_v17  ;;  %v1860_v51 = vunpack.c.2.s8 %v1156_v27 }
 0x4f9   :  { %4268 = vmatpush.bf16.msra.mxu3 %v3396_v53  ;;  %v3397_v49 = vpack.c.bf16 %v2469_v9, %v2437_v21  ;;  %v2981_v47 = vcvt.s32.f32 %v1957_v25  ;;  %v1892_v58 = vunpack.c.3.s8 %v1156_v27  ;;  %v2372_v56 = vcvt.s32.f32 %v1348_v39  ;;  %v1254_v21 = vld [vmem:[#allocation2 + $0x790] sm:$0xff]  ;;  %v1127_v9 = vld [vmem:[#allocation2 + $0x398] sm:$0xff] }
 0x4fa   :  { %4281 = vmatpush.bf16.msrb.mxu0 %v3652_v18  ;;  %v2404_v50 = vcvt.s32.f32 %v1380_v5  ;;  %v1349_v3 = vunpack.c.2.s8 %v1029_v26  ;;  %v1381_v4 = vunpack.c.3.s8 %v1029_v26  ;;  %v2884_v1 = vcvt.s32.f32 %v1860_v51  ;;  %v1255_v5 = vld [vmem:[#allocation2 + $0x798] sm:$0xff] }
 0x4fb   :  { %4294 = vmatpush.bf16.msrb.mxu1 %v3397_v49  ;;  %v3653_v55 = vpack.c.bf16 %v2981_v47, %v2949_v42  ;;  %v2916_v60 = vcvt.s32.f32 %v1892_v58  ;;  %v1861_v54 = vunpack.c.2.s8 %v1157_v46  ;;  %v1893_v10 = vunpack.c.3.s8 %v1157_v46 }
 0x4fc   :  { %v3364_v0 = vpack.c.bf16 %v2404_v50, %v2372_v56  ;;  %v2373_v52 = vcvt.s32.f32 %v1349_v3  ;;  %v2405_v30 = vcvt.s32.f32 %v1381_v4  ;;  %v1284_v14 = vunpack.c.0.s8 %v1028_v17 }
 0x4fd   :  { %4307 = vmatpush.bf16.msrb.mxu2 %v3653_v55  ;;  %v3620_v15 = vpack.c.bf16 %v2916_v60, %v2884_v1  ;;  %v2885_v16 = vcvt.s32.f32 %v1861_v54  ;;  %v1316_v23 = vunpack.c.1.s8 %v1028_v17  ;;  %v2917_v24 = vcvt.s32.f32 %v1893_v10 }
 0x4fe   :  { %4269 = vmatpush.bf16.msra.mxu3 %v3364_v0  ;;  %v3365_v32 = vpack.c.bf16 %v2405_v30, %v2373_v52  ;;  %v1796_v31 = vunpack.c.0.s8 %v1156_v27  ;;  %v1828_v40 = vunpack.c.1.s8 %v1156_v27  ;;  %v2308_v34 = vcvt.s32.f32 %v1284_v14 }
 0x4ff   :  { %4282 = vmatpush.bf16.msrb.mxu0 %v3620_v15  ;;  %v2340_v43 = vcvt.s32.f32 %v1316_v23  ;;  %v1285_v6 = vunpack.c.0.s8 %v1029_v26  ;;  %v1317_v35 = vunpack.c.1.s8 %v1029_v26  ;;  %v3621_v44 = vpack.c.bf16 %v2917_v24, %v2885_v16 }
 0x500   :  { %4295 = vmatpush.bf16.msrb.mxu1 %v3365_v32  ;;  %v2820_v48 = vcvt.s32.f32 %v1796_v31  ;;  %v2852_v57 = vcvt.s32.f32 %v1828_v40  ;;  %v1797_v38 = vunpack.c.0.s8 %v1157_v46  ;;  %v1829_v18 = vunpack.c.1.s8 %v1157_v46 }
 0x501   :  { %v3332_v45 = vpack.c.bf16 %v2340_v43, %v2308_v34  ;;  %v2309_v53 = vcvt.s32.f32 %v1285_v6  ;;  %v2341_v17 = vcvt.s32.f32 %v1317_v35  ;;  %4308 = vmatpush.bf16.msrb.mxu2 %v3621_v44  ;;  %v1734_v42 = vunpack.c.2.s8 %v1126_v7  ;;  %v1094_v6 = vld [vmem:[#allocation2 + $0x290] sm:$0xff] }
 0x502   :  { %v3588_v25 = vpack.c.bf16 %v2852_v57, %v2820_v48  ;;  %v2821_v27 = vcvt.s32.f32 %v1797_v38  ;;  %v1766_v39 = vunpack.c.3.s8 %v1126_v7  ;;  %v2853_v49 = vcvt.s32.f32 %v1829_v18  ;;  %v1222_v57 = vld [vmem:[#allocation2 + $0x690] sm:$0xff] }
 0x503   :  { %4270 = vmatpush.bf16.msra.mxu3 %v3332_v45  ;;  %v3333_v26 = vpack.c.bf16 %v2341_v17, %v2309_v53  ;;  %v2246_v47 = vunpack.c.2.s8 %v1254_v21  ;;  %v2278_v51 = vunpack.c.3.s8 %v1254_v21  ;;  %v2758_v58 = vcvt.s32.f32 %v1734_v42  ;;  %v1095_v17 = vld [vmem:[#allocation2 + $0x298] sm:$0xff] }
 0x504   :  { %4283 = vmatpush.bf16.msrb.mxu0 %v3588_v25  ;;  %v2790_v56 = vcvt.s32.f32 %v1766_v39  ;;  %v1735_v50 = vunpack.c.2.s8 %v1127_v9  ;;  %v1767_v3 = vunpack.c.3.s8 %v1127_v9  ;;  %v3589_v4 = vpack.c.bf16 %v2853_v49, %v2821_v27 }
 0x505   :  { %4296 = vmatpush.bf16.msrb.mxu1 %v3333_v26  ;;  %v3270_v46 = vcvt.s32.f32 %v2246_v47  ;;  %v3302_v55 = vcvt.s32.f32 %v2278_v51  ;;  %v2247_v1 = vunpack.c.2.s8 %v1255_v5  ;;  %v2279_v52 = vunpack.c.3.s8 %v1255_v5 }
 0x506   :  { %v3558_v60 = vpack.c.bf16 %v2790_v56, %v2758_v58  ;;  %v2759_v54 = vcvt.s32.f32 %v1735_v50  ;;  %v2791_v0 = vcvt.s32.f32 %v1767_v3  ;;  %4271 = vmatmul.bf16.vlgmr.msra.gmra.mxu3 %v9792_v22  ;;  %4309 = vmatpush.bf16.msrb.mxu2 %v3589_v4  ;;  %v1670_v15 = vunpack.c.0.s8 %v1126_v7 }
 0x507   :  { %v3814_v30 = vpack.c.bf16 %v3302_v55, %v3270_v46  ;;  %v3271_v10 = vcvt.s32.f32 %v2247_v1  ;;  %v1702_v16 = vunpack.c.1.s8 %v1126_v7  ;;  %4284 = vmatmul.bf16.vlgmr.msrb.gmra.mxu0 %v9796_v28  ;;  %v3303_v23 = vcvt.s32.f32 %v2279_v52 }
 0x508   :  { %4315 = vmatpush.bf16.msrb.mxu3 %v3558_v60  ;;  %v3559_v14 = vpack.c.bf16 %v2791_v0, %v2759_v54  ;;  %v2182_v32 = vunpack.c.0.s8 %v1254_v21  ;;  %v2214_v24 = vunpack.c.1.s8 %v1254_v21  ;;  %4297 = vmatmul.bf16.vlgmr.msrb.gmra.mxu1 %v9792_v22  ;;  %v2694_v31 = vcvt.s32.f32 %v1670_v15 }
 0x509   :  { %4328 = vmatpush.bf16.msra.mxu0 %v3814_v30  ;;  %v2726_v40 = vcvt.s32.f32 %v1702_v16  ;;  %v1671_v34 = vunpack.c.0.s8 %v1127_v9  ;;  %v1703_v43 = vunpack.c.1.s8 %v1127_v9  ;;  %v3815_v35 = vpack.c.bf16 %v3303_v23, %v3271_v10  ;;  %4310 = vmatmul.bf16.vlgmr.msrb.gmra.mxu2 %v9796_v28  ;;  %v1223_v9 = vld [vmem:[#allocation2 + $0x698] sm:$0xff] }
 0x50a   :  { %4341 = vmatpush.bf16.msra.mxu1 %v3559_v14  ;;  %v3206_v44 = vcvt.s32.f32 %v2182_v32  ;;  %v3238_v48 = vcvt.s32.f32 %v2214_v24  ;;  %v2183_v7 = vunpack.c.0.s8 %v1255_v5  ;;  %v2215_v21 = vunpack.c.1.s8 %v1255_v5 }
 0x50b   :  { %v3526_v38 = vpack.c.bf16 %v2726_v40, %v2694_v31  ;;  %v2695_v45 = vcvt.s32.f32 %v1671_v34  ;;  %v2727_v53 = vcvt.s32.f32 %v1703_v43  ;;  %4354 = vmatpush.bf16.msra.mxu2 %v3815_v35  ;;  %v1606_v27 = vunpack.c.2.s8 %v1094_v6  ;;  %v1062_v34 = vld [vmem:[#allocation2 + $0x190] sm:$0xff] }
 0x50c   :  { %v3782_v18 = vpack.c.bf16 %v3238_v48, %v3206_v44  ;;  %v3207_v25 = vcvt.s32.f32 %v2183_v7  ;;  %v1638_v42 = vunpack.c.3.s8 %v1094_v6  ;;  %v3239_v26 = vcvt.s32.f32 %v2215_v21  ;;  %v1190_v7 = vld [vmem:[#allocation2 + $0x590] sm:$0xff] }
 0x50d   :  { %4316 = vmatpush.bf16.msrb.mxu3 %v3526_v38  ;;  %v3527_v39 = vpack.c.bf16 %v2727_v53, %v2695_v45  ;;  %v2118_v49 = vunpack.c.2.s8 %v1222_v57  ;;  %v2150_v47 = vunpack.c.3.s8 %v1222_v57  ;;  %v2630_v51 = vcvt.s32.f32 %v1606_v27  ;;  %v9933_v38 = vpop.f32.mrf.mxu3  ;;  %v9939_v27 = vpop.f32.mrf.mxu2 }
 0x50e   :  { %4329 = vmatpush.bf16.msra.mxu0 %v3782_v18  ;;  %v2662_v58 = vcvt.s32.f32 %v1638_v42  ;;  %v1607_v56 = vunpack.c.2.s8 %v1095_v17  ;;  %v1639_v50 = vunpack.c.3.s8 %v1095_v17  ;;  %v3783_v3 = vpack.c.bf16 %v3239_v26, %v3207_v25  ;;  %v1063_v18 = vld [vmem:[#allocation2 + $0x198] sm:$0xff]  ;;  %v9937_v25 = vpop.f32.mrf.mxu1 }
 0x50f   :  { %4342 = vmatpush.bf16.msra.mxu1 %v3527_v39  ;;  %v3142_v5 = vcvt.s32.f32 %v2118_v49  ;;  %v3174_v4 = vcvt.s32.f32 %v2150_v47  ;;  %v2119_v46 = vunpack.c.2.s8 %v1223_v9  ;;  %v2151_v54 = vunpack.c.3.s8 %v1223_v9  ;;  %v1191_v49 = vld [vmem:[#allocation2 + $0x598] sm:$0xff] }
 0x510   :  { %v3494_v55 = vpack.c.bf16 %v2662_v58, %v2630_v51  ;;  %v2631_v1 = vcvt.s32.f32 %v1607_v56  ;;  %v2663_v60 = vcvt.s32.f32 %v1639_v50  ;;  %4355 = vmatpush.bf16.msra.mxu2 %v3783_v3  ;;  %v1542_v30 = vunpack.c.0.s8 %v1094_v6 }
 0x511   :  { %v3750_v0 = vpack.c.bf16 %v3174_v4, %v3142_v5  ;;  %v3143_v52 = vcvt.s32.f32 %v2119_v46  ;;  %v1574_v10 = vunpack.c.1.s8 %v1094_v6  ;;  %v3175_v16 = vcvt.s32.f32 %v2151_v54  ;;  %v9935_v6 = vpop.f32.mrf.mxu0 }
 0x512   :  { %4317 = vmatpush.bf16.msrb.mxu3 %v3494_v55  ;;  %v3495_v15 = vpack.c.bf16 %v2663_v60, %v2631_v1  ;;  %v2054_v14 = vunpack.c.0.s8 %v1222_v57  ;;  %v2086_v23 = vunpack.c.1.s8 %v1222_v57  ;;  %v2566_v32 = vcvt.s32.f32 %v1542_v30 }
 0x513   :  { %4330 = vmatpush.bf16.msra.mxu0 %v3750_v0  ;;  %v2598_v24 = vcvt.s32.f32 %v1574_v10  ;;  %v1543_v31 = vunpack.c.0.s8 %v1095_v17  ;;  %v1575_v40 = vunpack.c.1.s8 %v1095_v17  ;;  %v3751_v43 = vpack.c.bf16 %v3175_v16, %v3143_v52 }
 0x514   :  { %4343 = vmatpush.bf16.msra.mxu1 %v3495_v15  ;;  %v3078_v35 = vcvt.s32.f32 %v2054_v14  ;;  %v3110_v44 = vcvt.s32.f32 %v2086_v23  ;;  %v2055_v48 = vunpack.c.0.s8 %v1223_v9  ;;  %v2087_v57 = vunpack.c.1.s8 %v1223_v9 }
 0x515   :  { %v3462_v45 = vpack.c.bf16 %v2598_v24, %v2566_v32  ;;  %v2567_v53 = vcvt.s32.f32 %v1543_v31  ;;  %v2599_v21 = vcvt.s32.f32 %v1575_v40  ;;  %4356 = vmatpush.bf16.msra.mxu2 %v3751_v43  ;;  %v1478_v39 = vunpack.c.2.s8 %v1062_v34  ;;  %v4066_v31 = vpop.f32.mrf.mxu3 }
 0x516   :  { %v3718_v17 = vpack.c.bf16 %v3110_v44, %v3078_v35  ;;  %v3079_v42 = vcvt.s32.f32 %v2055_v48  ;;  %v1510_v26 = vunpack.c.3.s8 %v1062_v34  ;;  %v3111_v51 = vcvt.s32.f32 %v2087_v57 }
 0x517   :  { %4318 = vmatpush.bf16.msrb.mxu3 %v3462_v45  ;;  %v3463_v47 = vpack.c.bf16 %v2599_v21, %v2567_v53  ;;  %v1990_v58 = vunpack.c.2.s8 %v1190_v7  ;;  %v2022_v56 = vunpack.c.3.s8 %v1190_v7  ;;  %v2502_v50 = vcvt.s32.f32 %v1478_v39  ;;  %v1030_v45 = vld [vmem:[#allocation2 + $0x90] sm:$0xff]  ;;  %v4092_v53 = vpop.f32.mrf.mxu1  ;;  %v4105_v21 = vpop.f32.mrf.mxu2 }
 0x518   :  { %4331 = vmatpush.bf16.msra.mxu0 %v3718_v17  ;;  %v2534_v3 = vcvt.s32.f32 %v1510_v26  ;;  %v1479_v9 = vunpack.c.2.s8 %v1063_v18  ;;  %v1511_v5 = vunpack.c.3.s8 %v1063_v18  ;;  %v3719_v4 = vpack.c.bf16 %v3111_v51, %v3079_v42  ;;  %v1158_v39 = vld [vmem:[#allocation2 + $0x490] sm:$0xff] }
 0x519   :  { %4344 = vmatpush.bf16.msra.mxu1 %v3463_v47  ;;  %v3014_v46 = vcvt.s32.f32 %v1990_v58  ;;  %v3046_v55 = vcvt.s32.f32 %v2022_v56  ;;  %v1991_v1 = vunpack.c.2.s8 %v1191_v49  ;;  %v2023_v52 = vunpack.c.3.s8 %v1191_v49  ;;  %v4079_v40 = vpop.f32.mrf.mxu0  ;;  %v1031_v58 = vld [vmem:[#allocation2 + $0x98] sm:$0xff] }
 0x51a   :  { %v3430_v60 = vpack.c.bf16 %v2534_v3, %v2502_v50  ;;  %v2503_v54 = vcvt.s32.f32 %v1479_v9  ;;  %v2535_v0 = vcvt.s32.f32 %v1511_v5  ;;  %4357 = vmatpush.bf16.msra.mxu2 %v3719_v4  ;;  %v1414_v15 = vunpack.c.0.s8 %v1062_v34 }
 0x51b   :  { %v3686_v30 = vpack.c.bf16 %v3046_v55, %v3014_v46  ;;  %v3015_v10 = vcvt.s32.f32 %v1991_v1  ;;  %v1446_v16 = vunpack.c.1.s8 %v1062_v34  ;;  %v3047_v23 = vcvt.s32.f32 %v2023_v52 }
 0x51c   :  { %4319 = vmatpush.bf16.msrb.mxu3 %v3430_v60  ;;  %v3431_v14 = vpack.c.bf16 %v2535_v0, %v2503_v54  ;;  %v1926_v32 = vunpack.c.0.s8 %v1190_v7  ;;  %v1958_v24 = vunpack.c.1.s8 %v1190_v7  ;;  %v2438_v43 = vcvt.s32.f32 %v1414_v15 }
 0x51d   :  { %4332 = vmatpush.bf16.msra.mxu0 %v3686_v30  ;;  %v2470_v35 = vcvt.s32.f32 %v1446_v16  ;;  %v1415_v44 = vunpack.c.0.s8 %v1063_v18  ;;  %v1447_v48 = vunpack.c.1.s8 %v1063_v18  ;;  %v3687_v57 = vpack.c.bf16 %v3047_v23, %v3015_v10  ;;  %v1159_v18 = vld [vmem:[#allocation2 + $0x498] sm:$0xff] }
 0x51e   :  { %4345 = vmatpush.bf16.msra.mxu1 %v3431_v14  ;;  %v2950_v17 = vcvt.s32.f32 %v1926_v32  ;;  %v2982_v42 = vcvt.s32.f32 %v1958_v24  ;;  %v1927_v34 = vunpack.c.0.s8 %v1191_v49  ;;  %v1959_v7 = vunpack.c.1.s8 %v1191_v49 }
 0x51f   :  { %v3398_v26 = vpack.c.bf16 %v2470_v35, %v2438_v43  ;;  %v2439_v47 = vcvt.s32.f32 %v1415_v44  ;;  %v2471_v51 = vcvt.s32.f32 %v1447_v48  ;;  %4358 = vmatpush.bf16.msra.mxu2 %v3687_v57  ;;  %v1350_v3 = vunpack.c.2.s8 %v1030_v45 }
 0x520   :  { %v3654_v56 = vpack.c.bf16 %v2982_v42, %v2950_v17  ;;  %v2951_v50 = vcvt.s32.f32 %v1927_v34  ;;  %v1382_v9 = vunpack.c.3.s8 %v1030_v45  ;;  %v2983_v4 = vcvt.s32.f32 %v1959_v7  ;;  %v9941_v42 = vld [vmem:[#allocation2 + $0x3a0] sm:$0xff] }
 0x521   :  { %4320 = vmatpush.bf16.msrb.mxu3 %v3398_v26  ;;  %v3399_v5 = vpack.c.bf16 %v2471_v51, %v2439_v47  ;;  %v1862_v46 = vunpack.c.2.s8 %v1158_v39  ;;  %v1894_v55 = vunpack.c.3.s8 %v1158_v39  ;;  %v2374_v1 = vcvt.s32.f32 %v1350_v3  ;;  %v9943_v7 = vld [vmem:[#allocation2 + $0x7a0] sm:$0xff] }
 0x522   :  { %4333 = vmatpush.bf16.msra.mxu0 %v3654_v56  ;;  %v2406_v60 = vcvt.s32.f32 %v1382_v9  ;;  %v1351_v54 = vunpack.c.2.s8 %v1031_v58  ;;  %v1383_v0 = vunpack.c.3.s8 %v1031_v58  ;;  %v3655_v52 = vpack.c.bf16 %v2983_v4, %v2951_v50  ;;  %v9945_v9 = vld [vmem:[#allocation2 + $0x3a8] sm:$0xff] }
 0x523   :  { %4346 = vmatpush.bf16.msra.mxu1 %v3399_v5  ;;  %v2886_v49 = vcvt.s32.f32 %v1862_v46  ;;  %v2918_v30 = vcvt.s32.f32 %v1894_v55  ;;  %v1863_v10 = vunpack.c.2.s8 %v1159_v18  ;;  %v1895_v23 = vunpack.c.3.s8 %v1159_v18  ;;  %v9949_v46 = vld [vmem:[#allocation2 + $0x7a8] sm:$0xff] }
 0x524   :  { %v3366_v15 = vpack.c.bf16 %v2406_v60, %v2374_v1  ;;  %v2375_v16 = vcvt.s32.f32 %v1351_v54  ;;  %v2407_v14 = vcvt.s32.f32 %v1383_v0  ;;  %4359 = vmatpush.bf16.msra.mxu2 %v3655_v52  ;;  %v1286_v31 = vunpack.c.0.s8 %v1030_v45  ;;  %v9953_v0 = vpop.f32.mrf.mxu3 }
 0x525   :  { %v3622_v32 = vpack.c.bf16 %v2918_v30, %v2886_v49  ;;  %v2887_v24 = vcvt.s32.f32 %v1863_v10  ;;  %v1318_v40 = vunpack.c.1.s8 %v1030_v45  ;;  %v2919_v35 = vcvt.s32.f32 %v1895_v23 }
 0x526   :  { %4321 = vmatpush.bf16.msrb.mxu3 %v3366_v15  ;;  %v3367_v43 = vpack.c.bf16 %v2407_v14, %v2375_v16  ;;  %v1798_v44 = vunpack.c.0.s8 %v1158_v39  ;;  %v1830_v48 = vunpack.c.1.s8 %v1158_v39  ;;  %v2310_v53 = vcvt.s32.f32 %v1286_v31  ;;  %v9959_v15 = vpop.f32.mrf.mxu1  ;;  %v9961_v16 = vpop.f32.mrf.mxu2 }
 0x527   :  { %4334 = vmatpush.bf16.msra.mxu0 %v3622_v32  ;;  %v2342_v21 = vcvt.s32.f32 %v1318_v40  ;;  %v1287_v57 = vunpack.c.0.s8 %v1031_v58  ;;  %v1319_v17 = vunpack.c.1.s8 %v1031_v58  ;;  %v3623_v34 = vpack.c.bf16 %v2919_v35, %v2887_v24 }
 0x528   :  { %4347 = vmatpush.bf16.msra.mxu1 %v3367_v43  ;;  %v2822_v26 = vcvt.s32.f32 %v1798_v44  ;;  %v2854_v47 = vcvt.s32.f32 %v1830_v48  ;;  %v1799_v51 = vunpack.c.0.s8 %v1159_v18  ;;  %v1831_v3 = vunpack.c.1.s8 %v1159_v18  ;;  %v9955_v18 = vpop.f32.mrf.mxu0 }
 0x529   :  { %v3334_v45 = vpack.c.bf16 %v2342_v21, %v2310_v53  ;;  %v2311_v56 = vcvt.s32.f32 %v1287_v57  ;;  %v2343_v50 = vcvt.s32.f32 %v1319_v17  ;;  %4360 = vmatpush.bf16.msra.mxu2 %v3623_v34  ;;  %v1736_v58 = vunpack.c.2.s8 %v9941_v42 }
 0x52a   :  { %v3590_v39 = vpack.c.bf16 %v2854_v47, %v2822_v26  ;;  %v2823_v5 = vcvt.s32.f32 %v1799_v51  ;;  %v1768_v4 = vunpack.c.3.s8 %v9941_v42  ;;  %v2855_v1 = vcvt.s32.f32 %v1831_v3  ;;  %v9977_v26 = vld [vmem:[#allocation21] sm:$0xff] }
 0x52b   :  { %4322 = vmatpush.bf16.msrb.mxu3 %v3334_v45  ;;  %v3335_v55 = vpack.c.bf16 %v2343_v50, %v2311_v56  ;;  %v2248_v60 = vunpack.c.2.s8 %v9943_v7  ;;  %v2280_v54 = vunpack.c.3.s8 %v9943_v7  ;;  %v2760_v52 = vcvt.s32.f32 %v1736_v58  ;;  %v9979_v47 = vld [vmem:[#allocation20] sm:$0xff] }
 0x52c   :  { %4335 = vmatpush.bf16.msra.mxu0 %v3590_v39  ;;  %v2792_v49 = vcvt.s32.f32 %v1768_v4  ;;  %v1737_v30 = vunpack.c.2.s8 %v9945_v9  ;;  %v1769_v10 = vunpack.c.3.s8 %v9945_v9  ;;  %v3591_v14 = vpack.c.bf16 %v2855_v1, %v2823_v5  ;;  %v4118_v56 = vpop.f32.mrf.mxu3  ;;  %v1096_v4 = vld [vmem:[#allocation2 + $0x2a0] sm:$0xff] }
 0x52d   :  { %4348 = vmatpush.bf16.msra.mxu1 %v3335_v55  ;;  %v3272_v23 = vcvt.s32.f32 %v2248_v60  ;;  %v3304_v32 = vcvt.s32.f32 %v2280_v54  ;;  %v2249_v24 = vunpack.c.2.s8 %v9949_v46  ;;  %v2281_v35 = vunpack.c.3.s8 %v9949_v46 }
 0x52e   :  { %v3560_v31 = vpack.c.bf16 %v2792_v49, %v2760_v52  ;;  %v2761_v40 = vcvt.s32.f32 %v1737_v30  ;;  %v2793_v43 = vcvt.s32.f32 %v1769_v10  ;;  %4323 = vmatmul.bf16.vlgmr.msrb.gmra.mxu3 %v9792_v22  ;;  %4361 = vmatpush.bf16.msra.mxu2 %v3591_v14  ;;  %v9968_v53 = vadd.f32 %v9935_v6, %v9933_v38  ;;  %v4144_v55 = vpop.f32.mrf.mxu1  ;;  %v4157_v1 = vpop.f32.mrf.mxu2  ;;  %v1224_v52 = vld [vmem:[#allocation2 + $0x6a0] sm:$0xff] }
 0x52f   :  { %v3816_v44 = vpack.c.bf16 %v3304_v32, %v3272_v23  ;;  %v3273_v48 = vcvt.s32.f32 %v2249_v24  ;;  %4336 = vmatmul.bf16.vlgmr.msra.gmra.mxu0 %v9796_v28  ;;  %v3305_v57 = vcvt.s32.f32 %v2281_v35  ;;  %v9973_v17 = vadd.f32 %v9939_v27, %v9937_v25  ;;  %v1097_v23 = vld [vmem:[#allocation2 + $0x2a8] sm:$0xff] }
 0x530   :  { %4367 = vmatpush.bf16.msra.mxu3 %v3560_v31  ;;  %v3561_v21 = vpack.c.bf16 %v2793_v43, %v2761_v40  ;;  %4349 = vmatmul.bf16.vlgmr.msra.gmra.mxu1 %v9792_v22  ;;  %v1672_v34 = vunpack.c.0.s8 %v9941_v42  ;;  %v1704_v6 = vunpack.c.1.s8 %v9941_v42  ;;  %v2184_v51 = vunpack.c.0.s8 %v9943_v7  ;;  %v4131_v50 = vpop.f32.mrf.mxu0  ;;  %v1225_v40 = vld [vmem:[#allocation2 + $0x6a8] sm:$0xff] }
 0x531   :  { %4380 = vmatpush.bf16.msrb.mxu0 %v3816_v44  ;;  %v3817_v38 = vpack.c.bf16 %v3305_v57, %v3273_v48  ;;  %4362 = vmatmul.bf16.vlgmr.msra.gmra.mxu2 %v9796_v28  ;;  %v2216_v25 = vunpack.c.1.s8 %v9943_v7  ;;  %v1673_v45 = vunpack.c.0.s8 %v9945_v9  ;;  %v1705_v58 = vunpack.c.1.s8 %v9945_v9 }
 0x532   :  { %4393 = vmatpush.bf16.msrb.mxu1 %v3561_v21  ;;  %v2696_v27 = vcvt.s32.f32 %v1672_v34  ;;  %v2728_v3 = vcvt.s32.f32 %v1704_v6  ;;  %v3208_v39 = vcvt.s32.f32 %v2184_v51  ;;  %v4687_v42 = vperm.slane %v9977_v26, 0 }
 0x533   :  { %4406 = vmatpush.bf16.msrb.mxu2 %v3817_v38  ;;  %v3240_v5 = vcvt.s32.f32 %v2216_v25  ;;  %v4791_v60 = vperm.slane %v9979_v47, 0  ;;  %v2697_v54 = vcvt.s32.f32 %v1673_v45  ;;  %v2185_v7 = vunpack.c.0.s8 %v9949_v46 }
 0x534   :  { %v3528_v49 = vpack.c.bf16 %v2728_v3, %v2696_v27  ;;  %v2729_v10 = vcvt.s32.f32 %v1705_v58  ;;  %v2217_v14 = vunpack.c.1.s8 %v9949_v46  ;;  %v4688_v32 = vperm.slane %v9977_v26, 1 }
 0x535   :  { %v3784_v30 = vpack.c.bf16 %v3240_v5, %v3208_v39  ;;  %v3209_v9 = vcvt.s32.f32 %v2185_v7  ;;  %v1608_v24 = vunpack.c.2.s8 %v1096_v4  ;;  %v1640_v31 = vunpack.c.3.s8 %v1096_v4 }
 0x536   :  { %4368 = vmatpush.bf16.msra.mxu3 %v3528_v49  ;;  %v3529_v43 = vpack.c.bf16 %v2729_v10, %v2697_v54  ;;  %v3241_v35 = vcvt.s32.f32 %v2217_v14  ;;  %v2120_v44 = vunpack.c.2.s8 %v1224_v52  ;;  %v2152_v48 = vunpack.c.3.s8 %v1224_v52 }
 0x537   :  { %4381 = vmatpush.bf16.msrb.mxu0 %v3784_v30  ;;  %v2632_v21 = vcvt.s32.f32 %v1608_v24  ;;  %v2664_v57 = vcvt.s32.f32 %v1640_v31  ;;  %v1609_v34 = vunpack.c.2.s8 %v1097_v23  ;;  %v1641_v38 = vunpack.c.3.s8 %v1097_v23 }
 0x538   :  { %4394 = vmatpush.bf16.msrb.mxu1 %v3529_v43  ;;  %v3785_v6 = vpack.c.bf16 %v3241_v35, %v3209_v9  ;;  %v3144_v46 = vcvt.s32.f32 %v2120_v44  ;;  %v3176_v51 = vcvt.s32.f32 %v2152_v48  ;;  %v2121_v25 = vunpack.c.2.s8 %v1225_v40  ;;  %v1064_v9 = vld [vmem:[#allocation2 + $0x1a0] sm:$0xff] }
 0x539   :  { %v3496_v27 = vpack.c.bf16 %v2664_v57, %v2632_v21  ;;  %v2633_v45 = vcvt.s32.f32 %v1609_v34  ;;  %v2665_v56 = vcvt.s32.f32 %v1641_v38  ;;  %v2153_v50 = vunpack.c.3.s8 %v1225_v40  ;;  %v1192_v44 = vld [vmem:[#allocation2 + $0x5a0] sm:$0xff]  ;;  %v1065_v34 = vld [vmem:[#allocation2 + $0x1a8] sm:$0xff] }
 0x53a   :  { %4407 = vmatpush.bf16.msrb.mxu2 %v3785_v6  ;;  %v3752_v3 = vpack.c.bf16 %v3176_v51, %v3144_v46  ;;  %v3145_v39 = vcvt.s32.f32 %v2121_v25  ;;  %v1544_v5 = vunpack.c.0.s8 %v1096_v4  ;;  %v1576_v58 = vunpack.c.1.s8 %v1096_v4  ;;  %v9992_v51 = vld [vmem:[#allocation2 + $0x5a8] sm:$0xff] }
 0x53b   :  { %4369 = vmatpush.bf16.msra.mxu3 %v3496_v27  ;;  %v3497_v55 = vpack.c.bf16 %v2665_v56, %v2633_v45  ;;  %v3177_v1 = vcvt.s32.f32 %v2153_v50  ;;  %v2056_v54 = vunpack.c.0.s8 %v1224_v52  ;;  %v2088_v7 = vunpack.c.1.s8 %v1224_v52 }
 0x53c   :  { %4382 = vmatpush.bf16.msrb.mxu0 %v3752_v3  ;;  %v2568_v49 = vcvt.s32.f32 %v1544_v5  ;;  %v2600_v30 = vcvt.s32.f32 %v1576_v58  ;;  %v1545_v10 = vunpack.c.0.s8 %v1097_v23  ;;  %v1577_v14 = vunpack.c.1.s8 %v1097_v23 }
 0x53d   :  { %4395 = vmatpush.bf16.msrb.mxu1 %v3497_v55  ;;  %v3753_v24 = vpack.c.bf16 %v3177_v1, %v3145_v39  ;;  %v3080_v31 = vcvt.s32.f32 %v2056_v54  ;;  %v3112_v43 = vcvt.s32.f32 %v2088_v7  ;;  %v2057_v35 = vunpack.c.0.s8 %v1225_v40 }
 0x53e   :  { %v3464_v48 = vpack.c.bf16 %v2600_v30, %v2568_v49  ;;  %v2569_v21 = vcvt.s32.f32 %v1545_v10  ;;  %v2601_v4 = vcvt.s32.f32 %v1577_v14  ;;  %v2089_v57 = vunpack.c.1.s8 %v1225_v40 }
 0x53f   :  { %4408 = vmatpush.bf16.msrb.mxu2 %v3753_v24  ;;  %v3720_v38 = vpack.c.bf16 %v3112_v43, %v3080_v31  ;;  %v3081_v52 = vcvt.s32.f32 %v2057_v35  ;;  %v1480_v6 = vunpack.c.2.s8 %v1064_v9  ;;  %v1512_v46 = vunpack.c.3.s8 %v1064_v9 }
 0x540   :  { %4370 = vmatpush.bf16.msra.mxu3 %v3464_v48  ;;  %v3465_v23 = vpack.c.bf16 %v2601_v4, %v2569_v21  ;;  %v3113_v25 = vcvt.s32.f32 %v2089_v57  ;;  %v1992_v27 = vunpack.c.2.s8 %v1192_v44  ;;  %v2024_v45 = vunpack.c.3.s8 %v1192_v44 }
 0x541   :  { %4383 = vmatpush.bf16.msrb.mxu0 %v3720_v38  ;;  %v2504_v56 = vcvt.s32.f32 %v1480_v6  ;;  %v2536_v50 = vcvt.s32.f32 %v1512_v46  ;;  %v1481_v3 = vunpack.c.2.s8 %v1065_v34  ;;  %v1513_v39 = vunpack.c.3.s8 %v1065_v34 }
 0x542   :  { %4396 = vmatpush.bf16.msrb.mxu1 %v3465_v23  ;;  %v3721_v40 = vpack.c.bf16 %v3113_v25, %v3081_v52  ;;  %v3016_v5 = vcvt.s32.f32 %v1992_v27  ;;  %v3048_v58 = vcvt.s32.f32 %v2024_v45  ;;  %v1993_v55 = vunpack.c.2.s8 %v9992_v51 }
 0x543   :  { %v3432_v1 = vpack.c.bf16 %v2536_v50, %v2504_v56  ;;  %v2505_v54 = vcvt.s32.f32 %v1481_v3  ;;  %v2537_v7 = vcvt.s32.f32 %v1513_v39  ;;  %v2025_v49 = vunpack.c.3.s8 %v9992_v51  ;;  %v1033_v50 = vld [vmem:[#allocation2 + $0xa8] sm:$0xff] }
 0x544   :  { %v4751_v30 = vmul.f32 %v4687_v42, %v9848_v37  ;;  %4409 = vmatpush.bf16.msrb.mxu2 %v3721_v40  ;;  %v3688_v10 = vpack.c.bf16 %v3048_v58, %v3016_v5  ;;  %v3017_v14 = vcvt.s32.f32 %v1993_v55  ;;  %v10001_v24 = vadd.f32 %v9955_v18, %v9953_v0  ;;  %v1161_v5 = vld [vmem:[#allocation2 + $0x4a8] sm:$0xff] }
 0x545   :  { %4371 = vmatpush.bf16.msra.mxu3 %v3432_v1  ;;  %v3433_v31 = vpack.c.bf16 %v2537_v7, %v2505_v54  ;;  %v3049_v43 = vcvt.s32.f32 %v2025_v49  ;;  %v10005_v35 = vadd.f32 %v9961_v16, %v9959_v15  ;;  %v4752_v48 = vmul.f32 %v4688_v32, %v9853_v41  ;;  %v1032_v32 = vld [vmem:[#allocation2 + $0xa0] sm:$0xff] }
 0x546   :  { %v4792_v37 = vperm.slane %v9979_v47, 1  ;;  %4384 = vmatpush.bf16.msrb.mxu0 %v3688_v10  ;;  %v1416_v42 = vunpack.c.0.s8 %v1064_v9  ;;  %v1448_v4 = vunpack.c.1.s8 %v1064_v9  ;;  %v1928_v0 = vunpack.c.0.s8 %v1192_v44 }
 0x547   :  { %4397 = vmatpush.bf16.msrb.mxu1 %v3433_v31  ;;  %v3689_v21 = vpack.c.bf16 %v3049_v43, %v3017_v14  ;;  %v1960_v18 = vunpack.c.1.s8 %v1192_v44  ;;  %v10013_v57 = vadd.f32 %v4791_v60, %v4751_v30  ;;  %v1417_v15 = vunpack.c.0.s8 %v1065_v34  ;;  %v1160_v44 = vld [vmem:[#allocation2 + $0x4a0] sm:$0xff] }
 0x548   :  { %v2440_v38 = vcvt.s32.f32 %v1416_v42  ;;  %v2472_v16 = vcvt.s32.f32 %v1448_v4  ;;  %v2952_v52 = vcvt.s32.f32 %v1928_v0  ;;  %v1449_v41 = vunpack.c.1.s8 %v1065_v34 }
 0x549   :  { %4410 = vmatpush.bf16.msrb.mxu2 %v3689_v21  ;;  %v2984_v6 = vcvt.s32.f32 %v1960_v18  ;;  %v10015_v46 = vadd.f32 %v4792_v37, %v4752_v48  ;;  %v4689_v23 = vperm.slane %v9977_v26, 2  ;;  %v2441_v25 = vcvt.s32.f32 %v1417_v15 }
 0x54a   :  { %v1929_v9 = vunpack.c.0.s8 %v9992_v51  ;;  %v3400_v27 = vpack.c.bf16 %v2472_v16, %v2440_v38  ;;  %v2473_v60 = vcvt.s32.f32 %v1449_v41  ;;  %v1961_v56 = vunpack.c.1.s8 %v9992_v51 }
 0x54b   :  { %v3656_v45 = vpack.c.bf16 %v2984_v6, %v2952_v52  ;;  %v4793_v3 = vperm.slane %v9979_v47, 2  ;;  %v1352_v40 = vunpack.c.2.s8 %v1032_v32  ;;  %v1384_v34 = vunpack.c.3.s8 %v1032_v32 }
 0x54c   :  { %v2953_v39 = vcvt.s32.f32 %v1929_v9  ;;  %4372 = vmatpush.bf16.msra.mxu3 %v3400_v27  ;;  %v3401_v58 = vpack.c.bf16 %v2473_v60, %v2441_v25  ;;  %v2985_v55 = vcvt.s32.f32 %v1961_v56  ;;  %v1864_v1 = vunpack.c.2.s8 %v1160_v44 }
 0x54d   :  { %4385 = vmatpush.bf16.msrb.mxu0 %v3656_v45  ;;  %v1896_v54 = vunpack.c.3.s8 %v1160_v44  ;;  %v2376_v7 = vcvt.s32.f32 %v1352_v40  ;;  %v2408_v49 = vcvt.s32.f32 %v1384_v34  ;;  %v1353_v30 = vunpack.c.2.s8 %v1033_v50  ;;  %v1130_v45 = vld [vmem:[#allocation2 + $0x3b0] sm:$0xff] }
 0x54e   :  { %v1385_v10 = vunpack.c.3.s8 %v1033_v50  ;;  %4398 = vmatpush.bf16.msrb.mxu1 %v3401_v58  ;;  %v3657_v14 = vpack.c.bf16 %v2985_v55, %v2953_v39  ;;  %v2888_v51 = vcvt.s32.f32 %v1864_v1  ;;  %v1865_v43 = vunpack.c.2.s8 %v1161_v5  ;;  %v1258_v34 = vld [vmem:[#allocation2 + $0x7b0] sm:$0xff] }
 0x54f   :  { %v2920_v31 = vcvt.s32.f32 %v1896_v54  ;;  %v3368_v48 = vpack.c.bf16 %v2408_v49, %v2376_v7  ;;  %v2377_v37 = vcvt.s32.f32 %v1353_v30  ;;  %v1897_v21 = vunpack.c.3.s8 %v1161_v5  ;;  %v1131_v54 = vld [vmem:[#allocation2 + $0x3b8] sm:$0xff] }
 0x550   :  { %v2409_v42 = vcvt.s32.f32 %v1385_v10  ;;  %4411 = vmatpush.bf16.msrb.mxu2 %v3657_v14  ;;  %v2889_v0 = vcvt.s32.f32 %v1865_v43  ;;  %v1288_v18 = vunpack.c.0.s8 %v1032_v32  ;;  %v1320_v38 = vunpack.c.1.s8 %v1032_v32  ;;  %v1259_v10 = vld [vmem:[#allocation2 + $0x7b8] sm:$0xff] }
 0x551   :  { %v3624_v4 = vpack.c.bf16 %v2920_v31, %v2888_v51  ;;  %4373 = vmatpush.bf16.msra.mxu3 %v3368_v48  ;;  %v2921_v16 = vcvt.s32.f32 %v1897_v21  ;;  %v1800_v52 = vunpack.c.0.s8 %v1160_v44  ;;  %v1832_v6 = vunpack.c.1.s8 %v1160_v44 }
 0x552   :  { %v3369_v15 = vpack.c.bf16 %v2409_v42, %v2377_v37  ;;  %v2312_v41 = vcvt.s32.f32 %v1288_v18  ;;  %v2344_v25 = vcvt.s32.f32 %v1320_v38  ;;  %v1289_v9 = vunpack.c.0.s8 %v1033_v50 }
 0x553   :  { %4386 = vmatpush.bf16.msrb.mxu0 %v3624_v4  ;;  %v1321_v27 = vunpack.c.1.s8 %v1033_v50  ;;  %v3625_v60 = vpack.c.bf16 %v2921_v16, %v2889_v0  ;;  %v2824_v56 = vcvt.s32.f32 %v1800_v52  ;;  %v2856_v39 = vcvt.s32.f32 %v1832_v6 }
 0x554   :  { %4399 = vmatpush.bf16.msrb.mxu1 %v3369_v15  ;;  %v1801_v40 = vunpack.c.0.s8 %v1161_v5  ;;  %v3336_v58 = vpack.c.bf16 %v2344_v25, %v2312_v41  ;;  %v2313_v55 = vcvt.s32.f32 %v1289_v9  ;;  %v1833_v1 = vunpack.c.1.s8 %v1161_v5 }
 0x555   :  { %v2345_v32 = vcvt.s32.f32 %v1321_v27  ;;  %4412 = vmatpush.bf16.msrb.mxu2 %v3625_v60  ;;  %v3592_v7 = vpack.c.bf16 %v2856_v39, %v2824_v56  ;;  %v1738_v49 = vunpack.c.2.s8 %v1130_v45  ;;  %v1770_v30 = vunpack.c.3.s8 %v1130_v45 }
 0x556   :  { %v2825_v44 = vcvt.s32.f32 %v1801_v40  ;;  %4374 = vmatpush.bf16.msra.mxu3 %v3336_v58  ;;  %v2857_v14 = vcvt.s32.f32 %v1833_v1  ;;  %v2250_v51 = vunpack.c.2.s8 %v1258_v34  ;;  %v2282_v31 = vunpack.c.3.s8 %v1258_v34 }
 0x557   :  { %v3337_v50 = vpack.c.bf16 %v2345_v32, %v2313_v55  ;;  %4387 = vmatpush.bf16.msrb.mxu0 %v3592_v7  ;;  %v2762_v43 = vcvt.s32.f32 %v1738_v49  ;;  %v2794_v48 = vcvt.s32.f32 %v1770_v30  ;;  %v1739_v37 = vunpack.c.2.s8 %v1131_v54  ;;  %v1098_v32 = vld [vmem:[#allocation2 + $0x2b0] sm:$0xff] }
 0x558   :  { %v1771_v42 = vunpack.c.3.s8 %v1131_v54  ;;  %v3593_v21 = vpack.c.bf16 %v2857_v14, %v2825_v44  ;;  %v3274_v5 = vcvt.s32.f32 %v2250_v51  ;;  %v3306_v4 = vcvt.s32.f32 %v2282_v31  ;;  %v1226_v49 = vld [vmem:[#allocation2 + $0x6b0] sm:$0xff]  ;;  %v1099_v51 = vld [vmem:[#allocation2 + $0x2b8] sm:$0xff] }
 0x559   :  { %4400 = vmatpush.bf16.msrb.mxu1 %v3337_v50  ;;  %v2251_v0 = vunpack.c.2.s8 %v1259_v10  ;;  %v3562_v18 = vpack.c.bf16 %v2794_v48, %v2762_v43  ;;  %v2763_v38 = vcvt.s32.f32 %v1739_v37  ;;  %v2283_v16 = vunpack.c.3.s8 %v1259_v10  ;;  %4375 = vmatmul.bf16.vlgmr.msra.gmra.mxu3 %v9792_v22 }
 0x55a   :  { %v2795_v15 = vcvt.s32.f32 %v1771_v42  ;;  %4413 = vmatpush.bf16.msrb.mxu2 %v3593_v21  ;;  %v3818_v52 = vpack.c.bf16 %v3306_v4, %v3274_v5  ;;  %v1674_v41 = vunpack.c.0.s8 %v1130_v45  ;;  %v1706_v25 = vunpack.c.1.s8 %v1130_v45  ;;  %4388 = vmatmul.bf16.vlgmr.msrb.gmra.mxu0 %v9796_v28 }
 0x55b   :  { %v3275_v6 = vcvt.s32.f32 %v2251_v0  ;;  %4419 = vmatpush.bf16.msrb.mxu3 %v3562_v18  ;;  %v3307_v27 = vcvt.s32.f32 %v2283_v16  ;;  %v2186_v60 = vunpack.c.0.s8 %v1258_v34  ;;  %v2218_v56 = vunpack.c.1.s8 %v1258_v34 }
 0x55c   :  { %v3563_v9 = vpack.c.bf16 %v2795_v15, %v2763_v38  ;;  %4401 = vmatmul.bf16.vlgmr.msrb.gmra.mxu1 %v9792_v22  ;;  %4432 = vmatpush.bf16.msra.mxu0 %v3818_v52  ;;  %v2698_v39 = vcvt.s32.f32 %v1674_v41  ;;  %v2730_v40 = vcvt.s32.f32 %v1706_v25  ;;  %v1675_v58 = vunpack.c.0.s8 %v1131_v54 }
 0x55d   :  { %v1707_v55 = vunpack.c.1.s8 %v1131_v54  ;;  %v3819_v1 = vpack.c.bf16 %v3307_v27, %v3275_v6  ;;  %4414 = vmatmul.bf16.vlgmr.msrb.gmra.mxu2 %v9796_v28  ;;  %v3210_v45 = vcvt.s32.f32 %v2186_v60  ;;  %v3242_v7 = vcvt.s32.f32 %v2218_v56  ;;  %v1227_v54 = vld [vmem:[#allocation2 + $0x6b8] sm:$0xff] }
 0x55e   :  { %4445 = vmatpush.bf16.msra.mxu1 %v3563_v9  ;;  %v2187_v44 = vunpack.c.0.s8 %v1259_v10  ;;  %v3530_v30 = vpack.c.bf16 %v2730_v40, %v2698_v39  ;;  %v2699_v50 = vcvt.s32.f32 %v1675_v58  ;;  %v2219_v34 = vunpack.c.1.s8 %v1259_v10 }
 0x55f   :  { %v2731_v14 = vcvt.s32.f32 %v1707_v55  ;;  %4458 = vmatpush.bf16.msra.mxu2 %v3819_v1  ;;  %v3786_v31 = vpack.c.bf16 %v3242_v7, %v3210_v45  ;;  %v1610_v48 = vunpack.c.2.s8 %v1098_v32  ;;  %v1642_v37 = vunpack.c.3.s8 %v1098_v32 }
 0x560   :  { %v3211_v43 = vcvt.s32.f32 %v2187_v44  ;;  %4420 = vmatpush.bf16.msrb.mxu3 %v3530_v30  ;;  %v3243_v21 = vcvt.s32.f32 %v2219_v34  ;;  %v2122_v5 = vunpack.c.2.s8 %v1226_v49  ;;  %v2154_v4 = vunpack.c.3.s8 %v1226_v49 }
 0x561   :  { %v3531_v42 = vpack.c.bf16 %v2731_v14, %v2699_v50  ;;  %4433 = vmatpush.bf16.msra.mxu0 %v3786_v31  ;;  %v2634_v0 = vcvt.s32.f32 %v1610_v48  ;;  %v2666_v18 = vcvt.s32.f32 %v1642_v37  ;;  %v1611_v38 = vunpack.c.2.s8 %v1099_v51  ;;  %v1066_v14 = vld [vmem:[#allocation2 + $0x1b0] sm:$0xff] }
 0x562   :  { %v1643_v15 = vunpack.c.3.s8 %v1099_v51  ;;  %v3787_v16 = vpack.c.bf16 %v3243_v21, %v3211_v43  ;;  %v3146_v10 = vcvt.s32.f32 %v2122_v5  ;;  %v3178_v52 = vcvt.s32.f32 %v2154_v4  ;;  %v1194_v37 = vld [vmem:[#allocation2 + $0x5b0] sm:$0xff] }
 0x563   :  { %4446 = vmatpush.bf16.msra.mxu1 %v3531_v42  ;;  %v2123_v6 = vunpack.c.2.s8 %v1227_v54  ;;  %v3498_v41 = vpack.c.bf16 %v2666_v18, %v2634_v0  ;;  %v2635_v25 = vcvt.s32.f32 %v1611_v38  ;;  %v2155_v27 = vunpack.c.3.s8 %v1227_v54  ;;  %v10025_v42 = vpop.f32.mrf.mxu3  ;;  %v1067_v0 = vld [vmem:[#allocation2 + $0x1b8] sm:$0xff]  ;;  %v10029_v18 = vpop.f32.mrf.mxu1 }
 0x564   :  { %v2667_v9 = vcvt.s32.f32 %v1643_v15  ;;  %4459 = vmatpush.bf16.msra.mxu2 %v3787_v16  ;;  %v3754_v60 = vpack.c.bf16 %v3178_v52, %v3146_v10  ;;  %v1546_v39 = vunpack.c.0.s8 %v1098_v32  ;;  %v1578_v40 = vunpack.c.1.s8 %v1098_v32  ;;  %v10027_v32 = vpop.f32.mrf.mxu0  ;;  %v10031_v38 = vpop.f32.mrf.mxu2  ;;  %v1195_v52 = vld [vmem:[#allocation2 + $0x5b8] sm:$0xff] }
 0x565   :  { %v3147_v56 = vcvt.s32.f32 %v2123_v6  ;;  %4421 = vmatpush.bf16.msrb.mxu3 %v3498_v41  ;;  %v3179_v55 = vcvt.s32.f32 %v2155_v27  ;;  %v2058_v1 = vunpack.c.0.s8 %v1226_v49  ;;  %v2090_v45 = vunpack.c.1.s8 %v1226_v49 }
 0x566   :  { %v3499_v58 = vpack.c.bf16 %v2667_v9, %v2635_v25  ;;  %4434 = vmatpush.bf16.msra.mxu0 %v3754_v60  ;;  %v2570_v7 = vcvt.s32.f32 %v1546_v39  ;;  %v2602_v44 = vcvt.s32.f32 %v1578_v40  ;;  %v1547_v30 = vunpack.c.0.s8 %v1099_v51 }
 0x567   :  { %v1579_v50 = vunpack.c.1.s8 %v1099_v51  ;;  %v3755_v34 = vpack.c.bf16 %v3179_v55, %v3147_v56  ;;  %v3082_v31 = vcvt.s32.f32 %v2058_v1  ;;  %v3114_v43 = vcvt.s32.f32 %v2090_v45 }
 0x568   :  { %4447 = vmatpush.bf16.msra.mxu1 %v3499_v58  ;;  %v2059_v48 = vunpack.c.0.s8 %v1227_v54  ;;  %v3466_v21 = vpack.c.bf16 %v2602_v44, %v2570_v7  ;;  %v2571_v5 = vcvt.s32.f32 %v1547_v30  ;;  %v2091_v49 = vunpack.c.1.s8 %v1227_v54 }
 0x569   :  { %v2603_v4 = vcvt.s32.f32 %v1579_v50  ;;  %4460 = vmatpush.bf16.msra.mxu2 %v3755_v34  ;;  %v3722_v51 = vpack.c.bf16 %v3114_v43, %v3082_v31  ;;  %v1482_v16 = vunpack.c.2.s8 %v1066_v14  ;;  %v1514_v10 = vunpack.c.3.s8 %v1066_v14 }
 0x56a   :  { %v3083_v15 = vcvt.s32.f32 %v2059_v48  ;;  %4422 = vmatpush.bf16.msrb.mxu3 %v3466_v21  ;;  %v3115_v41 = vcvt.s32.f32 %v2091_v49  ;;  %v1994_v25 = vunpack.c.2.s8 %v1194_v37  ;;  %v2026_v9 = vunpack.c.3.s8 %v1194_v37 }
 0x56b   :  { %v3467_v6 = vpack.c.bf16 %v2603_v4, %v2571_v5  ;;  %4435 = vmatpush.bf16.msra.mxu0 %v3722_v51  ;;  %v2506_v27 = vcvt.s32.f32 %v1482_v16  ;;  %v2538_v60 = vcvt.s32.f32 %v1514_v10  ;;  %v1483_v54 = vunpack.c.2.s8 %v1067_v0  ;;  %v4170_v4 = vpop.f32.mrf.mxu3 }
 0x56c   :  { %v1515_v56 = vunpack.c.3.s8 %v1067_v0  ;;  %v3723_v39 = vpack.c.bf16 %v3115_v41, %v3083_v15  ;;  %v3018_v40 = vcvt.s32.f32 %v1994_v25  ;;  %v3050_v58 = vcvt.s32.f32 %v2026_v9  ;;  %v4183_v49 = vpop.f32.mrf.mxu0  ;;  %v4196_v41 = vpop.f32.mrf.mxu1 }
 0x56d   :  { %4448 = vmatpush.bf16.msra.mxu1 %v3467_v6  ;;  %v1995_v55 = vunpack.c.2.s8 %v1195_v52  ;;  %v3434_v1 = vpack.c.bf16 %v2538_v60, %v2506_v27  ;;  %v2507_v45 = vcvt.s32.f32 %v1483_v54  ;;  %v2027_v44 = vunpack.c.3.s8 %v1195_v52  ;;  %v1034_v6 = vld [vmem:[#allocation2 + $0xb0] sm:$0xff]  ;;  %v4209_v25 = vpop.f32.mrf.mxu2 }
 0x56e   :  { %v2539_v7 = vcvt.s32.f32 %v1515_v56  ;;  %4461 = vmatpush.bf16.msra.mxu2 %v3723_v39  ;;  %v3690_v30 = vpack.c.bf16 %v3050_v58, %v3018_v40  ;;  %v1418_v34 = vunpack.c.0.s8 %v1066_v14  ;;  %v1450_v31 = vunpack.c.1.s8 %v1066_v14  ;;  %v1162_v54 = vld [vmem:[#allocation2 + $0x4b0] sm:$0xff]  ;;  %v1035_v58 = vld [vmem:[#allocation2 + $0xb8] sm:$0xff] }
 0x56f   :  { %v3019_v50 = vcvt.s32.f32 %v1995_v55  ;;  %4423 = vmatpush.bf16.msrb.mxu3 %v3434_v1  ;;  %v3051_v48 = vcvt.s32.f32 %v2027_v44  ;;  %v1930_v21 = vunpack.c.0.s8 %v1194_v37  ;;  %v1962_v5 = vunpack.c.1.s8 %v1194_v37 }
 0x570   :  { %v3435_v43 = vpack.c.bf16 %v2539_v7, %v2507_v45  ;;  %4436 = vmatpush.bf16.msra.mxu0 %v3690_v30  ;;  %v2442_v51 = vcvt.s32.f32 %v1418_v34  ;;  %v2474_v15 = vcvt.s32.f32 %v1450_v31  ;;  %v1419_v16 = vunpack.c.0.s8 %v1067_v0 }
 0x571   :  { %v1451_v10 = vunpack.c.1.s8 %v1067_v0  ;;  %v3691_v9 = vpack.c.bf16 %v3051_v48, %v3019_v50  ;;  %v2954_v27 = vcvt.s32.f32 %v1930_v21  ;;  %v2986_v60 = vcvt.s32.f32 %v1962_v5  ;;  %v1163_v0 = vld [vmem:[#allocation2 + $0x4b8] sm:$0xff] }
 0x572   :  { %4449 = vmatpush.bf16.msra.mxu1 %v3435_v43  ;;  %v1931_v14 = vunpack.c.0.s8 %v1195_v52  ;;  %v3402_v56 = vpack.c.bf16 %v2474_v15, %v2442_v51  ;;  %v2443_v39 = vcvt.s32.f32 %v1419_v16  ;;  %v1963_v37 = vunpack.c.1.s8 %v1195_v52 }
 0x573   :  { %v2475_v40 = vcvt.s32.f32 %v1451_v10  ;;  %4462 = vmatpush.bf16.msra.mxu2 %v3691_v9  ;;  %v3658_v55 = vpack.c.bf16 %v2986_v60, %v2954_v27  ;;  %v1354_v45 = vunpack.c.2.s8 %v1034_v6  ;;  %v1386_v7 = vunpack.c.3.s8 %v1034_v6 }
 0x574   :  { %v2955_v1 = vcvt.s32.f32 %v1931_v14  ;;  %4424 = vmatpush.bf16.msrb.mxu3 %v3402_v56  ;;  %v2987_v30 = vcvt.s32.f32 %v1963_v37  ;;  %v1866_v34 = vunpack.c.2.s8 %v1162_v54  ;;  %v1898_v50 = vunpack.c.3.s8 %v1162_v54 }
 0x575   :  { %v3403_v44 = vpack.c.bf16 %v2475_v40, %v2443_v39  ;;  %4437 = vmatpush.bf16.msra.mxu0 %v3658_v55  ;;  %v2378_v31 = vcvt.s32.f32 %v1354_v45  ;;  %v2410_v43 = vcvt.s32.f32 %v1386_v7  ;;  %v1355_v48 = vunpack.c.2.s8 %v1035_v58  ;;  %v10033_v45 = vld [vmem:[#allocation2 + $0x3c0] sm:$0xff] }
 0x576   :  { %v1387_v21 = vunpack.c.3.s8 %v1035_v58  ;;  %v3659_v5 = vpack.c.bf16 %v2987_v30, %v2955_v1  ;;  %v2890_v52 = vcvt.s32.f32 %v1866_v34  ;;  %v2922_v4 = vcvt.s32.f32 %v1898_v50  ;;  %v10035_v50 = vld [vmem:[#allocation2 + $0x7c0] sm:$0xff] }
 0x577   :  { %4450 = vmatpush.bf16.msra.mxu1 %v3403_v44  ;;  %v1867_v49 = vunpack.c.2.s8 %v1163_v0  ;;  %v3370_v51 = vpack.c.bf16 %v2410_v43, %v2378_v31  ;;  %v2379_v15 = vcvt.s32.f32 %v1355_v48  ;;  %v1899_v10 = vunpack.c.3.s8 %v1163_v0 }
 0x578   :  { %v2411_v16 = vcvt.s32.f32 %v1387_v21  ;;  %4463 = vmatpush.bf16.msra.mxu2 %v3659_v5  ;;  %v3626_v41 = vpack.c.bf16 %v2922_v4, %v2890_v52  ;;  %v1290_v9 = vunpack.c.0.s8 %v1034_v6  ;;  %v1322_v27 = vunpack.c.1.s8 %v1034_v6  ;;  %v10037_v21 = vld [vmem:[#allocation2 + $0x3c8] sm:$0xff] }
 0x579   :  { %v2891_v25 = vcvt.s32.f32 %v1867_v49  ;;  %4425 = vmatpush.bf16.msrb.mxu3 %v3370_v51  ;;  %v2923_v14 = vcvt.s32.f32 %v1899_v10  ;;  %v1802_v56 = vunpack.c.0.s8 %v1162_v54  ;;  %v1834_v39 = vunpack.c.1.s8 %v1162_v54  ;;  %v10041_v4 = vld [vmem:[#allocation2 + $0x7c8] sm:$0xff]  ;;  %v10045_v10 = vpop.f32.mrf.mxu3 }
 0x57a   :  { %v3371_v60 = vpack.c.bf16 %v2411_v16, %v2379_v15  ;;  %4438 = vmatpush.bf16.msra.mxu0 %v3626_v41  ;;  %v2314_v40 = vcvt.s32.f32 %v1290_v9  ;;  %v2346_v37 = vcvt.s32.f32 %v1322_v27  ;;  %v1291_v55 = vunpack.c.0.s8 %v1035_v58 }
 0x57b   :  { %v1323_v1 = vunpack.c.1.s8 %v1035_v58  ;;  %v3627_v7 = vpack.c.bf16 %v2923_v14, %v2891_v25  ;;  %v2826_v44 = vcvt.s32.f32 %v1802_v56  ;;  %v2858_v30 = vcvt.s32.f32 %v1834_v39  ;;  %v10053_v14 = vpop.f32.mrf.mxu2 }
 0x57c   :  { %4451 = vmatpush.bf16.msra.mxu1 %v3371_v60  ;;  %v1803_v34 = vunpack.c.0.s8 %v1163_v0  ;;  %v3338_v6 = vpack.c.bf16 %v2346_v37, %v2314_v40  ;;  %v2315_v31 = vcvt.s32.f32 %v1291_v55  ;;  %v1835_v48 = vunpack.c.1.s8 %v1163_v0  ;;  %v10047_v0 = vpop.f32.mrf.mxu0  ;;  %v10051_v60 = vpop.f32.mrf.mxu1 }
 0x57d   :  { %v2347_v43 = vcvt.s32.f32 %v1323_v1  ;;  %4464 = vmatpush.bf16.msra.mxu2 %v3627_v7  ;;  %v3594_v54 = vpack.c.bf16 %v2858_v30, %v2826_v44  ;;  %v1740_v58 = vunpack.c.2.s8 %v10033_v45  ;;  %v1772_v52 = vunpack.c.3.s8 %v10033_v45 }
 0x57e   :  { %v2827_v5 = vcvt.s32.f32 %v1803_v34  ;;  %4426 = vmatpush.bf16.msrb.mxu3 %v3338_v6  ;;  %v2859_v51 = vcvt.s32.f32 %v1835_v48  ;;  %v2252_v15 = vunpack.c.2.s8 %v10035_v50  ;;  %v2284_v16 = vunpack.c.3.s8 %v10035_v50 }
 0x57f   :  { %v3339_v49 = vpack.c.bf16 %v2347_v43, %v2315_v31  ;;  %4439 = vmatpush.bf16.msra.mxu0 %v3594_v54  ;;  %v2764_v41 = vcvt.s32.f32 %v1740_v58  ;;  %v2796_v25 = vcvt.s32.f32 %v1772_v52  ;;  %v1741_v9 = vunpack.c.2.s8 %v10037_v21 }
 0x580   :  { %v1773_v27 = vunpack.c.3.s8 %v10037_v21  ;;  %v3595_v56 = vpack.c.bf16 %v2859_v51, %v2827_v5  ;;  %v3276_v39 = vcvt.s32.f32 %v2252_v15  ;;  %v3308_v40 = vcvt.s32.f32 %v2284_v16 }
 0x581   :  { %4452 = vmatpush.bf16.msra.mxu1 %v3339_v49  ;;  %v2253_v37 = vunpack.c.2.s8 %v10041_v4  ;;  %v3564_v55 = vpack.c.bf16 %v2796_v25, %v2764_v41  ;;  %v2765_v1 = vcvt.s32.f32 %v1741_v9  ;;  %v2285_v44 = vunpack.c.3.s8 %v10041_v4  ;;  %4427 = vmatmul.bf16.vlgmr.msrb.gmra.mxu3 %v9792_v22  ;;  %v4222_v16 = vpop.f32.mrf.mxu3  ;;  %v10087_v25 = vld [vmem:[#allocation20 + $0x8] sm:$0xff] }
 0x582   :  { %v2797_v7 = vcvt.s32.f32 %v1773_v27  ;;  %v4753_v30 = vmul.f32 %v4689_v23, %v9865_v29  ;;  %4465 = vmatpush.bf16.msra.mxu2 %v3595_v56  ;;  %v3820_v34 = vpack.c.bf16 %v3308_v40, %v3276_v39  ;;  %v10063_v31 = vadd.f32 %v10027_v32, %v10025_v42  ;;  %4440 = vmatmul.bf16.vlgmr.msra.gmra.mxu0 %v9796_v28  ;;  %v10075_v32 = vld [vmem:[#allocation21 + $0x8] sm:$0xff] }
 0x583   :  { %v3277_v6 = vcvt.s32.f32 %v2253_v37  ;;  %4471 = vmatpush.bf16.msra.mxu3 %v3564_v55  ;;  %v3309_v48 = vcvt.s32.f32 %v2285_v44  ;;  %v10068_v54 = vadd.f32 %v10031_v38, %v10029_v18  ;;  %v4690_v5 = vperm.slane %v9977_v26, 3  ;;  %v4261_v40 = vpop.f32.mrf.mxu2 }
 0x584   :  { %v3565_v43 = vpack.c.bf16 %v2797_v7, %v2765_v1  ;;  %4453 = vmatmul.bf16.vlgmr.msra.gmra.mxu1 %v9792_v22  ;;  %4484 = vmatpush.bf16.msrb.mxu0 %v3820_v34  ;;  %v1676_v42 = vunpack.c.0.s8 %v10033_v45  ;;  %v1708_v18 = vunpack.c.1.s8 %v10033_v45  ;;  %v2188_v38 = vunpack.c.0.s8 %v10035_v50  ;;  %v4235_v41 = vpop.f32.mrf.mxu0  ;;  %v4248_v39 = vpop.f32.mrf.mxu1  ;;  %v1228_v7 = vld [vmem:[#allocation2 + $0x6c0] sm:$0xff] }
 0x585   :  { %v3821_v58 = vpack.c.bf16 %v3309_v48, %v3277_v6  ;;  %4466 = vmatmul.bf16.vlgmr.msra.gmra.mxu2 %v9796_v28  ;;  %v2220_v52 = vunpack.c.1.s8 %v10035_v50  ;;  %v10083_v49 = vadd.f32 %v4793_v3, %v4753_v30  ;;  %v4794_v26 = vperm.slane %v9979_v47, 3  ;;  %v1100_v50 = vld [vmem:[#allocation2 + $0x2c0] sm:$0xff] }
 0x586   :  { %4497 = vmatpush.bf16.msrb.mxu1 %v3565_v43  ;;  %v2700_v51 = vcvt.s32.f32 %v1676_v42  ;;  %v1677_v15 = vunpack.c.0.s8 %v10037_v21  ;;  %v2732_v9 = vcvt.s32.f32 %v1708_v18  ;;  %v3212_v45 = vcvt.s32.f32 %v2188_v38  ;;  %v1101_v43 = vld [vmem:[#allocation2 + $0x2c8] sm:$0xff] }
 0x587   :  { %4510 = vmatpush.bf16.msrb.mxu2 %v3821_v58  ;;  %v3244_v27 = vcvt.s32.f32 %v2220_v52  ;;  %v1709_v56 = vunpack.c.1.s8 %v10037_v21  ;;  %v10091_v3 = vmul.f32 %v4690_v5, %v9869_v36  ;;  %v4695_v37 = vperm.slane %v10075_v32, 0  ;;  %v1229_v18 = vld [vmem:[#allocation2 + $0x6c8] sm:$0xff] }
 0x588   :  { %v2701_v55 = vcvt.s32.f32 %v1677_v15  ;;  %v2189_v1 = vunpack.c.0.s8 %v10041_v4  ;;  %v3532_v44 = vpack.c.bf16 %v2732_v9, %v2700_v51  ;;  %v2221_v6 = vunpack.c.1.s8 %v10041_v4 }
 0x589   :  { %v3788_v30 = vpack.c.bf16 %v3244_v27, %v3212_v45  ;;  %v2733_v34 = vcvt.s32.f32 %v1709_v56  ;;  %v4799_v21 = vperm.slane %v10087_v25, 0  ;;  %v1612_v42 = vunpack.c.2.s8 %v1100_v50 }
 0x58a   :  { %v3213_v48 = vcvt.s32.f32 %v2189_v1  ;;  %v1644_v58 = vunpack.c.3.s8 %v1100_v50  ;;  %4472 = vmatpush.bf16.msra.mxu3 %v3532_v44  ;;  %v3245_v5 = vcvt.s32.f32 %v2221_v6  ;;  %v2124_v38 = vunpack.c.2.s8 %v1228_v7 }
 0x58b   :  { %4485 = vmatpush.bf16.msrb.mxu0 %v3788_v30  ;;  %v3533_v36 = vpack.c.bf16 %v2733_v34, %v2701_v55  ;;  %v2156_v52 = vunpack.c.3.s8 %v1228_v7  ;;  %v2636_v15 = vcvt.s32.f32 %v1612_v42  ;;  %v1613_v51 = vunpack.c.2.s8 %v1101_v43 }
 0x58c   :  { %v2668_v16 = vcvt.s32.f32 %v1644_v58  ;;  %v1645_v41 = vunpack.c.3.s8 %v1101_v43  ;;  %v3789_v9 = vpack.c.bf16 %v3245_v5, %v3213_v48  ;;  %v3148_v4 = vcvt.s32.f32 %v2124_v38 }
 0x58d   :  { %4498 = vmatpush.bf16.msrb.mxu1 %v3533_v36  ;;  %v3180_v45 = vcvt.s32.f32 %v2156_v52  ;;  %v2125_v27 = vunpack.c.2.s8 %v1229_v18  ;;  %v2637_v39 = vcvt.s32.f32 %v1613_v51  ;;  %v2157_v1 = vunpack.c.3.s8 %v1229_v18  ;;  %v1068_v52 = vld [vmem:[#allocation2 + $0x1c0] sm:$0xff] }
 0x58e   :  { %v3500_v56 = vpack.c.bf16 %v2668_v16, %v2636_v15  ;;  %v2669_v40 = vcvt.s32.f32 %v1645_v41  ;;  %4511 = vmatpush.bf16.msrb.mxu2 %v3789_v9  ;;  %v1548_v55 = vunpack.c.0.s8 %v1100_v50  ;;  %v1580_v34 = vunpack.c.1.s8 %v1100_v50  ;;  %v1196_v9 = vld [vmem:[#allocation2 + $0x5c0] sm:$0xff] }
 0x58f   :  { %v3756_v44 = vpack.c.bf16 %v3180_v45, %v3148_v4  ;;  %v3149_v30 = vcvt.s32.f32 %v2125_v27  ;;  %v3181_v42 = vcvt.s32.f32 %v2157_v1  ;;  %v2060_v58 = vunpack.c.0.s8 %v1228_v7 }
 0x590   :  { %4473 = vmatpush.bf16.msra.mxu3 %v3500_v56  ;;  %v3501_v6 = vpack.c.bf16 %v2669_v40, %v2637_v39  ;;  %v2092_v2 = vunpack.c.1.s8 %v1228_v7  ;;  %v2572_v36 = vcvt.s32.f32 %v1548_v55  ;;  %v2604_v48 = vcvt.s32.f32 %v1580_v34  ;;  %v10097_v56 = vld [vmem:[#allocation2 + $0x1c8] sm:$0xff] }
 0x591   :  { %4486 = vmatpush.bf16.msrb.mxu0 %v3756_v44  ;;  %v1549_v5 = vunpack.c.0.s8 %v1101_v43  ;;  %v1581_v38 = vunpack.c.1.s8 %v1101_v43  ;;  %v3757_v15 = vpack.c.bf16 %v3181_v42, %v3149_v30  ;;  %v3084_v16 = vcvt.s32.f32 %v2060_v58  ;;  %v10099_v44 = vld [vmem:[#allocation2 + $0x5c8] sm:$0xff] }
 0x592   :  { %4499 = vmatpush.bf16.msrb.mxu1 %v3501_v6  ;;  %v3116_v51 = vcvt.s32.f32 %v2092_v2  ;;  %v2061_v41 = vunpack.c.0.s8 %v1229_v18  ;;  %v3468_v4 = vpack.c.bf16 %v2604_v48, %v2572_v36  ;;  %v2093_v27 = vunpack.c.1.s8 %v1229_v18 }
 0x593   :  { %v2573_v45 = vcvt.s32.f32 %v1549_v5  ;;  %v2605_v50 = vcvt.s32.f32 %v1581_v38  ;;  %4512 = vmatpush.bf16.msrb.mxu2 %v3757_v15  ;;  %v1484_v40 = vunpack.c.2.s8 %v1068_v52  ;;  %v1516_v1 = vunpack.c.3.s8 %v1068_v52 }
 0x594   :  { %v3724_v7 = vpack.c.bf16 %v3116_v51, %v3084_v16  ;;  %v3085_v39 = vcvt.s32.f32 %v2061_v41  ;;  %4474 = vmatpush.bf16.msra.mxu3 %v3468_v4  ;;  %v3117_v30 = vcvt.s32.f32 %v2093_v27  ;;  %v1996_v55 = vunpack.c.2.s8 %v1196_v9 }
 0x595   :  { %v3469_v43 = vpack.c.bf16 %v2605_v50, %v2573_v45  ;;  %v2028_v2 = vunpack.c.3.s8 %v1196_v9  ;;  %v2508_v34 = vcvt.s32.f32 %v1484_v40  ;;  %v2540_v6 = vcvt.s32.f32 %v1516_v1 }
 0x596   :  { %4487 = vmatpush.bf16.msrb.mxu0 %v3724_v7  ;;  %v1485_v42 = vunpack.c.2.s8 %v10097_v56  ;;  %v1517_v18 = vunpack.c.3.s8 %v10097_v56  ;;  %v3725_v58 = vpack.c.bf16 %v3117_v30, %v3085_v39  ;;  %v3020_v36 = vcvt.s32.f32 %v1996_v55 }
 0x597   :  { %4500 = vmatpush.bf16.msrb.mxu1 %v3469_v43  ;;  %v3052_v48 = vcvt.s32.f32 %v2028_v2  ;;  %v1997_v5 = vunpack.c.2.s8 %v10099_v44  ;;  %v3436_v38 = vpack.c.bf16 %v2540_v6, %v2508_v34  ;;  %v2029_v51 = vunpack.c.3.s8 %v10099_v44 }
 0x598   :  { %v2509_v15 = vcvt.s32.f32 %v1485_v42  ;;  %v2541_v16 = vcvt.s32.f32 %v1517_v18  ;;  %v4759_v41 = vmul.f32 %v4695_v37, %v9968_v53  ;;  %4513 = vmatpush.bf16.msrb.mxu2 %v3725_v58  ;;  %v4234_v50 = vadd.f32 %v10047_v0, %v10045_v10  ;;  %v1036_v42 = vld [vmem:[#allocation2 + $0xc0] sm:$0xff] }
 0x599   :  { %v3692_v4 = vpack.c.bf16 %v3052_v48, %v3020_v36  ;;  %v3021_v45 = vcvt.s32.f32 %v1997_v5  ;;  %4475 = vmatpush.bf16.msra.mxu3 %v3436_v38  ;;  %v3053_v39 = vcvt.s32.f32 %v2029_v51  ;;  %v10113_v40 = vadd.f32 %v10053_v14, %v10051_v60  ;;  %v1164_v58 = vld [vmem:[#allocation2 + $0x4c0] sm:$0xff] }
 0x59a   :  { %v3437_v7 = vpack.c.bf16 %v2541_v16, %v2509_v15  ;;  %v10118_v1 = vadd.f32 %v4794_v26, %v10091_v3  ;;  %v4696_v53 = vperm.slane %v10075_v32, 1  ;;  %v4800_v37 = vperm.slane %v10087_v25, 1  ;;  %v1037_v15 = vld [vmem:[#allocation2 + $0xc8] sm:$0xff] }
 0x59b   :  { %4488 = vmatpush.bf16.msrb.mxu0 %v3692_v4  ;;  %v1420_v10 = vunpack.c.0.s8 %v1068_v52  ;;  %v3693_v0 = vpack.c.bf16 %v3053_v39, %v3021_v45  ;;  %v1452_v43 = vunpack.c.1.s8 %v1068_v52  ;;  %v1932_v30 = vunpack.c.0.s8 %v1196_v9  ;;  %v1165_v4 = vld [vmem:[#allocation2 + $0x4c8] sm:$0xff] }
 0x59c   :  { %4501 = vmatpush.bf16.msrb.mxu1 %v3437_v7  ;;  %v1964_v55 = vunpack.c.1.s8 %v1196_v9  ;;  %v10124_v60 = vadd.f32 %v4799_v21, %v4759_v41  ;;  %v4701_v14 = vperm.slane %v10075_v32, 6  ;;  %v1421_v26 = vunpack.c.0.s8 %v10097_v56 }
 0x59d   :  { %v2444_v47 = vcvt.s32.f32 %v1420_v10  ;;  %4514 = vmatpush.bf16.msrb.mxu2 %v3693_v0  ;;  %v2476_v3 = vcvt.s32.f32 %v1452_v43  ;;  %v2956_v2 = vcvt.s32.f32 %v1932_v30  ;;  %v1453_v6 = vunpack.c.1.s8 %v10097_v56 }
 0x59e   :  { %v2988_v34 = vcvt.s32.f32 %v1964_v55  ;;  %v10130_v52 = vmul.f32 %v4696_v53, %v9973_v17  ;;  %v4805_v9 = vperm.slane %v10087_v25, 6  ;;  %v2445_v18 = vcvt.s32.f32 %v1421_v26 }
 0x59f   :  { %v1933_v21 = vunpack.c.0.s8 %v10099_v44  ;;  %v3404_v36 = vpack.c.bf16 %v2476_v3, %v2444_v47  ;;  %v2477_v5 = vcvt.s32.f32 %v1453_v6  ;;  %v1965_v38 = vunpack.c.1.s8 %v10099_v44 }
 0x5a0   :  { %v3660_v48 = vpack.c.bf16 %v2988_v34, %v2956_v2  ;;  %v10135_v16 = vmul.f32 %v4701_v14, %v4234_v50  ;;  %v1356_v56 = vunpack.c.2.s8 %v1036_v42  ;;  %v1388_v41 = vunpack.c.3.s8 %v1036_v42 }
 0x5a1   :  { %v2957_v51 = vcvt.s32.f32 %v1933_v21  ;;  %4476 = vmatpush.bf16.msra.mxu3 %v3404_v36  ;;  %v3405_v17 = vpack.c.bf16 %v2477_v5, %v2445_v18  ;;  %v2989_v45 = vcvt.s32.f32 %v1965_v38  ;;  %v1868_v7 = vunpack.c.2.s8 %v1164_v58 }
 0x5a2   :  { %4489 = vmatpush.bf16.msrb.mxu0 %v3660_v48  ;;  %v1900_v39 = vunpack.c.3.s8 %v1164_v58  ;;  %v2380_v53 = vcvt.s32.f32 %v1356_v56  ;;  %v2412_v10 = vcvt.s32.f32 %v1388_v41  ;;  %v1357_v0 = vunpack.c.2.s8 %v1037_v15 }
 0x5a3   :  { %v1389_v43 = vunpack.c.3.s8 %v1037_v15  ;;  %4502 = vmatpush.bf16.msrb.mxu1 %v3405_v17  ;;  %v3661_v30 = vpack.c.bf16 %v2989_v45, %v2957_v51  ;;  %v2892_v44 = vcvt.s32.f32 %v1868_v7  ;;  %v1869_v50 = vunpack.c.2.s8 %v1165_v4  ;;  %v1134_v17 = vld [vmem:[#allocation2 + $0x3d0] sm:$0xff] }
 0x5a4   :  { %v2924_v55 = vcvt.s32.f32 %v1900_v39  ;;  %v3372_v14 = vpack.c.bf16 %v2412_v10, %v2380_v53  ;;  %v2381_v47 = vcvt.s32.f32 %v1357_v0  ;;  %v1901_v3 = vunpack.c.3.s8 %v1165_v4  ;;  %v1262_v10 = vld [vmem:[#allocation2 + $0x7d0] sm:$0xff] }
 0x5a5   :  { %v2413_v26 = vcvt.s32.f32 %v1389_v43  ;;  %4515 = vmatpush.bf16.msrb.mxu2 %v3661_v30  ;;  %v2893_v34 = vcvt.s32.f32 %v1869_v50  ;;  %v1292_v6 = vunpack.c.0.s8 %v1036_v42  ;;  %v1324_v18 = vunpack.c.1.s8 %v1036_v42 }
 0x5a6   :  { %v3628_v2 = vpack.c.bf16 %v2924_v55, %v2892_v44  ;;  %4477 = vmatpush.bf16.msra.mxu3 %v3372_v14  ;;  %v2925_v36 = vcvt.s32.f32 %v1901_v3  ;;  %v1804_v48 = vunpack.c.0.s8 %v1164_v58  ;;  %v1836_v5 = vunpack.c.1.s8 %v1164_v58  ;;  %v1135_v44 = vld [vmem:[#allocation2 + $0x3d8] sm:$0xff] }
 0x5a7   :  { %v3373_v21 = vpack.c.bf16 %v2413_v26, %v2381_v47  ;;  %v2316_v38 = vcvt.s32.f32 %v1292_v6  ;;  %v2348_v51 = vcvt.s32.f32 %v1324_v18  ;;  %v1293_v56 = vunpack.c.0.s8 %v1037_v15  ;;  %v1263_v47 = vld [vmem:[#allocation2 + $0x7d8] sm:$0xff] }
 0x5a8   :  { %4490 = vmatpush.bf16.msrb.mxu0 %v3628_v2  ;;  %v1325_v41 = vunpack.c.1.s8 %v1037_v15  ;;  %v3629_v45 = vpack.c.bf16 %v2925_v36, %v2893_v34  ;;  %v2828_v7 = vcvt.s32.f32 %v1804_v48  ;;  %v2860_v39 = vcvt.s32.f32 %v1836_v5 }
 0x5a9   :  { %4503 = vmatpush.bf16.msrb.mxu1 %v3373_v21  ;;  %v1805_v53 = vunpack.c.0.s8 %v1165_v4  ;;  %v3340_v0 = vpack.c.bf16 %v2348_v51, %v2316_v38  ;;  %v2317_v43 = vcvt.s32.f32 %v1293_v56  ;;  %v1837_v30 = vunpack.c.1.s8 %v1165_v4 }
 0x5aa   :  { %v2349_v42 = vcvt.s32.f32 %v1325_v41  ;;  %4516 = vmatpush.bf16.msrb.mxu2 %v3629_v45  ;;  %v3596_v55 = vpack.c.bf16 %v2860_v39, %v2828_v7  ;;  %v1742_v50 = vunpack.c.2.s8 %v1134_v17  ;;  %v1774_v14 = vunpack.c.3.s8 %v1134_v17 }
 0x5ab   :  { %v2829_v58 = vcvt.s32.f32 %v1805_v53  ;;  %4478 = vmatpush.bf16.msra.mxu3 %v3340_v0  ;;  %v2861_v26 = vcvt.s32.f32 %v1837_v30  ;;  %v2254_v3 = vunpack.c.2.s8 %v1262_v10  ;;  %v2286_v2 = vunpack.c.3.s8 %v1262_v10 }
 0x5ac   :  { %v3341_v15 = vpack.c.bf16 %v2349_v42, %v2317_v43  ;;  %4491 = vmatpush.bf16.msrb.mxu0 %v3596_v55  ;;  %v2766_v34 = vcvt.s32.f32 %v1742_v50  ;;  %v2798_v6 = vcvt.s32.f32 %v1774_v14  ;;  %v1743_v18 = vunpack.c.2.s8 %v1135_v44 }
 0x5ad   :  { %v1775_v21 = vunpack.c.3.s8 %v1135_v44  ;;  %v3597_v36 = vpack.c.bf16 %v2861_v26, %v2829_v58  ;;  %v3278_v4 = vcvt.s32.f32 %v2254_v3  ;;  %v3310_v48 = vcvt.s32.f32 %v2286_v2 }
 0x5ae   :  { %4504 = vmatpush.bf16.msrb.mxu1 %v3341_v15  ;;  %v2255_v5 = vunpack.c.2.s8 %v1263_v47  ;;  %v3566_v38 = vpack.c.bf16 %v2798_v6, %v2766_v34  ;;  %v2767_v51 = vcvt.s32.f32 %v1743_v18  ;;  %v2287_v41 = vunpack.c.3.s8 %v1263_v47  ;;  %4479 = vmatmul.bf16.vlgmr.msra.gmra.mxu3 %v9792_v22  ;;  %v1102_v15 = vld [vmem:[#allocation2 + $0x2d0] sm:$0xff] }
 0x5af   :  { %v2799_v56 = vcvt.s32.f32 %v1775_v21  ;;  %4517 = vmatpush.bf16.msrb.mxu2 %v3597_v36  ;;  %v3822_v45 = vpack.c.bf16 %v3310_v48, %v3278_v4  ;;  %v1678_v39 = vunpack.c.0.s8 %v1134_v17  ;;  %v1710_v53 = vunpack.c.1.s8 %v1134_v17  ;;  %4492 = vmatmul.bf16.vlgmr.msrb.gmra.mxu0 %v9796_v28  ;;  %v1230_v34 = vld [vmem:[#allocation2 + $0x6d0] sm:$0xff]  ;;  %v1103_v36 = vld [vmem:[#allocation2 + $0x2d8] sm:$0xff] }
 0x5b0   :  { %v3279_v7 = vcvt.s32.f32 %v2255_v5  ;;  %4523 = vmatpush.bf16.msrb.mxu3 %v3566_v38  ;;  %v3311_v43 = vcvt.s32.f32 %v2287_v41  ;;  %v2190_v42 = vunpack.c.0.s8 %v1262_v10  ;;  %v2222_v30 = vunpack.c.1.s8 %v1262_v10 }
 0x5b1   :  { %v3567_v0 = vpack.c.bf16 %v2799_v56, %v2767_v51  ;;  %4505 = vmatmul.bf16.vlgmr.msrb.gmra.mxu1 %v9792_v22  ;;  %4536 = vmatpush.bf16.msra.mxu0 %v3822_v45  ;;  %v2702_v55 = vcvt.s32.f32 %v1678_v39  ;;  %v2734_v58 = vcvt.s32.f32 %v1710_v53  ;;  %v1679_v50 = vunpack.c.0.s8 %v1135_v44 }
 0x5b2   :  { %v1711_v14 = vunpack.c.1.s8 %v1135_v44  ;;  %v3823_v26 = vpack.c.bf16 %v3311_v43, %v3279_v7  ;;  %v3214_v3 = vcvt.s32.f32 %v2190_v42  ;;  %v3246_v2 = vcvt.s32.f32 %v2222_v30  ;;  %4518 = vmatmul.bf16.vlgmr.msrb.gmra.mxu2 %v9796_v28  ;;  %v1231_v44 = vld [vmem:[#allocation2 + $0x6d8] sm:$0xff] }
 0x5b3   :  { %4549 = vmatpush.bf16.msra.mxu1 %v3567_v0  ;;  %v2191_v17 = vunpack.c.0.s8 %v1263_v47  ;;  %v3534_v6 = vpack.c.bf16 %v2734_v58, %v2702_v55  ;;  %v2703_v18 = vcvt.s32.f32 %v1679_v50  ;;  %v2223_v10 = vunpack.c.1.s8 %v1263_v47 }
 0x5b4   :  { %v2735_v21 = vcvt.s32.f32 %v1711_v14  ;;  %4562 = vmatpush.bf16.msra.mxu2 %v3823_v26  ;;  %v3790_v4 = vpack.c.bf16 %v3246_v2, %v3214_v3  ;;  %v1614_v5 = vunpack.c.2.s8 %v1102_v15  ;;  %v1646_v38 = vunpack.c.3.s8 %v1102_v15 }
 0x5b5   :  { %v3215_v48 = vcvt.s32.f32 %v2191_v17  ;;  %4524 = vmatpush.bf16.msrb.mxu3 %v3534_v6  ;;  %v3247_v56 = vcvt.s32.f32 %v2223_v10  ;;  %v2126_v41 = vunpack.c.2.s8 %v1230_v34  ;;  %v2158_v45 = vunpack.c.3.s8 %v1230_v34 }
 0x5b6   :  { %v3535_v51 = vpack.c.bf16 %v2735_v21, %v2703_v18  ;;  %4537 = vmatpush.bf16.msra.mxu0 %v3790_v4  ;;  %v2638_v7 = vcvt.s32.f32 %v1614_v5  ;;  %v2670_v39 = vcvt.s32.f32 %v1646_v38  ;;  %v1615_v53 = vunpack.c.2.s8 %v1103_v36 }
 0x5b7   :  { %v1647_v0 = vunpack.c.3.s8 %v1103_v36  ;;  %v3791_v43 = vpack.c.bf16 %v3247_v56, %v3215_v48  ;;  %v3150_v47 = vcvt.s32.f32 %v2126_v41  ;;  %v3182_v42 = vcvt.s32.f32 %v2158_v45 }
 0x5b8   :  { %4550 = vmatpush.bf16.msra.mxu1 %v3535_v51  ;;  %v2127_v30 = vunpack.c.2.s8 %v1231_v44  ;;  %v3502_v55 = vpack.c.bf16 %v2670_v39, %v2638_v7  ;;  %v2639_v58 = vcvt.s32.f32 %v1615_v53  ;;  %v2159_v14 = vunpack.c.3.s8 %v1231_v44  ;;  %v1070_v51 = vld [vmem:[#allocation2 + $0x1d0] sm:$0xff]  ;;  %v10141_v53 = vpop.f32.mrf.mxu3 }
 0x5b9   :  { %v2671_v50 = vcvt.s32.f32 %v1647_v0  ;;  %4563 = vmatpush.bf16.msra.mxu2 %v3791_v43  ;;  %v3758_v26 = vpack.c.bf16 %v3182_v42, %v3150_v47  ;;  %v1550_v2 = vunpack.c.0.s8 %v1102_v15  ;;  %v1582_v17 = vunpack.c.1.s8 %v1102_v15  ;;  %v1198_v39 = vld [vmem:[#allocation2 + $0x5d0] sm:$0xff]  ;;  %v10143_v15 = vpop.f32.mrf.mxu0  ;;  %v1071_v42 = vld [vmem:[#allocation2 + $0x1d8] sm:$0xff] }
 0x5ba   :  { %v3151_v3 = vcvt.s32.f32 %v2127_v30  ;;  %4525 = vmatpush.bf16.msrb.mxu3 %v3502_v55  ;;  %v3183_v18 = vcvt.s32.f32 %v2159_v14  ;;  %v2062_v21 = vunpack.c.0.s8 %v1230_v34  ;;  %v2094_v10 = vunpack.c.1.s8 %v1230_v34  ;;  %v10145_v30 = vpop.f32.mrf.mxu1  ;;  %v10147_v55 = vpop.f32.mrf.mxu2 }
 0x5bb   :  { %v3503_v6 = vpack.c.bf16 %v2671_v50, %v2639_v58  ;;  %4538 = vmatpush.bf16.msra.mxu0 %v3758_v26  ;;  %v2574_v4 = vcvt.s32.f32 %v1550_v2  ;;  %v2606_v48 = vcvt.s32.f32 %v1582_v17  ;;  %v1551_v5 = vunpack.c.0.s8 %v1103_v36  ;;  %v1199_v26 = vld [vmem:[#allocation2 + $0x5d8] sm:$0xff] }
 0x5bc   :  { %v1583_v38 = vunpack.c.1.s8 %v1103_v36  ;;  %v3759_v56 = vpack.c.bf16 %v3183_v18, %v3151_v3  ;;  %v3086_v41 = vcvt.s32.f32 %v2062_v21  ;;  %v3118_v45 = vcvt.s32.f32 %v2094_v10 }
 0x5bd   :  { %4551 = vmatpush.bf16.msra.mxu1 %v3503_v6  ;;  %v2063_v7 = vunpack.c.0.s8 %v1231_v44  ;;  %v3470_v0 = vpack.c.bf16 %v2606_v48, %v2574_v4  ;;  %v2575_v43 = vcvt.s32.f32 %v1551_v5  ;;  %v2095_v34 = vunpack.c.1.s8 %v1231_v44 }
 0x5be   :  { %v2607_v47 = vcvt.s32.f32 %v1583_v38  ;;  %4564 = vmatpush.bf16.msra.mxu2 %v3759_v56  ;;  %v3726_v36 = vpack.c.bf16 %v3118_v45, %v3086_v41  ;;  %v1486_v50 = vunpack.c.2.s8 %v1070_v51  ;;  %v1518_v14 = vunpack.c.3.s8 %v1070_v51 }
 0x5bf   :  { %v3087_v58 = vcvt.s32.f32 %v2063_v7  ;;  %4526 = vmatpush.bf16.msrb.mxu3 %v3470_v0  ;;  %v3119_v2 = vcvt.s32.f32 %v2095_v34  ;;  %v1998_v17 = vunpack.c.2.s8 %v1198_v39  ;;  %v2030_v6 = vunpack.c.3.s8 %v1198_v39 }
 0x5c0   :  { %v3471_v3 = vpack.c.bf16 %v2607_v47, %v2575_v43  ;;  %4539 = vmatpush.bf16.msra.mxu0 %v3726_v36  ;;  %v2510_v18 = vcvt.s32.f32 %v1486_v50  ;;  %v2542_v21 = vcvt.s32.f32 %v1518_v14  ;;  %v1487_v44 = vunpack.c.2.s8 %v1071_v42  ;;  %v4274_v23 = vpop.f32.mrf.mxu3 }
 0x5c1   :  { %v1519_v10 = vunpack.c.3.s8 %v1071_v42  ;;  %v3727_v4 = vpack.c.bf16 %v3119_v2, %v3087_v58  ;;  %v3022_v48 = vcvt.s32.f32 %v1998_v17  ;;  %v3054_v5 = vcvt.s32.f32 %v2030_v6  ;;  %v1039_v23 = vld [vmem:[#allocation2 + $0xd8] sm:$0xff] }
 0x5c2   :  { %4552 = vmatpush.bf16.msra.mxu1 %v3471_v3  ;;  %v1999_v38 = vunpack.c.2.s8 %v1199_v26  ;;  %v3438_v56 = vpack.c.bf16 %v2542_v21, %v2510_v18  ;;  %v2511_v41 = vcvt.s32.f32 %v1487_v44  ;;  %v2031_v7 = vunpack.c.3.s8 %v1199_v26  ;;  %v4287_v3 = vpop.f32.mrf.mxu0  ;;  %v1038_v18 = vld [vmem:[#allocation2 + $0xd0] sm:$0xff]  ;;  %v4300_v21 = vpop.f32.mrf.mxu1 }
 0x5c3   :  { %v2543_v45 = vcvt.s32.f32 %v1519_v10  ;;  %4565 = vmatpush.bf16.msra.mxu2 %v3727_v4  ;;  %v3694_v0 = vpack.c.bf16 %v3054_v5, %v3022_v48  ;;  %v1422_v47 = vunpack.c.0.s8 %v1070_v51  ;;  %v1454_v34 = vunpack.c.1.s8 %v1070_v51  ;;  %v4313_v44 = vpop.f32.mrf.mxu2  ;;  %v1166_v5 = vld [vmem:[#allocation2 + $0x4d0] sm:$0xff] }
 0x5c4   :  { %v3023_v43 = vcvt.s32.f32 %v1999_v38  ;;  %4527 = vmatpush.bf16.msrb.mxu3 %v3438_v56  ;;  %v3055_v50 = vcvt.s32.f32 %v2031_v7  ;;  %v1934_v14 = vunpack.c.0.s8 %v1198_v39  ;;  %v1966_v61 = vunpack.c.1.s8 %v1198_v39 }
 0x5c5   :  { %v3439_v36 = vpack.c.bf16 %v2543_v45, %v2511_v41  ;;  %4540 = vmatpush.bf16.msra.mxu0 %v3694_v0  ;;  %v2446_v58 = vcvt.s32.f32 %v1422_v47  ;;  %v2478_v2 = vcvt.s32.f32 %v1454_v34  ;;  %v1423_v17 = vunpack.c.0.s8 %v1071_v42 }
 0x5c6   :  { %v1455_v6 = vunpack.c.1.s8 %v1071_v42  ;;  %v3695_v10 = vpack.c.bf16 %v3055_v50, %v3023_v43  ;;  %v2958_v4 = vcvt.s32.f32 %v1934_v14  ;;  %v2990_v48 = vcvt.s32.f32 %v1966_v61  ;;  %v1167_v42 = vld [vmem:[#allocation2 + $0x4d8] sm:$0xff] }
 0x5c7   :  { %4553 = vmatpush.bf16.msra.mxu1 %v3439_v36  ;;  %v1935_v51 = vunpack.c.0.s8 %v1199_v26  ;;  %v3406_v38 = vpack.c.bf16 %v2478_v2, %v2446_v58  ;;  %v2447_v56 = vcvt.s32.f32 %v1423_v17  ;;  %v1967_v39 = vunpack.c.1.s8 %v1199_v26 }
 0x5c8   :  { %v2479_v41 = vcvt.s32.f32 %v1455_v6  ;;  %4566 = vmatpush.bf16.msra.mxu2 %v3695_v10  ;;  %v3662_v45 = vpack.c.bf16 %v2990_v48, %v2958_v4  ;;  %v1358_v0 = vunpack.c.2.s8 %v1038_v18  ;;  %v1390_v47 = vunpack.c.3.s8 %v1038_v18 }
 0x5c9   :  { %v2959_v7 = vcvt.s32.f32 %v1935_v51  ;;  %4528 = vmatpush.bf16.msrb.mxu3 %v3406_v38  ;;  %v2991_v3 = vcvt.s32.f32 %v1967_v39  ;;  %v1870_v36 = vunpack.c.2.s8 %v1166_v5  ;;  %v1902_v43 = vunpack.c.3.s8 %v1166_v5 }
 0x5ca   :  { %v3407_v34 = vpack.c.bf16 %v2479_v41, %v2447_v56  ;;  %4541 = vmatpush.bf16.msra.mxu0 %v3662_v45  ;;  %v2382_v61 = vcvt.s32.f32 %v1358_v0  ;;  %v2414_v50 = vcvt.s32.f32 %v1390_v47  ;;  %v1359_v14 = vunpack.c.2.s8 %v1039_v23 }
 0x5cb   :  { %v1391_v58 = vunpack.c.3.s8 %v1039_v23  ;;  %v3663_v2 = vpack.c.bf16 %v2991_v3, %v2959_v7  ;;  %v2894_v26 = vcvt.s32.f32 %v1870_v36  ;;  %v2926_v17 = vcvt.s32.f32 %v1902_v43  ;;  %v10149_v36 = vld [vmem:[#allocation2 + $0x3e0] sm:$0xff] }
 0x5cc   :  { %4554 = vmatpush.bf16.msra.mxu1 %v3407_v34  ;;  %v1871_v6 = vunpack.c.2.s8 %v1167_v42  ;;  %v3374_v21 = vpack.c.bf16 %v2414_v50, %v2382_v61  ;;  %v2383_v44 = vcvt.s32.f32 %v1359_v14  ;;  %v1903_v4 = vunpack.c.3.s8 %v1167_v42 }
 0x5cd   :  { %v2415_v10 = vcvt.s32.f32 %v1391_v58  ;;  %4567 = vmatpush.bf16.msra.mxu2 %v3663_v2  ;;  %v3630_v48 = vpack.c.bf16 %v2926_v17, %v2894_v26  ;;  %v1294_v38 = vunpack.c.0.s8 %v1038_v18  ;;  %v1326_v56 = vunpack.c.1.s8 %v1038_v18  ;;  %v10151_v58 = vld [vmem:[#allocation2 + $0x7e0] sm:$0xff] }
 0x5ce   :  { %v2895_v51 = vcvt.s32.f32 %v1871_v6  ;;  %4529 = vmatpush.bf16.msrb.mxu3 %v3374_v21  ;;  %v2927_v39 = vcvt.s32.f32 %v1903_v4  ;;  %v1806_v45 = vunpack.c.0.s8 %v1166_v5  ;;  %v1838_v0 = vunpack.c.1.s8 %v1166_v5  ;;  %v10153_v6 = vld [vmem:[#allocation2 + $0x3e8] sm:$0xff] }
 0x5cf   :  { %v3375_v41 = vpack.c.bf16 %v2415_v10, %v2383_v44  ;;  %4542 = vmatpush.bf16.msra.mxu0 %v3630_v48  ;;  %v2318_v47 = vcvt.s32.f32 %v1294_v38  ;;  %v2350_v7 = vcvt.s32.f32 %v1326_v56  ;;  %v1295_v34 = vunpack.c.0.s8 %v1039_v23  ;;  %v10157_v10 = vld [vmem:[#allocation2 + $0x7e8] sm:$0xff]  ;;  %v10161_v56 = vpop.f32.mrf.mxu3 }
 0x5d0   :  { %v1327_v3 = vunpack.c.1.s8 %v1039_v23  ;;  %v3631_v43 = vpack.c.bf16 %v2927_v39, %v2895_v51  ;;  %v2830_v61 = vcvt.s32.f32 %v1806_v45  ;;  %v2862_v50 = vcvt.s32.f32 %v1838_v0 }
 0x5d1   :  { %4555 = vmatpush.bf16.msra.mxu1 %v3375_v41  ;;  %v1807_v14 = vunpack.c.0.s8 %v1167_v42  ;;  %v3342_v18 = vpack.c.bf16 %v2350_v7, %v2318_v47  ;;  %v2319_v2 = vcvt.s32.f32 %v1295_v34  ;;  %v1839_v17 = vunpack.c.1.s8 %v1167_v42  ;;  %v10163_v42 = vpop.f32.mrf.mxu0  ;;  %v10167_v47 = vpop.f32.mrf.mxu1 }
 0x5d2   :  { %v2351_v26 = vcvt.s32.f32 %v1327_v3  ;;  %4568 = vmatpush.bf16.msra.mxu2 %v3631_v43  ;;  %v3598_v5 = vpack.c.bf16 %v2862_v50, %v2830_v61  ;;  %v1744_v23 = vunpack.c.2.s8 %v10149_v36  ;;  %v1776_v44 = vunpack.c.3.s8 %v10149_v36  ;;  %v10169_v7 = vpop.f32.mrf.mxu2 }
 0x5d3   :  { %v2831_v21 = vcvt.s32.f32 %v1807_v14  ;;  %4530 = vmatpush.bf16.msrb.mxu3 %v3342_v18  ;;  %v2863_v48 = vcvt.s32.f32 %v1839_v17  ;;  %v2256_v51 = vunpack.c.2.s8 %v10151_v58  ;;  %v2288_v38 = vunpack.c.3.s8 %v10151_v58 }
 0x5d4   :  { %v3343_v4 = vpack.c.bf16 %v2351_v26, %v2319_v2  ;;  %4543 = vmatpush.bf16.msra.mxu0 %v3598_v5  ;;  %v2768_v41 = vcvt.s32.f32 %v1744_v23  ;;  %v2800_v39 = vcvt.s32.f32 %v1776_v44  ;;  %v1745_v45 = vunpack.c.2.s8 %v10153_v6  ;;  %v10173_v26 = vld [vmem:[#allocation21 + $0x10] sm:$0xff] }
 0x5d5   :  { %v1777_v0 = vunpack.c.3.s8 %v10153_v6  ;;  %v3599_v34 = vpack.c.bf16 %v2863_v48, %v2831_v21  ;;  %v3280_v3 = vcvt.s32.f32 %v2256_v51  ;;  %v3312_v43 = vcvt.s32.f32 %v2288_v38  ;;  %v10185_v38 = vld [vmem:[#allocation20 + $0x10] sm:$0xff] }
 0x5d6   :  { %4556 = vmatpush.bf16.msra.mxu1 %v3343_v4  ;;  %v2257_v61 = vunpack.c.2.s8 %v10157_v10  ;;  %v3568_v50 = vpack.c.bf16 %v2800_v39, %v2768_v41  ;;  %v2769_v14 = vcvt.s32.f32 %v1745_v45  ;;  %v2289_v2 = vunpack.c.3.s8 %v10157_v10  ;;  %4531 = vmatmul.bf16.vlgmr.msrb.gmra.mxu3 %v9792_v22 }
 0x5d7   :  { %v2801_v18 = vcvt.s32.f32 %v1777_v0  ;;  %4569 = vmatpush.bf16.msra.mxu2 %v3599_v34  ;;  %v3824_v23 = vpack.c.bf16 %v3312_v43, %v3280_v3  ;;  %4544 = vmatmul.bf16.vlgmr.msra.gmra.mxu0 %v9796_v28  ;;  %v10182_v44 = vadd.f32 %v4800_v37, %v10130_v52  ;;  %v4702_v4 = vperm.slane %v10075_v32, 7  ;;  %v4326_v3 = vpop.f32.mrf.mxu3 }
 0x5d8   :  { %v3281_v21 = vcvt.s32.f32 %v2257_v61  ;;  %4575 = vmatpush.bf16.msra.mxu3 %v3568_v50  ;;  %v3313_v51 = vcvt.s32.f32 %v2289_v2  ;;  %v10191_v41 = vadd.f32 %v4805_v9, %v10135_v16  ;;  %v4286_v39 = vadd.f32 %v10143_v15, %v10141_v53 }
 0x5d9   :  { %v3569_v48 = vpack.c.bf16 %v2801_v18, %v2769_v14  ;;  %4557 = vmatmul.bf16.vlgmr.msra.gmra.mxu1 %v9792_v22  ;;  %4588 = vmatpush.bf16.msrb.mxu0 %v3824_v23  ;;  %v4703_v37 = vperm.slane %v10173_v26, 0  ;;  %v1680_v52 = vunpack.c.0.s8 %v10149_v36  ;;  %v1712_v0 = vunpack.c.1.s8 %v10149_v36  ;;  %v4339_v43 = vpop.f32.mrf.mxu0  ;;  %v1104_v18 = vld [vmem:[#allocation2 + $0x2e0] sm:$0xff]  ;;  %v4352_v2 = vpop.f32.mrf.mxu1 }
 0x5da   :  { %v3825_v45 = vpack.c.bf16 %v3313_v51, %v3281_v21  ;;  %4570 = vmatmul.bf16.vlgmr.msra.gmra.mxu2 %v9796_v28  ;;  %v2192_v34 = vunpack.c.0.s8 %v10151_v58  ;;  %v2224_v25 = vunpack.c.1.s8 %v10151_v58  ;;  %v10204_v16 = vadd.f32 %v10147_v55, %v10145_v30  ;;  %v4365_v58 = vpop.f32.mrf.mxu2  ;;  %v1233_v2 = vld [vmem:[#allocation2 + $0x6e8] sm:$0xff] }
 0x5db   :  { %4601 = vmatpush.bf16.msrb.mxu1 %v3569_v48  ;;  %v2704_v53 = vcvt.s32.f32 %v1680_v52  ;;  %v1681_v15 = vunpack.c.0.s8 %v10153_v6  ;;  %v2736_v61 = vcvt.s32.f32 %v1712_v0  ;;  %v1713_v36 = vunpack.c.1.s8 %v10153_v6  ;;  %v1232_v48 = vld [vmem:[#allocation2 + $0x6e0] sm:$0xff]  ;;  %v1105_v0 = vld [vmem:[#allocation2 + $0x2e8] sm:$0xff] }
 0x5dc   :  { %4614 = vmatpush.bf16.msrb.mxu2 %v3825_v45  ;;  %v3216_v50 = vcvt.s32.f32 %v2192_v34  ;;  %v3248_v14 = vcvt.s32.f32 %v2224_v25  ;;  %v10208_v23 = vmul.f32 %v4703_v37, %v4286_v39  ;;  %v4704_v21 = vperm.slane %v10173_v26, 1 }
 0x5dd   :  { %v2705_v30 = vcvt.s32.f32 %v1681_v15  ;;  %v2193_v55 = vunpack.c.0.s8 %v10157_v10  ;;  %v3536_v51 = vpack.c.bf16 %v2736_v61, %v2704_v53  ;;  %v2737_v3 = vcvt.s32.f32 %v1713_v36 }
 0x5de   :  { %v3792_v52 = vpack.c.bf16 %v3248_v14, %v3216_v50  ;;  %v2225_v45 = vunpack.c.1.s8 %v10157_v10  ;;  %v1616_v25 = vunpack.c.2.s8 %v1104_v18  ;;  %v1648_v43 = vunpack.c.3.s8 %v1104_v18 }
 0x5df   :  { %v3217_v6 = vcvt.s32.f32 %v2193_v55  ;;  %4576 = vmatpush.bf16.msra.mxu3 %v3536_v51  ;;  %v3537_v39 = vpack.c.bf16 %v2737_v3, %v2705_v30  ;;  %v2128_v15 = vunpack.c.2.s8 %v1232_v48  ;;  %v2160_v58 = vunpack.c.3.s8 %v1232_v48 }
 0x5e0   :  { %4589 = vmatpush.bf16.msrb.mxu0 %v3792_v52  ;;  %v3249_v37 = vcvt.s32.f32 %v2225_v45  ;;  %v2640_v29 = vcvt.s32.f32 %v1616_v25  ;;  %v2672_v17 = vcvt.s32.f32 %v1648_v43  ;;  %v1617_v53 = vunpack.c.2.s8 %v1105_v0 }
 0x5e1   :  { %v1649_v61 = vunpack.c.3.s8 %v1105_v0  ;;  %4602 = vmatpush.bf16.msrb.mxu1 %v3537_v39  ;;  %v3152_v10 = vcvt.s32.f32 %v2128_v15  ;;  %v3184_v14 = vcvt.s32.f32 %v2160_v58  ;;  %v2129_v36 = vunpack.c.2.s8 %v1233_v2  ;;  %v10214_v58 = vld [vmem:[#allocation2 + $0x1e0] sm:$0xff] }
 0x5e2   :  { %v3793_v50 = vpack.c.bf16 %v3249_v37, %v3217_v6  ;;  %v3504_v27 = vpack.c.bf16 %v2672_v17, %v2640_v29  ;;  %v2641_v55 = vcvt.s32.f32 %v1617_v53  ;;  %v2161_v34 = vunpack.c.3.s8 %v1233_v2 }
 0x5e3   :  { %v2673_v5 = vcvt.s32.f32 %v1649_v61  ;;  %v3760_v51 = vpack.c.bf16 %v3184_v14, %v3152_v10  ;;  %v3153_v52 = vcvt.s32.f32 %v2129_v36  ;;  %v1552_v30 = vunpack.c.0.s8 %v1104_v18 }
 0x5e4   :  { %4615 = vmatpush.bf16.msrb.mxu2 %v3793_v50  ;;  %v1584_v3 = vunpack.c.1.s8 %v1104_v18  ;;  %4577 = vmatpush.bf16.msra.mxu3 %v3504_v27  ;;  %v3185_v25 = vcvt.s32.f32 %v2161_v34  ;;  %v2064_v43 = vunpack.c.0.s8 %v1232_v48  ;;  %v2096_v9 = vunpack.c.1.s8 %v1232_v48  ;;  %v1200_v50 = vld [vmem:[#allocation2 + $0x5e0] sm:$0xff]  ;;  %v10216_v34 = vld [vmem:[#allocation2 + $0x1e8] sm:$0xff] }
 0x5e5   :  { %v3505_v45 = vpack.c.bf16 %v2673_v5, %v2641_v55  ;;  %4590 = vmatpush.bf16.msrb.mxu0 %v3760_v51  ;;  %v2576_v39 = vcvt.s32.f32 %v1552_v30  ;;  %v1553_v37 = vunpack.c.0.s8 %v1105_v0  ;;  %v1585_v15 = vunpack.c.1.s8 %v1105_v0  ;;  %v10220_v55 = vld [vmem:[#allocation2 + $0x5e8] sm:$0xff] }
 0x5e6   :  { %v2608_v6 = vcvt.s32.f32 %v1584_v3  ;;  %v3761_v29 = vpack.c.bf16 %v3185_v25, %v3153_v52  ;;  %v3088_v17 = vcvt.s32.f32 %v2064_v43  ;;  %v3120_v53 = vcvt.s32.f32 %v2096_v9 }
 0x5e7   :  { %4603 = vmatpush.bf16.msrb.mxu1 %v3505_v45  ;;  %v2065_v61 = vunpack.c.0.s8 %v1233_v2  ;;  %v2577_v18 = vcvt.s32.f32 %v1553_v37  ;;  %v2609_v27 = vcvt.s32.f32 %v1585_v15  ;;  %v2097_v5 = vunpack.c.1.s8 %v1233_v2 }
 0x5e8   :  { %v3472_v10 = vpack.c.bf16 %v2608_v6, %v2576_v39  ;;  %4616 = vmatpush.bf16.msrb.mxu2 %v3761_v29  ;;  %v3728_v48 = vpack.c.bf16 %v3120_v53, %v3088_v17  ;;  %v1488_v36 = vunpack.c.2.s8 %v10214_v58  ;;  %v1520_v0 = vunpack.c.3.s8 %v10214_v58 }
 0x5e9   :  { %v3089_v14 = vcvt.s32.f32 %v2065_v61  ;;  %v3473_v51 = vpack.c.bf16 %v2609_v27, %v2577_v18  ;;  %v3121_v9 = vcvt.s32.f32 %v2097_v5  ;;  %v2000_v52 = vunpack.c.2.s8 %v1200_v50 }
 0x5ea   :  { %4578 = vmatpush.bf16.msra.mxu3 %v3472_v10  ;;  %v2032_v30 = vunpack.c.3.s8 %v1200_v50  ;;  %4591 = vmatpush.bf16.msrb.mxu0 %v3728_v48  ;;  %v2512_v3 = vcvt.s32.f32 %v1488_v36  ;;  %v2544_v45 = vcvt.s32.f32 %v1520_v0  ;;  %v1489_v2 = vunpack.c.2.s8 %v10216_v34 }
 0x5eb   :  { %v1521_v25 = vunpack.c.3.s8 %v10216_v34  ;;  %4604 = vmatpush.bf16.msrb.mxu1 %v3473_v51  ;;  %v3729_v43 = vpack.c.bf16 %v3121_v9, %v3089_v14  ;;  %v3024_v39 = vcvt.s32.f32 %v2000_v52  ;;  %v2001_v37 = vunpack.c.2.s8 %v10220_v55 }
 0x5ec   :  { %v3056_v6 = vcvt.s32.f32 %v2032_v30  ;;  %v3440_v15 = vpack.c.bf16 %v2544_v45, %v2512_v3  ;;  %v2513_v29 = vcvt.s32.f32 %v1489_v2  ;;  %v2033_v53 = vunpack.c.3.s8 %v10220_v55 }
 0x5ed   :  { %v2545_v17 = vcvt.s32.f32 %v1521_v25  ;;  %v4768_v61 = vmul.f32 %v4704_v21, %v10204_v16  ;;  %4617 = vmatpush.bf16.msrb.mxu2 %v3729_v43  ;;  %v3025_v18 = vcvt.s32.f32 %v2001_v37  ;;  %v10231_v27 = vadd.f32 %v10163_v42, %v10161_v56  ;;  %v10241_v21 = vld [vmem:[#allocation20 + $0x8] sm:$0xff]  ;;  %v1040_v43 = vld [vmem:[#allocation2 + $0xe0] sm:$0xff] }
 0x5ee   :  { %v3696_v10 = vpack.c.bf16 %v3056_v6, %v3024_v39  ;;  %4579 = vmatpush.bf16.msra.mxu3 %v3440_v15  ;;  %v3057_v14 = vcvt.s32.f32 %v2033_v53  ;;  %v10236_v36 = vadd.f32 %v10169_v7, %v10167_v47  ;;  %v4766_v16 = vmul.f32 %v4702_v4, %v10113_v40  ;;  %v1168_v37 = vld [vmem:[#allocation2 + $0x4e0] sm:$0xff] }
 0x5ef   :  { %v3441_v48 = vpack.c.bf16 %v2545_v17, %v2513_v29  ;;  %v4806_v0 = vperm.slane %v10241_v21, 7  ;;  %v10806_v56 = vperm.slane %v10185_v38, 0  ;;  %v1424_v51 = vunpack.c.0.s8 %v10214_v58 }
 0x5f0   :  { %4592 = vmatpush.bf16.msrb.mxu0 %v3696_v10  ;;  %v3697_v9 = vpack.c.bf16 %v3057_v14, %v3025_v18  ;;  %v1456_v47 = vunpack.c.1.s8 %v10214_v58  ;;  %v1936_v7 = vunpack.c.0.s8 %v1200_v50  ;;  %v1968_v52 = vunpack.c.1.s8 %v1200_v50 }
 0x5f1   :  { %v4871_v42 = vadd.f32 %v10806_v56, %v10208_v23  ;;  %4605 = vmatpush.bf16.msrb.mxu1 %v3441_v48  ;;  %v10807_v40 = vperm.slane %v10185_v38, 1  ;;  %v2448_v30 = vcvt.s32.f32 %v1424_v51  ;;  %v1425_v3 = vunpack.c.0.s8 %v10216_v34  ;;  %v1169_v56 = vld [vmem:[#allocation2 + $0x4e8] sm:$0xff] }
 0x5f2   :  { %4618 = vmatpush.bf16.msrb.mxu2 %v3697_v9  ;;  %v2480_v45 = vcvt.s32.f32 %v1456_v47  ;;  %v2960_v23 = vcvt.s32.f32 %v1936_v7  ;;  %v2992_v2 = vcvt.s32.f32 %v1968_v52  ;;  %v1457_v25 = vunpack.c.1.s8 %v10216_v34 }
 0x5f3   :  { %v4872_v4 = vadd.f32 %v10807_v40, %v4768_v61  ;;  %v10254_v39 = vadd.f32 %v4806_v0, %v4766_v16  ;;  %v4903_v58 = vmax.f32 %v4871_v42, 0.0  ;;  %v2449_v6 = vcvt.s32.f32 %v1425_v3  ;;  %v1041_v61 = vld [vmem:[#allocation2 + $0xe8] sm:$0xff] }
 0x5f4   :  { %v1937_v50 = vunpack.c.0.s8 %v10220_v55  ;;  %v3408_v15 = vpack.c.bf16 %v2480_v45, %v2448_v30  ;;  %v3664_v29 = vpack.c.bf16 %v2992_v2, %v2960_v23  ;;  %v2481_v17 = vcvt.s32.f32 %v1457_v25 }
 0x5f5   :  { %v1969_v53 = vunpack.c.1.s8 %v10220_v55  ;;  %v4904_v10 = vmax.f32 %v4872_v4, 0.0  ;;  %v1360_v48 = vunpack.c.2.s8 %v1040_v43  ;;  %v1392_v14 = vunpack.c.3.s8 %v1040_v43 }
 0x5f6   :  { %v2961_v18 = vcvt.s32.f32 %v1937_v50  ;;  %4580 = vmatpush.bf16.msra.mxu3 %v3408_v15  ;;  %4593 = vmatpush.bf16.msrb.mxu0 %v3664_v29  ;;  %v3409_v34 = vpack.c.bf16 %v2481_v17, %v2449_v6  ;;  %v1872_v0 = vunpack.c.2.s8 %v1168_v37  ;;  %v1904_v42 = vunpack.c.3.s8 %v1168_v37 }
 0x5f7   :  { %v2993_v16 = vcvt.s32.f32 %v1969_v53  ;;  %v2384_v51 = vcvt.s32.f32 %v1360_v48  ;;  %v2416_v9 = vcvt.s32.f32 %v1392_v14  ;;  %v1361_v47 = vunpack.c.2.s8 %v1041_v61 }
 0x5f8   :  { %v1393_v7 = vunpack.c.3.s8 %v1041_v61  ;;  %4606 = vmatpush.bf16.msrb.mxu1 %v3409_v34  ;;  %v2896_v40 = vcvt.s32.f32 %v1872_v0  ;;  %v2928_v55 = vcvt.s32.f32 %v1904_v42  ;;  %v1873_v30 = vunpack.c.2.s8 %v1169_v56 }
 0x5f9   :  { %v3665_v52 = vpack.c.bf16 %v2993_v16, %v2961_v18  ;;  %v3376_v4 = vpack.c.bf16 %v2416_v9, %v2384_v51  ;;  %v2385_v3 = vcvt.s32.f32 %v1361_v47  ;;  %v1905_v23 = vunpack.c.3.s8 %v1169_v56  ;;  %v1138_v16 = vld [vmem:[#allocation2 + $0x3f0] sm:$0xff]  ;;  %v10265_v9 = vpop.f32.mrf.mxu3 }
 0x5fa   :  { %v2417_v45 = vcvt.s32.f32 %v1393_v7  ;;  %v3632_v2 = vpack.c.bf16 %v2928_v55, %v2896_v40  ;;  %v2897_v25 = vcvt.s32.f32 %v1873_v30  ;;  %v10258_v6 = vpack.c.bf16 %v4904_v10, %v4903_v58  ;;  %v10263_v51 = vld [vmem:[#allocation2 + $0x7f0] sm:$0xff]  ;;  %v10269_v55 = vpop.f32.mrf.mxu1 }
 0x5fb   :  { %4619 = vmatpush.bf16.msrb.mxu2 %v3665_v52  ;;  %v1296_v50 = vunpack.c.0.s8 %v1040_v43  ;;  %4581 = vmatpush.bf16.msra.mxu3 %v3376_v4  ;;  %v2929_v29 = vcvt.s32.f32 %v1905_v23  ;;  %v1328_v17 = vunpack.c.1.s8 %v1040_v43  ;;  %v1808_v53 = vunpack.c.0.s8 %v1168_v37  ;;  %v10267_v43 = vpop.f32.mrf.mxu0 }
 0x5fc   :  { %v3377_v15 = vpack.c.bf16 %v2417_v45, %v2385_v3  ;;  %4594 = vmatpush.bf16.msrb.mxu0 %v3632_v2  ;;  %4994 = vrot.lane.b32.xlu2 %v10258_v6, %s9462_s20  ;;  %v1840_v14 = vunpack.c.1.s8 %v1168_v37  ;;  %v1297_v34 = vunpack.c.0.s8 %v1041_v61  ;;  %v1329_v42 = vunpack.c.1.s8 %v1041_v61  ;;  %v10271_v37 = vpop.f32.mrf.mxu2  ;;  %v1139_v61 = vld [vmem:[#allocation2 + $0x3f8] sm:$0xff] }
 0x5fd   :  { %v2320_v48 = vcvt.s32.f32 %v1296_v50  ;;  %v3633_v0 = vpack.c.bf16 %v2929_v29, %v2897_v25  ;;  %v2352_v58 = vcvt.s32.f32 %v1328_v17  ;;  %v2832_v10 = vcvt.s32.f32 %v1808_v53 }
 0x5fe   :  { %4607 = vmatpush.bf16.msrb.mxu1 %v3377_v15  ;;  %v2864_v47 = vcvt.s32.f32 %v1840_v14  ;;  %v2321_v7 = vcvt.s32.f32 %v1297_v34  ;;  %v1809_v52 = vunpack.c.0.s8 %v1169_v56  ;;  %v1841_v40 = vunpack.c.1.s8 %v1169_v56  ;;  %v1267_v15 = vld [vmem:[#allocation2 + $0x7f8] sm:$0xff] }
 0x5ff   :  { %4620 = vmatpush.bf16.msrb.mxu2 %v3633_v0  ;;  %v3344_v30 = vpack.c.bf16 %v2352_v58, %v2320_v48  ;;  %v2353_v4 = vcvt.s32.f32 %v1329_v42  ;;  %v1746_v3 = vunpack.c.2.s8 %v1138_v16  ;;  %v1778_v45 = vunpack.c.3.s8 %v1138_v16 }
 0x600   :  { %v3600_v23 = vpack.c.bf16 %v2864_v47, %v2832_v10  ;;  %v2833_v2 = vcvt.s32.f32 %v1809_v52  ;;  %v2865_v25 = vcvt.s32.f32 %v1841_v40  ;;  %v2258_v50 = vunpack.c.2.s8 %v10263_v51 }
 0x601   :  { %4582 = vmatpush.bf16.msra.mxu3 %v3344_v30  ;;  %v3345_v29 = vpack.c.bf16 %v2353_v4, %v2321_v7  ;;  %v2770_v17 = vcvt.s32.f32 %v1746_v3  ;;  %v2802_v56 = vcvt.s32.f32 %v1778_v45  ;;  %v2290_v53 = vunpack.c.3.s8 %v10263_v51 }
 0x602   :  { %4595 = vmatpush.bf16.msrb.mxu0 %v3600_v23  ;;  %v3601_v14 = vpack.c.bf16 %v2865_v25, %v2833_v2  ;;  %v3282_v34 = vcvt.s32.f32 %v2258_v50  ;;  %v1747_v48 = vunpack.c.2.s8 %v1139_v61  ;;  %v1779_v0 = vunpack.c.3.s8 %v1139_v61  ;;  %v4378_v2 = vpop.f32.mrf.mxu3 }
 0x603   :  { %4608 = vmatpush.bf16.msrb.mxu1 %v3345_v29  ;;  %v3570_v58 = vpack.c.bf16 %v2802_v56, %v2770_v17  ;;  %v3314_v42 = vcvt.s32.f32 %v2290_v53  ;;  %v2259_v10 = vunpack.c.2.s8 %v1267_v15  ;;  %v2291_v47 = vunpack.c.3.s8 %v1267_v15  ;;  %v4391_v25 = vpop.f32.mrf.mxu0  ;;  %v1106_v53 = vld [vmem:[#allocation2 + $0x2f0] sm:$0xff] }
 0x604   :  { %4621 = vmatpush.bf16.msrb.mxu2 %v3601_v14  ;;  %v2771_v52 = vcvt.s32.f32 %v1747_v48  ;;  %v2803_v40 = vcvt.s32.f32 %v1779_v0  ;;  %4583 = vmatmul.bf16.vlgmr.msra.gmra.mxu3 %v9792_v22  ;;  %v1682_v7 = vunpack.c.0.s8 %v1138_v16  ;;  %v1714_v30 = vunpack.c.1.s8 %v1138_v16  ;;  %v4404_v14 = vpop.f32.mrf.mxu1  ;;  %v4417_v16 = vpop.f32.mrf.mxu2  ;;  %v1107_v25 = vld [vmem:[#allocation2 + $0x2f8] sm:$0xff] }
 0x605   :  { %4627 = vmatpush.bf16.msrb.mxu3 %v3570_v58  ;;  %v3826_v4 = vpack.c.bf16 %v3314_v42, %v3282_v34  ;;  %v3283_v3 = vcvt.s32.f32 %v2259_v10  ;;  %v3315_v45 = vcvt.s32.f32 %v2291_v47  ;;  %v2194_v23 = vunpack.c.0.s8 %v10263_v51  ;;  %4596 = vmatmul.bf16.vlgmr.msrb.gmra.mxu0 %v9796_v28  ;;  %v1234_v42 = vld [vmem:[#allocation2 + $0x6f0] sm:$0xff] }
 0x606   :  { %v3571_v50 = vpack.c.bf16 %v2803_v40, %v2771_v52  ;;  %v2706_v29 = vcvt.s32.f32 %v1682_v7  ;;  %v2738_v17 = vcvt.s32.f32 %v1714_v30  ;;  %v2226_v56 = vunpack.c.1.s8 %v10263_v51  ;;  %4609 = vmatmul.bf16.vlgmr.msrb.gmra.mxu1 %v9792_v22 }
 0x607   :  { %4640 = vmatpush.bf16.msra.mxu0 %v3826_v4  ;;  %v3827_v34 = vpack.c.bf16 %v3315_v45, %v3283_v3  ;;  %4622 = vmatmul.bf16.vlgmr.msrb.gmra.mxu2 %v9796_v28  ;;  %v3218_v48 = vcvt.s32.f32 %v2194_v23  ;;  %v1683_v0 = vunpack.c.0.s8 %v1139_v61  ;;  %v1715_v58 = vunpack.c.1.s8 %v1139_v61  ;;  %v1235_v23 = vld [vmem:[#allocation2 + $0x6f8] sm:$0xff] }
 0x608   :  { %4653 = vmatpush.bf16.msra.mxu1 %v3571_v50  ;;  %v3538_v10 = vpack.c.bf16 %v2738_v17, %v2706_v29  ;;  %v3250_v47 = vcvt.s32.f32 %v2226_v56  ;;  %v2195_v52 = vunpack.c.0.s8 %v1267_v15  ;;  %v2227_v40 = vunpack.c.1.s8 %v1267_v15 }
 0x609   :  { %4666 = vmatpush.bf16.msra.mxu2 %v3827_v34  ;;  %v2707_v51 = vcvt.s32.f32 %v1683_v0  ;;  %v2739_v7 = vcvt.s32.f32 %v1715_v58  ;;  %v1618_v30 = vunpack.c.2.s8 %v1106_v53  ;;  %v1650_v2 = vunpack.c.3.s8 %v1106_v53 }
 0x60a   :  { %4628 = vmatpush.bf16.msrb.mxu3 %v3538_v10  ;;  %v3794_v4 = vpack.c.bf16 %v3250_v47, %v3218_v48  ;;  %v3219_v3 = vcvt.s32.f32 %v2195_v52  ;;  %v3251_v45 = vcvt.s32.f32 %v2227_v40  ;;  %v2130_v14 = vunpack.c.2.s8 %v1234_v42 }
 0x60b   :  { %v3539_v16 = vpack.c.bf16 %v2739_v7, %v2707_v51  ;;  %v2642_v61 = vcvt.s32.f32 %v1618_v30  ;;  %v2674_v18 = vcvt.s32.f32 %v1650_v2  ;;  %v2162_v50 = vunpack.c.3.s8 %v1234_v42 }
 0x60c   :  { %4641 = vmatpush.bf16.msra.mxu0 %v3794_v4  ;;  %v3795_v29 = vpack.c.bf16 %v3251_v45, %v3219_v3  ;;  %v3154_v17 = vcvt.s32.f32 %v2130_v14  ;;  %v1619_v15 = vunpack.c.2.s8 %v1107_v25  ;;  %v1651_v56 = vunpack.c.3.s8 %v1107_v25  ;;  %v10281_v14 = vld [vmem:[#allocation2 + $0x1f0] sm:$0xff] }
 0x60d   :  { %4654 = vmatpush.bf16.msra.mxu1 %v3539_v16  ;;  %v3506_v34 = vpack.c.bf16 %v2674_v18, %v2642_v61  ;;  %v3186_v0 = vcvt.s32.f32 %v2162_v50  ;;  %v2131_v58 = vunpack.c.2.s8 %v1235_v23  ;;  %v2163_v32 = vunpack.c.3.s8 %v1235_v23 }
 0x60e   :  { %4667 = vmatpush.bf16.msra.mxu2 %v3795_v29  ;;  %v2643_v48 = vcvt.s32.f32 %v1619_v15  ;;  %v2675_v10 = vcvt.s32.f32 %v1651_v56  ;;  %v1554_v47 = vunpack.c.0.s8 %v1106_v53  ;;  %v1586_v52 = vunpack.c.1.s8 %v1106_v53  ;;  %v10283_v29 = vld [vmem:[#allocation2 + $0x5f0] sm:$0xff] }
 0x60f   :  { %4629 = vmatpush.bf16.msrb.mxu3 %v3506_v34  ;;  %v3762_v40 = vpack.c.bf16 %v3186_v0, %v3154_v17  ;;  %v3155_v51 = vcvt.s32.f32 %v2131_v58  ;;  %v3187_v7 = vcvt.s32.f32 %v2163_v32  ;;  %v2066_v30 = vunpack.c.0.s8 %v1234_v42  ;;  %v1075_v58 = vld [vmem:[#allocation2 + $0x1f8] sm:$0xff] }
 0x610   :  { %v3507_v2 = vpack.c.bf16 %v2675_v10, %v2643_v48  ;;  %v2578_v4 = vcvt.s32.f32 %v1554_v47  ;;  %v2610_v3 = vcvt.s32.f32 %v1586_v52  ;;  %v2098_v45 = vunpack.c.1.s8 %v1234_v42  ;;  %v10288_v52 = vld [vmem:[#allocation2 + $0x5f8] sm:$0xff] }
 0x611   :  { %4642 = vmatpush.bf16.msra.mxu0 %v3762_v40  ;;  %v3763_v18 = vpack.c.bf16 %v3187_v7, %v3155_v51  ;;  %v3090_v16 = vcvt.s32.f32 %v2066_v30  ;;  %v1555_v61 = vunpack.c.0.s8 %v1107_v25  ;;  %v1587_v50 = vunpack.c.1.s8 %v1107_v25 }
 0x612   :  { %4655 = vmatpush.bf16.msra.mxu1 %v3507_v2  ;;  %v3474_v53 = vpack.c.bf16 %v2610_v3, %v2578_v4  ;;  %v3122_v15 = vcvt.s32.f32 %v2098_v45  ;;  %v2067_v17 = vunpack.c.0.s8 %v1235_v23  ;;  %v2099_v56 = vunpack.c.1.s8 %v1235_v23 }
 0x613   :  { %4668 = vmatpush.bf16.msra.mxu2 %v3763_v18  ;;  %v2579_v32 = vcvt.s32.f32 %v1555_v61  ;;  %v2611_v34 = vcvt.s32.f32 %v1587_v50  ;;  %v1490_v0 = vunpack.c.2.s8 %v10281_v14  ;;  %v1522_v42 = vunpack.c.3.s8 %v10281_v14 }
 0x614   :  { %4630 = vmatpush.bf16.msrb.mxu3 %v3474_v53  ;;  %v3730_v48 = vpack.c.bf16 %v3122_v15, %v3090_v16  ;;  %v3091_v10 = vcvt.s32.f32 %v2067_v17  ;;  %v3123_v47 = vcvt.s32.f32 %v2099_v56  ;;  %v2002_v25 = vunpack.c.2.s8 %v10283_v29 }
 0x615   :  { %v3475_v40 = vpack.c.bf16 %v2611_v34, %v2579_v32  ;;  %v2514_v51 = vcvt.s32.f32 %v1490_v0  ;;  %v2546_v7 = vcvt.s32.f32 %v1522_v42  ;;  %v2034_v23 = vunpack.c.3.s8 %v10283_v29 }
 0x616   :  { %4643 = vmatpush.bf16.msra.mxu0 %v3730_v48  ;;  %v3731_v30 = vpack.c.bf16 %v3123_v47, %v3091_v10  ;;  %v3026_v2 = vcvt.s32.f32 %v2002_v25  ;;  %v1491_v4 = vunpack.c.2.s8 %v1075_v58  ;;  %v1523_v3 = vunpack.c.3.s8 %v1075_v58 }
 0x617   :  { %4656 = vmatpush.bf16.msra.mxu1 %v3475_v40  ;;  %v3442_v45 = vpack.c.bf16 %v2546_v7, %v2514_v51  ;;  %v3058_v18 = vcvt.s32.f32 %v2034_v23  ;;  %v2003_v16 = vunpack.c.2.s8 %v10288_v52  ;;  %v2035_v61 = vunpack.c.3.s8 %v10288_v52 }
 0x618   :  { %4669 = vmatpush.bf16.msra.mxu2 %v3731_v30  ;;  %v2515_v50 = vcvt.s32.f32 %v1491_v4  ;;  %v2547_v53 = vcvt.s32.f32 %v1523_v3  ;;  %v4390_v15 = vadd.f32 %v10267_v43, %v10265_v9  ;;  %v4707_v17 = vperm.slane %v10173_v26, 4  ;;  %v1042_v3 = vld [vmem:[#allocation2 + $0xf0] sm:$0xff] }
 0x619   :  { %4631 = vmatpush.bf16.msrb.mxu3 %v3442_v45  ;;  %v3698_v56 = vpack.c.bf16 %v3058_v18, %v3026_v2  ;;  %v3027_v32 = vcvt.s32.f32 %v2003_v16  ;;  %v3059_v34 = vcvt.s32.f32 %v2035_v61  ;;  %v4811_v0 = vperm.slane %v10185_v38, 4  ;;  %v10307_v2 = vpop.f32.mrf.mxu3  ;;  %v10311_v45 = vpop.f32.mrf.mxu1 }
 0x61a   :  { %v3443_v42 = vpack.c.bf16 %v2547_v53, %v2515_v50  ;;  %v4771_v48 = vmul.f32 %v4707_v17, %v4390_v15  ;;  %v4416_v10 = vadd.f32 %v10271_v37, %v10269_v55  ;;  %v4708_v47 = vperm.slane %v10173_v26, 5  ;;  %v10309_v55 = vpop.f32.mrf.mxu0  ;;  %v1170_v50 = vld [vmem:[#allocation2 + $0x4f0] sm:$0xff] }
 0x61b   :  { %4644 = vmatpush.bf16.msra.mxu0 %v3698_v56  ;;  %v3699_v25 = vpack.c.bf16 %v3059_v34, %v3027_v32  ;;  %v4812_v40 = vperm.slane %v10185_v38, 5  ;;  %v1426_v9 = vunpack.c.0.s8 %v10281_v14  ;;  %v1458_v43 = vunpack.c.1.s8 %v10281_v14  ;;  %v10313_v14 = vpop.f32.mrf.mxu2  ;;  %v1043_v32 = vld [vmem:[#allocation2 + $0xf8] sm:$0xff] }
 0x61c   :  { %4657 = vmatpush.bf16.msra.mxu1 %v3443_v42  ;;  %v10303_v51 = vadd.f32 %v4811_v0, %v4771_v48  ;;  %v4772_v7 = vmul.f32 %v4708_v47, %v4416_v10  ;;  %v1938_v23 = vunpack.c.0.s8 %v10283_v29  ;;  %v1970_v30 = vunpack.c.1.s8 %v10283_v29  ;;  %v1171_v48 = vld [vmem:[#allocation2 + $0x4f8] sm:$0xff] }
 0x61d   :  { %4670 = vmatpush.bf16.msra.mxu2 %v3699_v25  ;;  %v2450_v26 = vcvt.s32.f32 %v1426_v9  ;;  %v2482_v37 = vcvt.s32.f32 %v1458_v43  ;;  %v1427_v38 = vunpack.c.0.s8 %v1075_v58  ;;  %v1459_v4 = vunpack.c.1.s8 %v1075_v58 }
 0x61e   :  { %v10316_v16 = vadd.f32 %v4812_v40, %v4772_v7  ;;  %v2962_v61 = vcvt.s32.f32 %v1938_v23  ;;  %v2994_v29 = vcvt.s32.f32 %v1970_v30  ;;  %v1939_v56 = vunpack.c.0.s8 %v10288_v52 }
 0x61f   :  { %v3410_v53 = vpack.c.bf16 %v2482_v37, %v2450_v26  ;;  %v2451_v15 = vcvt.s32.f32 %v1427_v38  ;;  %v2483_v17 = vcvt.s32.f32 %v1459_v4  ;;  %v1971_v0 = vunpack.c.1.s8 %v10288_v52 }
 0x620   :  { %v4908_v58 = vmax.f32 %v10316_v16, 0.0  ;;  %v3666_v34 = vpack.c.bf16 %v2994_v29, %v2962_v61  ;;  %v1362_v42 = vunpack.c.2.s8 %v1042_v3  ;;  %v2963_v47 = vcvt.s32.f32 %v1939_v56 }
 0x621   :  { %4632 = vmatpush.bf16.msrb.mxu3 %v3410_v53  ;;  %v3411_v10 = vpack.c.bf16 %v2483_v17, %v2451_v15  ;;  %v1394_v25 = vunpack.c.3.s8 %v1042_v3  ;;  %v1874_v40 = vunpack.c.2.s8 %v1170_v50  ;;  %v2995_v9 = vcvt.s32.f32 %v1971_v0  ;;  %v4430_v29 = vpop.f32.mrf.mxu3 }
 0x622   :  { %4645 = vmatpush.bf16.msra.mxu0 %v3666_v34  ;;  %v2386_v43 = vcvt.s32.f32 %v1362_v42  ;;  %v1906_v7 = vunpack.c.3.s8 %v1170_v50  ;;  %v1363_v23 = vunpack.c.2.s8 %v1043_v32  ;;  %v1395_v37 = vunpack.c.3.s8 %v1043_v32  ;;  %v4443_v53 = vpop.f32.mrf.mxu0  ;;  %v4456_v34 = vpop.f32.mrf.mxu1 }
 0x623   :  { %4658 = vmatpush.bf16.msra.mxu1 %v3411_v10  ;;  %v2418_v30 = vcvt.s32.f32 %v1394_v25  ;;  %v2898_v26 = vcvt.s32.f32 %v1874_v40  ;;  %v1875_v38 = vunpack.c.2.s8 %v1171_v48  ;;  %v3667_v4 = vpack.c.bf16 %v2995_v9, %v2963_v47  ;;  %v4469_v0 = vpop.f32.mrf.mxu2 }
 0x624   :  { %v2930_v16 = vcvt.s32.f32 %v1906_v7  ;;  %v2387_v52 = vcvt.s32.f32 %v1363_v23  ;;  %v1907_v61 = vunpack.c.3.s8 %v1171_v48  ;;  %v2419_v17 = vcvt.s32.f32 %v1395_v37 }
 0x625   :  { %v3378_v15 = vpack.c.bf16 %v2418_v30, %v2386_v43  ;;  %v2899_v56 = vcvt.s32.f32 %v1875_v38  ;;  %v1298_v5 = vunpack.c.0.s8 %v1042_v3  ;;  %4671 = vmatpush.bf16.msra.mxu2 %v3667_v4  ;;  %v1330_v10 = vunpack.c.1.s8 %v1042_v3 }
 0x626   :  { %v3634_v42 = vpack.c.bf16 %v2930_v16, %v2898_v26  ;;  %v2931_v18 = vcvt.s32.f32 %v1907_v61  ;;  %v1810_v25 = vunpack.c.0.s8 %v1170_v50  ;;  %v3379_v40 = vpack.c.bf16 %v2419_v17, %v2387_v52 }
 0x627   :  { %4633 = vmatpush.bf16.msrb.mxu3 %v3378_v15  ;;  %v2322_v63 = vcvt.s32.f32 %v1298_v5  ;;  %v1842_v47 = vunpack.c.1.s8 %v1170_v50  ;;  %v1299_v9 = vunpack.c.0.s8 %v1043_v32  ;;  %v2354_v23 = vcvt.s32.f32 %v1330_v10  ;;  %v8996_v10 = vld [vmem:[#allocation21] sm:$0xff] }
 0x628   :  { %4646 = vmatpush.bf16.msra.mxu0 %v3634_v42  ;;  %v3635_v7 = vpack.c.bf16 %v2931_v18, %v2899_v56  ;;  %v2834_v29 = vcvt.s32.f32 %v1810_v25  ;;  %v1331_v43 = vunpack.c.1.s8 %v1043_v32  ;;  %4659 = vmatpush.bf16.msra.mxu1 %v3379_v40  ;;  %v1811_v38 = vunpack.c.0.s8 %v1171_v48 }
 0x629   :  { %v2866_v30 = vcvt.s32.f32 %v1842_v47  ;;  %v2323_v37 = vcvt.s32.f32 %v1299_v9  ;;  %v1843_v53 = vunpack.c.1.s8 %v1171_v48  ;;  %v3346_v26 = vpack.c.bf16 %v2354_v23, %v2322_v63 }
 0x62a   :  { %4672 = vmatpush.bf16.msra.mxu2 %v3635_v7  ;;  %v2355_v4 = vcvt.s32.f32 %v1331_v43  ;;  %v10808_v3 = vmax.f32 %v10303_v51, 0.0  ;;  %v10809_v5 = vmax.f32 %v10124_v60, 0.0  ;;  %v10810_v50 = vmax.f32 %v10182_v44, 0.0  ;;  %v8997_v43 = vld [vmem:[#allocation20] sm:$0xff] }
 0x62b   :  { %v3602_v52 = vpack.c.bf16 %v2866_v30, %v2834_v29  ;;  %v2835_v32 = vcvt.s32.f32 %v1811_v38  ;;  %v2867_v61 = vcvt.s32.f32 %v1843_v53  ;;  %v10811_v15 = vmax.f32 %v10191_v41, 0.0  ;;  %4634 = vmatpush.bf16.msrb.mxu3 %v3346_v26 }
 0x62c   :  { %v10323_v16 = vpack.c.bf16 %v4908_v58, %v10808_v3  ;;  %v10329_v18 = vpack.c.bf16 %v10810_v50, %v10809_v5  ;;  %v10812_v48 = vmax.f32 %v10254_v39, 0.0  ;;  %v3347_v63 = vpack.c.bf16 %v2355_v4, %v2323_v37 }
 0x62d   :  { %v10341_v60 = vadd.f32 %v10309_v55, %v10307_v2  ;;  %4647 = vmatpush.bf16.msra.mxu0 %v3602_v52  ;;  %v3603_v44 = vpack.c.bf16 %v2867_v61, %v2835_v32  ;;  %v10345_v51 = vadd.f32 %v10313_v14, %v10311_v45  ;;  %v10813_v41 = vmax.f32 %v10083_v49, 0.0  ;;  %v10365_v45 = vld [vmem:[#allocation21 + $0x18] sm:$0xff] }
 0x62e   :  { %v10335_v17 = vpack.c.bf16 %v10812_v48, %v10811_v15  ;;  %5008 = vrot.lane.b32.xlu2 %v10323_v16, %s9462_s20  ;;  %4660 = vmatpush.bf16.msra.mxu1 %v3347_v63  ;;  %v10814_v39 = vmax.f32 %v10118_v1, 0.0  ;;  %v10815_v56 = vmax.f32 %v10013_v57, 0.0  ;;  %v10816_v2 = vmax.f32 %v10015_v46, 0.0  ;;  %v4493_v1 = vpop.f32.mrf.mxu0  ;;  %v10367_v14 = vld [vmem:[#allocation20 + $0x18] sm:$0xff]  ;;  %v4506_v0 = vpop.f32.mrf.mxu1 }
 0x62f   :  { %4673 = vmatpush.bf16.msra.mxu2 %v3603_v44  ;;  %4635 = vmatmul.bf16.vlgmr.msrb.gmra.mxu3 %v9792_v22  ;;  %v4711_v46 = vperm.slane %v10365_v45, 0  ;;  %v4815_v34 = vperm.slane %v10367_v14, 0  ;;  %v4692_v25 = vperm.slane %v8996_v10, 5  ;;  %v4816_v47 = vperm.slane %v10367_v14, 1 }
 0x630   :  { %v10351_v58 = vpack.c.bf16 %v10814_v39, %v10813_v41  ;;  %v10358_v55 = vpack.c.bf16 %v10816_v2, %v10815_v56  ;;  %4648 = vmatmul.bf16.vlgmr.msra.gmra.mxu0 %v9796_v28  ;;  %v4693_v9 = vperm.slane %v8996_v10, 6  ;;  %v4694_v23 = vperm.slane %v8996_v10, 7 }
 0x631   :  { %4661 = vmatmul.bf16.vlgmr.msra.gmra.mxu1 %v9792_v22  ;;  %v4480_v49 = vpop.f32.mrf.mxu3  ;;  %v4712_v22 = vperm.slane %v10365_v45, 1  ;;  %v4795_v30 = vperm.slane %v8997_v43, 4  ;;  %v4756_v53 = vmul.f32 %v4692_v25, %v9911_v8  ;;  %v4796_v26 = vperm.slane %v8997_v43, 5 }
 0x632   :  { %4674 = vmatmul.bf16.vlgmr.msra.gmra.mxu2 %v9796_v28  ;;  %v4494_v57 = vadd.f32 %v4493_v1, %v4480_v49  ;;  %v4691_v28 = vperm.slane %v8996_v10, 4  ;;  %v4757_v3 = vmul.f32 %v4693_v9, %v9923_v33  ;;  %v4797_v5 = vperm.slane %v8997_v43, 6 }
 0x633   :  { %v4758_v50 = vmul.f32 %v4694_v23, %v9927_v11  ;;  %v4798_v52 = vperm.slane %v8997_v43, 7  ;;  %v4860_v39 = vadd.f32 %v4796_v26, %v4756_v53  ;;  %v4817_v10 = vperm.slane %v10367_v14, 2 }
 0x634   :  { %v4775_v7 = vmul.f32 %v4711_v46, %v4494_v57  ;;  %v4755_v38 = vmul.f32 %v4691_v28, %v9906_v62  ;;  %v4861_v56 = vadd.f32 %v4797_v5, %v4757_v3  ;;  %v4714_v25 = vperm.slane %v10365_v45, 3 }
 0x635   :  { %v4519_v42 = vpop.f32.mrf.mxu2  ;;  %v4862_v62 = vadd.f32 %v4798_v52, %v4758_v50  ;;  %v4892_v33 = vmax.f32 %v4860_v39, 0.0 }
 0x636   :  { %4966 = vrot.lane.b32.xlu2 %v10329_v18, %s9462_s20  ;;  %v4520_v40 = vadd.f32 %v4519_v42, %v4506_v0  ;;  %v4879_v37 = vadd.f32 %v4815_v34, %v4775_v7  ;;  %v4495_v48 = vpop.f32.mrf.mxu0  ;;  %v4508_v63 = vpop.f32.mrf.mxu1  ;;  %v4859_v41 = vadd.f32 %v4795_v30, %v4755_v38  ;;  %v4893_v11 = vmax.f32 %v4861_v56, 0.0  ;;  %v9000_v56 = vld [vmem:[#allocation21 + $0x8] sm:$0xff] }
 0x637   :  { %v4894_v49 = vmax.f32 %v4862_v62, 0.0  ;;  %v4713_v0 = vperm.slane %v10365_v45, 2  ;;  %v8999_v63 = vld [vmem:[#allocation20 + $0x10] sm:$0xff]  ;;  %v4697_v62 = vperm.slane %v9000_v56, 2 }
 0x638   :  { %v4776_v29 = vmul.f32 %v4712_v22, %v4520_v40  ;;  %v4911_v32 = vmax.f32 %v4879_v37, 0.0  ;;  %v4891_v8 = vmax.f32 %v4859_v41, 0.0  ;;  %v4810_v39 = vperm.slane %v8999_v63, 3 }
 0x639   :  { %v4482_v15 = vpop.f32.mrf.mxu3  ;;  %v10384_v57 = vpack.c.bf16 %v4894_v49, %v4893_v11  ;;  %v4801_v49 = vperm.slane %v10241_v21, 2 }
 0x63a   :  { %v4880_v4 = vadd.f32 %v4816_v47, %v4776_v29  ;;  %v10382_v1 = vpack.c.bf16 %v4892_v33, %v4891_v8  ;;  %v4818_v29 = vperm.slane %v10367_v14, 3  ;;  %v4698_v8 = vperm.slane %v9000_v56, 3 }
 0x63c   :  { %v4912_v61 = vmax.f32 %v4880_v4, 0.0 }
 0x63d   :  { %v4521_v44 = vpop.f32.mrf.mxu2 }
 0x63e   :  { %4987 = vrot.lane.b32.xlu2 %v10335_v17, %s9462_s20  ;;  %v4931_v2 = vpack.c.bf16 %v4912_v61, %v4911_v32  ;;  %v10397_v32 = vld [vmem:[#allocation21 + $0x10] sm:$0xff]  ;;  %v4809_v44 = vperm.slane %v8999_v63, 2 }
 0x63f   :  { %v4705_v61 = vperm.slane %v10397_v32, 2  ;;  %v4706_v15 = vperm.slane %v10397_v32, 3 }
 0x640   :  { %5022 = vrot.lane.b32.xlu0 %v4931_v2, %s9462_s20  ;;  %v5020_v26 = vrot.slane %v4931_v2, 4 }
 0x641   :  { %v4769_v48 = vmul.f32 %v4705_v61, %v10231_v27  ;;  %v4770_v41 = vmul.f32 %v4706_v15, %v10236_v36  ;;  %v4700_v36 = vperm.slane %v9000_v56, 5  ;;  %v4820_v15 = vperm.slane %v10367_v14, 5 }
 0x643   :  { %v4873_v33 = vadd.f32 %v4809_v44, %v4769_v48  ;;  %v4874_v11 = vadd.f32 %v4810_v39, %v4770_v41 }
 0x645   :  { %v4906_v27 = vmax.f32 %v4874_v11, 0.0 }
 0x646   :  { %4945 = vrot.lane.b32.xlu2 %v10351_v58, %s9462_s20 }
 0x654   :  { %v4545_v46 = vpop.f32.mrf.mxu0 }
 0x656   :  { %v4558_v34 = vpop.f32.mrf.mxu1 }
 0x659   :  { %v4532_v42 = vpop.f32.mrf.mxu3 }
 0x65a   :  { %v4546_v22 = vadd.f32 %v4545_v46, %v4532_v42  ;;  %v4762_v46 = vmul.f32 %v4698_v8, %v10005_v35  ;;  %v4804_v35 = vperm.slane %v10241_v21, 5 }
 0x65c   :  { %v4777_v28 = vmul.f32 %v4713_v0, %v4546_v22  ;;  %v4547_v40 = vpop.f32.mrf.mxu0  ;;  %v4905_v0 = vmax.f32 %v4873_v33, 0.0 }
 0x65d   :  { %v4571_v47 = vpop.f32.mrf.mxu2 }
 0x65e   :  { %v4560_v9 = vpop.f32.mrf.mxu1  ;;  %v4881_v7 = vadd.f32 %v4817_v10, %v4777_v28  ;;  %v4572_v23 = vadd.f32 %v4571_v47, %v4558_v34  ;;  %v4802_v34 = vperm.slane %v10241_v21, 3  ;;  %v4699_v10 = vperm.slane %v9000_v56, 4 }
 0x65f   :  { %v10407_v28 = vpack.c.bf16 %v4906_v27, %v4905_v0  ;;  %v4764_v9 = vmul.f32 %v4700_v36, %v10068_v54  ;;  %v4813_v0 = vperm.slane %v8999_v63, 6 }
 0x660   :  { %v4778_v43 = vmul.f32 %v4714_v25, %v4572_v23  ;;  %v4913_v37 = vmax.f32 %v4881_v7, 0.0  ;;  %v4866_v22 = vadd.f32 %v4802_v34, %v4762_v46  ;;  %v4763_v47 = vmul.f32 %v4699_v10, %v10063_v31 }
 0x661   :  { %v4534_v30 = vpop.f32.mrf.mxu3  ;;  %v4716_v31 = vperm.slane %v10365_v45, 5 }
 0x662   :  { %v4882_v38 = vadd.f32 %v4818_v29, %v4778_v43  ;;  %v4898_v40 = vmax.f32 %v4866_v22, 0.0  ;;  %v4868_v30 = vadd.f32 %v4804_v35, %v4764_v9  ;;  %v4718_v9 = vperm.slane %v10365_v45, 7 }
 0x664   :  { %v4914_v53 = vmax.f32 %v4882_v38, 0.0 }
 0x665   :  { %v4573_v4 = vpop.f32.mrf.mxu2 }
 0x666   :  { %v4932_v3 = vpack.c.bf16 %v4914_v53, %v4913_v37  ;;  %v4715_v37 = vperm.slane %v10365_v45, 4 }
 0x668   :  { %5029 = vrot.lane.b32.xlu1 %v4932_v3, %s9462_s20  ;;  %v5280_v5 = vrot.slane %v4932_v3, 4  ;;  %v10392_v50 = vsel %vm5064_vm4, %v4932_v3, %v5020_v26  ;;  %v4819_v26 = vperm.slane %v10367_v14, 4  ;;  %v4900_v3 = vmax.f32 %v4868_v30, 0.0 }
 0x669   :  { %v4822_v30 = vperm.slane %v10367_v14, 7 }
 0x66a   :  { %v10395_v52 = vsel %vm5064_vm4, %v5280_v5, %v4931_v2  ;;  %v4761_v2 = vmul.f32 %v4697_v62, %v10001_v24  ;;  %v4803_v24 = vperm.slane %v10241_v21, 4 }
 0x66c   :  { %v4865_v42 = vadd.f32 %v4801_v49, %v4761_v2  ;;  %v4867_v43 = vadd.f32 %v4803_v24, %v4763_v47  ;;  %v4709_v2 = vperm.slane %v10397_v32, 6  ;;  %v4710_v49 = vperm.slane %v10397_v32, 7 }
 0x66d   :  { %v4821_v24 = vperm.slane %v10367_v14, 6  ;;  %v10449_v14 = vpop.permute.xlu2 %4994 }
 0x66e   :  { %v4897_v25 = vmax.f32 %v4865_v42, 0.0  ;;  %v4899_v4 = vmax.f32 %v4867_v43, 0.0  ;;  %v4773_v34 = vmul.f32 %v4709_v2, %v10341_v60  ;;  %v4774_v27 = vmul.f32 %v4710_v49, %v10345_v51 }
 0x66f   :  { %v4814_v42 = vperm.slane %v8999_v63, 7  ;;  %v4717_v51 = vperm.slane %v10365_v45, 6 }
 0x670   :  { %v10413_v29 = vpack.c.bf16 %v4898_v40, %v4897_v25  ;;  %v10419_v39 = vpack.c.bf16 %v4900_v3, %v4899_v4  ;;  %v4877_v22 = vadd.f32 %v4813_v0, %v4773_v34  ;;  %v4964_v34 = vrot.slane %v10329_v18, 4 }
 0x671   :  { %v4878_v10 = vadd.f32 %v4814_v42, %v4774_v27  ;;  %v5063_v42 = vrot.slane %v10351_v58, 4 }
 0x672   :  { %v4909_v36 = vmax.f32 %v4877_v22, 0.0 }
 0x673   :  { %v4910_v25 = vmax.f32 %v4878_v10, 0.0  ;;  %v4992_v10 = vrot.slane %v10258_v6, 4 }
 0x675   :  { %v10428_v40 = vpack.c.bf16 %v4910_v25, %v4909_v36 }
 0x682   :  { %v4597_v7 = vpop.f32.mrf.mxu0 }
 0x683   :  { %v4610_v23 = vpop.f32.mrf.mxu1 }
 0x687   :  { %v4584_v38 = vpop.f32.mrf.mxu3 }
 0x688   :  { %v4598_v53 = vadd.f32 %v4597_v7, %v4584_v38 }
 0x68a   :  { %v4779_v5 = vmul.f32 %v4715_v37, %v4598_v53  ;;  %v4623_v54 = vpop.f32.mrf.mxu2  ;;  %v4599_v61 = vpop.f32.mrf.mxu0 }
 0x68b   :  { %v4624_v21 = vadd.f32 %v4623_v54, %v4610_v23  ;;  %v4612_v48 = vpop.f32.mrf.mxu1 }
 0x68c   :  { %v4883_v44 = vadd.f32 %v4819_v26, %v4779_v5 }
 0x68d   :  { %v4780_v41 = vmul.f32 %v4716_v31, %v4624_v21 }
 0x68e   :  { %v4915_v56 = vmax.f32 %v4883_v44, 0.0  ;;  %v10451_v44 = vpop.permute.xlu2 %5008 }
 0x68f   :  { %v4884_v62 = vadd.f32 %v4820_v15, %v4780_v41  ;;  %v4586_v8 = vpop.f32.mrf.mxu3 }
 0x691   :  { %v4916_v33 = vmax.f32 %v4884_v62, 0.0 }
 0x692   :  { %v4625_v11 = vpop.f32.mrf.mxu2 }
 0x693   :  { %v4933_v46 = vpack.c.bf16 %v4916_v33, %v4915_v56  ;;  %v9470_v56 = vmov 1983009808   ;;  %v4936_v33 = vrot.slane %v10358_v55, 4 }
 0x694   :  { %v5067_v62 = vunpack.c.l.s4 %v9470_v56 }
 0x695   :  { %5036 = vrot.lane.b32.xlu0 %v4933_v46, %s9462_s20  ;;  %v5034_v54 = vrot.slane %v4933_v46, 4  ;;  %v5071_v22 = vsel %vm5064_vm4, %v10351_v58, %v4936_v33 }
 0x696   :  { %v10455_v8 = vunpack.c.0.s8 %v5067_v62  ;;  %v10460_v2 = vpop.permute.xlu2 %4966 }
 0x698   :  { %v5291_v11 = vperm.slane %v10392_v50, %v10455_v8  ;;  %v5285_v58 = vperm.slane %v10395_v52, %v10455_v8  ;;  %v5100_v52 = vrot.slane %v10384_v57, 4 }
 0x69a   :  { %v5292_v36 = vrot.slane %v5291_v11, 4  ;;  %v10506_v33 = vsel %vm5064_vm4, %v5100_v52, %v10382_v1 }
 0x69d   :  { %5001 = vrot.lane.b32.xlu0 %v10407_v28, %s9462_s20 }
 0x6a5   :  { %4980 = vrot.lane.b32.xlu0 %v10419_v39, %s9462_s20 }
 0x6ad   :  { %v4649_v32 = vpop.f32.mrf.mxu0  ;;  %4938 = vrot.lane.b32.xlu0 %v10358_v55, %s9462_s20 }
 0x6ae   :  { %v4662_v60 = vpop.f32.mrf.mxu1 }
 0x6b2   :  { %v4636_v63 = vpop.f32.mrf.mxu3  ;;  %v5023_v48 = vpop.permute.xlu0 %5022 }
 0x6b3   :  { %v4650_v47 = vadd.f32 %v4649_v32, %v4636_v63  ;;  %v5075_v63 = vperm.slane %v5071_v22, %v10455_v8 }
 0x6b5   :  { %v4781_v35 = vmul.f32 %v4717_v51, %v4650_v47  ;;  %v4675_v7 = vpop.f32.mrf.mxu2  ;;  %v4651_v23 = vpop.f32.mrf.mxu0  ;;  %4959 = vrot.lane.b32.xlu0 %v10384_v57, %s9462_s20  ;;  %v5143_v51 = vsel %vm5064_vm4, %v10413_v29, %v4964_v34  ;;  %v5065_v47 = vsel %vm5064_vm4, %v5063_v42, %v10358_v55  ;;  %v5293_v55 = vsel %vm5064_vm4, %v5292_v36, %v5285_v58 }
 0x6b6   :  { %v4676_v43 = vadd.f32 %v4675_v7, %v4662_v60  ;;  %v4664_v37 = vpop.f32.mrf.mxu1  ;;  %v5136_v60 = vrot.slane %v10413_v29, 4  ;;  %v9471_v23 = vmov 1934713408  }
 0x6b7   :  { %v4885_v38 = vadd.f32 %v4821_v24, %v4781_v35  ;;  %v4950_v24 = vrot.slane %v10382_v1, 4  ;;  %v5215_v35 = vsel %vm5064_vm4, %v10407_v28, %v4992_v10 }
 0x6b8   :  { %v4782_v53 = vmul.f32 %v4718_v9, %v4676_v43  ;;  %v5079_v43 = vunpack.c.l.s4 %v9471_v23 }
 0x6b9   :  { %v4917_v26 = vmax.f32 %v4885_v38, 0.0  ;;  %v5069_v38 = vperm.slane %v5065_v47, %v10455_v8 }
 0x6ba   :  { %v4886_v31 = vadd.f32 %v4822_v30, %v4782_v53  ;;  %v4638_v4 = vpop.f32.mrf.mxu3  ;;  %v5137_v53 = vsel %vm5064_vm4, %v5136_v60, %v10329_v18  ;;  %v4996_v18 = vrot.slane %v10449_v14, 4 }
 0x6bb   :  { %v5172_v4 = vrot.slane %v10335_v17, 4  ;;  %v5141_v62 = vperm.slane %v5137_v53, %v10455_v8 }
 0x6bc   :  { %v4918_v3 = vmax.f32 %v4886_v31, 0.0  ;;  %v5006_v31 = vrot.slane %v10323_v16, 4 }
 0x6bd   :  { %v4677_v5 = vpop.f32.mrf.mxu2 }
 0x6be   :  { %v4934_v61 = vpack.c.bf16 %v4918_v3, %v4917_v26  ;;  %v5076_v26 = vrot.slane %v5075_v63, 4  ;;  %v4988_v3 = vpop.permute.xlu2 %4987  ;;  %v10496_v5 = vsel %vm5064_vm4, %v10384_v57, %v4950_v24  ;;  %v10508_v57 = vunpack.c.0.s8 %v5079_v43 }
 0x6bf   :  { %v5111_v11 = vperm.slane %v10496_v5, %v10455_v8 }
 0x6c0   :  { %5043 = vrot.lane.b32.xlu1 %v4934_v61, %s9462_s20  ;;  %v5316_v45 = vrot.slane %v4934_v61, 4  ;;  %v5323_v21 = vsel %vm5064_vm4, %v4934_v61, %v5034_v54  ;;  %v5208_v54 = vrot.slane %v10407_v28, 4  ;;  %v5219_v61 = vperm.slane %v5215_v35, %v10455_v8 }
 0x6c1   :  { %v5327_v49 = vperm.slane %v5323_v21, %v10455_v8  ;;  %v10511_v28 = vsel %vm5064_vm4, %v5076_v26, %v5069_v38 }
 0x6c2   :  { %v5317_v15 = vsel %vm5064_vm4, %v5316_v45, %v4933_v46  ;;  %v5024_v46 = vrot.slane %v5023_v48, 4  ;;  %v5209_v42 = vsel %vm5064_vm4, %v5208_v54, %v10258_v6  ;;  %v5220_v22 = vrot.slane %v5219_v61, 4 }
 0x6c3   :  { %v5328_v25 = vrot.slane %v5327_v49, 4  ;;  %v5321_v9 = vperm.slane %v5317_v15, %v10455_v8  ;;  %v10517_v49 = vsel %vm5064_vm4, %v5172_v4, %v10419_v39 }
 0x6c5   :  { %v5329_v37 = vsel %vm5064_vm4, %v5328_v25, %v5321_v9  ;;  %v5251_v25 = vsel %vm5064_vm4, %v10428_v40, %v5006_v31 }
 0x6c6   :  { %v5255_v24 = vperm.slane %v5251_v25, %v10455_v8 }
 0x6c8   :  { %5015 = vrot.lane.b32.xlu1 %v10428_v40, %s9462_s20  ;;  %v5256_v61 = vrot.slane %v5255_v24, 4 }
 0x6d0   :  { %4973 = vrot.lane.b32.xlu1 %v10413_v29, %s9462_s20  ;;  %v5147_v29 = vperm.slane %v5143_v51, %v10455_v8  ;;  %v5190_v51 = vrot.slane %v4988_v3, 4 }
 0x6d2   :  { %v5148_v56 = vrot.slane %v5147_v29, 4  ;;  %v5213_v29 = vperm.slane %v5209_v42, %v10455_v8 }
 0x6d8   :  { %4952 = vrot.lane.b32.xlu1 %v10382_v1, %s9462_s20  ;;  %v5010_v1 = vrot.slane %v10451_v44, 4 }
 0x6da   :  { %v5030_v0 = vpop.permute.xlu1 %5029 }
 0x6db   :  { %v5298_v50 = vrot.slane %v5030_v0, 4  ;;  %v5305_v32 = vsel %vm5064_vm4, %v5030_v0, %v5024_v46 }
 0x6dc   :  { %v5309_v7 = vperm.slane %v5305_v32, %v10455_v8  ;;  %v5177_v32 = vperm.slane %v10517_v49, %v10455_v8 }
 0x6dd   :  { %v5299_v30 = vsel %vm5064_vm4, %v5298_v50, %v5023_v48  ;;  %v4978_v48 = vrot.slane %v10419_v39, 4  ;;  %v5244_v39 = vrot.slane %v10428_v40, 4  ;;  %v10532_v50 = vsel %vm5064_vm4, %v5148_v56, %v5141_v62 }
 0x6de   :  { %v5303_v45 = vperm.slane %v5299_v30, %v10455_v8  ;;  %v5310_v21 = vrot.slane %v5309_v7, 4  ;;  %v4946_v7 = vpop.permute.xlu2 %4945 }
 0x6df   :  { %v5179_v36 = vsel %vm5064_vm4, %v10335_v17, %v4978_v48  ;;  %v5245_v23 = vsel %vm5064_vm4, %v5244_v39, %v10323_v16  ;;  %v5333_v16 = vperm.slane %v5329_v37, %v10508_v57  ;;  %v5082_v54 = vrot.slane %v4946_v7, 4 }
 0x6e0   :  { %v5311_v10 = vsel %vm5064_vm4, %v5310_v21, %v5303_v45  ;;  %v5183_v35 = vperm.slane %v5179_v36, %v10455_v8 }
 0x6e1   :  { %v5315_v40 = vperm.slane %v5311_v10, %v10508_v57 }
 0x6e2   :  { %v5184_v45 = vrot.slane %v5183_v35, 4 }
 0x707   :  { %v10453_v41 = vpop.permute.xlu0 %5036 }
 0x708   :  { %v5038_v6 = vrot.slane %v10453_v41, 4 }
 0x70f   :  { %v10464_v27 = vpop.permute.xlu0 %5001 }
 0x710   :  { %v5226_v46 = vrot.slane %v10464_v27, 4  ;;  %v5233_v34 = vsel %vm5064_vm4, %v10464_v27, %v4996_v18  ;;  %v4968_v27 = vrot.slane %v10460_v2, 4 }
 0x711   :  { %v5237_v60 = vperm.slane %v5233_v34, %v10455_v8 }
 0x712   :  { %v5227_v17 = vsel %vm5064_vm4, %v5226_v46, %v10449_v14  ;;  %v5297_v14 = vperm.slane %v5293_v55, %v10508_v57  ;;  %v5249_v46 = vperm.slane %v5245_v23, %v10455_v8 }
 0x713   :  { %v5231_v30 = vperm.slane %v5227_v17, %v10455_v8  ;;  %v5238_v38 = vrot.slane %v5237_v60, 4 }
 0x714   :  { %v5390_v48 = vpack.i.b16 %v5315_v40, %v5297_v14  ;;  %v5391_v56 = vshrl.u32 %v5297_v14, 16 }
 0x715   :  { %v5239_v49 = vsel %vm5064_vm4, %v5238_v38, %v5231_v30 }
 0x717   :  { %v4981_v15 = vpop.permute.xlu0 %4980 }
 0x718   :  { %v4982_v0 = vrot.slane %v4981_v15, 4  ;;  %v5191_v55 = vsel %vm5064_vm4, %v5190_v51, %v4981_v15  ;;  %v5397_v15 = vshrl.u32 %v5333_v16, 16  ;;  %v5243_v51 = vperm.slane %v5239_v49, %v10508_v57 }
 0x719   :  { %v5195_v37 = vperm.slane %v5191_v55, %v10455_v8 }
 0x71a   :  { %v5197_v63 = vsel %vm5064_vm4, %v4988_v3, %v4982_v0  ;;  %v5392_v3 = vshrl.u32 %v5315_v40, 16  ;;  %v5257_v40 = vsel %vm5064_vm4, %v5256_v61, %v5249_v46  ;;  %v5380_v30 = vshrl.u32 %v5243_v51, 16 }
 0x71b   :  { %v5201_v52 = vperm.slane %v5197_v63, %v10455_v8 }
 0x71c   :  { %v5393_v42 = vpack.i.b16 %v5392_v3, %v5391_v56 }
 0x71d   :  { %v5202_v34 = vrot.slane %v5201_v52, 4 }
 0x71e   :  { %v5461_v23 = vunpack.c.l.b16 %v5393_v42  ;;  %v5153_v42 = vperm.slane %v10532_v50, %v10508_v57 }
 0x71f   :  { %v4939_v53 = vpop.permute.xlu0 %4938  ;;  %v5203_v35 = vsel %vm5064_vm4, %v5202_v34, %v5195_v37  ;;  %v8727_v37 = vld [vmem:[#allocation23 + $0x18] sm:$0xff] }
 0x720   :  { %v4940_v21 = vrot.slane %v4939_v53, 4  ;;  %v5207_v61 = vperm.slane %v5203_v35, %v10508_v57  ;;  %5540 = vmatpush.bf16.msrb.mxu1 %v8727_v37 }
 0x732   :  { %v5044_v47 = vpop.permute.xlu1 %5043 }
 0x733   :  { %v5334_v58 = vrot.slane %v5044_v47, 4  ;;  %v5341_v9 = vsel %vm5064_vm4, %v5044_v47, %v5038_v6  ;;  %v5089_v6 = vsel %vm5064_vm4, %v4946_v7, %v4940_v21 }
 0x734   :  { %v5345_v43 = vperm.slane %v5341_v9, %v10455_v8  ;;  %v5185_v9 = vsel %vm5064_vm4, %v5184_v45, %v5177_v32  ;;  %v5093_v14 = vperm.slane %v5089_v6, %v10455_v8  ;;  %v5083_v32 = vsel %vm5064_vm4, %v5082_v54, %v4939_v53 }
 0x735   :  { %v5335_v26 = vsel %vm5064_vm4, %v5334_v58, %v10453_v41  ;;  %v5221_v41 = vsel %vm5064_vm4, %v5220_v22, %v5213_v29  ;;  %v5415_v22 = vunpack.c.l.b16 %v5390_v48  ;;  %v5189_v3 = vperm.slane %v5185_v9, %v10508_v57 }
 0x736   :  { %v5339_v31 = vperm.slane %v5335_v26, %v10455_v8  ;;  %v5346_v4 = vrot.slane %v5345_v43, 4 }
 0x738   :  { %v5347_v18 = vsel %vm5064_vm4, %v5346_v4, %v5339_v31 }
 0x739   :  { %v5351_v62 = vperm.slane %v5347_v18, %v10508_v57 }
 0x73a   :  { %v5016_v0 = vpop.permute.xlu1 %5015 }
 0x73b   :  { %v5262_v10 = vrot.slane %v5016_v0, 4  ;;  %v5269_v36 = vsel %vm5064_vm4, %v5016_v0, %v5010_v1  ;;  %v5396_v39 = vpack.i.b16 %v5351_v62, %v5333_v16  ;;  %v5398_v25 = vshrl.u32 %v5351_v62, 16 }
 0x73c   :  { %v5273_v60 = vperm.slane %v5269_v36, %v10455_v8  ;;  %v5225_v1 = vperm.slane %v5221_v41, %v10508_v57  ;;  %v5094_v62 = vrot.slane %v5093_v14, 4  ;;  %v4960_v36 = vpop.permute.xlu0 %4959 }
 0x73d   :  { %v5263_v17 = vsel %vm5064_vm4, %v5262_v10, %v10451_v44  ;;  %v5416_v63 = vunpack.c.l.b16 %v5396_v39  ;;  %v5399_v47 = vpack.i.b16 %v5398_v25, %v5397_v15  ;;  %v5261_v44 = vperm.slane %v5257_v40, %v10508_v57 }
 0x73e   :  { %v5267_v24 = vperm.slane %v5263_v17, %v10455_v8  ;;  %v5274_v58 = vrot.slane %v5273_v60, 4  ;;  %v5378_v31 = vpack.i.b16 %v5243_v51, %v5225_v1  ;;  %v5379_v16 = vshrl.u32 %v5225_v1, 16 }
 0x73f   :  { %v5420_v7 = vpack.c.b16 %v5416_v63, %v5415_v22  ;;  %v5462_v43 = vunpack.c.l.b16 %v5399_v47  ;;  %v5385_v53 = vshrl.u32 %v5261_v44, 16  ;;  %v5105_v15 = vperm.slane %v10506_v33, %v10455_v8 }
 0x740   :  { %v5275_v29 = vsel %vm5064_vm4, %v5274_v58, %v5267_v24  ;;  %v5381_v56 = vpack.i.b16 %v5380_v30, %v5379_v16  ;;  %v5413_v49 = vunpack.c.l.b16 %v5378_v31  ;;  %v5087_v10 = vperm.slane %v5083_v32, %v10455_v8 }
 0x741   :  { %v5434_v38 = vsel %vm826_vm2, %v5420_v7, 0  ;;  %v5466_v52 = vpack.c.b16 %v5462_v43, %v5461_v23  ;;  %v5279_v26 = vperm.slane %v5275_v29, %v10508_v57  ;;  %v5374_v25 = vshrl.u32 %v5207_v61, 16 }
 0x742   :  { %v4974_v4 = vpop.permute.xlu1 %4973  ;;  %5440 = vmatpush.bf16.xpose.msra.mxu3 %v5434_v38  ;;  %v5459_v6 = vunpack.c.l.b16 %v5381_v56  ;;  %v5372_v51 = vpack.i.b16 %v5207_v61, %v5189_v3  ;;  %v5095_v17 = vsel %vm5064_vm4, %v5094_v62, %v5087_v10  ;;  %v5373_v47 = vshrl.u32 %v5189_v3, 16 }
 0x743   :  { %v5154_v55 = vrot.slane %v4974_v4, 4  ;;  %v5161_v45 = vsel %vm5064_vm4, %v4974_v4, %v4968_v27  ;;  %v5480_v21 = vsel %vm826_vm2, %v5466_v52, 0  ;;  %v5384_v18 = vpack.i.b16 %v5279_v26, %v5261_v44 }
 0x744   :  { %v5165_v48 = vperm.slane %v5161_v45, %v10455_v8  ;;  %5486 = vmatpush.bf16.xpose.msrb.mxu0 %v5480_v21  ;;  %v5386_v54 = vshrl.u32 %v5279_v26, 16  ;;  %v5118_v33 = vrot.slane %v4960_v36, 4  ;;  %v5367_v58 = vshrl.u32 %v5153_v42, 16 }
 0x745   :  { %v5155_v41 = vsel %vm5064_vm4, %v5154_v55, %v10460_v2  ;;  %v5414_v46 = vunpack.c.l.b16 %v5384_v18  ;;  %v8726_v2 = vld [vmem:[#allocation23 + $0x10] sm:$0xff]  ;;  %v5112_v1 = vrot.slane %v5111_v11, 4  ;;  %v5375_v23 = vpack.i.b16 %v5374_v25, %v5373_v47 }
 0x746   :  { %v5159_v34 = vperm.slane %v5155_v41, %v10455_v8  ;;  %v5166_v0 = vrot.slane %v5165_v48, 4  ;;  %v5387_v27 = vpack.i.b16 %v5386_v54, %v5385_v53  ;;  %5541 = vmatpush.bf16.msrb.mxu1 %v8726_v2  ;;  %v5412_v14 = vunpack.c.l.b16 %v5372_v51 }
 0x747   :  { %v5419_v39 = vpack.c.b16 %v5414_v46, %v5413_v49  ;;  %v5099_v44 = vperm.slane %v5095_v17, %v10508_v57  ;;  %v5081_v11 = vperm.slane %v10511_v28, %v10508_v57  ;;  %v5113_v26 = vsel %vm5064_vm4, %v5112_v1, %v5105_v15 }
 0x748   :  { %v5460_v60 = vunpack.c.l.b16 %v5387_v27  ;;  %v5167_v22 = vsel %vm5064_vm4, %v5166_v0, %v5159_v34  ;;  %v5458_v4 = vunpack.c.l.b16 %v5375_v23  ;;  %v5117_v21 = vperm.slane %v5113_v26, %v10508_v57 }
 0x749   :  { %v5431_v63 = vsel %vm826_vm2, %v5419_v39, 0  ;;  %v5171_v50 = vperm.slane %v5167_v22, %v10508_v57  ;;  %v5356_v61 = vshrl.u32 %v5099_v44, 16  ;;  %v5354_v48 = vpack.i.b16 %v5099_v44, %v5081_v11 }
 0x74a   :  { %v4953_v40 = vpop.permute.xlu1 %4952  ;;  %5441 = vmatpush.bf16.xpose.msra.mxu3 %v5431_v63  ;;  %v5465_v24 = vpack.c.b16 %v5460_v60, %v5459_v6  ;;  %v5355_v56 = vshrl.u32 %v5081_v11, 16  ;;  %v5400_v34 = vpack.c.bf16 %v9738_v12, %v9738_v12  ;;  %v5401_v0 = vpack.c.bf16 %v9740_v13, %v9740_v13 }
 0x74b   :  { %v4954_v9 = vrot.slane %v4953_v40, 4  ;;  %v5366_v35 = vpack.i.b16 %v5171_v50, %v5153_v42  ;;  %v5368_v7 = vshrl.u32 %v5171_v50, 16  ;;  %v5119_v29 = vsel %vm5064_vm4, %v5118_v33, %v4953_v40  ;;  %v8994_v40 = vld [vmem:[%s10817_s13] ss:$0 sm:$0xff] }
 0x74c   :  { %v5477_v43 = vsel %vm826_vm2, %v5465_v24, 0  ;;  %v5123_v16 = vperm.slane %v5119_v29, %v10455_v8  ;;  %v5357_v54 = vpack.i.b16 %v5356_v61, %v5355_v56  ;;  %v5409_v49 = vunpack.c.l.b16 %v5354_v48 }
 0x74d   :  { %v5125_v30 = vsel %vm5064_vm4, %v4960_v36, %v4954_v9  ;;  %5487 = vmatpush.bf16.xpose.msrb.mxu0 %v5477_v43  ;;  %v5411_v38 = vunpack.c.l.b16 %v5366_v35  ;;  %v5369_v52 = vpack.i.b16 %v5368_v7, %v5367_v58  ;;  %v5403_v10 = vpack.c.bf16 %v9747_v20, %v9747_v20  ;;  %v8724_v20 = vld [vmem:[#allocation23] sm:$0xff] }
 0x74e   :  { %v5129_v5 = vperm.slane %v5125_v30, %v10455_v8  ;;  %v5361_v8 = vshrl.u32 %v5117_v21, 16  ;;  %v5455_v27 = vunpack.c.l.b16 %v5357_v54  ;;  %v5406_v25 = vunpack.c.l.b16 %v5400_v34 }
 0x74f   :  { %v5418_v31 = vpack.c.b16 %v5412_v14, %v5411_v38  ;;  %v5457_v32 = vunpack.c.l.b16 %v5369_v52  ;;  %v5407_v2 = vunpack.c.l.b16 %v5401_v0  ;;  %v5453_v60 = vunpack.c.l.b16 %v5403_v10 }
 0x750   :  { %v5130_v3 = vrot.slane %v5129_v5, 4 }
 0x751   :  { %v5428_v55 = vsel %vm826_vm2, %v5418_v31, 0  ;;  %v5464_v45 = vpack.c.b16 %v5458_v4, %v5457_v32  ;;  %v5408_v13 = vpack.c.b16 %v5407_v2, %v5406_v25 }
 0x752   :  { %v5131_v18 = vsel %vm5064_vm4, %v5130_v3, %v5123_v16  ;;  %5442 = vmatpush.bf16.xpose.msra.mxu3 %v5428_v55 }
 0x753   :  { %v5474_v28 = vsel %vm826_vm2, %v5464_v45, 0  ;;  %v5135_v53 = vperm.slane %v5131_v18, %v10508_v57  ;;  %v5402_v57 = vpack.c.bf16 %v9745_v19, %v9745_v19  ;;  %v8725_v19 = vld [vmem:[#allocation23 + $0x8] sm:$0xff] }
 0x754   :  { %5542 = vmatpush.bf16.msrb.mxu1 %v8725_v19 }
 0x755   :  { %5488 = vmatpush.bf16.xpose.msrb.mxu0 %v5474_v28  ;;  %v5360_v62 = vpack.i.b16 %v5135_v53, %v5117_v21  ;;  %v5362_v41 = vshrl.u32 %v5135_v53, 16  ;;  %v5452_v6 = vunpack.c.l.b16 %v5402_v57 }
 0x757   :  { %v5410_v46 = vunpack.c.l.b16 %v5360_v62  ;;  %v5363_v37 = vpack.i.b16 %v5362_v41, %v5361_v8  ;;  %v5454_v22 = vpack.c.b16 %v5453_v60, %v5452_v6 }
 0x758   :  { %5543 = vmatpush.bf16.msrb.mxu1 %v8724_v20 }
 0x759   :  { %v5417_v42 = vpack.c.b16 %v5410_v46, %v5409_v49  ;;  %v5456_v15 = vunpack.c.l.b16 %v5363_v37 }
 0x75b   :  { %v5425_v36 = vsel %vm826_vm2, %v5417_v42, 0  ;;  %v5463_v39 = vpack.c.b16 %v5456_v15, %v5455_v27 }
 0x75c   :  { %5443 = vmatpush.bf16.xpose.msra.mxu3 %v5425_v36 }
 0x75d   :  { %v5471_v12 = vsel %vm826_vm2, %v5463_v39, 0 }
 0x75e   :  { %5489 = vmatpush.bf16.xpose.msrb.mxu0 %v5471_v12 }
 0x763   :  { %7805 = vmatmul.msk.bf16.vlgmr.msra.gmra.mxu3 %vm826_vm2, %v5408_v13 }
 0x765   :  { %7806 = vmatmul.msk.bf16.vlgmr.msrb.gmra.mxu0 %vm826_vm2, %v5454_v22 }
 0x7e2   :  { %v5491_v50 = vpop.f32.mrf.mxu0 }
 0x7e6   :  { %v5445_v51 = vpop.f32.mrf.mxu3 }
 0x7ea   :  { %v5493_v47 = vpop.f32.mrf.mxu0 }
 0x7eb   :  { %v5497_v33 = vpack.c.bf16 %v5493_v47, %v5491_v50 }
 0x7ee   :  { %v5447_v17 = vpop.f32.mrf.mxu3 }
 0x7ef   :  { %v5496_v63 = vpack.c.bf16 %v5447_v17, %v5445_v51 }
 0x7f1   :  { %7823 = vmatmul.msk.bf16.vlgmr.msrb.gmra.mxu1 %vm826_vm2, %v5496_v63 }
 0x801   :  { %7824 = vmatmul.msk.bf16.gmra.mxu1 %vm826_vm2, %v5497_v33 }
 0x86e   :  { %v5545_v24 = vpop.f32.mrf.mxu1 }
 0x86f   :  { %v10632_v58 = vadd.f32 %v8994_v40, %v5545_v24 }
 0x871   :  { %v5563_v1 = vmax.f32 %v10632_v58, 0.0 }
 0x876   :  { %v5547_v9 = vpop.f32.mrf.mxu1 }
 0x877   :  { %v10635_v35 = vadd.f32 %v8994_v40, %v5547_v9 }
 0x879   :  { %v5564_v7 = vmax.f32 %v10635_v35, 0.0 }
 0x87e   :  { %v5550_v23 = vpop.f32.mrf.mxu1 }
 0x87f   :  { %v10638_v43 = vadd.f32 %v8994_v40, %v5550_v23 }
 0x881   :  { %v5565_v14 = vmax.f32 %v10638_v43, 0.0 }
 0x886   :  { %v5552_v44 = vpop.f32.mrf.mxu1 }
 0x887   :  { %v10641_v29 = vadd.f32 %v8994_v40, %v5552_v44 }
 0x889   :  { %v5566_v30 = vmax.f32 %v10641_v29, 0.0 }
 0x88a   :  { %9408 = dma.done.wait [#allocation8 + $0x1], 4096 }
 0x88b   :  { %9409 = vsyncadd [#allocation8 + $0x1], 4294963200  ;;  %v7939_v38 = vld [vmem:[#allocation3 + $0xe0] sm:$0xf]  ;;  %v8758_v52 = vld [vmem:[#allocation3 + $0xec] sm:$0xf0] }
 0x88c   :  { %v8756_v5 = vld [vmem:[#allocation3 + $0xe4] sm:$0xf]  ;;  %v7940_v11 = vor.u32 %v8758_v52, %v7939_v38  ;;  %v7941_v26 = vld [vmem:[#allocation3 + $0xf0] sm:$0xf0]  ;;  %v7947_v31 = vld [vmem:[#allocation3 + $0xe8] sm:$0xf] }
 0x88d   :  { %v8759_v32 = vld [vmem:[#allocation3 + $0xf4] sm:$0xf0]  ;;  %v7944_v4 = vor.u32 %v8756_v5, %v7941_v26  ;;  %v8757_v3 = vld [vmem:[#allocation3 + $0xec] sm:$0xf]  ;;  %v7949_v61 = vld [vmem:[#allocation3 + $0xf8] sm:$0xf0] }
 0x88e   :  { %v7948_v16 = vor.u32 %v8759_v32, %v7947_v31  ;;  %v7923_v55 = vld [vmem:[#allocation3 + $0xc0] sm:$0xf]  ;;  %5765 = vmatpush.bf16.msrb.mxu2 %v7940_v11  ;;  %v7952_v45 = vor.u32 %v8757_v3, %v7949_v61  ;;  %v8754_v21 = vld [vmem:[#allocation3 + $0xcc] sm:$0xf0]  ;;  %v8752_v18 = vld [vmem:[#allocation3 + $0xc4] sm:$0xf] }
 0x88f   :  { %v7925_v48 = vld [vmem:[#allocation3 + $0xd0] sm:$0xf0]  ;;  %5784 = vmatpush.bf16.msrb.mxu3 %v7944_v4  ;;  %v7924_v56 = vor.u32 %v8754_v21, %v7923_v55  ;;  %v7931_v53 = vld [vmem:[#allocation3 + $0xc8] sm:$0xf]  ;;  %v8755_v54 = vld [vmem:[#allocation3 + $0xd4] sm:$0xf0] }
 0x890   :  { %5803 = vmatpush.bf16.msra.mxu0 %v7948_v16  ;;  %v7928_v28 = vor.u32 %v8752_v18, %v7925_v48  ;;  %v8753_v62 = vld [vmem:[#allocation3 + $0xcc] sm:$0xf]  ;;  %5822 = vmatpush.bf16.msra.mxu1 %v7952_v45  ;;  %v7932_v8 = vor.u32 %v8755_v54, %v7931_v53  ;;  %v7933_v41 = vld [vmem:[#allocation3 + $0xd8] sm:$0xf0]  ;;  %v7907_v49 = vld [vmem:[#allocation3 + $0xa0] sm:$0xf] }
 0x891   :  { %v8750_v46 = vld [vmem:[#allocation3 + $0xac] sm:$0xf0]  ;;  %v7936_v37 = vor.u32 %v8753_v62, %v7933_v41  ;;  %v8748_v34 = vld [vmem:[#allocation3 + $0xa4] sm:$0xf]  ;;  %v7909_v0 = vld [vmem:[#allocation3 + $0xb0] sm:$0xf0] }
 0x892   :  { %v7915_v27 = vld [vmem:[#allocation3 + $0xa8] sm:$0xf]  ;;  %5766 = vmatpush.bf16.msrb.mxu2 %v7924_v56  ;;  %v7908_v42 = vor.u32 %v8750_v46, %v7907_v49  ;;  %v8751_v15 = vld [vmem:[#allocation3 + $0xb4] sm:$0xf0]  ;;  %v8749_v57 = vld [vmem:[#allocation3 + $0xac] sm:$0xf]  ;;  %v7912_v36 = vor.u32 %v8748_v34, %v7909_v0 }
 0x893   :  { %v7917_v10 = vld [vmem:[#allocation3 + $0xb8] sm:$0xf0]  ;;  %5785 = vmatpush.bf16.msrb.mxu3 %v7928_v28  ;;  %v7916_v39 = vor.u32 %v8751_v15, %v7915_v27  ;;  %v7891_v25 = vld [vmem:[#allocation3 + $0x80] sm:$0xf]  ;;  %v8746_v2 = vld [vmem:[#allocation3 + $0x8c] sm:$0xf0] }
 0x894   :  { %5804 = vmatpush.bf16.msra.mxu0 %v7932_v8  ;;  %v8744_v12 = vld [vmem:[#allocation3 + $0x84] sm:$0xf]  ;;  %5823 = vmatpush.bf16.msra.mxu1 %v7936_v37  ;;  %v7920_v6 = vor.u32 %v8749_v57, %v7917_v10  ;;  %v7893_v60 = vld [vmem:[#allocation3 + $0x90] sm:$0xf0]  ;;  %v7899_v13 = vld [vmem:[#allocation3 + $0x88] sm:$0xf]  ;;  %v7892_v51 = vor.u32 %v8746_v2, %v7891_v25 }
 0x895   :  { %v8747_v22 = vld [vmem:[#allocation3 + $0x94] sm:$0xf0]  ;;  %v8745_v19 = vld [vmem:[#allocation3 + $0x8c] sm:$0xf]  ;;  %v7901_v20 = vld [vmem:[#allocation3 + $0x98] sm:$0xf0]  ;;  %v7896_v17 = vor.u32 %v8744_v12, %v7893_v60 }
 0x896   :  { %5767 = vmatpush.bf16.msrb.mxu2 %v7908_v42  ;;  %v7900_v63 = vor.u32 %v8747_v22, %v7899_v13  ;;  %v7875_v50 = vld [vmem:[#allocation3 + $0x60] sm:$0xf]  ;;  %v8742_v47 = vld [vmem:[#allocation3 + $0x6c] sm:$0xf0]  ;;  %v8740_v33 = vld [vmem:[#allocation3 + $0x64] sm:$0xf]  ;;  %v7904_v40 = vor.u32 %v8745_v19, %v7901_v20  ;;  %v5571_v22 = vpack.c.bf16 %v5564_v7, %v5563_v1  ;;  %v5572_v19 = vpack.c.bf16 %v5566_v30, %v5565_v14 }
 0x897   :  { %5786 = vmatpush.bf16.msrb.mxu3 %v7912_v36  ;;  %v7877_v24 = vld [vmem:[#allocation3 + $0x70] sm:$0xf0]  ;;  %v7883_v9 = vld [vmem:[#allocation3 + $0x68] sm:$0xf]  ;;  %v8743_v23 = vld [vmem:[#allocation3 + $0x74] sm:$0xf0]  ;;  %v7876_v52 = vor.u32 %v8742_v47, %v7875_v50 }
 0x898   :  { %5805 = vmatpush.bf16.msra.mxu0 %v7916_v39  ;;  %5824 = vmatpush.bf16.msra.mxu1 %v7920_v6  ;;  %v8741_v44 = vld [vmem:[#allocation3 + $0x6c] sm:$0xf]  ;;  %v7885_v38 = vld [vmem:[#allocation3 + $0x78] sm:$0xf0]  ;;  %v7880_v5 = vor.u32 %v8740_v33, %v7877_v24  ;;  %v7884_v11 = vor.u32 %v8743_v23, %v7883_v9  ;;  %v7859_v26 = vld [vmem:[#allocation3 + $0x40] sm:$0xf] }
 0x899   :  { %v8738_v31 = vld [vmem:[#allocation3 + $0x4c] sm:$0xf0]  ;;  %v8736_v32 = vld [vmem:[#allocation3 + $0x44] sm:$0xf]  ;;  %v7888_v4 = vor.u32 %v8741_v44, %v7885_v38  ;;  %v7861_v16 = vld [vmem:[#allocation3 + $0x50] sm:$0xf0] }
 0x89a   :  { %5768 = vmatpush.bf16.msrb.mxu2 %v7892_v51  ;;  %v7867_v3 = vld [vmem:[#allocation3 + $0x48] sm:$0xf]  ;;  %v8739_v61 = vld [vmem:[#allocation3 + $0x54] sm:$0xf0]  ;;  %v8737_v55 = vld [vmem:[#allocation3 + $0x4c] sm:$0xf]  ;;  %v7860_v21 = vor.u32 %v8738_v31, %v7859_v26  ;;  %v7864_v18 = vor.u32 %v8736_v32, %v7861_v16 }
 0x89b   :  { %5787 = vmatpush.bf16.msrb.mxu3 %v7896_v17  ;;  %v7869_v45 = vld [vmem:[#allocation3 + $0x58] sm:$0xf0]  ;;  %v7868_v48 = vor.u32 %v8739_v61, %v7867_v3  ;;  %v7843_v56 = vld [vmem:[#allocation3 + $0x20] sm:$0xf]  ;;  %v8734_v28 = vld [vmem:[#allocation3 + $0x2c] sm:$0xf0] }
 0x89c   :  { %5806 = vmatpush.bf16.msra.mxu0 %v7900_v63  ;;  %5825 = vmatpush.bf16.msra.mxu1 %v7904_v40  ;;  %v8732_v53 = vld [vmem:[#allocation3 + $0x24] sm:$0xf]  ;;  %v7872_v54 = vor.u32 %v8737_v55, %v7869_v45  ;;  %v7845_v62 = vld [vmem:[#allocation3 + $0x30] sm:$0xf0]  ;;  %v7851_v8 = vld [vmem:[#allocation3 + $0x28] sm:$0xf]  ;;  %v7844_v37 = vor.u32 %v8734_v28, %v7843_v56 }
 0x89d   :  { %v8735_v41 = vld [vmem:[#allocation3 + $0x34] sm:$0xf0]  ;;  %v8733_v49 = vld [vmem:[#allocation3 + $0x2c] sm:$0xf]  ;;  %v7853_v46 = vld [vmem:[#allocation3 + $0x38] sm:$0xf0]  ;;  %v7848_v34 = vor.u32 %v8732_v53, %v7845_v62 }
 0x89e   :  { %5769 = vmatpush.bf16.msrb.mxu2 %v7876_v52  ;;  %v7852_v0 = vor.u32 %v8735_v41, %v7851_v8  ;;  %v7827_v27 = vld [vmem:[#allocation3] sm:$0xf]  ;;  %v8730_v42 = vld [vmem:[#allocation3 + $0xc] sm:$0xf0]  ;;  %v8728_v15 = vld [vmem:[#allocation3 + $0x4] sm:$0xf]  ;;  %v7856_v57 = vor.u32 %v8733_v49, %v7853_v46 }
 0x89f   :  { %5788 = vmatpush.bf16.msrb.mxu3 %v7880_v5  ;;  %v7829_v10 = vld [vmem:[#allocation3 + $0x10] sm:$0xf0]  ;;  %v7835_v36 = vld [vmem:[#allocation3 + $0x8] sm:$0xf]  ;;  %v8731_v39 = vld [vmem:[#allocation3 + $0x14] sm:$0xf0]  ;;  %v7828_v12 = vor.u32 %v8730_v42, %v7827_v27 }
 0x8a0   :  { %5807 = vmatpush.bf16.msra.mxu0 %v7884_v11  ;;  %5826 = vmatpush.bf16.msra.mxu1 %v7888_v4  ;;  %v8729_v25 = vld [vmem:[#allocation3 + $0xc] sm:$0xf]  ;;  %v7837_v2 = vld [vmem:[#allocation3 + $0x18] sm:$0xf0]  ;;  %v7832_v6 = vor.u32 %v8728_v15, %v7829_v10  ;;  %v7836_v60 = vor.u32 %v8731_v39, %v7835_v36  ;;  %s10818_s20 = sld [smem:[#allocation56_spill]] }
 0x8a1   :  { %v7840_v13 = vor.u32 %v8729_v25, %v7837_v2 }
 0x8a2   :  { %5770 = vmatpush.bf16.msrb.mxu2 %v7860_v21 }
 0x8a3   :  { %5789 = vmatpush.bf16.msrb.mxu3 %v7864_v18 }
 0x8a4   :  { %5808 = vmatpush.bf16.msra.mxu0 %v7868_v48  ;;  %5827 = vmatpush.bf16.msra.mxu1 %v7872_v54 }
 0x8a6   :  { %5771 = vmatpush.bf16.msrb.mxu2 %v7844_v37  ;;  %v5841_v35 = vld [vmem:[%s10818_s20] sm:$0xf] }
 0x8a7   :  { %5790 = vmatpush.bf16.msrb.mxu3 %v7848_v34  ;;  %v5845_v7 = vperm.slane %v5841_v35, 2  ;;  %v5846_v20 = vperm.slane %v5841_v35, 3  ;;  %v10653_v47 = vperm.slane %v5841_v35, 0  ;;  %v10655_v43 = vperm.slane %v5841_v35, 1 }
 0x8a8   :  { %5809 = vmatpush.bf16.msra.mxu0 %v7852_v0  ;;  %5828 = vmatpush.bf16.msra.mxu1 %v7856_v57 }
 0x8aa   :  { %5772 = vmatpush.bf16.msrb.mxu2 %v7828_v12 }
 0x8ab   :  { %5791 = vmatpush.bf16.msrb.mxu3 %v7832_v6 }
 0x8ac   :  { %5810 = vmatpush.bf16.msra.mxu0 %v7836_v60  ;;  %5829 = vmatpush.bf16.msra.mxu1 %v7840_v13 }
 0x8ad   :  { %5773 = vmatmul.bf16.vlgmr.msrb.gmra.mxu2 %v5571_v22 }
 0x8ae   :  { %5792 = vmatmul.bf16.vlgmr.msrb.gmra.mxu3 %v5571_v22 }
 0x8af   :  { %5811 = vmatmul.bf16.vlgmr.msra.gmra.mxu0 %v5571_v22  ;;  %5830 = vmatmul.bf16.vlgmr.msra.gmra.mxu1 %v5571_v22 }
 0x8bd   :  { %5778 = vmatmul.bf16.gmra.mxu2 %v5572_v19 }
 0x8be   :  { %5797 = vmatmul.bf16.gmra.mxu3 %v5572_v19 }
 0x8bf   :  { %5816 = vmatmul.bf16.gmra.mxu0 %v5572_v19  ;;  %5835 = vmatmul.bf16.gmra.mxu1 %v5572_v19 }
 0x92c   :  { %v5812_v58 = vpop.f32.mrf.mxu0  ;;  %v5831_v1 = vpop.f32.mrf.mxu1 }
 0x92d   :  { %v5853_v63 = vadd.f32 %v5845_v7, %v5812_v58  ;;  %v5854_v50 = vadd.f32 %v5846_v20, %v5831_v1 }
 0x92f   :  { %v5869_v40 = vmax.f32 %v5853_v63, 0.0  ;;  %v5870_v9 = vmax.f32 %v5854_v50, 0.0 }
 0x930   :  { %v5774_v51 = vpop.f32.mrf.mxu2 }
 0x931   :  { %v5793_v17 = vpop.f32.mrf.mxu3  ;;  %v5851_v23 = vadd.f32 %v10653_v47, %v5774_v51 }
 0x932   :  { %v5852_v38 = vadd.f32 %v10655_v43, %v5793_v17 }
 0x933   :  { %v5867_v16 = vmax.f32 %v5851_v23, 0.0 }
 0x934   :  { %v5814_v33 = vpop.f32.mrf.mxu0  ;;  %v5833_v14 = vpop.f32.mrf.mxu1  ;;  %v5868_v45 = vmax.f32 %v5852_v38, 0.0 }
 0x935   :  { %v5857_v29 = vadd.f32 %v5845_v7, %v5814_v33  ;;  %v5858_v30 = vadd.f32 %v5846_v20, %v5833_v14 }
 0x937   :  { %v5873_v24 = vmax.f32 %v5857_v29, 0.0  ;;  %v5874_v44 = vmax.f32 %v5858_v30, 0.0 }
 0x938   :  { %v5776_v5 = vpop.f32.mrf.mxu2 }
 0x939   :  { %v5897_v52 = vmax.f32 %v5869_v40, %v5873_v24  ;;  %v5904_v11 = vmax.f32 %v5870_v9, %v5874_v44  ;;  %v5855_v26 = vadd.f32 %v10653_v47, %v5776_v5  ;;  %v5795_v31 = vpop.f32.mrf.mxu3 }
 0x93a   :  { %v5856_v4 = vadd.f32 %v10655_v43, %v5795_v31 }
 0x93b   :  { %v5898_v32 = vrot.slane %v5897_v52, 4  ;;  %v5905_v3 = vrot.slane %v5904_v11, 4  ;;  %v5871_v61 = vmax.f32 %v5855_v26, 0.0 }
 0x93c   :  { %v5817_v55 = vpop.f32.mrf.mxu0  ;;  %v5872_v18 = vmax.f32 %v5856_v4, 0.0  ;;  %v5836_v48 = vpop.f32.mrf.mxu1 }
 0x93d   :  { %v5899_v21 = vmax.f32 %v5897_v52, %v5898_v32  ;;  %v5906_v56 = vmax.f32 %v5904_v11, %v5905_v3  ;;  %v5883_v28 = vmax.f32 %v5867_v16, %v5871_v61  ;;  %v5861_v15 = vadd.f32 %v5845_v7, %v5817_v55 }
 0x93e   :  { %v5890_v54 = vmax.f32 %v5868_v45, %v5872_v18  ;;  %v5862_v36 = vadd.f32 %v5846_v20, %v5836_v48 }
 0x93f   :  { %v5900_v53 = vrot.slane %v5899_v21, 2  ;;  %v5907_v62 = vrot.slane %v5906_v56, 2  ;;  %v5884_v8 = vrot.slane %v5883_v28, 4  ;;  %v5877_v58 = vmax.f32 %v5861_v15, 0.0 }
 0x940   :  { %v5891_v49 = vrot.slane %v5890_v54, 4  ;;  %v5779_v46 = vpop.f32.mrf.mxu2  ;;  %v5878_v51 = vmax.f32 %v5862_v36, 0.0 }
 0x941   :  { %v5901_v41 = vmax.f32 %v5899_v21, %v5900_v53  ;;  %v5908_v37 = vmax.f32 %v5906_v56, %v5907_v62  ;;  %v5885_v34 = vmax.f32 %v5883_v28, %v5884_v8  ;;  %v5798_v0 = vpop.f32.mrf.mxu3  ;;  %v5859_v17 = vadd.f32 %v10653_v47, %v5779_v46 }
 0x942   :  { %v5892_v42 = vmax.f32 %v5890_v54, %v5891_v49  ;;  %v5860_v33 = vadd.f32 %v10655_v43, %v5798_v0 }
 0x943   :  { %v5902_v27 = vrot.slane %v5901_v41, 1  ;;  %v5909_v57 = vrot.slane %v5908_v37, 1  ;;  %v5886_v10 = vrot.slane %v5885_v34, 2  ;;  %v5875_v44 = vmax.f32 %v5859_v17, 0.0 }
 0x944   :  { %v5819_v39 = vpop.f32.mrf.mxu0  ;;  %v5893_v2 = vrot.slane %v5892_v42, 2  ;;  %v5838_v6 = vpop.f32.mrf.mxu1  ;;  %v5876_v5 = vmax.f32 %v5860_v33, 0.0 }
 0x945   :  { %v10661_v25 = vmax.f32 %v5901_v41, %v5902_v27  ;;  %v5865_v12 = vadd.f32 %v5845_v7, %v5819_v39  ;;  %v10663_v60 = vmax.f32 %v5908_v37, %v5909_v57  ;;  %v5887_v13 = vmax.f32 %v5885_v34, %v5886_v10 }
 0x946   :  { %v5866_v22 = vadd.f32 %v5846_v20, %v5838_v6  ;;  %v5894_v19 = vmax.f32 %v5892_v42, %v5893_v2 }
 0x947   :  { %v5881_v35 = vmax.f32 %v5865_v12, 0.0  ;;  %v5888_v1 = vrot.slane %v5887_v13, 1 }
 0x948   :  { %v5882_v63 = vmax.f32 %v5866_v22, 0.0  ;;  %v5895_v50 = vrot.slane %v5894_v19, 1  ;;  %v5781_v14 = vpop.f32.mrf.mxu2 }
 0x949   :  { %v5925_v29 = vmax.f32 %v5877_v58, %v5881_v35  ;;  %v10667_v30 = vmax.f32 %v5887_v13, %v5888_v1  ;;  %v5863_v40 = vadd.f32 %v10653_v47, %v5781_v14  ;;  %v5800_v24 = vpop.f32.mrf.mxu3 }
 0x94a   :  { %v5932_v7 = vmax.f32 %v5878_v51, %v5882_v63  ;;  %v10670_v20 = vmax.f32 %v5894_v19, %v5895_v50  ;;  %v5864_v23 = vadd.f32 %v10655_v43, %v5800_v24 }
 0x94b   :  { %v5926_v9 = vrot.slane %v5925_v29, 4  ;;  %v5879_v52 = vmax.f32 %v5863_v40, 0.0 }
 0x94c   :  { %v5933_v38 = vrot.slane %v5932_v7, 4  ;;  %v5880_v26 = vmax.f32 %v5864_v23, 0.0 }
 0x94d   :  { %v5927_v11 = vmax.f32 %v5925_v29, %v5926_v9  ;;  %v5911_v32 = vmax.f32 %v5875_v44, %v5879_v52 }
 0x94e   :  { %v5934_v31 = vmax.f32 %v5932_v7, %v5933_v38  ;;  %v5918_v16 = vmax.f32 %v5876_v5, %v5880_v26 }
 0x94f   :  { %v5928_v4 = vrot.slane %v5927_v11, 2  ;;  %v5912_v61 = vrot.slane %v5911_v32, 4 }
 0x950   :  { %v5935_v3 = vrot.slane %v5934_v31, 2  ;;  %v5919_v47 = vrot.slane %v5918_v16, 4 }
 0x951   :  { %v5929_v55 = vmax.f32 %v5927_v11, %v5928_v4  ;;  %v5913_v21 = vmax.f32 %v5911_v32, %v5912_v61 }
 0x952   :  { %v5936_v45 = vmax.f32 %v5934_v31, %v5935_v3  ;;  %v5920_v48 = vmax.f32 %v5918_v16, %v5919_v47 }
 0x953   :  { %v5930_v18 = vrot.slane %v5929_v55, 1  ;;  %v5914_v43 = vrot.slane %v5913_v21, 2 }
 0x954   :  { %v5937_v56 = vrot.slane %v5936_v45, 1  ;;  %v5921_v53 = vrot.slane %v5920_v48, 2 }
 0x955   :  { %v10673_v28 = vmax.f32 %v5929_v55, %v5930_v18  ;;  %v5915_v62 = vmax.f32 %v5913_v21, %v5914_v43 }
 0x956   :  { %v10675_v54 = vmax.f32 %v5936_v45, %v5937_v56  ;;  %v5922_v8 = vmax.f32 %v5920_v48, %v5921_v53 }
 0x957   :  { %v5916_v41 = vrot.slane %v5915_v62, 1 }
 0x958   :  { %v5923_v49 = vrot.slane %v5922_v8, 1 }
 0x959   :  { %v10677_v46 = vmax.f32 %v5915_v62, %v5916_v41 }
 0x95a   :  { %v10679_v37 = vmax.f32 %v5922_v8, %v5923_v49 }
 0x95b   :  { %9410 = dma.done.wait [#allocation8 + $0x2], 8192 }
 0x95c   :  { %9411 = vsyncadd [#allocation8 + $0x2], 4294959104  ;;  %v8011_v34 = vld [vmem:[#allocation4 + $0x70] sm:$0xf]  ;;  %v8775_v0 = vld [vmem:[#allocation4 + $0x74] sm:$0xf0] }
 0x95d   :  { %v8075_v27 = vld [vmem:[#allocation4 + $0xf0] sm:$0xf]  ;;  %v8012_v42 = vor.u32 %v8775_v0, %v8011_v34  ;;  %v8791_v15 = vld [vmem:[#allocation4 + $0xf4] sm:$0xf0]  ;;  %v8003_v6 = vld [vmem:[#allocation4 + $0x60] sm:$0xf] }
 0x95e   :  { %v8139_v57 = vld [vmem:[#allocation4 + $0x170] sm:$0xf]  ;;  %v8807_v10 = vld [vmem:[#allocation4 + $0x174] sm:$0xf0]  ;;  %v8076_v36 = vor.u32 %v8791_v15, %v8075_v27  ;;  %v8773_v22 = vld [vmem:[#allocation4 + $0x64] sm:$0xf0] }
 0x95f   :  { %v8140_v39 = vor.u32 %v8807_v10, %v8139_v57  ;;  %v8203_v2 = vld [vmem:[#allocation4 + $0x1f0] sm:$0xf]  ;;  %v8823_v12 = vld [vmem:[#allocation4 + $0x1f4] sm:$0xf0]  ;;  %6369 = vmatpush.bf16.msra.mxu2 %v8012_v42  ;;  %v8067_v19 = vld [vmem:[#allocation4 + $0xe0] sm:$0xf]  ;;  %v8004_v35 = vor.u32 %v8773_v22, %v8003_v6 }
 0x960   :  { %v8204_v13 = vor.u32 %v8823_v12, %v8203_v2  ;;  %v8789_v58 = vld [vmem:[#allocation4 + $0xe4] sm:$0xf0]  ;;  %6382 = vmatpush.bf16.msra.mxu3 %v8076_v36  ;;  %v8131_v51 = vld [vmem:[#allocation4 + $0x160] sm:$0xf]  ;;  %v7995_v29 = vld [vmem:[#allocation4 + $0x50] sm:$0xf] }
 0x961   :  { %6395 = vmatpush.bf16.msrb.mxu0 %v8140_v39  ;;  %v8068_v1 = vor.u32 %v8789_v58, %v8067_v19  ;;  %v8805_v17 = vld [vmem:[#allocation4 + $0x164] sm:$0xf0]  ;;  %v8195_v63 = vld [vmem:[#allocation4 + $0x1e0] sm:$0xf]  ;;  %v8771_v14 = vld [vmem:[#allocation4 + $0x54] sm:$0xf0]  ;;  %v5943_v19 = vpack.c.bf16 %v10667_v30, %v10667_v30  ;;  %v5947_v58 = vpack.c.bf16 %v10677_v46, %v10677_v46  ;;  %v5948_v30 = vpack.c.bf16 %v10679_v37, %v10679_v37 }
 0x962   :  { %6408 = vmatpush.bf16.msrb.mxu1 %v8204_v13  ;;  %v8132_v50 = vor.u32 %v8805_v17, %v8131_v51  ;;  %v8821_v33 = vld [vmem:[#allocation4 + $0x1e4] sm:$0xf0]  ;;  %v8059_v40 = vld [vmem:[#allocation4 + $0xd0] sm:$0xf]  ;;  %v8787_v24 = vld [vmem:[#allocation4 + $0xd4] sm:$0xf0]  ;;  %v7996_v23 = vor.u32 %v8771_v14, %v7995_v29  ;;  %v5945_v46 = vpack.c.bf16 %v10661_v25, %v10661_v25 }
 0x963   :  { %v8196_v7 = vor.u32 %v8821_v33, %v8195_v63  ;;  %v8123_v9 = vld [vmem:[#allocation4 + $0x150] sm:$0xf]  ;;  %6370 = vmatpush.bf16.msra.mxu2 %v8004_v35  ;;  %v8803_v44 = vld [vmem:[#allocation4 + $0x154] sm:$0xf0]  ;;  %v8060_v5 = vor.u32 %v8787_v24, %v8059_v40  ;;  %v7987_v26 = vld [vmem:[#allocation4 + $0x40] sm:$0xf]  ;;  %v5949_v40 = vpack.c.bf16 %v10673_v28, %v10673_v28 }
 0x964   :  { %v8187_v38 = vld [vmem:[#allocation4 + $0x1d0] sm:$0xf]  ;;  %v8819_v52 = vld [vmem:[#allocation4 + $0x1d4] sm:$0xf0]  ;;  %6383 = vmatpush.bf16.msra.mxu3 %v8068_v1  ;;  %v8124_v11 = vor.u32 %v8803_v44, %v8123_v9  ;;  %v8769_v31 = vld [vmem:[#allocation4 + $0x44] sm:$0xf0] }
 0x965   :  { %6396 = vmatpush.bf16.msrb.mxu0 %v8132_v50  ;;  %v8051_v32 = vld [vmem:[#allocation4 + $0xc0] sm:$0xf]  ;;  %v8188_v4 = vor.u32 %v8819_v52, %v8187_v38  ;;  %v8785_v16 = vld [vmem:[#allocation4 + $0xc4] sm:$0xf0]  ;;  %v7988_v45 = vor.u32 %v8769_v31, %v7987_v26  ;;  %v7979_v48 = vld [vmem:[#allocation4 + $0x30] sm:$0xf]  ;;  %v5944_v50 = vpack.c.bf16 %v10670_v20, %v10670_v20  ;;  %v5950_v20 = vpack.c.bf16 %v10675_v54, %v10675_v54 }
 0x966   :  { %6409 = vmatpush.bf16.msrb.mxu1 %v8196_v7  ;;  %v8115_v3 = vld [vmem:[#allocation4 + $0x140] sm:$0xf]  ;;  %v8801_v61 = vld [vmem:[#allocation4 + $0x144] sm:$0xf0]  ;;  %v8052_v21 = vor.u32 %v8785_v16, %v8051_v32  ;;  %v8767_v56 = vld [vmem:[#allocation4 + $0x34] sm:$0xf0]  ;;  %v6033_v31 = vunpack.c.l.b16 %v5947_v58  ;;  %v6034_v54 = vunpack.c.l.b16 %v5948_v30 }
 0x967   :  { %v8179_v55 = vld [vmem:[#allocation4 + $0x1c0] sm:$0xf]  ;;  %v8817_v47 = vld [vmem:[#allocation4 + $0x1c4] sm:$0xf0]  ;;  %6371 = vmatpush.bf16.msra.mxu2 %v7996_v23  ;;  %v8116_v18 = vor.u32 %v8801_v61, %v8115_v3  ;;  %v8043_v43 = vld [vmem:[#allocation4 + $0xb0] sm:$0xf]  ;;  %v7980_v0 = vor.u32 %v8767_v56, %v7979_v48  ;;  %v5946_v23 = vpack.c.bf16 %v10663_v60, %v10663_v60  ;;  %v6030_v32 = vunpack.c.l.b16 %v5944_v50 }
 0x968   :  { %6384 = vmatpush.bf16.msra.mxu3 %v8060_v5  ;;  %v8180_v53 = vor.u32 %v8817_v47, %v8179_v55  ;;  %v8783_v62 = vld [vmem:[#allocation4 + $0xb4] sm:$0xf0]  ;;  %v8107_v8 = vld [vmem:[#allocation4 + $0x130] sm:$0xf]  ;;  %v7971_v15 = vld [vmem:[#allocation4 + $0x20] sm:$0xf]  ;;  %v6029_v5 = vunpack.c.l.b16 %v5943_v19  ;;  %v6031_v61 = vunpack.c.l.b16 %v5945_v46  ;;  %v6035_v55 = vunpack.c.l.b16 %v5949_v40 }
 0x969   :  { %6397 = vmatpush.bf16.msrb.mxu0 %v8124_v11  ;;  %v8799_v41 = vld [vmem:[#allocation4 + $0x134] sm:$0xf0]  ;;  %v8171_v49 = vld [vmem:[#allocation4 + $0x1b0] sm:$0xf]  ;;  %v8044_v27 = vor.u32 %v8783_v62, %v8043_v43  ;;  %v8765_v57 = vld [vmem:[#allocation4 + $0x24] sm:$0xf0]  ;;  %v6036_v48 = vunpack.c.l.b16 %v5950_v20 }
 0x96a   :  { %6410 = vmatpush.bf16.msrb.mxu1 %v8188_v4  ;;  %v8815_v34 = vld [vmem:[#allocation4 + $0x1b4] sm:$0xf0]  ;;  %v8108_v42 = vor.u32 %v8799_v41, %v8107_v8  ;;  %v8035_v10 = vld [vmem:[#allocation4 + $0xa0] sm:$0xf]  ;;  %v8781_v39 = vld [vmem:[#allocation4 + $0xa4] sm:$0xf0]  ;;  %v7972_v22 = vor.u32 %v8765_v57, %v7971_v15  ;;  %v6038_v15 = vsel %vm3840_vm3, %v6034_v54, %v6030_v32  ;;  %v6039_v57 = vsel %vm3840_vm3, %v6035_v55, %v6031_v61 }
 0x96b   :  { %6372 = vmatpush.bf16.msra.mxu2 %v7988_v45  ;;  %v8172_v36 = vor.u32 %v8815_v34, %v8171_v49  ;;  %v8099_v2 = vld [vmem:[#allocation4 + $0x120] sm:$0xf]  ;;  %v8797_v12 = vld [vmem:[#allocation4 + $0x124] sm:$0xf0]  ;;  %v8036_v35 = vor.u32 %v8781_v39, %v8035_v10  ;;  %v7963_v51 = vld [vmem:[#allocation4 + $0x10] sm:$0xf] }
 0x96c   :  { %6385 = vmatpush.bf16.msra.mxu3 %v8052_v21  ;;  %v8163_v6 = vld [vmem:[#allocation4 + $0x1a0] sm:$0xf]  ;;  %v8813_v13 = vld [vmem:[#allocation4 + $0x1a4] sm:$0xf0]  ;;  %v8100_v1 = vor.u32 %v8797_v12, %v8099_v2  ;;  %v8763_v17 = vld [vmem:[#allocation4 + $0x14] sm:$0xf0] }
 0x96d   :  { %6398 = vmatpush.bf16.msrb.mxu0 %v8116_v18  ;;  %v8027_v63 = vld [vmem:[#allocation4 + $0x90] sm:$0xf]  ;;  %v8164_v33 = vor.u32 %v8813_v13, %v8163_v6  ;;  %v8779_v29 = vld [vmem:[#allocation4 + $0x94] sm:$0xf0]  ;;  %v7964_v44 = vor.u32 %v8763_v17, %v7963_v51  ;;  %v7955_v38 = vld [vmem:[#allocation4] sm:$0xf]  ;;  %v6032_v18 = vunpack.c.l.b16 %v5946_v23  ;;  %v10703_v17 = vpack.c.b16 %v6038_v15, %v6038_v15 }
 0x96e   :  { %6411 = vmatpush.bf16.msrb.mxu1 %v8180_v53  ;;  %v8091_v14 = vld [vmem:[#allocation4 + $0x110] sm:$0xf]  ;;  %v8795_v7 = vld [vmem:[#allocation4 + $0x114] sm:$0xf0]  ;;  %v8761_v52 = vld [vmem:[#allocation4 + $0x4] sm:$0xf0]  ;;  %v8028_v37 = vor.u32 %v8779_v29, %v8027_v63  ;;  %v10705_v63 = vpack.c.b16 %v6039_v57, %v6039_v57 }
 0x96f   :  { %6373 = vmatpush.bf16.msra.mxu2 %v7980_v0  ;;  %v8155_v24 = vld [vmem:[#allocation4 + $0x190] sm:$0xf]  ;;  %v8811_v9 = vld [vmem:[#allocation4 + $0x194] sm:$0xf0]  ;;  %v8092_v25 = vor.u32 %v8795_v7, %v8091_v14  ;;  %v8019_v11 = vld [vmem:[#allocation4 + $0x80] sm:$0xf]  ;;  %v7956_v56 = vor.u32 %v8761_v52, %v7955_v38  ;;  %v6037_v0 = vsel %vm3840_vm3, %v6033_v31, %v6029_v5  ;;  %v6040_v6 = vsel %vm3840_vm3, %v6036_v48, %v6032_v18 }
 0x970   :  { %6386 = vmatpush.bf16.msra.mxu3 %v8044_v27  ;;  %v8777_v26 = vld [vmem:[#allocation4 + $0x84] sm:$0xf0]  ;;  %v8083_v28 = vld [vmem:[#allocation4 + $0x100] sm:$0xf]  ;;  %v8156_v4 = vor.u32 %v8811_v9, %v8155_v24  ;;  %v8774_v47 = vld [vmem:[#allocation4 + $0x74] sm:$0xf] }
 0x971   :  { %6399 = vmatpush.bf16.msrb.mxu0 %v8108_v42  ;;  %v8793_v60 = vld [vmem:[#allocation4 + $0x104] sm:$0xf0]  ;;  %v8147_v16 = vld [vmem:[#allocation4 + $0x180] sm:$0xf]  ;;  %v8013_v45 = vld [vmem:[#allocation4 + $0x78] sm:$0xf0]  ;;  %v8020_v8 = vor.u32 %v8777_v26, %v8019_v11 }
 0x972   :  { %6412 = vmatpush.bf16.msrb.mxu1 %v8172_v36  ;;  %v8809_v3 = vld [vmem:[#allocation4 + $0x184] sm:$0xf0]  ;;  %v8790_v21 = vld [vmem:[#allocation4 + $0xf4] sm:$0xf]  ;;  %v8077_v43 = vld [vmem:[#allocation4 + $0xf8] sm:$0xf0]  ;;  %v8084_v41 = vor.u32 %v8793_v60, %v8083_v28  ;;  %v8016_v42 = vor.u32 %v8774_v47, %v8013_v45 }
 0x973   :  { %6374 = vmatpush.bf16.msra.mxu2 %v7972_v22  ;;  %v8806_v53 = vld [vmem:[#allocation4 + $0x174] sm:$0xf]  ;;  %v8141_v62 = vld [vmem:[#allocation4 + $0x178] sm:$0xf0]  ;;  %v8148_v27 = vor.u32 %v8809_v3, %v8147_v16  ;;  %v8080_v10 = vor.u32 %v8790_v21, %v8077_v43  ;;  %v8772_v39 = vld [vmem:[#allocation4 + $0x64] sm:$0xf] }
 0x974   :  { %6387 = vmatpush.bf16.msra.mxu3 %v8036_v35  ;;  %v8822_v49 = vld [vmem:[#allocation4 + $0x1f4] sm:$0xf]  ;;  %v8205_v34 = vld [vmem:[#allocation4 + $0x1f8] sm:$0xf0]  ;;  %v8144_v36 = vor.u32 %v8806_v53, %v8141_v62  ;;  %v8005_v2 = vld [vmem:[#allocation4 + $0x68] sm:$0xf0]  ;;  %v10701_v35 = vpack.c.b16 %v6037_v0, %v6037_v0 }
 0x975   :  { %6400 = vmatpush.bf16.msrb.mxu0 %v8100_v1  ;;  %v8788_v12 = vld [vmem:[#allocation4 + $0xe4] sm:$0xf]  ;;  %v8208_v13 = vor.u32 %v8822_v49, %v8205_v34  ;;  %v8069_v22 = vld [vmem:[#allocation4 + $0xe8] sm:$0xf0]  ;;  %v8008_v50 = vor.u32 %v8772_v39, %v8005_v2  ;;  %v8770_v7 = vld [vmem:[#allocation4 + $0x54] sm:$0xf] }
 0x976   :  { %6413 = vmatpush.bf16.msrb.mxu1 %v8164_v33  ;;  %v8804_v19 = vld [vmem:[#allocation4 + $0x164] sm:$0xf]  ;;  %v8133_v58 = vld [vmem:[#allocation4 + $0x168] sm:$0xf0]  ;;  %v10707_v33 = vpack.c.b16 %v6040_v6, %v6040_v6  ;;  %v8072_v29 = vor.u32 %v8788_v12, %v8069_v22  ;;  %v7997_v30 = vld [vmem:[#allocation4 + $0x58] sm:$0xf0] }
 0x977   :  { %6375 = vmatpush.bf16.msra.mxu2 %v7964_v44  ;;  %v8820_v1 = vld [vmem:[#allocation4 + $0x1e4] sm:$0xf]  ;;  %v8197_v51 = vld [vmem:[#allocation4 + $0x1e8] sm:$0xf0]  ;;  %v8136_v14 = vor.u32 %v8804_v19, %v8133_v58  ;;  %v8786_v46 = vld [vmem:[#allocation4 + $0xd4] sm:$0xf]  ;;  %v8000_v38 = vor.u32 %v8770_v7, %v7997_v30 }
 0x978   :  { %6388 = vmatpush.bf16.msra.mxu3 %v8028_v37  ;;  %v8200_v40 = vor.u32 %v8820_v1, %v8197_v51  ;;  %v8061_v24 = vld [vmem:[#allocation4 + $0xd8] sm:$0xf0]  ;;  %v8802_v9 = vld [vmem:[#allocation4 + $0x154] sm:$0xf]  ;;  %v8768_v37 = vld [vmem:[#allocation4 + $0x44] sm:$0xf] }
 0x979   :  { %6401 = vmatpush.bf16.msrb.mxu0 %v8092_v25  ;;  %v8125_v23 = vld [vmem:[#allocation4 + $0x158] sm:$0xf0]  ;;  %v8818_v20 = vld [vmem:[#allocation4 + $0x1d4] sm:$0xf]  ;;  %v8064_v52 = vor.u32 %v8786_v46, %v8061_v24  ;;  %v7989_v25 = vld [vmem:[#allocation4 + $0x48] sm:$0xf0] }
 0x97a   :  { %6414 = vmatpush.bf16.msrb.mxu1 %v8156_v4  ;;  %v8189_v44 = vld [vmem:[#allocation4 + $0x1d8] sm:$0xf0]  ;;  %v8128_v5 = vor.u32 %v8802_v9, %v8125_v23  ;;  %v8784_v11 = vld [vmem:[#allocation4 + $0xc4] sm:$0xf]  ;;  %v8053_v28 = vld [vmem:[#allocation4 + $0xc8] sm:$0xf0]  ;;  %v7992_v16 = vor.u32 %v8768_v37, %v7989_v25 }
 0x97b   :  { %6376 = vmatpush.bf16.msra.mxu2 %v7956_v56  ;;  %v8192_v26 = vor.u32 %v8818_v20, %v8189_v44  ;;  %v8800_v31 = vld [vmem:[#allocation4 + $0x144] sm:$0xf]  ;;  %v8117_v32 = vld [vmem:[#allocation4 + $0x148] sm:$0xf0]  ;;  %v8056_v3 = vor.u32 %v8784_v11, %v8053_v28  ;;  %v8766_v61 = vld [vmem:[#allocation4 + $0x34] sm:$0xf] }
 0x97c   :  { %6389 = vmatpush.bf16.msra.mxu3 %v8020_v8  ;;  %v8816_v4 = vld [vmem:[#allocation4 + $0x1c4] sm:$0xf]  ;;  %v8181_v60 = vld [vmem:[#allocation4 + $0x1c8] sm:$0xf0]  ;;  %v8120_v54 = vor.u32 %v8800_v31, %v8117_v32  ;;  %v7981_v55 = vld [vmem:[#allocation4 + $0x38] sm:$0xf0] }
 0x97d   :  { %6402 = vmatpush.bf16.msrb.mxu0 %v8084_v41  ;;  %v8782_v47 = vld [vmem:[#allocation4 + $0xb4] sm:$0xf]  ;;  %v8184_v45 = vor.u32 %v8816_v4, %v8181_v60  ;;  %v8045_v21 = vld [vmem:[#allocation4 + $0xb8] sm:$0xf0]  ;;  %v7984_v53 = vor.u32 %v8766_v61, %v7981_v55  ;;  %v8764_v41 = vld [vmem:[#allocation4 + $0x24] sm:$0xf] }
 0x97e   :  { %6415 = vmatpush.bf16.msrb.mxu1 %v8148_v27  ;;  %6377 = vmatmul.bf16.vlgmr.msra.gmra.mxu2 %v10701_v35  ;;  %v8798_v18 = vld [vmem:[#allocation4 + $0x134] sm:$0xf]  ;;  %v8109_v48 = vld [vmem:[#allocation4 + $0x138] sm:$0xf0]  ;;  %v8048_v62 = vor.u32 %v8782_v47, %v8045_v21  ;;  %v7973_v49 = vld [vmem:[#allocation4 + $0x28] sm:$0xf0] }
 0x97f   :  { %6421 = vmatpush.bf16.msrb.mxu2 %v8016_v42  ;;  %6390 = vmatmul.bf16.vlgmr.msra.gmra.mxu3 %v10703_v17  ;;  %v8814_v56 = vld [vmem:[#allocation4 + $0x1b4] sm:$0xf]  ;;  %v8173_v43 = vld [vmem:[#allocation4 + $0x1b8] sm:$0xf0]  ;;  %v8112_v8 = vor.u32 %v8798_v18, %v8109_v48  ;;  %v8780_v34 = vld [vmem:[#allocation4 + $0xa4] sm:$0xf] }
 0x980   :  { %6434 = vmatpush.bf16.msrb.mxu3 %v8080_v10  ;;  %6403 = vmatmul.bf16.vlgmr.msrb.gmra.mxu0 %v10705_v63  ;;  %v8176_v0 = vor.u32 %v8814_v56, %v8173_v43  ;;  %v8037_v27 = vld [vmem:[#allocation4 + $0xa8] sm:$0xf0]  ;;  %v8796_v42 = vld [vmem:[#allocation4 + $0x124] sm:$0xf]  ;;  %v8762_v12 = vld [vmem:[#allocation4 + $0x14] sm:$0xf] }
 0x981   :  { %6447 = vmatpush.bf16.msra.mxu0 %v8144_v36  ;;  %6416 = vmatmul.bf16.vlgmr.msrb.gmra.mxu1 %v10707_v33  ;;  %v8101_v15 = vld [vmem:[#allocation4 + $0x128] sm:$0xf0]  ;;  %v8812_v57 = vld [vmem:[#allocation4 + $0x1a4] sm:$0xf]  ;;  %v7976_v36 = vor.u32 %v8764_v41, %v7973_v49  ;;  %v8040_v39 = vor.u32 %v8780_v34, %v8037_v27  ;;  %v7965_v6 = vld [vmem:[#allocation4 + $0x18] sm:$0xf0] }
 0x982   :  { %6460 = vmatpush.bf16.msra.mxu1 %v8208_v13  ;;  %v8165_v10 = vld [vmem:[#allocation4 + $0x1a8] sm:$0xf0]  ;;  %v8104_v2 = vor.u32 %v8796_v42, %v8101_v15  ;;  %v8778_v13 = vld [vmem:[#allocation4 + $0x94] sm:$0xf]  ;;  %v8029_v19 = vld [vmem:[#allocation4 + $0x98] sm:$0xf0] }
 0x983   :  { %6422 = vmatpush.bf16.msrb.mxu2 %v8008_v50  ;;  %v8168_v22 = vor.u32 %v8812_v57, %v8165_v10  ;;  %v8794_v58 = vld [vmem:[#allocation4 + $0x114] sm:$0xf]  ;;  %v8093_v1 = vld [vmem:[#allocation4 + $0x118] sm:$0xf0]  ;;  %v8760_v30 = vld [vmem:[#allocation4 + $0x4] sm:$0xf] }
 0x984   :  { %6435 = vmatpush.bf16.msrb.mxu3 %v8072_v29  ;;  %v8810_v51 = vld [vmem:[#allocation4 + $0x194] sm:$0xf]  ;;  %v8157_v50 = vld [vmem:[#allocation4 + $0x198] sm:$0xf0]  ;;  %v7968_v29 = vor.u32 %v8762_v12, %v7965_v6  ;;  %v8096_v7 = vor.u32 %v8794_v58, %v8093_v1  ;;  %v7957_v46 = vld [vmem:[#allocation4 + $0x8] sm:$0xf0] }
 0x985   :  { %6448 = vmatpush.bf16.msra.mxu0 %v8136_v14  ;;  %v8032_v14 = vor.u32 %v8778_v13, %v8029_v19  ;;  %v8160_v24 = vor.u32 %v8810_v51, %v8157_v50  ;;  %v8021_v9 = vld [vmem:[#allocation4 + $0x88] sm:$0xf0]  ;;  %v8792_v23 = vld [vmem:[#allocation4 + $0x104] sm:$0xf]  ;;  %s10819_s14 = sld [smem:[#allocation57_spill]] }
 0x986   :  { %6461 = vmatpush.bf16.msra.mxu1 %v8200_v40  ;;  %v8776_v40 = vld [vmem:[#allocation4 + $0x84] sm:$0xf]  ;;  %v8085_v20 = vld [vmem:[#allocation4 + $0x108] sm:$0xf0] }
 0x987   :  { %6423 = vmatpush.bf16.msrb.mxu2 %v8000_v38  ;;  %v8808_v44 = vld [vmem:[#allocation4 + $0x184] sm:$0xf]  ;;  %v8149_v38 = vld [vmem:[#allocation4 + $0x188] sm:$0xf0]  ;;  %v8088_v37 = vor.u32 %v8792_v23, %v8085_v20 }
 0x988   :  { %6436 = vmatpush.bf16.msrb.mxu3 %v8064_v52  ;;  %v7960_v52 = vor.u32 %v8760_v30, %v7957_v46  ;;  %v8152_v25 = vor.u32 %v8808_v44, %v8149_v38 }
 0x989   :  { %6449 = vmatpush.bf16.msra.mxu0 %v8128_v5  ;;  %v8024_v5 = vor.u32 %v8776_v40, %v8021_v9 }
 0x98a   :  { %6462 = vmatpush.bf16.msra.mxu1 %v8192_v26 }
 0x98b   :  { %6424 = vmatpush.bf16.msrb.mxu2 %v7992_v16  ;;  %v6015_v11 = vld [vmem:[%s10819_s14] sm:$0x3] }
 0x98c   :  { %6437 = vmatpush.bf16.msrb.mxu3 %v8056_v3  ;;  %v6017_v31 = vperm.slane %v6015_v11, 0 }
 0x98d   :  { %6450 = vmatpush.bf16.msra.mxu0 %v8120_v54 }
 0x98e   :  { %6463 = vmatpush.bf16.msra.mxu1 %v8184_v45 }
 0x98f   :  { %6425 = vmatpush.bf16.msrb.mxu2 %v7984_v53 }
 0x990   :  { %6438 = vmatpush.bf16.msrb.mxu3 %v8048_v62 }
 0x991   :  { %6451 = vmatpush.bf16.msra.mxu0 %v8112_v8 }
 0x992   :  { %6464 = vmatpush.bf16.msra.mxu1 %v8176_v0 }
 0x993   :  { %6426 = vmatpush.bf16.msrb.mxu2 %v7976_v36 }
 0x994   :  { %6439 = vmatpush.bf16.msrb.mxu3 %v8040_v39 }
 0x995   :  { %6452 = vmatpush.bf16.msra.mxu0 %v8104_v2 }
 0x996   :  { %6465 = vmatpush.bf16.msra.mxu1 %v8168_v22 }
 0x997   :  { %6427 = vmatpush.bf16.msrb.mxu2 %v7968_v29 }
 0x998   :  { %6440 = vmatpush.bf16.msrb.mxu3 %v8032_v14 }
 0x999   :  { %6453 = vmatpush.bf16.msra.mxu0 %v8096_v7 }
 0x99a   :  { %6466 = vmatpush.bf16.msra.mxu1 %v8160_v24 }
 0x99b   :  { %6428 = vmatpush.bf16.msrb.mxu2 %v7960_v52 }
 0x99c   :  { %6441 = vmatpush.bf16.msrb.mxu3 %v8024_v5 }
 0x99d   :  { %6454 = vmatpush.bf16.msra.mxu0 %v8088_v37 }
 0x99e   :  { %6467 = vmatpush.bf16.msra.mxu1 %v8152_v25  ;;  %6429 = vmatmul.bf16.vlgmr.msrb.gmra.mxu2 %v10701_v35 }
 0x99f   :  { %6442 = vmatmul.bf16.vlgmr.msrb.gmra.mxu3 %v10703_v17 }
 0x9a0   :  { %6455 = vmatmul.bf16.vlgmr.msra.gmra.mxu0 %v10705_v63 }
 0x9a1   :  { %6468 = vmatmul.bf16.vlgmr.msra.gmra.mxu1 %v10707_v33  ;;  %v6018_v33 = vperm.slane %v6015_v11, 1 }
 0x9fd   :  { %v6404_v26 = vpop.f32.mrf.mxu0 }
 0x9fe   :  { %v6417_v28 = vpop.f32.mrf.mxu1 }
 0xa01   :  { %v6378_v32 = vpop.f32.mrf.mxu2 }
 0xa02   :  { %v6379_v4 = vadd.f32 %v6378_v32, %v6017_v31  ;;  %v6391_v60 = vpop.f32.mrf.mxu3 }
 0xa04   :  { %v6392_v16 = vadd.f32 %v6391_v60, %v6379_v4 }
 0xa05   :  { %v6406_v3 = vpop.f32.mrf.mxu0 }
 0xa06   :  { %v6419_v54 = vpop.f32.mrf.mxu1  ;;  %v6405_v61 = vadd.f32 %v6404_v26, %v6392_v16 }
 0xa08   :  { %v10718_v55 = vadd.f32 %v6417_v28, %v6405_v61 }
 0xa09   :  { %v6380_v35 = vpop.f32.mrf.mxu2 }
 0xa0a   :  { %v6473_v17 = vmax.f32 %v10718_v55, 0.0  ;;  %v6393_v47 = vpop.f32.mrf.mxu3 }
 0xa1d   :  { %v6456_v63 = vpop.f32.mrf.mxu0 }
 0xa1e   :  { %v6469_v45 = vpop.f32.mrf.mxu1 }
 0xa21   :  { %v6430_v21 = vpop.f32.mrf.mxu2 }
 0xa22   :  { %v6431_v18 = vadd.f32 %v6430_v21, %v6018_v33  ;;  %v6443_v48 = vpop.f32.mrf.mxu3 }
 0xa24   :  { %v6444_v56 = vadd.f32 %v6443_v48, %v6431_v18 }
 0xa25   :  { %v6458_v43 = vpop.f32.mrf.mxu0 }
 0xa26   :  { %v6471_v53 = vpop.f32.mrf.mxu1  ;;  %v6457_v62 = vadd.f32 %v6456_v63, %v6444_v56 }
 0xa28   :  { %v10721_v8 = vadd.f32 %v6469_v45, %v6457_v62 }
 0xa29   :  { %v6432_v41 = vpop.f32.mrf.mxu2 }
 0xa2a   :  { %v6474_v49 = vmax.f32 %v10721_v8, 0.0  ;;  %v6445_v34 = vpop.f32.mrf.mxu3 }
 0xa2b   :  { %9412 = dma.done.wait [#allocation8 + $0x3], 4096 }
 0xa2c   :  { %9413 = vsyncadd [#allocation8 + $0x3], 4294963200  ;;  %v8267_v0 = vld [vmem:[#allocation5 + $0x70] sm:$0xf]  ;;  %v8839_v27 = vld [vmem:[#allocation5 + $0x74] sm:$0xf0] }
 0xa2d   :  { %v8331_v42 = vld [vmem:[#allocation5 + $0xf0] sm:$0xf]  ;;  %v8268_v15 = vor.u32 %v8839_v27, %v8267_v0  ;;  %v8855_v57 = vld [vmem:[#allocation5 + $0xf4] sm:$0xf0]  ;;  %v8838_v10 = vld [vmem:[#allocation5 + $0x74] sm:$0xf] }
 0xa2e   :  { %v8269_v36 = vld [vmem:[#allocation5 + $0x78] sm:$0xf0]  ;;  %v8332_v39 = vor.u32 %v8855_v57, %v8331_v42  ;;  %v8854_v12 = vld [vmem:[#allocation5 + $0xf4] sm:$0xf]  ;;  %v8259_v13 = vld [vmem:[#allocation5 + $0x60] sm:$0xf] }
 0xa2f   :  { %v8272_v2 = vor.u32 %v8838_v10, %v8269_v36  ;;  %v8333_v6 = vld [vmem:[#allocation5 + $0xf8] sm:$0xf0]  ;;  %6679 = vmatpush.bf16.msra.mxu2 %v8268_v15  ;;  %v8837_v19 = vld [vmem:[#allocation5 + $0x64] sm:$0xf0]  ;;  %v8323_v58 = vld [vmem:[#allocation5 + $0xe0] sm:$0xf] }
 0xa30   :  { %v8336_v22 = vor.u32 %v8854_v12, %v8333_v6  ;;  %v8853_v1 = vld [vmem:[#allocation5 + $0xe4] sm:$0xf0]  ;;  %6692 = vmatpush.bf16.msra.mxu3 %v8332_v39  ;;  %v8260_v51 = vor.u32 %v8837_v19, %v8259_v13  ;;  %v8836_v29 = vld [vmem:[#allocation5 + $0x64] sm:$0xf]  ;;  %v8261_v14 = vld [vmem:[#allocation5 + $0x68] sm:$0xf0] }
 0xa31   :  { %6705 = vmatpush.bf16.msrb.mxu0 %v8272_v2  ;;  %v8324_v50 = vor.u32 %v8853_v1, %v8323_v58  ;;  %v8852_v7 = vld [vmem:[#allocation5 + $0xe4] sm:$0xf]  ;;  %v8264_v30 = vor.u32 %v8836_v29, %v8261_v14  ;;  %v8325_v46 = vld [vmem:[#allocation5 + $0xe8] sm:$0xf0]  ;;  %v8251_v40 = vld [vmem:[#allocation5 + $0x50] sm:$0xf] }
 0xa32   :  { %6718 = vmatpush.bf16.msrb.mxu1 %v8336_v22  ;;  %v8835_v24 = vld [vmem:[#allocation5 + $0x54] sm:$0xf0]  ;;  %v8328_v9 = vor.u32 %v8852_v7, %v8325_v46  ;;  %v8315_v23 = vld [vmem:[#allocation5 + $0xd0] sm:$0xf]  ;;  %v8834_v44 = vld [vmem:[#allocation5 + $0x54] sm:$0xf] }
 0xa33   :  { %v8851_v20 = vld [vmem:[#allocation5 + $0xd4] sm:$0xf0]  ;;  %6680 = vmatpush.bf16.msra.mxu2 %v8260_v51  ;;  %v8252_v38 = vor.u32 %v8835_v24, %v8251_v40  ;;  %v8253_v52 = vld [vmem:[#allocation5 + $0x58] sm:$0xf0]  ;;  %v8850_v5 = vld [vmem:[#allocation5 + $0xd4] sm:$0xf] }
 0xa34   :  { %v8317_v37 = vld [vmem:[#allocation5 + $0xd8] sm:$0xf0]  ;;  %6693 = vmatpush.bf16.msra.mxu3 %v8324_v50  ;;  %v8316_v25 = vor.u32 %v8851_v20, %v8315_v23  ;;  %v8256_v11 = vor.u32 %v8834_v44, %v8253_v52  ;;  %v8243_v26 = vld [vmem:[#allocation5 + $0x40] sm:$0xf]  ;;  %v8833_v28 = vld [vmem:[#allocation5 + $0x44] sm:$0xf0] }
 0xa35   :  { %6706 = vmatpush.bf16.msrb.mxu0 %v8264_v30  ;;  %v8307_v31 = vld [vmem:[#allocation5 + $0xc0] sm:$0xf]  ;;  %v8320_v32 = vor.u32 %v8850_v5, %v8317_v37  ;;  %v8849_v4 = vld [vmem:[#allocation5 + $0xc4] sm:$0xf0]  ;;  %v8832_v60 = vld [vmem:[#allocation5 + $0x44] sm:$0xf]  ;;  %v8244_v61 = vor.u32 %v8833_v28, %v8243_v26 }
 0xa36   :  { %6719 = vmatpush.bf16.msrb.mxu1 %v8328_v9  ;;  %v8245_v16 = vld [vmem:[#allocation5 + $0x48] sm:$0xf0]  ;;  %v8848_v3 = vld [vmem:[#allocation5 + $0xc4] sm:$0xf]  ;;  %v8308_v35 = vor.u32 %v8849_v4, %v8307_v31  ;;  %v8235_v63 = vld [vmem:[#allocation5 + $0x30] sm:$0xf]  ;;  %v6479_v31 = vpack.c.bf16 %v6473_v17, %v6473_v17 }
 0xa37   :  { %v8309_v54 = vld [vmem:[#allocation5 + $0xc8] sm:$0xf0]  ;;  %6681 = vmatpush.bf16.msra.mxu2 %v8252_v38  ;;  %v8248_v47 = vor.u32 %v8832_v60, %v8245_v16  ;;  %v8831_v45 = vld [vmem:[#allocation5 + $0x34] sm:$0xf0]  ;;  %v8299_v33 = vld [vmem:[#allocation5 + $0xb0] sm:$0xf] }
 0xa38   :  { %6694 = vmatpush.bf16.msra.mxu3 %v8316_v25  ;;  %v8312_v21 = vor.u32 %v8848_v3, %v8309_v54  ;;  %v8847_v18 = vld [vmem:[#allocation5 + $0xb4] sm:$0xf0]  ;;  %v8830_v48 = vld [vmem:[#allocation5 + $0x34] sm:$0xf]  ;;  %v8237_v56 = vld [vmem:[#allocation5 + $0x38] sm:$0xf0]  ;;  %v8236_v62 = vor.u32 %v8831_v45, %v8235_v63 }
 0xa39   :  { %6707 = vmatpush.bf16.msrb.mxu0 %v8256_v11  ;;  %v8846_v43 = vld [vmem:[#allocation5 + $0xb4] sm:$0xf]  ;;  %v8301_v53 = vld [vmem:[#allocation5 + $0xb8] sm:$0xf0]  ;;  %v8300_v41 = vor.u32 %v8847_v18, %v8299_v33  ;;  %v8240_v34 = vor.u32 %v8830_v48, %v8237_v56  ;;  %v8227_v0 = vld [vmem:[#allocation5 + $0x20] sm:$0xf] }
 0xa3a   :  { %6720 = vmatpush.bf16.msrb.mxu1 %v8320_v32  ;;  %v8829_v27 = vld [vmem:[#allocation5 + $0x24] sm:$0xf0]  ;;  %v8291_v42 = vld [vmem:[#allocation5 + $0xa0] sm:$0xf]  ;;  %v8304_v15 = vor.u32 %v8846_v43, %v8301_v53  ;;  %v8828_v10 = vld [vmem:[#allocation5 + $0x24] sm:$0xf]  ;;  %v6480_v32 = vpack.c.bf16 %v6474_v49, %v6474_v49 }
 0xa3b   :  { %6682 = vmatpush.bf16.msra.mxu2 %v8244_v61  ;;  %v8845_v57 = vld [vmem:[#allocation5 + $0xa4] sm:$0xf0]  ;;  %v8229_v36 = vld [vmem:[#allocation5 + $0x28] sm:$0xf0]  ;;  %v8844_v39 = vld [vmem:[#allocation5 + $0xa4] sm:$0xf]  ;;  %v8228_v12 = vor.u32 %v8829_v27, %v8227_v0 }
 0xa3c   :  { %6695 = vmatpush.bf16.msra.mxu3 %v8308_v35  ;;  %v8293_v2 = vld [vmem:[#allocation5 + $0xa8] sm:$0xf0]  ;;  %v8292_v6 = vor.u32 %v8845_v57, %v8291_v42  ;;  %v8232_v13 = vor.u32 %v8828_v10, %v8229_v36  ;;  %v8219_v22 = vld [vmem:[#allocation5 + $0x10] sm:$0xf]  ;;  %v8827_v19 = vld [vmem:[#allocation5 + $0x14] sm:$0xf0] }
 0xa3d   :  { %6708 = vmatpush.bf16.msrb.mxu0 %v8248_v47  ;;  %v8283_v58 = vld [vmem:[#allocation5 + $0x90] sm:$0xf]  ;;  %v8296_v1 = vor.u32 %v8844_v39, %v8293_v2  ;;  %v8843_v51 = vld [vmem:[#allocation5 + $0x94] sm:$0xf0]  ;;  %v8826_v50 = vld [vmem:[#allocation5 + $0x14] sm:$0xf]  ;;  %v8220_v30 = vor.u32 %v8827_v19, %v8219_v22 }
 0xa3e   :  { %6721 = vmatpush.bf16.msrb.mxu1 %v8312_v21  ;;  %v8221_v29 = vld [vmem:[#allocation5 + $0x18] sm:$0xf0]  ;;  %v8842_v14 = vld [vmem:[#allocation5 + $0x94] sm:$0xf]  ;;  %v8284_v46 = vor.u32 %v8843_v51, %v8283_v58  ;;  %v8211_v24 = vld [vmem:[#allocation5] sm:$0xf] }
 0xa3f   :  { %6683 = vmatpush.bf16.msra.mxu2 %v8236_v62  ;;  %v8285_v7 = vld [vmem:[#allocation5 + $0x98] sm:$0xf0]  ;;  %v8224_v40 = vor.u32 %v8826_v50, %v8221_v29  ;;  %v8825_v9 = vld [vmem:[#allocation5 + $0x4] sm:$0xf0]  ;;  %v8275_v23 = vld [vmem:[#allocation5 + $0x80] sm:$0xf] }
 0xa40   :  { %6696 = vmatpush.bf16.msra.mxu3 %v8300_v41  ;;  %v8288_v20 = vor.u32 %v8842_v14, %v8285_v7  ;;  %v8841_v44 = vld [vmem:[#allocation5 + $0x84] sm:$0xf0]  ;;  %v8824_v38 = vld [vmem:[#allocation5 + $0x4] sm:$0xf]  ;;  %v8213_v52 = vld [vmem:[#allocation5 + $0x8] sm:$0xf0]  ;;  %v8212_v25 = vor.u32 %v8825_v9, %v8211_v24 }
 0xa41   :  { %6709 = vmatpush.bf16.msrb.mxu0 %v8240_v34  ;;  %v8840_v5 = vld [vmem:[#allocation5 + $0x84] sm:$0xf]  ;;  %v8277_v37 = vld [vmem:[#allocation5 + $0x88] sm:$0xf0]  ;;  %s10820_s7 = sld [smem:[#allocation58_spill]]  ;;  %v8276_v11 = vor.u32 %v8841_v44, %v8275_v23  ;;  %v8216_v26 = vor.u32 %v8824_v38, %v8213_v52 }
 0xa42   :  { %6722 = vmatpush.bf16.msrb.mxu1 %v8304_v15  ;;  %v8280_v28 = vor.u32 %v8840_v5, %v8277_v37 }
 0xa43   :  { %6684 = vmatpush.bf16.msra.mxu2 %v8228_v12 }
 0xa44   :  { %6697 = vmatpush.bf16.msra.mxu3 %v8292_v6 }
 0xa45   :  { %6710 = vmatpush.bf16.msrb.mxu0 %v8232_v13 }
 0xa46   :  { %6723 = vmatpush.bf16.msrb.mxu1 %v8296_v1 }
 0xa47   :  { %6685 = vmatpush.bf16.msra.mxu2 %v8220_v30  ;;  %v6513_v4 = vld [vmem:[%s10820_s7] sm:$0x3] }
 0xa48   :  { %6698 = vmatpush.bf16.msra.mxu3 %v8284_v46  ;;  %v6516_v60 = vperm.slane %v6513_v4, 1  ;;  %v6515_v55 = vperm.slane %v6513_v4, 0 }
 0xa49   :  { %6711 = vmatpush.bf16.msrb.mxu0 %v8224_v40 }
 0xa4a   :  { %6724 = vmatpush.bf16.msrb.mxu1 %v8288_v20 }
 0xa4b   :  { %6686 = vmatpush.bf16.msra.mxu2 %v8212_v25 }
 0xa4c   :  { %6699 = vmatpush.bf16.msra.mxu3 %v8276_v11 }
 0xa4d   :  { %6712 = vmatpush.bf16.msrb.mxu0 %v8216_v26 }
 0xa4e   :  { %6725 = vmatpush.bf16.msrb.mxu1 %v8280_v28  ;;  %6687 = vmatmul.bf16.vlgmr.msra.gmra.mxu2 %v6479_v31 }
 0xa4f   :  { %6700 = vmatmul.bf16.vlgmr.msra.gmra.mxu3 %v6480_v32 }
 0xa50   :  { %6713 = vmatmul.bf16.vlgmr.msrb.gmra.mxu0 %v6479_v31 }
 0xa51   :  { %6726 = vmatmul.bf16.vlgmr.msrb.gmra.mxu1 %v6480_v32 }
 0xacd   :  { %v6714_v16 = vpop.f32.mrf.mxu0 }
 0xace   :  { %v6715_v3 = vadd.f32 %v6714_v16, %v6516_v60  ;;  %v6727_v54 = vpop.f32.mrf.mxu1 }
 0xad0   :  { %v10731_v61 = vadd.f32 %v6727_v54, %v6715_v3 }
 0xad1   :  { %v6688_v8 = vpop.f32.mrf.mxu2 }
 0xad2   :  { %v6732_v17 = vmax.f32 %v10731_v61, 0.0  ;;  %v6689_v35 = vadd.f32 %v6688_v8, %v6515_v55  ;;  %v6701_v49 = vpop.f32.mrf.mxu3 }
 0xad4   :  { %v10734_v47 = vadd.f32 %v6701_v49, %v6689_v35 }
 0xad5   :  { %v6716_v63 = vpop.f32.mrf.mxu0 }
 0xad6   :  { %v6729_v45 = vpop.f32.mrf.mxu1  ;;  %v6731_v33 = vmax.f32 %v10734_v47, 0.0 }
 0xad9   :  { %v6690_v21 = vpop.f32.mrf.mxu2 }
 0xada   :  { %v6703_v18 = vpop.f32.mrf.mxu3 }
 0xadb   :  { %9414 = dma.done.wait [#allocation8 + $0x4], 4096 }
 0xadc   :  { %9415 = vsyncadd [#allocation8 + $0x4], 4294963200 }
 0xadd   :  { %9416 = dma.done.wait [#allocation8 + $0x5], 4096 }
 0xade   :  { %9417 = vsyncadd [#allocation8 + $0x5], 4294963200  ;;  %v8395_v48 = vld [vmem:[#allocation7 + $0x70] sm:$0xf]  ;;  %v8903_v56 = vld [vmem:[#allocation7 + $0x74] sm:$0xf0] }
 0xadf   :  { %v8459_v43 = vld [vmem:[#allocation7 + $0xf0] sm:$0xf]  ;;  %v8396_v53 = vor.u32 %v8903_v56, %v8395_v48  ;;  %v8919_v62 = vld [vmem:[#allocation7 + $0xf4] sm:$0xf0]  ;;  %v8902_v41 = vld [vmem:[#allocation7 + $0x74] sm:$0xf] }
 0xae0   :  { %v8397_v34 = vld [vmem:[#allocation7 + $0x78] sm:$0xf0]  ;;  %v8460_v0 = vor.u32 %v8919_v62, %v8459_v43  ;;  %v8918_v42 = vld [vmem:[#allocation7 + $0xf4] sm:$0xf]  ;;  %v8387_v57 = vld [vmem:[#allocation7 + $0x60] sm:$0xf] }
 0xae1   :  { %v8400_v27 = vor.u32 %v8902_v41, %v8397_v34  ;;  %v8461_v15 = vld [vmem:[#allocation7 + $0xf8] sm:$0xf0]  ;;  %6965 = vmatpush.bf16.msrb.mxu2 %v8396_v53  ;;  %v8901_v36 = vld [vmem:[#allocation7 + $0x64] sm:$0xf0]  ;;  %v8451_v39 = vld [vmem:[#allocation7 + $0xe0] sm:$0xf] }
 0xae2   :  { %v8464_v10 = vor.u32 %v8918_v42, %v8461_v15  ;;  %v8917_v2 = vld [vmem:[#allocation7 + $0xe4] sm:$0xf0]  ;;  %6978 = vmatpush.bf16.msrb.mxu3 %v8460_v0  ;;  %v8388_v12 = vor.u32 %v8901_v36, %v8387_v57  ;;  %v8900_v13 = vld [vmem:[#allocation7 + $0x64] sm:$0xf]  ;;  %v8389_v22 = vld [vmem:[#allocation7 + $0x68] sm:$0xf0] }
 0xae3   :  { %6991 = vmatpush.bf16.msra.mxu0 %v8400_v27  ;;  %v8452_v6 = vor.u32 %v8917_v2, %v8451_v39  ;;  %v8916_v19 = vld [vmem:[#allocation7 + $0xe4] sm:$0xf]  ;;  %v8392_v58 = vor.u32 %v8900_v13, %v8389_v22  ;;  %v8453_v1 = vld [vmem:[#allocation7 + $0xe8] sm:$0xf0]  ;;  %v8379_v51 = vld [vmem:[#allocation7 + $0x50] sm:$0xf] }
 0xae4   :  { %7004 = vmatpush.bf16.msra.mxu1 %v8464_v10  ;;  %v8899_v50 = vld [vmem:[#allocation7 + $0x54] sm:$0xf0]  ;;  %v8456_v29 = vor.u32 %v8916_v19, %v8453_v1  ;;  %v8443_v14 = vld [vmem:[#allocation7 + $0xd0] sm:$0xf]  ;;  %v8898_v30 = vld [vmem:[#allocation7 + $0x54] sm:$0xf] }
 0xae5   :  { %v8915_v7 = vld [vmem:[#allocation7 + $0xd4] sm:$0xf0]  ;;  %6966 = vmatpush.bf16.msrb.mxu2 %v8388_v12  ;;  %v8380_v46 = vor.u32 %v8899_v50, %v8379_v51  ;;  %v8381_v40 = vld [vmem:[#allocation7 + $0x58] sm:$0xf0]  ;;  %v8914_v24 = vld [vmem:[#allocation7 + $0xd4] sm:$0xf] }
 0xae6   :  { %v8445_v9 = vld [vmem:[#allocation7 + $0xd8] sm:$0xf0]  ;;  %6979 = vmatpush.bf16.msrb.mxu3 %v8452_v6  ;;  %v8444_v23 = vor.u32 %v8915_v7, %v8443_v14  ;;  %v8384_v20 = vor.u32 %v8898_v30, %v8381_v40  ;;  %v8371_v44 = vld [vmem:[#allocation7 + $0x40] sm:$0xf]  ;;  %v8897_v38 = vld [vmem:[#allocation7 + $0x44] sm:$0xf0] }
 0xae7   :  { %6992 = vmatpush.bf16.msra.mxu0 %v8392_v58  ;;  %v8435_v52 = vld [vmem:[#allocation7 + $0xc0] sm:$0xf]  ;;  %v8448_v5 = vor.u32 %v8914_v24, %v8445_v9  ;;  %v8913_v37 = vld [vmem:[#allocation7 + $0xc4] sm:$0xf0]  ;;  %v8896_v25 = vld [vmem:[#allocation7 + $0x44] sm:$0xf]  ;;  %v8372_v31 = vor.u32 %v8897_v38, %v8371_v44 }
 0xae8   :  { %7005 = vmatpush.bf16.msra.mxu1 %v8456_v29  ;;  %v8373_v11 = vld [vmem:[#allocation7 + $0x48] sm:$0xf0]  ;;  %v8912_v26 = vld [vmem:[#allocation7 + $0xc4] sm:$0xf]  ;;  %v8436_v32 = vor.u32 %v8913_v37, %v8435_v52  ;;  %v8363_v60 = vld [vmem:[#allocation7 + $0x30] sm:$0xf] }
 0xae9   :  { %v8437_v28 = vld [vmem:[#allocation7 + $0xc8] sm:$0xf0]  ;;  %6967 = vmatpush.bf16.msrb.mxu2 %v8380_v46  ;;  %v8376_v4 = vor.u32 %v8896_v25, %v8373_v11  ;;  %v8895_v16 = vld [vmem:[#allocation7 + $0x34] sm:$0xf0]  ;;  %v8427_v3 = vld [vmem:[#allocation7 + $0xb0] sm:$0xf] }
 0xaea   :  { %6980 = vmatpush.bf16.msrb.mxu3 %v8444_v23  ;;  %v8440_v54 = vor.u32 %v8912_v26, %v8437_v28  ;;  %v8911_v55 = vld [vmem:[#allocation7 + $0xb4] sm:$0xf0]  ;;  %v8894_v8 = vld [vmem:[#allocation7 + $0x34] sm:$0xf]  ;;  %v8365_v35 = vld [vmem:[#allocation7 + $0x38] sm:$0xf0]  ;;  %v8364_v45 = vor.u32 %v8895_v16, %v8363_v60 }
 0xaeb   :  { %6993 = vmatpush.bf16.msra.mxu0 %v8384_v20  ;;  %v8910_v49 = vld [vmem:[#allocation7 + $0xb4] sm:$0xf]  ;;  %v8429_v63 = vld [vmem:[#allocation7 + $0xb8] sm:$0xf0]  ;;  %v8428_v21 = vor.u32 %v8911_v55, %v8427_v3  ;;  %v8368_v18 = vor.u32 %v8894_v8, %v8365_v35  ;;  %v8355_v48 = vld [vmem:[#allocation7 + $0x20] sm:$0xf] }
 0xaec   :  { %7006 = vmatpush.bf16.msra.mxu1 %v8448_v5  ;;  %v8893_v56 = vld [vmem:[#allocation7 + $0x24] sm:$0xf0]  ;;  %v8419_v43 = vld [vmem:[#allocation7 + $0xa0] sm:$0xf]  ;;  %v8432_v53 = vor.u32 %v8910_v49, %v8429_v63  ;;  %v8892_v41 = vld [vmem:[#allocation7 + $0x24] sm:$0xf]  ;;  %v6771_v63 = vpack.c.bf16 %v6731_v33, %v6731_v33 }
 0xaed   :  { %6968 = vmatpush.bf16.msrb.mxu2 %v8372_v31  ;;  %v8909_v62 = vld [vmem:[#allocation7 + $0xa4] sm:$0xf0]  ;;  %v8357_v34 = vld [vmem:[#allocation7 + $0x28] sm:$0xf0]  ;;  %v8908_v0 = vld [vmem:[#allocation7 + $0xa4] sm:$0xf]  ;;  %v8356_v42 = vor.u32 %v8893_v56, %v8355_v48 }
 0xaee   :  { %6981 = vmatpush.bf16.msrb.mxu3 %v8436_v32  ;;  %v8421_v27 = vld [vmem:[#allocation7 + $0xa8] sm:$0xf0]  ;;  %v8420_v15 = vor.u32 %v8909_v62, %v8419_v43  ;;  %v8360_v57 = vor.u32 %v8892_v41, %v8357_v34  ;;  %v8347_v10 = vld [vmem:[#allocation7 + $0x10] sm:$0xf]  ;;  %v8891_v36 = vld [vmem:[#allocation7 + $0x14] sm:$0xf0] }
 0xaef   :  { %6994 = vmatpush.bf16.msra.mxu0 %v8376_v4  ;;  %v8411_v39 = vld [vmem:[#allocation7 + $0x90] sm:$0xf]  ;;  %v8424_v2 = vor.u32 %v8908_v0, %v8421_v27  ;;  %v8907_v12 = vld [vmem:[#allocation7 + $0x94] sm:$0xf0]  ;;  %v8890_v6 = vld [vmem:[#allocation7 + $0x14] sm:$0xf]  ;;  %v8348_v58 = vor.u32 %v8891_v36, %v8347_v10 }
 0xaf0   :  { %7007 = vmatpush.bf16.msra.mxu1 %v8440_v54  ;;  %v8349_v13 = vld [vmem:[#allocation7 + $0x18] sm:$0xf0]  ;;  %v8906_v22 = vld [vmem:[#allocation7 + $0x94] sm:$0xf]  ;;  %v8339_v1 = vld [vmem:[#allocation7] sm:$0xf]  ;;  %v8412_v50 = vor.u32 %v8907_v12, %v8411_v39 }
 0xaf1   :  { %6969 = vmatpush.bf16.msrb.mxu2 %v8364_v45  ;;  %v8413_v19 = vld [vmem:[#allocation7 + $0x98] sm:$0xf0]  ;;  %v8889_v51 = vld [vmem:[#allocation7 + $0x4] sm:$0xf0]  ;;  %v8352_v29 = vor.u32 %v8890_v6, %v8349_v13  ;;  %v8403_v14 = vld [vmem:[#allocation7 + $0x80] sm:$0xf] }
 0xaf2   :  { %6982 = vmatpush.bf16.msrb.mxu3 %v8428_v21  ;;  %v8905_v7 = vld [vmem:[#allocation7 + $0x84] sm:$0xf0]  ;;  %v8888_v30 = vld [vmem:[#allocation7 + $0x4] sm:$0xf]  ;;  %v8416_v46 = vor.u32 %v8906_v22, %v8413_v19  ;;  %v8341_v40 = vld [vmem:[#allocation7 + $0x8] sm:$0xf0]  ;;  %v8340_v38 = vor.u32 %v8889_v51, %v8339_v1 }
 0xaf3   :  { %6995 = vmatpush.bf16.msra.mxu0 %v8368_v18  ;;  %v8523_v24 = vld [vmem:[#allocation6 + $0x70] sm:$0xf]  ;;  %v8871_v9 = vld [vmem:[#allocation6 + $0x74] sm:$0xf0]  ;;  %v8870_v44 = vld [vmem:[#allocation6 + $0x74] sm:$0xf]  ;;  %v8404_v25 = vor.u32 %v8905_v7, %v8403_v14  ;;  %v8344_v11 = vor.u32 %v8888_v30, %v8341_v40  ;;  %v6772_v18 = vpack.c.bf16 %v6732_v17, %v6732_v17 }
 0xaf4   :  { %7008 = vmatpush.bf16.msra.mxu1 %v8432_v53  ;;  %v8587_v23 = vld [vmem:[#allocation6 + $0xf0] sm:$0xf]  ;;  %v8887_v20 = vld [vmem:[#allocation6 + $0xf4] sm:$0xf0]  ;;  %v8525_v52 = vld [vmem:[#allocation6 + $0x78] sm:$0xf0]  ;;  %v8524_v31 = vor.u32 %v8871_v9, %v8523_v24 }
 0xaf5   :  { %6970 = vmatpush.bf16.msrb.mxu2 %v8356_v42  ;;  %v8904_v5 = vld [vmem:[#allocation7 + $0x84] sm:$0xf]  ;;  %v8405_v37 = vld [vmem:[#allocation7 + $0x88] sm:$0xf0]  ;;  %v8886_v26 = vld [vmem:[#allocation6 + $0xf4] sm:$0xf]  ;;  %v8588_v32 = vor.u32 %v8887_v20, %v8587_v23  ;;  %v8528_v60 = vor.u32 %v8870_v44, %v8525_v52 }
 0xaf6   :  { %6983 = vmatpush.bf16.msrb.mxu3 %v8420_v15  ;;  %v8589_v28 = vld [vmem:[#allocation6 + $0xf8] sm:$0xf0]  ;;  %v8515_v4 = vld [vmem:[#allocation6 + $0x60] sm:$0xf]  ;;  %v8408_v16 = vor.u32 %v8904_v5, %v8405_v37  ;;  %v8869_v3 = vld [vmem:[#allocation6 + $0x64] sm:$0xf0] }
 0xaf7   :  { %6996 = vmatpush.bf16.msra.mxu0 %v8360_v57  ;;  %v8579_v54 = vld [vmem:[#allocation6 + $0xe0] sm:$0xf]  ;;  %v8885_v55 = vld [vmem:[#allocation6 + $0xe4] sm:$0xf0]  ;;  %v8592_v8 = vor.u32 %v8886_v26, %v8589_v28  ;;  %v8868_v35 = vld [vmem:[#allocation6 + $0x64] sm:$0xf]  ;;  %v8516_v48 = vor.u32 %v8869_v3, %v8515_v4 }
 0xaf8   :  { %7009 = vmatpush.bf16.msra.mxu1 %v8424_v2  ;;  %v8517_v49 = vld [vmem:[#allocation6 + $0x68] sm:$0xf0]  ;;  %v8884_v45 = vld [vmem:[#allocation6 + $0xe4] sm:$0xf]  ;;  %v8580_v56 = vor.u32 %v8885_v55, %v8579_v54  ;;  %v8507_v43 = vld [vmem:[#allocation6 + $0x50] sm:$0xf] }
 0xaf9   :  { %6971 = vmatpush.bf16.msrb.mxu2 %v8348_v58  ;;  %v8581_v21 = vld [vmem:[#allocation6 + $0xe8] sm:$0xf0]  ;;  %v8520_v53 = vor.u32 %v8868_v35, %v8517_v49  ;;  %v8867_v62 = vld [vmem:[#allocation6 + $0x54] sm:$0xf0]  ;;  %v8571_v47 = vld [vmem:[#allocation6 + $0xd0] sm:$0xf] }
 0xafa   :  { %6984 = vmatpush.bf16.msrb.mxu3 %v8412_v50  ;;  %v8883_v41 = vld [vmem:[#allocation6 + $0xd4] sm:$0xf0]  ;;  %v8584_v33 = vor.u32 %v8884_v45, %v8581_v21  ;;  %v8866_v34 = vld [vmem:[#allocation6 + $0x54] sm:$0xf]  ;;  %v8509_v0 = vld [vmem:[#allocation6 + $0x58] sm:$0xf0]  ;;  %v8508_v17 = vor.u32 %v8867_v62, %v8507_v43 }
 0xafb   :  { %6997 = vmatpush.bf16.msra.mxu0 %v8352_v29  ;;  %v8882_v61 = vld [vmem:[#allocation6 + $0xd4] sm:$0xf]  ;;  %v8573_v27 = vld [vmem:[#allocation6 + $0xd8] sm:$0xf0]  ;;  %v8572_v42 = vor.u32 %v8883_v41, %v8571_v47  ;;  %v8499_v15 = vld [vmem:[#allocation6 + $0x40] sm:$0xf]  ;;  %v8512_v57 = vor.u32 %v8866_v34, %v8509_v0 }
 0xafc   :  { %7010 = vmatpush.bf16.msra.mxu1 %v8416_v46  ;;  %v8865_v10 = vld [vmem:[#allocation6 + $0x44] sm:$0xf0]  ;;  %v8563_v36 = vld [vmem:[#allocation6 + $0xc0] sm:$0xf]  ;;  %v8576_v2 = vor.u32 %v8882_v61, %v8573_v27  ;;  %v8864_v12 = vld [vmem:[#allocation6 + $0x44] sm:$0xf] }
 0xafd   :  { %6972 = vmatpush.bf16.msrb.mxu2 %v8340_v38  ;;  %v8881_v39 = vld [vmem:[#allocation6 + $0xc4] sm:$0xf0]  ;;  %v8501_v6 = vld [vmem:[#allocation6 + $0x48] sm:$0xf0]  ;;  %v8880_v13 = vld [vmem:[#allocation6 + $0xc4] sm:$0xf]  ;;  %v8500_v19 = vor.u32 %v8865_v10, %v8499_v15 }
 0xafe   :  { %6985 = vmatpush.bf16.msrb.mxu3 %v8404_v25  ;;  %v8565_v22 = vld [vmem:[#allocation6 + $0xc8] sm:$0xf0]  ;;  %v8564_v58 = vor.u32 %v8881_v39, %v8563_v36  ;;  %v8491_v1 = vld [vmem:[#allocation6 + $0x30] sm:$0xf]  ;;  %v8504_v51 = vor.u32 %v8864_v12, %v8501_v6  ;;  %v8863_v50 = vld [vmem:[#allocation6 + $0x34] sm:$0xf0] }
 0xaff   :  { %6998 = vmatpush.bf16.msra.mxu0 %v8344_v11  ;;  %v8555_v29 = vld [vmem:[#allocation6 + $0xb0] sm:$0xf]  ;;  %v8879_v14 = vld [vmem:[#allocation6 + $0xb4] sm:$0xf0]  ;;  %v8568_v7 = vor.u32 %v8880_v13, %v8565_v22  ;;  %v8862_v30 = vld [vmem:[#allocation6 + $0x34] sm:$0xf]  ;;  %v8492_v9 = vor.u32 %v8863_v50, %v8491_v1 }
 0xb00   :  { %7011 = vmatpush.bf16.msra.mxu1 %v8408_v16  ;;  %6973 = vmatmul.bf16.vlgmr.msrb.gmra.mxu2 %v6771_v63  ;;  %v8493_v46 = vld [vmem:[#allocation6 + $0x38] sm:$0xf0]  ;;  %v8878_v40 = vld [vmem:[#allocation6 + $0xb4] sm:$0xf]  ;;  %v8556_v23 = vor.u32 %v8879_v14, %v8555_v29  ;;  %v8483_v20 = vld [vmem:[#allocation6 + $0x20] sm:$0xf] }
 0xb01   :  { %7177 = vmatpush.bf16.msra.mxu2 %v8524_v31  ;;  %6986 = vmatmul.bf16.vlgmr.msrb.gmra.mxu3 %v6772_v18  ;;  %v8557_v24 = vld [vmem:[#allocation6 + $0xb8] sm:$0xf0]  ;;  %v8496_v44 = vor.u32 %v8862_v30, %v8493_v46  ;;  %v8861_v38 = vld [vmem:[#allocation6 + $0x24] sm:$0xf0]  ;;  %v8547_v52 = vld [vmem:[#allocation6 + $0xa0] sm:$0xf] }
 0xb02   :  { %7190 = vmatpush.bf16.msra.mxu3 %v8588_v32  ;;  %6999 = vmatmul.bf16.vlgmr.msra.gmra.mxu0 %v6771_v63  ;;  %v8877_v5 = vld [vmem:[#allocation6 + $0xa4] sm:$0xf0]  ;;  %v8560_v37 = vor.u32 %v8878_v40, %v8557_v24  ;;  %v8860_v25 = vld [vmem:[#allocation6 + $0x24] sm:$0xf]  ;;  %v8485_v11 = vld [vmem:[#allocation6 + $0x28] sm:$0xf0]  ;;  %v8484_v31 = vor.u32 %v8861_v38, %v8483_v20 }
 0xb03   :  { %7203 = vmatpush.bf16.msrb.mxu0 %v8528_v60  ;;  %7012 = vmatmul.bf16.vlgmr.msra.gmra.mxu1 %v6772_v18  ;;  %v8876_v26 = vld [vmem:[#allocation6 + $0xa4] sm:$0xf]  ;;  %v8549_v28 = vld [vmem:[#allocation6 + $0xa8] sm:$0xf0]  ;;  %v8548_v32 = vor.u32 %v8877_v5, %v8547_v52  ;;  %v8475_v4 = vld [vmem:[#allocation6 + $0x10] sm:$0xf]  ;;  %v8488_v60 = vor.u32 %v8860_v25, %v8485_v11 }
 0xb04   :  { %7216 = vmatpush.bf16.msrb.mxu1 %v8592_v8  ;;  %v8859_v16 = vld [vmem:[#allocation6 + $0x14] sm:$0xf0]  ;;  %v8539_v3 = vld [vmem:[#allocation6 + $0x90] sm:$0xf]  ;;  %v8552_v55 = vor.u32 %v8876_v26, %v8549_v28  ;;  %v8858_v8 = vld [vmem:[#allocation6 + $0x14] sm:$0xf] }
 0xb05   :  { %7178 = vmatpush.bf16.msra.mxu2 %v8516_v48  ;;  %v8875_v54 = vld [vmem:[#allocation6 + $0x94] sm:$0xf0]  ;;  %v8477_v35 = vld [vmem:[#allocation6 + $0x18] sm:$0xf0]  ;;  %v8874_v49 = vld [vmem:[#allocation6 + $0x94] sm:$0xf]  ;;  %v8476_v45 = vor.u32 %v8859_v16, %v8475_v4 }
 0xb06   :  { %7191 = vmatpush.bf16.msra.mxu3 %v8580_v56  ;;  %v8541_v63 = vld [vmem:[#allocation6 + $0x98] sm:$0xf0]  ;;  %v8540_v21 = vor.u32 %v8875_v54, %v8539_v3  ;;  %v8467_v18 = vld [vmem:[#allocation6] sm:$0xf]  ;;  %v8480_v48 = vor.u32 %v8858_v8, %v8477_v35  ;;  %s10821_s10 = sld [smem:[#allocation60_spill]]  ;;  %v10822_v15 = vmax.f32 %v9732_v59, 0.0 }
 0xb07   :  { %7204 = vmatpush.bf16.msrb.mxu0 %v8520_v53  ;;  %v8857_v56 = vld [vmem:[#allocation6 + $0x4] sm:$0xf0]  ;;  %v8531_v43 = vld [vmem:[#allocation6 + $0x80] sm:$0xf]  ;;  %v8544_v62 = vor.u32 %v8874_v49, %v8541_v63  ;;  %v8856_v47 = vld [vmem:[#allocation6 + $0x4] sm:$0xf] }
 0xb08   :  { %7217 = vmatpush.bf16.msrb.mxu1 %v8584_v33  ;;  %v8873_v53 = vld [vmem:[#allocation6 + $0x84] sm:$0xf0]  ;;  %v8469_v41 = vld [vmem:[#allocation6 + $0x8] sm:$0xf0]  ;;  %v8872_v33 = vld [vmem:[#allocation6 + $0x84] sm:$0xf]  ;;  %v8468_v0 = vor.u32 %v8857_v56, %v8467_v18 }
 0xb09   :  { %7179 = vmatpush.bf16.msra.mxu2 %v8508_v17  ;;  %v8533_v34 = vld [vmem:[#allocation6 + $0x88] sm:$0xf0]  ;;  %v8532_v61 = vor.u32 %v8873_v53, %v8531_v43  ;;  %v8472_v27 = vor.u32 %v8856_v47, %v8469_v41  ;;  %s10825_s16 = sld [smem:[#allocation51_spill]]  ;;  %s9472_s26 = smov 2   ;;  %vm7443_vm6 = vcmask 15360   ;;  %vm7445_vm7 = vcmask 25600  }
 0xb0a   :  { %7192 = vmatpush.bf16.msra.mxu3 %v8572_v42  ;;  %v8536_v42 = vor.u32 %v8872_v33, %v8533_v34  ;;  %v10823_v10 = vld [vmem:[#allocation65_spill] sm:$0xff]  ;;  %s10826_s23 = sld [smem:[#allocation59_spill]]  ;;  %s9473_s1 = smov 126  }
 0xb0b   :  { %7205 = vmatpush.bf16.msrb.mxu0 %v8512_v57  ;;  %v6737_v57 = vpack.c.bf16 %v10822_v15, %v10822_v15  ;;  %v10824_v36 = vmax.f32 %v10823_v10, 0.0  ;;  %s10827_s30 = sld [smem:[#allocation61_spill]]  ;;  %s9474_s27 = smov [#allocation24]  }
 0xb0c   :  { %7218 = vmatpush.bf16.msrb.mxu1 %v8576_v2  ;;  %v8935_v17 = vld [vmem:[%s10821_s10 + $0x78] sm:$0xff]  ;;  %v8934_v59 = vld [vmem:[%s10821_s10 + $0x70] sm:$0xff]  ;;  %v8933_v12 = vld [vmem:[%s10821_s10 + $0x68] sm:$0xff]  ;;  %s7452_s22 = sshll.u32 %s9474_s27, 4  ;;  %s7454_s0 = sshll.u32 %s9638_s12, 4  ;;  %s7453_s22 = int_to_ptr.vmem [resolvable:$true] %s7452_s22  ;;  %s7455_s0 = int_to_ptr.hbm [resolvable:$true] %s7454_s0 }
 0xb0d   :  { %7180 = vmatpush.bf16.msra.mxu2 %v8500_v19  ;;  %v6738_v39 = vpack.c.bf16 %v10824_v36, %v10824_v36  ;;  %v8927_v2 = vld [vmem:[%s10821_s10 + $0x38] sm:$0xff]  ;;  %v8926_v6 = vld [vmem:[%s10821_s10 + $0x30] sm:$0xff]  ;;  %v8932_v13 = vld [vmem:[%s10821_s10 + $0x60] sm:$0xff]  ;;  %s9384_s2 = sshra.s32 %s7455_s0, 4  ;;  %s9388_s17 = scalar_lea.hbm %s9638_s12, 2  ;;  %s9385_s2 = int_to_ptr.hbm [resolvable:$true] %s9384_s2 }
 0xb0e   :  { %7193 = vmatpush.bf16.msra.mxu3 %v8564_v58  ;;  %v8925_v22 = vld [vmem:[%s10821_s10 + $0x28] sm:$0xff]  ;;  %v8931_v19 = vld [vmem:[%s10821_s10 + $0x58] sm:$0xff]  ;;  %v8924_v58 = vld [vmem:[%s10821_s10 + $0x20] sm:$0xff]  ;;  %s9386_s5 = scalar_lea.hbm %s9385_s2, 2  ;;  %p9389_p6 = scmp.lt.s32.totalorder %s9385_s2, %s9638_s12 }
 0xb0f   :  { %7206 = vmatpush.bf16.msrb.mxu0 %v8504_v51  ;;  %v8930_v1 = vld [vmem:[%s10821_s10 + $0x50] sm:$0xff]  ;;  %v8923_v51 = vld [vmem:[%s10821_s10 + $0x18] sm:$0xff]  ;;  %v8929_v50 = vld [vmem:[%s10821_s10 + $0x48] sm:$0xff]  ;;  %p9387_p5 = scmp.ne.s32.totalorder %s9385_s2, %s9386_s5  ;;  %p9390_p7 = scmp.lt.s32.totalorder %s9388_s17, %s9386_s5 }
 0xb10   :  { %7219 = vmatpush.bf16.msrb.mxu1 %v8568_v7  ;;  %v8922_v14 = vld [vmem:[%s10821_s10 + $0x10] sm:$0xff]  ;;  %v8928_v30 = vld [vmem:[%s10821_s10 + $0x40] sm:$0xff]  ;;  %v8921_v40 = vld [vmem:[%s10821_s10 + $0x8] sm:$0xff] }
 0xb11   :  { %7181 = vmatpush.bf16.msra.mxu2 %v8492_v9  ;;  %v10766_v38 = vld [vmem:[%s10825_s16] sm:$0x3]  ;;  %p9391_p8 = por %p9390_p7, %p9389_p6 }
 0xb12   :  { %7194 = vmatpush.bf16.msra.mxu3 %v8556_v23  ;;  %v8920_v23 = vld [vmem:[%s10821_s10] sm:$0xff]  ;;  %7412 = vrot.lane.b32.xlu0 %v10766_v38, %s9472_s26 }
 0xb13   :  { %7207 = vmatpush.bf16.msrb.mxu0 %v8496_v44  ;;  %v7229_v5 = vld [vmem:[%s10826_s23] sm:$0x3]  ;;  %p9392_p9 = pnand %p9391_p8, %p9387_p5 }
 0xb14   :  { %7220 = vmatpush.bf16.msrb.mxu1 %v8560_v37  ;;  %v7232_v28 = vperm.slane %v7229_v5, 1  ;;  %v7231_v54 = vperm.slane %v7229_v5, 0  ;;  %v9001_v53 = vld [vmem:[%s10827_s30] ss:$0 sm:$0xff] }
 0xb15   :  { %7182 = vmatpush.bf16.msra.mxu2 %v8484_v31 }
 0xb16   :  { %7195 = vmatpush.bf16.msra.mxu3 %v8548_v32 }
 0xb17   :  { %7208 = vmatpush.bf16.msrb.mxu0 %v8488_v60 }
 0xb18   :  { %7221 = vmatpush.bf16.msrb.mxu1 %v8552_v55 }
 0xb19   :  { %7183 = vmatpush.bf16.msra.mxu2 %v8476_v45 }
 0xb1a   :  { %7196 = vmatpush.bf16.msra.mxu3 %v8540_v21 }
 0xb1b   :  { %7209 = vmatpush.bf16.msrb.mxu0 %v8480_v48 }
 0xb1c   :  { %7222 = vmatpush.bf16.msrb.mxu1 %v8544_v62 }
 0xb1d   :  { %7184 = vmatpush.bf16.msra.mxu2 %v8468_v0 }
 0xb1e   :  { %7197 = vmatpush.bf16.msra.mxu3 %v8532_v61 }
 0xb1f   :  { %7210 = vmatpush.bf16.msrb.mxu0 %v8472_v27 }
 0xb20   :  { %7223 = vmatpush.bf16.msrb.mxu1 %v8536_v42  ;;  %7185 = vmatmul.bf16.vlgmr.msra.gmra.mxu2 %v6737_v57 }
 0xb21   :  { %7198 = vmatmul.bf16.vlgmr.msra.gmra.mxu3 %v6738_v39  ;;  %7373 = vmatpush.bf16.msrb.mxu2 %v8927_v2 }
 0xb22   :  { %7386 = vmatpush.bf16.msrb.mxu3 %v8935_v17  ;;  %7211 = vmatmul.bf16.vlgmr.msrb.gmra.mxu0 %v6737_v57 }
 0xb23   :  { %7224 = vmatmul.bf16.vlgmr.msrb.gmra.mxu1 %v6738_v39 }
 0xb25   :  { %7374 = vmatpush.bf16.msrb.mxu2 %v8926_v6 }
 0xb26   :  { %7387 = vmatpush.bf16.msrb.mxu3 %v8934_v59 }
 0xb29   :  { %7375 = vmatpush.bf16.msrb.mxu2 %v8925_v22 }
 0xb2a   :  { %7388 = vmatpush.bf16.msrb.mxu3 %v8933_v12 }
 0xb2d   :  { %7376 = vmatpush.bf16.msrb.mxu2 %v8924_v58 }
 0xb2e   :  { %7389 = vmatpush.bf16.msrb.mxu3 %v8932_v13 }
 0xb31   :  { %7377 = vmatpush.bf16.msrb.mxu2 %v8923_v51  ;;  %v7422_v51 = vmul.f32 -0.5, %v10766_v38 }
 0xb32   :  { %7390 = vmatpush.bf16.msrb.mxu3 %v8931_v19 }
 0xb35   :  { %7378 = vmatpush.bf16.msrb.mxu2 %v8922_v14  ;;  %v7423_v14 = vmul.f32 %v7422_v51, %v10766_v38 }
 0xb36   :  { %7391 = vmatpush.bf16.msrb.mxu3 %v8930_v1 }
 0xb39   :  { %7379 = vmatpush.bf16.msrb.mxu2 %v8921_v40 }
 0xb3a   :  { %7392 = vmatpush.bf16.msrb.mxu3 %v8929_v50 }
 0xb3d   :  { %7380 = vmatpush.bf16.msrb.mxu2 %v8920_v23 }
 0xb3e   :  { %7393 = vmatpush.bf16.msrb.mxu3 %v8928_v30 }
 0xb7f   :  { %v7000_v29 = vpop.f32.mrf.mxu0 }
 0xb80   :  { %v7013_v7 = vpop.f32.mrf.mxu1 }
 0xb81   :  { %v7014_v37 = vadd.f32 %v7013_v7, %v7000_v29 }
 0xb83   :  { %v6974_v46 = vpop.f32.mrf.mxu2 }
 0xb84   :  { %v6987_v24 = vpop.f32.mrf.mxu3  ;;  %v7413_v36 = vpop.permute.xlu0 %7412 }
 0xb85   :  { %v6988_v32 = vadd.f32 %v6987_v24, %v6974_v46 }
 0xb87   :  { %v7002_v9 = vpop.f32.mrf.mxu0 }
 0xb88   :  { %v7015_v20 = vpop.f32.mrf.mxu1 }
 0xb8b   :  { %v6976_v44 = vpop.f32.mrf.mxu2 }
 0xb8c   :  { %v6989_v52 = vpop.f32.mrf.mxu3 }
 0xb9f   :  { %v7212_v25 = vpop.f32.mrf.mxu0 }
 0xba0   :  { %v7213_v11 = vadd.f32 %v7212_v25, %v7014_v37  ;;  %v7225_v26 = vpop.f32.mrf.mxu1 }
 0xba2   :  { %v7226_v31 = vadd.f32 %v7225_v26, %v7213_v11 }
 0xba3   :  { %v7186_v60 = vpop.f32.mrf.mxu2 }
 0xba4   :  { %v7236_v4 = vadd.f32 %v7232_v28, %v7226_v31  ;;  %v7199_v16 = vpop.f32.mrf.mxu3  ;;  %v7187_v3 = vadd.f32 %v7186_v60, %v6988_v32 }
 0xba6   :  { %v7238_v55 = vmax.f32 %v7236_v4, 0.0  ;;  %v7200_v8 = vadd.f32 %v7199_v16, %v7187_v3 }
 0xba7   :  { %v7214_v35 = vpop.f32.mrf.mxu0 }
 0xba8   :  { %v7240_v49 = vpack.c.bf16 %v7238_v55, %v7238_v55  ;;  %v7227_v63 = vpop.f32.mrf.mxu1  ;;  %v7235_v45 = vadd.f32 %v7231_v54, %v7200_v8 }
 0xbaa   :  { %7394 = vmatmul.bf16.vlgmr.msrb.gmra.mxu3 %v7240_v49  ;;  %v7237_v21 = vmax.f32 %v7235_v45, 0.0 }
 0xbab   :  { %v7188_v18 = vpop.f32.mrf.mxu2 }
 0xbac   :  { %v7201_v48 = vpop.f32.mrf.mxu3  ;;  %v7239_v56 = vpack.c.bf16 %v7237_v21, %v7237_v21 }
 0xbae   :  { %7381 = vmatmul.bf16.vlgmr.msrb.gmra.mxu2 %v7239_v56 }
 0xc2d   :  { %v7395_v43 = vpop.f32.mrf.mxu3 }
 0xc31   :  { %v7382_v62 = vpop.f32.mrf.mxu2 }
 0xc32   :  { %v7383_v47 = vadd.f32 %v9001_v53, %v7382_v62 }
 0xc34   :  { %v7396_v41 = vadd.f32 %v7395_v43, %v7383_v47 }
 0xc35   :  { %v7397_v33 = vpop.f32.mrf.mxu3 }
 0xc36   :  { %v7400_v34 = vand.u32 2147483647, %v7396_v41  ;;  %v7399_v57 = vmax.f32 %v7396_v41, 0.0  ;;  %vm7408_vm5 = vcmp.gt.f32.partialorder %v7396_v41, 20.0 }
 0xc38   :  { %v7401_v0 = vsub.f32 0.0, %v7400_v34 }
 0xc39   :  { %v7384_v61 = vpop.f32.mrf.mxu2 }
 0xc3a   :  { %v7402_v27 = vmul.f32 1.442695, %v7401_v0 }
 0xc3c   :  { %9002 = vpow2.f32 %v7402_v27 }
 0xc42   :  { %v9003_v17 = vpop.eup %9002 }
 0xc43   :  { %v7404_v42 = vadd.f32 1.0, %v9003_v17 }
 0xc45   :  { %9004 = vlog2.f32 %v7404_v42 }
 0xc4b   :  { %v9005_v15 = vpop.eup %9004 }
 0xc4c   :  { %v7406_v10 = vmul.f32 0.6931472, %v9005_v15 }
 0xc4e   :  { %v7407_v39 = vadd.f32 %v7406_v10, %v7399_v57 }
 0xc50   :  { %v7409_v59 = vsel %vm7408_vm5, %v7396_v41, %v7407_v39 }
 0xc51   :  { %v7415_v2 = vmul.f32 %v7413_v36, %v7409_v59  ;;  %v7424_v12 = vmax.f32 %v7409_v59, 1e-30 }
 0xc53   :  { %9006 = vlog2.f32 %v7424_v12  ;;  %7417 = vrot.lane.b32.xlu0 %v7415_v2, %s9473_s1 }
 0xc59   :  { %v9007_v6 = vpop.eup %9006 }
 0xc5a   :  { %v7426_v13 = vmul.f32 0.6931472, %v9007_v6 }
 0xc5c   :  { %7428 = vrot.lane.b32.xlu1 %v7426_v13, %s9473_s1 }
 0xcc5   :  { %v7418_v22 = vpop.permute.xlu0 %7417 }
 0xcc6   :  { %v7420_v19 = vadd.f32 %v7418_v22, %v7396_v41 }
 0xcc8   :  { %9008 = vtanh.f32 %v7420_v19 }
 0xcce   :  { %v9009_v58 = vpop.eup %9008  ;;  %v7429_v7 = vpop.permute.xlu1 %7428 }
 0xccf   :  { %v7433_v1 = vmul.f32 %v9009_v58, %v9009_v58  ;;  %v7431_v30 = vsub.f32 %v7423_v14, %v7429_v7 }
 0xcd1   :  { %v7434_v50 = vsub.f32 1.0, %v7433_v1  ;;  %v8657_v40 = vadd.f32 -0.9189385, %v7431_v30 }
 0xcd3   :  { %v7435_v29 = vadd.f32 1e-07, %v7434_v50 }
 0xcd5   :  { %9010 = vlog2.f32 %v7435_v29 }
 0xcdb   :  { %v9011_v46 = vpop.eup %9010 }
 0xcdc   :  { %v7437_v24 = vmul.f32 0.6931472, %v9011_v46 }
 0xcde   :  { %v7438_v9 = vsub.f32 %v8657_v40, %v7437_v24 }
 0xce0   :  { %7440 = vrot.lane.b32.xlu1 %v7438_v9, %s9472_s26 }
 0xd52   :  { %v7441_v23 = vpop.permute.xlu1 %7440 }
 0xd53   :  { %v7444_v20 = vsel %vm7443_vm6, %v9009_v58, %v7441_v23 }
 0xd54   :  { %7446 = vst.msk [vmem:[#allocation24] sm:$0x3] %vm7445_vm7, %v7444_v20 }
 0xd55   :  { %9395 = shalt.err (!%p9392_p9)
}
 0xd56   :  { %7457 = dma.vmem_to_hbm [thread:$0]  %s7453_s22, 32, %s7455_s0, [#allocation11]  }
 0xd57   :  { %9418 = dma.done.wait [#allocation11], 32  }
 0xd58   :  { %9419 = vsyncadd [#allocation11], 4294967264 }
 0xd59   :  { %7462 = vsyncpa [#allocation10], 1 }
 0xd5a   :  { %7463 = vsyncpa [#allocation13], 1 }
 0xd5b   :  { %7464 = vsyncpa [#allocation16], 1 }
 0xd5c   :  { %7465 = vsyncpa [#allocation19], 1 }
 0xd5d   :  { %7466 = vsyncpa [#allocation22], 1 }
 0xd5e   :  { %7467 = vsyncpa [#allocation11], 1 }
 0xd5f   :  { %7468 = vsyncmov [#allocation8] }
 0xd62   :  { %s7469_s9 = vpop.sfrf %7468 }
 0xd63   :  { %p8658_p10 = scmp.ne.s32.totalorder %s7469_s9, 0 }
 0xd65   :  { %7473 = shalt.err (%p8658_p10)  }
 0xd66   :  { %7475 = vsyncmov [#allocation8 + $0x1] }
 0xd69   :  { %s7476_s25 = vpop.sfrf %7475 }
 0xd6a   :  { %p8659_p11 = scmp.ne.s32.totalorder %s7476_s25, 0 }
 0xd6c   :  { %7480 = shalt.err (%p8659_p11)  }
 0xd6d   :  { %7482 = vsyncmov [#allocation8 + $0x2] }
 0xd70   :  { %s7483_s12 = vpop.sfrf %7482 }
 0xd71   :  { %p8660_p12 = scmp.ne.s32.totalorder %s7483_s12, 0 }
 0xd73   :  { %7487 = shalt.err (%p8660_p12)  }
 0xd74   :  { %7489 = vsyncmov [#allocation8 + $0x3] }
 0xd77   :  { %s7490_s29 = vpop.sfrf %7489 }
 0xd78   :  { %p8661_p13 = scmp.ne.s32.totalorder %s7490_s29, 0 }
 0xd7a   :  { %7494 = shalt.err (%p8661_p13)  }
 0xd7b   :  { %7496 = vsyncmov [#allocation8 + $0x4] }
 0xd7e   :  { %s7497_s4 = vpop.sfrf %7496 }
 0xd7f   :  { %p8662_p0 = scmp.ne.s32.totalorder %s7497_s4, 0 }
 0xd81   :  { %7501 = shalt.err (%p8662_p0)  }
 0xd82   :  { %7503 = vsyncmov [#allocation8 + $0x5] }
 0xd85   :  { %s7504_s11 = vpop.sfrf %7503 }
 0xd86   :  { %p8663_p1 = scmp.ne.s32.totalorder %s7504_s11, 0 }
 0xd88   :  { %7508 = shalt.err (%p8663_p1)  }

</bundles_post_ra>
